<compile_context>
chip_gen: v5e
topology: v5e:2x2
jax: 0.10.0
libtpu: 0.0.40
codegen_flags: <defaults>
</compile_context>

<pallas_src>
import functools

import jax
import jax.numpy as jnp
from jax.experimental import pallas as pl
from jax.experimental.pallas import tpu as pltpu

EPS = 1e-5


def _round_up(x, m):
    return ((x + m - 1) // m) * m


def _cdiv(a, b):
    return (a + b - 1) // b


def _layernorm(x, eps=EPS):
    mu = jnp.mean(x, axis=-1, keepdims=True)
    var = jnp.mean((x - mu) ** 2, axis=-1, keepdims=True)
    return (x - mu) * jax.lax.rsqrt(var + eps)


def transition_adaln_kernel(
    x_ref, c_ref, m_ref,        # row tiles: (tm, dim), (tm, dim_cond), (tm, 1)
    lnc_w_ref,                  # (1, dim_cond) f32           LayerNorm(cond) weight
    wc_ref,                     # (2*dim_cond, 3*dim) bf16    block-diag [[wg|wb], ws]
    bc_ref,                     # (1, 3*dim) f32              [bg | 0 | bs]
    w12_ref,                    # (dim, 2*dh) bf16            [w1 | w2]
    w3_ref,                     # (dh, dim) bf16
    o_ref,                      # (tm, dim)
    acc_ref,                    # VMEM scratch (tm, dim) f32
    *, dh_chunk,
):
    dim = o_ref.shape[-1]
    dh = w3_ref.shape[0]
    mxu = wc_ref.dtype
    f32 = jnp.float32

    x = x_ref[...].astype(f32)
    c = c_ref[...].astype(f32)
    m = m_ref[...].astype(f32)                      # (tm, 1)

    # --- AdaptiveLayerNorm statistics / affine (f32 on VPU/EUP) ---
    x_n = _layernorm(x)                             # no affine
    c_n = _layernorm(c) * lnc_w_ref[...]            # weight-only affine

    # --- Fused cond projections: [gamma | beta | gate] from one MXU matmul ---
    c_all = jnp.concatenate([c_n, c], axis=-1).astype(mxu)        # (tm, 2*dim_cond)
    r = jnp.dot(c_all, wc_ref[...], preferred_element_type=f32) + bc_ref[...]
    gamma = jax.nn.sigmoid(r[:, :dim])
    beta = r[:, dim:2 * dim]
    gate = jax.nn.sigmoid(r[:, 2 * dim:])

    h = (gamma * x_n + beta).astype(mxu)            # mask folded in once at the end

    # --- Transition (SwiGLU), chunked over dh to bound live f32 intermediates ---
    n_chunks = dh // dh_chunk
    for j in range(n_chunks):                       # static, small unroll
        lo = j * dh_chunk
        u = jnp.dot(h, w12_ref[:, lo:lo + dh_chunk], preferred_element_type=f32)
        v = jnp.dot(h, w12_ref[:, dh + lo:dh + lo + dh_chunk],
                    preferred_element_type=f32)
        g = (jax.nn.silu(u) * v).astype(mxu)
        tj = jnp.dot(g, w3_ref[lo:lo + dh_chunk, :], preferred_element_type=f32)
        if j == 0:
            acc_ref[...] = tj
        else:
            acc_ref[...] += tj

    # --- Output scale + single mask multiply (binary mask => same as repeated) ---
    o_ref[...] = ((gate * m) * acc_ref[...]).astype(o_ref.dtype)


def _pack_params(params, mxu_dtype, dim, dim_cond, dh):
    f32 = jnp.float32
    wgb = jnp.concatenate([params["wg"], params["wb"]], axis=1)       # (dim_cond, 2*dim)
    wc = jnp.zeros((2 * dim_cond, 3 * dim), f32)
    wc = wc.at[:dim_cond, :2 * dim].set(wgb.astype(f32))
    wc = wc.at[dim_cond:, 2 * dim:].set(params["ws"].astype(f32))
    bc = jnp.concatenate(
        [params["bg"].reshape(1, dim).astype(f32),
         jnp.zeros((1, dim), f32),
         params["bs"].reshape(1, dim).astype(f32)], axis=1)
    w12 = jnp.concatenate([params["w1"], params["w2"]], axis=1)
    return dict(
        lnc_w=params["lnc_w"].astype(f32).reshape(1, dim_cond),
        wc=wc.astype(mxu_dtype),
        bc=bc,
        w12=w12.astype(mxu_dtype),
        w3=params["w3"].astype(mxu_dtype),
    )


def _build_call(M, dim, dim_cond, dh, tm, dh_chunk, out_dtype, vmem_limit_bytes,
                single_buffer_weights):
    row = lambda w: pl.BlockSpec((tm, w), lambda i: (i, 0))
    if single_buffer_weights:
        # Constant-index weights never change block -> one VMEM copy is enough.
        wspec = lambda shape: pl.BlockSpec(shape, lambda i: (0, 0),
                                           pipeline_mode=pl.Buffered(1))
    else:
        wspec = lambda shape: pl.BlockSpec(shape, lambda i: (0, 0))

    kernel = functools.partial(transition_adaln_kernel, dh_chunk=dh_chunk)
    return pl.pallas_call(
        kernel,
        out_shape=jax.ShapeDtypeStruct((M, dim), out_dtype),
        grid_spec=pltpu.PrefetchScalarGridSpec(
            num_scalar_prefetch=0,
            grid=(_cdiv(M, tm),),                 # ragged last tile handled by Pallas
            in_specs=[
                row(dim),                         # x rows
                row(dim_cond),                    # cond rows
                row(1),                           # mask rows
                wspec((1, dim_cond)),             # lnc_w
                wspec((2 * dim_cond, 3 * dim)),   # fused cond weight
                wspec((1, 3 * dim)),              # fused cond bias
                wspec((dim, 2 * dh)),             # w12
                wspec((dh, dim)),                 # w3
            ],
            out_specs=pl.BlockSpec((tm, dim), lambda i: (i, 0)),
            scratch_shapes=[pltpu.VMEM((tm, dim), jnp.float32)],
        ),
        compiler_params=pltpu.CompilerParams(
            dimension_semantics=("parallel",),    # row tiles split across TCs (v7x)
            vmem_limit_bytes=vmem_limit_bytes,
        ),
    )


def transition_adaln(x, cond, mask, params, *, tm=512, dh_chunk=512,
                     mxu_dtype=jnp.bfloat16):
    """x:[b,n,dim], cond:[b,n,dim_cond], mask:[b,n] -> [b,n,dim].

    Output dtype follows x.dtype; passing bf16 x/cond halves HBM I/O while all
    LayerNorm / sigmoid / silu arithmetic stays f32 in-kernel.
    """
    b, n, dim = x.shape
    dim_cond = cond.shape[-1]
    dh = params["w1"].shape[1]
    M = b * n

    # Lane alignment of the packed [gamma|beta|gate] and [u|v] splits.
    assert dim % 128 == 0, "dim must be a multiple of 128 (lane-aligned packed splits)"
    assert dh % 128 == 0, "expansion_factor*dim must be a multiple of 128"

    # Row tile: multiple of 8, no larger than the rounded row count, and small enough
    # that the "parallel" grid has >=2 steps (keeps v7x's second TensorCore busy).
    tm = max(8, min(_round_up(tm, 8), _round_up(M, 8)))
    tm = min(tm, max(8, _round_up(_cdiv(M, 2), 8)))

    # dh chunk: largest multiple of 128 dividing dh that is <= requested chunk.
    dh_chunk = min(dh, max(128, (dh_chunk // 128) * 128))
    while dh % dh_chunk:
        dh_chunk -= 128

    # No host-side padding (saves a full extra HBM read+write of x and cond):
    # the ragged last tile's OOB rows are row-local garbage and their writes dropped.
    x2 = x.reshape(M, dim)
    c2 = cond.reshape(M, dim_cond)
    m2 = mask.reshape(M, 1).astype(jnp.float32)

    p = _pack_params(params, mxu_dtype, dim, dim_cond, dh)
    weights = (p["lnc_w"], p["wc"], p["bc"], p["w12"], p["w3"])

    # Scoped-VMEM budget: weights (x2 for the double-buffered fallback) +
    # double-buffered row tiles (mask lane-pads to 128) + f32 intermediates + scratch.
    nbytes = lambda a: int(a.size) * a.dtype.itemsize
    out_itemsize = jnp.dtype(x.dtype).itemsize
    w_bytes = sum(nbytes(w) for w in weights)
    io_bytes = 2 * tm * (dim * x2.dtype.itemsize + dim_cond * c2.dtype.itemsize
                         + 128 * 4 + dim * out_itemsize)
    act_bytes = tm * 4 * (12 * dim + 4 * dim_cond + 3 * dh_chunk)
    est = 2 * w_bytes + io_bytes + act_bytes + tm * dim * 4 + (4 << 20)
    try:
        vmem_cap = int(pltpu.get_tpu_info().vmem_capacity_bytes)
    except Exception:
        vmem_cap = 64 << 20        # v7x per-TC VMEM (smallest across v5e/v6e/v7x)
    vmem_limit = int(min(max(est, 32 << 20), (3 * vmem_cap) // 4))

    args = (x2, c2, m2) + weights
    # TODO(synk): for dims where even chunked weights bust the v7x budget, add a second
    #             "arbitrary" grid axis over dh instead of full weight VMEM residency.
    # TODO(synk): optional v7x fp8 path for w12/w3 (gated on accuracy vs the reference).
    try:
        out = _build_call(M, dim, dim_cond, dh, tm, dh_chunk, x.dtype, vmem_limit,
                          single_buffer_weights=True)(*args)
    except (TypeError, ValueError, NotImplementedError, pltpu.LoweringException):
        # pipeline_mode=pl.Buffered(1) unsupported on this build -> default double
        # buffering of the constant-index weights (never re-DMA'd, just 2x resident).
        out = _build_call(M, dim, dim_cond, dh, tm, dh_chunk, x.dtype, vmem_limit,
                          single_buffer_weights=False)(*args)

    return out.reshape(b, n, dim)


def transition_adaln_ref(x, cond, mask, params, mxu_dtype=jnp.bfloat16):
    """Pure-JAX reference with the PyTorch module's repeated masking and the kernel's
    bf16-operand / f32-accumulate matmul numerics."""
    f32 = jnp.float32
    dim = params["wg"].shape[1]
    dh = params["w1"].shape[1]
    m = mask[..., None].astype(f32)
    x = x.astype(f32)
    c = cond.astype(f32)

    wgb = jnp.concatenate([params["wg"], params["wb"]], axis=1).astype(mxu_dtype)
    w12 = jnp.concatenate([params["w1"], params["w2"]], axis=1).astype(mxu_dtype)
    w3 = params["w3"].astype(mxu_dtype)
    ws = params["ws"].astype(mxu_dtype)

    x_n = _layernorm(x)
    c_n = _layernorm(c) * params["lnc_w"].reshape(-1)
    gb = jnp.dot(c_n.astype(mxu_dtype), wgb, preferred_element_type=f32)
    gamma = jax.nn.sigmoid(gb[..., :dim] + params["bg"].reshape(-1))
    beta = gb[..., dim:]
    h = (gamma * x_n + beta) * m
    uv = jnp.dot(h.astype(mxu_dtype), w12, preferred_element_type=f32)
    t = jnp.dot((jax.nn.silu(uv[..., :dh]) * uv[..., dh:]).astype(mxu_dtype),
                w3, preferred_element_type=f32) * m
    s = jax.nn.sigmoid(jnp.dot(c.astype(mxu_dtype), ws, preferred_element_type=f32)
                       + params["bs"].reshape(-1))
    return ((s * t) * m) * m


def make_params(key, dim, dim_cond, expansion_factor=4):
    dh = dim * expansion_factor
    ks = jax.random.split(key, 7)
    scale = 0.02
    return {
        "lnc_w": jnp.ones((1, dim_cond), jnp.float32),
        "wg": scale * jax.random.normal(ks[0], (dim_cond, dim), jnp.float32),
        "bg": scale * jax.random.normal(ks[1], (1, dim), jnp.float32),
        "wb": scale * jax.random.normal(ks[2], (dim_cond, dim), jnp.float32),
        "w1": scale * jax.random.normal(ks[3], (dim, dh), jnp.float32),
        "w2": scale * jax.random.normal(ks[4], (dim, dh), jnp.float32),
        "w3": scale * jax.random.normal(ks[5], (dh, dim), jnp.float32),
        "ws": scale * jax.random.normal(ks[6], (dim_cond, dim), jnp.float32),
        "bs": jnp.full((1, dim), -2.0, jnp.float32),  # gate biased toward small output
    }


if __name__ == "__main__":
    key = jax.random.PRNGKey(0)

    def run_case(b, n, dim, dim_cond, expansion, salt):
        kx, kc, km, kp = jax.random.split(jax.random.fold_in(key, salt), 4)
        x = jax.random.normal(kx, (b, n, dim), jnp.float32)
        cond = jax.random.normal(kc, (b, n, dim_cond), jnp.float32)
        mask = (jax.random.uniform(km, (b, n)) > 0.2).astype(jnp.float32)
        params = make_params(kp, dim, dim_cond, expansion_factor=expansion)

        out = jax.block_until_ready(transition_adaln(x, cond, mask, params))
        ref = jax.block_until_ready(transition_adaln_ref(x, cond, mask, params))
        assert out.shape == (b, n, dim)
        rel = float(jnp.max(jnp.abs(out - ref)) / (jnp.max(jnp.abs(ref)) + 1e-12))
        assert rel < 1e-2, f"mismatch vs reference rel={rel:.3e} (b={b}, n={n})"

    # Evenly divisible rows (M=512 -> 2 row tiles) and a ragged row count
    # (M=77 -> 2 tiles, last one partial, handled without any host-side pad).
    run_case(2, 256, 128, 64, 4, salt=1)
    run_case(1, 77, 128, 64, 4, salt=2)
    print("KERNEL_OK")
</pallas_src>

<mosaic_0001>
module attributes {stable_mosaic.version = 11 : i64} {
  func.func @transition_adaln_kernel(%arg0: i32, %arg1: memref<256x128xf32, #tpu.memory_space<vmem>>, %arg2: memref<256x64xf32, #tpu.memory_space<vmem>>, %arg3: memref<256x1xf32, #tpu.memory_space<vmem>>, %arg4: memref<1x64xf32, #tpu.memory_space<vmem>>, %arg5: memref<128x384xbf16, #tpu.memory_space<vmem>>, %arg6: memref<1x384xf32, #tpu.memory_space<vmem>>, %arg7: memref<128x1024xbf16, #tpu.memory_space<vmem>>, %arg8: memref<512x128xbf16, #tpu.memory_space<vmem>>, %arg9: memref<256x128xf32, #tpu.memory_space<vmem>>, %arg10: memref<256x128xf32, #tpu.memory_space<vmem>>) attributes {dimension_semantics = [#tpu.dimension_semantics<parallel>], iteration_bounds = array<i64: 2>, scalar_prefetch = 0 : i64, scratch_operands = 1 : i64, tpu.core_type = #tpu.core_type<tc>, window_params = [{transform_indices = @transform_0, window_bounds = array<i64: 256, 128>}, {transform_indices = @transform_1, window_bounds = array<i64: 256, 64>}, {transform_indices = @transform_2, window_bounds = array<i64: 256, 1>}, {pipeline_mode = #tpu.pipeline_mode<synchronous>, transform_indices = @transform_3, window_bounds = array<i64: 1, 64>}, {pipeline_mode = #tpu.pipeline_mode<synchronous>, transform_indices = @transform_4, window_bounds = array<i64: 128, 384>}, {pipeline_mode = #tpu.pipeline_mode<synchronous>, transform_indices = @transform_5, window_bounds = array<i64: 1, 384>}, {pipeline_mode = #tpu.pipeline_mode<synchronous>, transform_indices = @transform_6, window_bounds = array<i64: 128, 1024>}, {pipeline_mode = #tpu.pipeline_mode<synchronous>, transform_indices = @transform_7, window_bounds = array<i64: 512, 128>}, {transform_indices = @transform_8, window_bounds = array<i64: 256, 128>}]} {
    %c0 = arith.constant 0 : index
    %c0_0 = arith.constant 0 : index
    %0 = vector.load %arg1[%c0, %c0_0] : memref<256x128xf32, #tpu.memory_space<vmem>>, vector<256x128xf32>
    %c0_1 = arith.constant 0 : index
    %c0_2 = arith.constant 0 : index
    %1 = vector.load %arg2[%c0_1, %c0_2] : memref<256x64xf32, #tpu.memory_space<vmem>>, vector<256x64xf32>
    %c0_3 = arith.constant 0 : index
    %c0_4 = arith.constant 0 : index
    %2 = vector.load %arg3[%c0_3, %c0_4] : memref<256x1xf32, #tpu.memory_space<vmem>>, vector<256x1xf32>
    %cst = arith.constant dense<0.000000e+00> : vector<256xf32>
    %3 = vector.multi_reduction <add>, %0, %cst [1] : vector<256x128xf32> to vector<256xf32>
    %4 = vector.shape_cast %3 : vector<256xf32> to vector<256x1xf32>
    %cst_5 = arith.constant 1.280000e+02 : f32
    %5 = vector.broadcast %cst_5 : f32 to vector<256x1xf32>
    %6 = arith.divf %4, %5 : vector<256x1xf32>
    %7 = vector.broadcast %6 : vector<256x1xf32> to vector<256x128xf32>
    %8 = arith.subf %0, %7 : vector<256x128xf32>
    %9 = arith.mulf %8, %8 : vector<256x128xf32>
    %cst_6 = arith.constant dense<0.000000e+00> : vector<256xf32>
    %10 = vector.multi_reduction <add>, %9, %cst_6 [1] : vector<256x128xf32> to vector<256xf32>
    %11 = vector.shape_cast %10 : vector<256xf32> to vector<256x1xf32>
    %cst_7 = arith.constant 1.280000e+02 : f32
    %12 = vector.broadcast %cst_7 : f32 to vector<256x1xf32>
    %13 = arith.divf %11, %12 : vector<256x1xf32>
    %14 = vector.broadcast %6 : vector<256x1xf32> to vector<256x128xf32>
    %15 = arith.subf %0, %14 : vector<256x128xf32>
    %cst_8 = arith.constant 9.99999974E-6 : f32
    %16 = vector.broadcast %cst_8 : f32 to vector<256x1xf32>
    %17 = arith.addf %13, %16 : vector<256x1xf32>
    %18 = math.rsqrt %17 : vector<256x1xf32>
    %19 = vector.broadcast %18 : vector<256x1xf32> to vector<256x128xf32>
    %20 = arith.mulf %15, %19 : vector<256x128xf32>
    %cst_9 = arith.constant dense<0.000000e+00> : vector<256xf32>
    %21 = vector.multi_reduction <add>, %1, %cst_9 [1] : vector<256x64xf32> to vector<256xf32>
    %22 = vector.shape_cast %21 : vector<256xf32> to vector<256x1xf32>
    %cst_10 = arith.constant 6.400000e+01 : f32
    %23 = vector.broadcast %cst_10 : f32 to vector<256x1xf32>
    %24 = arith.divf %22, %23 : vector<256x1xf32>
    %25 = vector.broadcast %24 : vector<256x1xf32> to vector<256x64xf32>
    %26 = arith.subf %1, %25 : vector<256x64xf32>
    %27 = arith.mulf %26, %26 : vector<256x64xf32>
    %cst_11 = arith.constant dense<0.000000e+00> : vector<256xf32>
    %28 = vector.multi_reduction <add>, %27, %cst_11 [1] : vector<256x64xf32> to vector<256xf32>
    %29 = vector.shape_cast %28 : vector<256xf32> to vector<256x1xf32>
    %cst_12 = arith.constant 6.400000e+01 : f32
    %30 = vector.broadcast %cst_12 : f32 to vector<256x1xf32>
    %31 = arith.divf %29, %30 : vector<256x1xf32>
    %32 = vector.broadcast %24 : vector<256x1xf32> to vector<256x64xf32>
    %33 = arith.subf %1, %32 : vector<256x64xf32>
    %cst_13 = arith.constant 9.99999974E-6 : f32
    %34 = vector.broadcast %cst_13 : f32 to vector<256x1xf32>
    %35 = arith.addf %31, %34 : vector<256x1xf32>
    %36 = math.rsqrt %35 : vector<256x1xf32>
    %37 = vector.broadcast %36 : vector<256x1xf32> to vector<256x64xf32>
    %38 = arith.mulf %33, %37 : vector<256x64xf32>
    %c0_14 = arith.constant 0 : index
    %c0_15 = arith.constant 0 : index
    %39 = vector.load %arg4[%c0_14, %c0_15] : memref<1x64xf32, #tpu.memory_space<vmem>>, vector<1x64xf32>
    %40 = vector.broadcast %39 : vector<1x64xf32> to vector<256x64xf32>
    %41 = arith.mulf %38, %40 : vector<256x64xf32>
    %42 = tpu.concatenate %41, %1 in 1 : vector<256x64xf32>, vector<256x64xf32> -> vector<256x128xf32>
    %43 = arith.truncf %42 : vector<256x128xf32> to vector<256x128xbf16>
    %c0_16 = arith.constant 0 : index
    %c0_17 = arith.constant 0 : index
    %44 = vector.load %arg5[%c0_16, %c0_17] : memref<128x384xbf16, #tpu.memory_space<vmem>>, vector<128x384xbf16>
    %cst_18 = arith.constant dense<0.000000e+00> : vector<256x384xf32>
    %45 = tpu.matmul %43, %44, %cst_18 {dimension_numbers = #tpu.dot_dimension_numbers<[1], [0], [0], [1], [0, 0, 1, 1], [], []>} : vector<256x128xbf16>, vector<128x384xbf16>, vector<256x384xf32> -> vector<256x384xf32>
    %c0_19 = arith.constant 0 : index
    %c0_20 = arith.constant 0 : index
    %46 = vector.load %arg6[%c0_19, %c0_20] : memref<1x384xf32, #tpu.memory_space<vmem>>, vector<1x384xf32>
    %47 = vector.broadcast %46 : vector<1x384xf32> to vector<256x384xf32>
    %48 = arith.addf %45, %47 : vector<256x384xf32>
    %49 = vector.extract_strided_slice %48 {offsets = [0, 0], sizes = [256, 128], strides = [1, 1]} : vector<256x384xf32> to vector<256x128xf32>
    %50 = arith.negf %49 : vector<256x128xf32>
    %51 = math.exp %50 : vector<256x128xf32>
    %cst_21 = arith.constant 1.000000e+00 : f32
    %52 = vector.broadcast %cst_21 : f32 to vector<256x128xf32>
    %53 = arith.addf %52, %51 : vector<256x128xf32>
    %54 = arith.divf %52, %53 : vector<256x128xf32>
    %55 = vector.extract_strided_slice %48 {offsets = [0, 128], sizes = [256, 128], strides = [1, 1]} : vector<256x384xf32> to vector<256x128xf32>
    %56 = vector.extract_strided_slice %48 {offsets = [0, 256], sizes = [256, 128], strides = [1, 1]} : vector<256x384xf32> to vector<256x128xf32>
    %57 = arith.negf %56 : vector<256x128xf32>
    %58 = math.exp %57 : vector<256x128xf32>
    %cst_22 = arith.constant 1.000000e+00 : f32
    %59 = vector.broadcast %cst_22 : f32 to vector<256x128xf32>
    %60 = arith.addf %59, %58 : vector<256x128xf32>
    %61 = arith.divf %59, %60 : vector<256x128xf32>
    %62 = arith.mulf %54, %20 : vector<256x128xf32>
    %63 = arith.addf %62, %55 : vector<256x128xf32>
    %64 = arith.truncf %63 : vector<256x128xf32> to vector<256x128xbf16>
    %c0_23 = arith.constant 0 : index
    %c0_24 = arith.constant 0 : index
    %65 = vector.load %arg7[%c0_23, %c0_24] : memref<128x1024xbf16, #tpu.memory_space<vmem>>, vector<128x512xbf16>
    %cst_25 = arith.constant dense<0.000000e+00> : vector<256x512xf32>
    %66 = tpu.matmul %64, %65, %cst_25 {dimension_numbers = #tpu.dot_dimension_numbers<[1], [0], [0], [1], [0, 0, 1, 1], [], []>} : vector<256x128xbf16>, vector<128x512xbf16>, vector<256x512xf32> -> vector<256x512xf32>
    %c0_26 = arith.constant 0 : index
    %c512 = arith.constant 512 : index
    %67 = vector.load %arg7[%c0_26, %c512] : memref<128x1024xbf16, #tpu.memory_space<vmem>>, vector<128x512xbf16>
    %cst_27 = arith.constant dense<0.000000e+00> : vector<256x512xf32>
    %68 = tpu.matmul %64, %67, %cst_27 {dimension_numbers = #tpu.dot_dimension_numbers<[1], [0], [0], [1], [0, 0, 1, 1], [], []>} : vector<256x128xbf16>, vector<128x512xbf16>, vector<256x512xf32> -> vector<256x512xf32>
    %69 = arith.negf %66 : vector<256x512xf32>
    %70 = math.exp %69 : vector<256x512xf32>
    %cst_28 = arith.constant 1.000000e+00 : f32
    %71 = vector.broadcast %cst_28 : f32 to vector<256x512xf32>
    %72 = arith.addf %71, %70 : vector<256x512xf32>
    %73 = arith.divf %71, %72 : vector<256x512xf32>
    %74 = arith.mulf %66, %73 : vector<256x512xf32>
    %75 = arith.mulf %74, %68 : vector<256x512xf32>
    %76 = arith.truncf %75 : vector<256x512xf32> to vector<256x512xbf16>
    %c0_29 = arith.constant 0 : index
    %c0_30 = arith.constant 0 : index
    %77 = vector.load %arg8[%c0_29, %c0_30] : memref<512x128xbf16, #tpu.memory_space<vmem>>, vector<512x128xbf16>
    %cst_31 = arith.constant dense<0.000000e+00> : vector<256x128xf32>
    %78 = tpu.matmul %76, %77, %cst_31 {dimension_numbers = #tpu.dot_dimension_numbers<[1], [0], [0], [1], [0, 0, 1, 1], [], []>} : vector<256x512xbf16>, vector<512x128xbf16>, vector<256x128xf32> -> vector<256x128xf32>
    %c0_32 = arith.constant 0 : index
    %c0_33 = arith.constant 0 : index
    %79 = vector.load %arg10[%c0_32, %c0_33] : memref<256x128xf32, #tpu.memory_space<vmem>>, vector<256x128xf32>
    tpu.vector_store %arg10[%c0_32, %c0_33], %78 {strides = array<i32>} : memref<256x128xf32, #tpu.memory_space<vmem>>, vector<256x128xf32>,
    %80 = vector.broadcast %2 : vector<256x1xf32> to vector<256x128xf32>
    %81 = arith.mulf %61, %80 : vector<256x128xf32>
    %c0_34 = arith.constant 0 : index
    %c0_35 = arith.constant 0 : index
    %82 = vector.load %arg10[%c0_34, %c0_35] : memref<256x128xf32, #tpu.memory_space<vmem>>, vector<256x128xf32>
    %83 = arith.mulf %81, %82 : vector<256x128xf32>
    %c0_36 = arith.constant 0 : index
    %c0_37 = arith.constant 0 : index
    %84 = vector.load %arg9[%c0_36, %c0_37] : memref<256x128xf32, #tpu.memory_space<vmem>>, vector<256x128xf32>
    tpu.vector_store %arg9[%c0_36, %c0_37], %83 {strides = array<i32>} : memref<256x128xf32, #tpu.memory_space<vmem>>, vector<256x128xf32>,
    return
  }
  func.func @transform_0(%arg0: i32) -> (i32, i32) {
    %c0_i32 = arith.constant 0 : i32
    %c0_i32_0 = arith.constant 0 : i32
    return %arg0, %c0_i32 : i32, i32
  }
  func.func @transform_1(%arg0: i32) -> (i32, i32) {
    %c0_i32 = arith.constant 0 : i32
    %c0_i32_0 = arith.constant 0 : i32
    return %arg0, %c0_i32 : i32, i32
  }
  func.func @transform_2(%arg0: i32) -> (i32, i32) {
    %c0_i32 = arith.constant 0 : i32
    %c0_i32_0 = arith.constant 0 : i32
    return %arg0, %c0_i32 : i32, i32
  }
  func.func @transform_3(%arg0: i32) -> (i32, i32) {
    %c0_i32 = arith.constant 0 : i32
    %c0_i32_0 = arith.constant 0 : i32
    %c0_i32_1 = arith.constant 0 : i32
    return %c0_i32, %c0_i32_0 : i32, i32
  }
  func.func @transform_4(%arg0: i32) -> (i32, i32) {
    %c0_i32 = arith.constant 0 : i32
    %c0_i32_0 = arith.constant 0 : i32
    %c0_i32_1 = arith.constant 0 : i32
    return %c0_i32, %c0_i32_0 : i32, i32
  }
  func.func @transform_5(%arg0: i32) -> (i32, i32) {
    %c0_i32 = arith.constant 0 : i32
    %c0_i32_0 = arith.constant 0 : i32
    %c0_i32_1 = arith.constant 0 : i32
    return %c0_i32, %c0_i32_0 : i32, i32
  }
  func.func @transform_6(%arg0: i32) -> (i32, i32) {
    %c0_i32 = arith.constant 0 : i32
    %c0_i32_0 = arith.constant 0 : i32
    %c0_i32_1 = arith.constant 0 : i32
    return %c0_i32, %c0_i32_0 : i32, i32
  }
  func.func @transform_7(%arg0: i32) -> (i32, i32) {
    %c0_i32 = arith.constant 0 : i32
    %c0_i32_0 = arith.constant 0 : i32
    %c0_i32_1 = arith.constant 0 : i32
    return %c0_i32, %c0_i32_0 : i32, i32
  }
  func.func @transform_8(%arg0: i32) -> (i32, i32) {
    %c0_i32 = arith.constant 0 : i32
    %c0_i32_0 = arith.constant 0 : i32
    return %arg0, %c0_i32 : i32, i32
  }
}

</mosaic_0001>

<bundles_post_ra>
// kernel: tpu_custom_call.1
= control target key start
LH: loop header
LB: loop body
LE: loop exit
PB: predicated region body
PF: predicated region fallthrough
CT: control target
= control target key end

     0   :  { %s20369_s0 = inlined_call_operand.vmem [shape: f32[512,128], index: 0, kind: input, shape index: {}]   ;;  %s20370_s1 = inlined_call_operand.vmem [shape: f32[512,64], index: 1, kind: input, shape index: {}]   ;;  %s20371_s2 = inlined_call_operand.vmem [shape: f32[512,1], index: 2, kind: input, shape index: {}]   ;;  %s20372_s3 = inlined_call_operand.hbm [shape: f32[1,64], index: 3, kind: input, shape index: {}]   ;;  %s20373_s4 = inlined_call_operand.hbm [shape: bf16[128,384], index: 4, kind: input, shape index: {}]   ;;  %s20374_s5 = inlined_call_operand.hbm [shape: f32[1,384], index: 5, kind: input, shape index: {}]   ;;  %s20375_s6 = inlined_call_operand.vmem [shape: bf16[128,1024], index: 6, kind: input, shape index: {}]   ;;  %s20376_s7 = inlined_call_operand.vmem [shape: bf16[512,128], index: 7, kind: input, shape index: {}]   ;;  %s20377_s8 = inlined_call_operand.hbm [shape: f32[512,128], index: 8, kind: output, shape index: {}]  }
   0x1   :  { %20539 = sst [smem:[#allocation171_spill]] %s20373_s4 }
   0x2   :  { %13 = vsyncpa [#allocation4], 0 }
   0x3   :  { %14 = vsyncpa [#allocation7], 0 }
   0x4   :  { %15 = vsyncpa [#allocation5], 0 }
   0x5   :  { %17 = vsyncpa [#allocation5 + $0x1], 0  ;;  %s10834_s27 = smov 0   ;;  %s10836_s28 = smov 0  }
   0x6   :  { %s10838_s29 = smov 0   ;;  %s10840_s30 = smov 0  }
   0x7 LB: > { %s10855_s9 = sadd.s32 4294967295, %s10776_s30   ;;  %s8708_s10 = sadd.s32 4294967294, %s10776_s30   ;;  %s10776_s30 = sphi %s10840_s30, %s21905_s30   ;;  %s10772_s29 = sphi %s10838_s29, %s21904_s29   ;;  %s10768_s28 = sphi %s10836_s28, %s21903_s28   ;;  %s10764_s27 = sphi %s10834_s27, %s21902_s27  }
   0x8   : > { %s10859_s11 = sadd.s32 1, %s10776_s30   ;;  %s213_s12 = sadd.s32 1, %s10772_s29 }
   0x9   : > { %s210_s13 = ssub.s32 %s10776_s30, %s10859_s11  ;;  %p223_p0 = scmp.ne.s32.totalorder %s10772_s29, %s10768_s28 }
   0xa   : > { %p211_p1 = scmp.eq.s32.totalorder %s210_s13, 0  ;;  %p224_p2 = scmp.eq.s32.totalorder %s10855_s9, 1 }
   0xb   : > { %p229_p3 = scmp.ne.s32.totalorder %s10768_s28, %s10764_s27  ;;  %p230_p4 = scmp.eq.s32.totalorder %s8708_s10, 1 }
   0xc   : > { %s10870_s14 = scalar_select %p211_p1, %s10772_s29, %s213_s12  }
   0xd   : > { %p10872_p5 = por %p224_p2, %p223_p0  ;;  %p10876_p6 = por %p230_p4, %p229_p3 }
   0xe   : > { %p8709_p7 = scmp.ge.s32.totalorder %s10776_s30, 1  ;;  %p237_p8 = scmp.lt.s32.totalorder %s10776_s30, 3 }
   0xf   : > { %p9575_p9 = scmp.eq.s32.totalorder %s10855_s9, 0  ;;  %s20543_s4 = sld [smem:[#allocation171_spill]] }
  0x10   : > { %p10883_p10 = pnand %p8709_p7, %p237_p8  ;;  %s10778_s21 = smov [#allocation6]  }
  0x11   : > { %s262_s22 = sshll.u32 %s10778_s21, 4  ;;  %s249_s26 = sshll.u32 %s20372_s3, 4  ;;  %s263_s22 = int_to_ptr.vmem [resolvable:$true] %s262_s22  ;;  %s250_s26 = int_to_ptr.hbm [resolvable:$true] %s249_s26 }
  0x12   : > { %p9561_p11 = pneg %p10883_p10  ;;  %s10779_s10 = smov 192  }
  0x13   : > { %s10780_s12 = smov 12   ;;  %s10781_s13 = smov [#allocation3]  }
  0x14   : > { %p10894_p12 = pnand %p9575_p9, %p9561_p11  ;;  %s251_s18 = sshll.u32 %s10781_s13, 4  ;;  %s252_s18 = int_to_ptr.vmem [resolvable:$true] %s251_s18 }
  0x15   : > { %s260_s20 = sshll.u32 %s20543_s4, 4  ;;  %s275_s4 = sshll.u32 %s20374_s5, 4  ;;  %s261_s20 = int_to_ptr.hbm [resolvable:$true] %s260_s20  ;;  %s276_s4 = int_to_ptr.hbm [resolvable:$true] %s275_s4 }
  0x16   : > { %9567 = dma.hbm_to_vmem [thread:$0]  (!%p10894_p12), %s261_s20, 3072, %s263_s22, [#allocation7], %s10779_s10, %s10779_s10, %s10780_s12  }
  0x17   : > { %9564 = dma.hbm_to_vmem [thread:$0]  (!%p10894_p12), %s250_s26, 16, %s252_s18, [#allocation4]  }
  0x18   : > { %s10782_s24 = smov [#allocation8]   ;;  %323 = sbr.rel (%p10883_p10) target bundleno = 2107 (0x83b), region = 52 }
  0x19   : > { %s277_s25 = sshll.u32 %s10782_s24, 4  ;;  %s278_s25 = int_to_ptr.vmem [resolvable:$true] %s277_s25 }
  0x1a   : > { %9570 = dma.hbm_to_vmem [thread:$0]  (!%p10894_p12), %s276_s4, 48, %s278_s25, [#allocation7]  }
  0x1d   : > { %10751 = dma.done.wait (%p9575_p9), [#allocation4], 16  }
  0x1e   : > { %10753 = vsyncadd (%p9575_p9), [#allocation4], 4294967280 }
  0x1f   : > { %10755 = dma.done.wait (%p9575_p9), [#allocation7], 3120  }
  0x20   : > { %10757 = vsyncadd (%p9575_p9), [#allocation7], 4294964176  ;;  %s8719_s20 = sshll.u32 %s10855_s9, 5  ;;  %vm1140_vm0 = vcmask 523264   ;;  %s10783_s26 = smov 64   ;;  %v10784_v42 = vmov 64.0  }
  0x21   : > { %p379_p13 = scmp.lt.s32.totalorder %s8719_s20, 63  ;;  %9709 = vrcp.f32 %v10784_v42  ;;  %s375_s21 = sand.u32 1, %s10768_s28  }
  0x22   : > { %s8718_s24 = sshll.u32 %s375_s21, 8  ;;  %s9522_s25 = sshll.u32 %s10855_s9, 8 }
  0x23   : > { %s21907_s20 = smov (!%p379_p13, %s8719_s20), 63  ;;  %s8587_s17 = scalar_lea.hbm %s20377_s8, %s9522_s25 }
  0x24   : > { %s10921_s4 = sshll.u32 %s21907_s20, 3  ;;  %s8590_s22 = sshll.u32 %s8587_s17, 4  ;;  %s8591_s22 = int_to_ptr.hbm [resolvable:$true] %s8590_s22 }
  0x25   : > { %s10927_s23 = scalar_lea.vmem %s20370_s1, %s10921_s4  ;;  %s11717_s13 = scalar_lea.vmem %s20369_s0, %s10921_s4 }
  0x26   : > { %v10930_v0 = vld [vmem:[%s10927_s23 + $0xd0] sm:$0xff]  ;;  %v10933_v1 = vld [vmem:[%s10927_s23 + $0xc0] sm:$0xff]  ;;  %v10945_v6 = vld [vmem:[%s10927_s23 + $0xd8] sm:$0xff]  ;;  %s10726_s19 = scalar_lea.hbm %s20377_s8, 512 }
  0x27   : > { %v10936_v2 = vld [vmem:[%s10927_s23] sm:$0xff]  ;;  %v1219_v3 = vsel %vm1140_vm0, %v10930_v0, 0.0  ;;  %v1213_v4 = vsel %vm1140_vm0, %v10933_v1, 0.0  ;;  %v10948_v7 = vld [vmem:[%s10927_s23 + $0xc8] sm:$0xff]  ;;  %v1222_v9 = vsel %vm1140_vm0, %v10945_v6, 0.0  ;;  %v10960_v12 = vld [vmem:[%s10927_s23 + $0x10] sm:$0xff]  ;;  %v9635_v40 = vpack.i.bf16 %v10945_v6, %v10930_v0  ;;  %v9710_v43 = vpop.eup %9709 }
  0x28   : > { %v1141_v5 = vsel %vm1140_vm0, %v10936_v2, 0.0  ;;  %1220 = vadd.xlane.f32.xlu2 %v1219_v3  ;;  %1214 = vadd.xlane.f32.xlu0 %v1213_v4  ;;  %v10951_v8 = vld [vmem:[%s10927_s23 + $0x8] sm:$0xff]  ;;  %v1216_v10 = vsel %vm1140_vm0, %v10948_v7, 0.0  ;;  %v10963_v13 = vld [vmem:[%s10927_s23 + $0xe0] sm:$0xff]  ;;  %v10966_v14 = vld [vmem:[%s10927_s23 + $0x18] sm:$0xff]  ;;  %v1147_v15 = vsel %vm1140_vm0, %v10960_v12, 0.0  ;;  %v9625_v38 = vpack.i.bf16 %v10948_v7, %v10933_v1 }
  0x29   : > { %1142 = vadd.xlane.f32.xlu1 %v1141_v5  ;;  %v1144_v11 = vsel %vm1140_vm0, %v10951_v8, 0.0  ;;  %v1225_v16 = vsel %vm1140_vm0, %v10963_v13, 0.0  ;;  %v1150_v17 = vsel %vm1140_vm0, %v10966_v14, 0.0  ;;  %v10975_v18 = vld [vmem:[%s10927_s23 + $0xe8] sm:$0xff]  ;;  %v10981_v20 = vld [vmem:[%s10927_s23 + $0x20] sm:$0xff]  ;;  %v10990_v24 = vld [vmem:[%s10927_s23 + $0xf8] sm:$0xff]  ;;  %v9630_v39 = vpack.i.bf16 %v10951_v8, %v10936_v2 }
  0x2a   : > { %v10978_v19 = vld [vmem:[%s10927_s23 + $0x28] sm:$0xff]  ;;  %v1228_v21 = vsel %vm1140_vm0, %v10975_v18, 0.0  ;;  %v1153_v23 = vsel %vm1140_vm0, %v10981_v20, 0.0  ;;  %v10993_v25 = vld [vmem:[%s10927_s23 + $0xf0] sm:$0xff]  ;;  %v10996_v26 = vld [vmem:[%s10927_s23 + $0x38] sm:$0xff]  ;;  %v1234_v27 = vsel %vm1140_vm0, %v10990_v24, 0.0  ;;  %v9640_v41 = vpack.i.bf16 %v10966_v14, %v10960_v12 }
  0x2b   : > { %v1156_v22 = vsel %vm1140_vm0, %v10978_v19, 0.0  ;;  %v1231_v28 = vsel %vm1140_vm0, %v10993_v25, 0.0  ;;  %v1162_v29 = vsel %vm1140_vm0, %v10996_v26, 0.0  ;;  %v11005_v30 = vld [vmem:[%s10927_s23 + $0x30] sm:$0xff]  ;;  %v11008_v31 = vld [vmem:[%s10927_s23 + $0x48] sm:$0xff]  ;;  %v11015_v34 = vld [vmem:[%s10927_s23 + $0x40] sm:$0xff]  ;;  %vm1242_vm1 = vweird.f32 %v9710_v43 }
  0x2c   : > { %v1159_v32 = vsel %vm1140_vm0, %v11005_v30, 0.0  ;;  %v1168_v33 = vsel %vm1140_vm0, %v11008_v31, 0.0  ;;  %v11018_v35 = vld [vmem:[%s10927_s23 + $0x58] sm:$0xff]  ;;  %v1165_v36 = vsel %vm1140_vm0, %v11015_v34, 0.0  ;;  %v1238_v44 = vmul.f32 64.0, %v9710_v43  ;;  %v11037_v46 = vld [vmem:[%s10927_s23 + $0x50] sm:$0xff] }
  0x2d   : > { %v1174_v37 = vsel %vm1140_vm0, %v11018_v35, 0.0  ;;  %v1171_v48 = vsel %vm1140_vm0, %v11037_v46, 0.0 }
  0x2e   : > { %v1239_v45 = vsub.f32 1.0, %v1238_v44 }
  0x30   : > { %1223 = vadd.xlane.f32.xlu2 %v1222_v9  ;;  %1217 = vadd.xlane.f32.xlu0 %v1216_v10  ;;  %v1240_v47 = vmul.f32 %v9710_v43, %v1239_v45 }
  0x31   : > { %1145 = vadd.xlane.f32.xlu1 %v1144_v11 }
  0x32   : > { %v1241_v49 = vadd.f32 %v9710_v43, %v1240_v47 }
  0x34   : > { %v11041_v50 = vsel %vm1242_vm1, %v9710_v43, %v1241_v49 }
  0x38   : > { %1148 = vadd.xlane.f32.xlu0 %v1147_v15  ;;  %1226 = vadd.xlane.f32.xlu2 %v1225_v16 }
  0x39   : > { %1151 = vadd.xlane.f32.xlu1 %v1150_v17 }
  0x40   : > { %1229 = vadd.xlane.f32.xlu0 %v1228_v21  ;;  %1157 = vadd.xlane.f32.xlu2 %v1156_v22 }
  0x41   : > { %1154 = vadd.xlane.f32.xlu1 %v1153_v23 }
  0x48   : > { %1235 = vadd.xlane.f32.xlu0 %v1234_v27  ;;  %1232 = vadd.xlane.f32.xlu2 %v1231_v28 }
  0x49   : > { %1163 = vadd.xlane.f32.xlu1 %v1162_v29 }
  0x50   : > { %1160 = vadd.xlane.f32.xlu0 %v1159_v32 }
  0x51   : > { %1169 = vadd.xlane.f32.xlu1 %v1168_v33 }
  0x58   : > { %1166 = vadd.xlane.f32.xlu0 %v1165_v36 }
  0x59   : > { %1175 = vadd.xlane.f32.xlu1 %v1174_v37 }
  0x60   : > { %9626 = vrot.lane.b32.xlu2 %v9625_v38, %s10783_s26 }
  0x6c   : > { %9631 = vrot.lane.b32.xlu0 %v9630_v39, %s10783_s26 }
  0x72   : > { %9636 = vrot.lane.b32.xlu1 %v9635_v40, %s10783_s26 }
  0x7a   : > { %9641 = vrot.lane.b32.xlu1 %v9640_v41, %s10783_s26 }
  0x96   : > { %1172 = vadd.xlane.f32.xlu0 %v1171_v48 }
  0x9b   : > { %v1221_v51 = vpop.xlane.xlu2 %1220  ;;  %v1215_v52 = vpop.xlane.xlu0 %1214 }
  0x9c   : > { %v1268_v53 = vmul.f32 %v11041_v50, %v1215_v52  ;;  %v1143_v54 = vpop.xlane.xlu1 %1142  ;;  %v1270_v5 = vmul.f32 %v11041_v50, %v1221_v51 }
  0x9d   : > { %v1244_v3 = vmul.f32 %v11041_v50, %v1143_v54 }
  0x9e   : > { %v11045_v55 = vsub.f32 %v10933_v1, %v1268_v53  ;;  %v11076_v17 = vsub.f32 %v10930_v0, %v1270_v5  ;;  %v11131_v5 = vld [vmem:[%s10927_s23 + $0x60] sm:$0xff] }
  0xa0   : > { %v1332_v56 = vmul.f32 %v11045_v55, %v11045_v55  ;;  %v1334_v29 = vmul.f32 %v11076_v17, %v11076_v17 }
  0xa2   : > { %v1412_v57 = vsel %vm1140_vm0, %v1332_v56, 0.0  ;;  %v1418_v37 = vsel %vm1140_vm0, %v1334_v29, 0.0 }
  0xa3   : > { %v1224_v58 = vpop.xlane.xlu2 %1223  ;;  %v1218_v59 = vpop.xlane.xlu0 %1217  ;;  %1413 = vadd.xlane.f32.xlu0 %v1412_v57 }
  0xa4   : > { %v1271_v60 = vmul.f32 %v11041_v50, %v1224_v58  ;;  %v1269_v61 = vmul.f32 %v11041_v50, %v1218_v59  ;;  %v1146_v62 = vpop.xlane.xlu1 %1145 }
  0xa5   : > { %v1245_v63 = vmul.f32 %v11041_v50, %v1146_v62 }
  0xa6   : > { %v11055_v1 = vsub.f32 %v10945_v6, %v1271_v60  ;;  %v11058_v4 = vsub.f32 %v10948_v7, %v1269_v61  ;;  %v11071_v6 = vsub.f32 %v10936_v2, %v1244_v3 }
  0xa7   : > { %v11062_v9 = vsub.f32 %v10951_v8, %v1245_v63 }
  0xa8   : > { %v1335_v10 = vmul.f32 %v11055_v1, %v11055_v1  ;;  %v1333_v11 = vmul.f32 %v11058_v4, %v11058_v4  ;;  %v1308_v28 = vmul.f32 %v11071_v6, %v11071_v6 }
  0xa9   : > { %v1309_v15 = vmul.f32 %v11062_v9, %v11062_v9 }
  0xaa   : > { %v1421_v7 = vsel %vm1140_vm0, %v1335_v10, 0.0  ;;  %v1415_v16 = vsel %vm1140_vm0, %v1333_v11, 0.0  ;;  %v1340_v33 = vsel %vm1140_vm0, %v1308_v28, 0.0 }
  0xab   : > { %v1149_v8 = vpop.xlane.xlu0 %1148  ;;  %1422 = vadd.xlane.f32.xlu0 %v1421_v7  ;;  %1416 = vadd.xlane.f32.xlu1 %v1415_v16  ;;  %v1343_v21 = vsel %vm1140_vm0, %v1309_v15, 0.0  ;;  %v1227_v22 = vpop.xlane.xlu2 %1226  ;;  %v1177_v7 = vsel %vm1140_vm0, %v11131_v5, 0.0 }
  0xac   : > { %v1246_v23 = vmul.f32 %v11041_v50, %v1149_v8  ;;  %1344 = vadd.xlane.f32.xlu2 %v1343_v21  ;;  %v1152_v27 = vpop.xlane.xlu1 %1151  ;;  %v1272_v41 = vmul.f32 %v11041_v50, %v1227_v22 }
  0xad   : > { %v1247_v2 = vmul.f32 %v11041_v50, %v1152_v27 }
  0xae   : > { %v11086_v0 = vsub.f32 %v10960_v12, %v1246_v23  ;;  %v11105_v45 = vsub.f32 %v10963_v13, %v1272_v41  ;;  %v11168_v41 = vld [vmem:[%s10927_s23 + $0x70] sm:$0xff] }
  0xaf   : > { %v11089_v32 = vsub.f32 %v10966_v14, %v1247_v2 }
  0xb0   : > { %v1310_v39 = vmul.f32 %v11086_v0, %v11086_v0  ;;  %v1336_v56 = vmul.f32 %v11105_v45, %v11105_v45 }
  0xb1   : > { %v1311_v12 = vmul.f32 %v11089_v32, %v11089_v32 }
  0xb2   : > { %v1346_v14 = vsel %vm1140_vm0, %v1310_v39, 0.0  ;;  %v1424_v62 = vsel %vm1140_vm0, %v1336_v56, 0.0  ;;  %v9655_v56 = vpack.i.bf16 %v10990_v24, %v10993_v25 }
  0xb3   : > { %v1230_v36 = vpop.xlane.xlu0 %1229  ;;  %1341 = vadd.xlane.f32.xlu1 %v1340_v33  ;;  %v1158_v38 = vpop.xlane.xlu2 %1157  ;;  %v1349_v44 = vsel %vm1140_vm0, %v1311_v12, 0.0  ;;  %v9645_v12 = vpack.i.bf16 %v10975_v18, %v10963_v13 }
  0xb4   : > { %1419 = vadd.xlane.f32.xlu2 %v1418_v37  ;;  %v1249_v40 = vmul.f32 %v11041_v50, %v1158_v38  ;;  %v1155_v42 = vpop.xlane.xlu1 %1154  ;;  %v1273_v49 = vmul.f32 %v11041_v50, %v1230_v36  ;;  %v11160_v38 = vld [vmem:[%s10927_s23 + $0x68] sm:$0xff] }
  0xb5   : > { %v1248_v15 = vmul.f32 %v11041_v50, %v1155_v42  ;;  %v11174_v42 = vld [vmem:[%s10927_s23 + $0x78] sm:$0xff] }
  0xb6   : > { %v11101_v43 = vsub.f32 %v10978_v19, %v1249_v40  ;;  %v11118_v57 = vsub.f32 %v10975_v18, %v1273_v49  ;;  %v1180_v40 = vsel %vm1140_vm0, %v11160_v38, 0.0  ;;  %v8811_v49 = vld [vmem:[#allocation6 + $0xa8] sm:$0xf] }
  0xb7   : > { %v11145_v23 = vsub.f32 %v10981_v20, %v1248_v15  ;;  %v8813_v15 = vld [vmem:[#allocation6 + $0xb4] sm:$0xf0] }
  0xb8   : > { %v1313_v53 = vmul.f32 %v11101_v43, %v11101_v43  ;;  %v1337_v3 = vmul.f32 %v11118_v57, %v11118_v57 }
  0xb9   : > { %v1312_v28 = vmul.f32 %v11145_v23, %v11145_v23 }
  0xba   : > { %v1355_v60 = vsel %vm1140_vm0, %v1313_v53, 0.0  ;;  %v1427_v16 = vsel %vm1140_vm0, %v1337_v3, 0.0  ;;  %v9418_v3 = vld [vmem:[#allocation6 + $0x80] sm:$0xf0] }
  0xbb   : > { %v1236_v47 = vpop.xlane.xlu0 %1235  ;;  %1347 = vadd.xlane.f32.xlu1 %v1346_v14  ;;  %v1233_v48 = vpop.xlane.xlu2 %1232  ;;  %v1352_v36 = vsel %vm1140_vm0, %v1312_v28, 0.0  ;;  %v1183_v14 = vsel %vm1140_vm0, %v11168_v41, 0.0 }
  0xbc   : > { %v1275_v51 = vmul.f32 %v11041_v50, %v1236_v47  ;;  %1350 = vadd.xlane.f32.xlu2 %v1349_v44  ;;  %v1274_v52 = vmul.f32 %v11041_v50, %v1233_v48  ;;  %v1164_v63 = vpop.xlane.xlu1 %1163  ;;  %v1186_v44 = vsel %vm1140_vm0, %v11174_v42, 0.0  ;;  %v9650_v47 = vpack.i.bf16 %v10978_v19, %v10981_v20 }
  0xbd   : > { %v1251_v11 = vmul.f32 %v11041_v50, %v1164_v63  ;;  %v8787_v63 = vld [vmem:[#allocation6 + $0x78] sm:$0xf] }
  0xbe   : > { %v11113_v54 = vsub.f32 %v10990_v24, %v1275_v51  ;;  %v11123_v59 = vsub.f32 %v10993_v25, %v1274_v52  ;;  %v9424_v51 = vld [vmem:[#allocation6 + $0xb0] sm:$0xf0]  ;;  %v8819_v24 = vld [vmem:[#allocation6 + $0xb0] sm:$0xf]  ;;  %v9425_v25 = vld [vmem:[#allocation6 + $0xb8] sm:$0xf0] }
  0xbf   : > { %v11142_v21 = vsub.f32 %v10996_v26, %v1251_v11  ;;  %v8812_v52 = vor.u32 %v9424_v51, %v8811_v49  ;;  %v8788_v11 = vor.u32 %v9418_v3, %v8787_v63  ;;  %v8789_v49 = vld [vmem:[#allocation6 + $0x84] sm:$0xf0]  ;;  %v9414_v63 = vld [vmem:[#allocation6 + $0x64] sm:$0xf] }
  0xc0   : > { %v1339_v58 = vmul.f32 %v11113_v54, %v11113_v54  ;;  %20545 = vst [vmem:[#allocation13_spill] sm:$0xff] %v11123_v59  ;;  %v1338_v10 = vmul.f32 %v11123_v59, %v11123_v59 }
  0xc1   : > { %20546 = vst [vmem:[#allocation14_spill] sm:$0xff] %v11142_v21  ;;  %v1315_v2 = vmul.f32 %v11142_v21, %v11142_v21  ;;  %9523 = vmatpush.bf16.msra.mxu3 %v8812_v52  ;;  %2232 = vmatpush.bf16.msra.mxu0 %v8812_v52 }
  0xc2   : > { %v1433_v61 = vsel %vm1140_vm0, %v1339_v58, 0.0  ;;  %v1430_v8 = vsel %vm1140_vm0, %v1338_v10, 0.0  ;;  %v8799_v58 = vld [vmem:[#allocation6 + $0x90] sm:$0xf]  ;;  %v9423_v10 = vld [vmem:[#allocation6 + $0xac] sm:$0xf] }
  0xc3   : > { %1434 = vadd.xlane.f32.xlu0 %v1433_v61  ;;  %1425 = vadd.xlane.f32.xlu1 %v1424_v62  ;;  %v1161_v22 = vpop.xlane.xlu0 %1160  ;;  %v1361_v33 = vsel %vm1140_vm0, %v1315_v2, 0.0  ;;  %v9420_v2 = vld [vmem:[#allocation6 + $0x94] sm:$0xf] }
  0xc4   : > { %1356 = vadd.xlane.f32.xlu2 %v1355_v60  ;;  %v1250_v27 = vmul.f32 %v11041_v50, %v1161_v22  ;;  %v1170_v18 = vpop.xlane.xlu1 %1169  ;;  %v9421_v60 = vld [vmem:[#allocation6 + $0x98] sm:$0xf0]  ;;  %v8775_v22 = vld [vmem:[#allocation6 + $0x60] sm:$0xf] }
  0xc5   : > { %v8800_v19 = vor.u32 %v9421_v60, %v8799_v58  ;;  %v1253_v51 = vmul.f32 %v11041_v50, %v1170_v18  ;;  %v9419_v58 = vld [vmem:[#allocation6 + $0x88] sm:$0xf0]  ;;  %v8777_v18 = vld [vmem:[#allocation6 + $0x6c] sm:$0xf0] }
  0xc6   : > { %v11153_v29 = vsub.f32 %v11005_v30, %v1250_v27  ;;  %v9415_v27 = vld [vmem:[#allocation6 + $0x68] sm:$0xf0] }
  0xc7   : > { %9524 = vmatpush.bf16.msra.mxu3 %v8800_v19  ;;  %2233 = vmatpush.bf16.msra.mxu0 %v8800_v19  ;;  %v8776_v28 = vor.u32 %v9415_v27, %v8775_v22  ;;  %v8751_v19 = vld [vmem:[#allocation6 + $0x30] sm:$0xf]  ;;  %v11217_v3 = vsub.f32 %v11008_v31, %v1253_v51  ;;  %v8739_v22 = vld [vmem:[#allocation6 + $0x18] sm:$0xf]  ;;  %v9406_v27 = vld [vmem:[#allocation6 + $0x20] sm:$0xf0] }
  0xc8   : > { %20547 = vst [vmem:[#allocation15_spill] sm:$0xff] %v11153_v29  ;;  %v1314_v37 = vmul.f32 %v11153_v29, %v11153_v29 }
  0xc9   : > { %20549 = vst [vmem:[#allocation17_spill] sm:$0xff] %v11217_v3 }
  0xca   : > { %v1358_v39 = vsel %vm1140_vm0, %v1314_v37, 0.0  ;;  %v9422_v37 = vld [vmem:[#allocation6 + $0xa0] sm:$0xf0] }
  0xcb   : > { %1178 = vadd.xlane.f32.xlu0 %v1177_v7  ;;  %1428 = vadd.xlane.f32.xlu1 %v1427_v16  ;;  %v1167_v13 = vpop.xlane.xlu0 %1166  ;;  %v11194_v7 = vor.u32 %v9423_v10, %v8813_v15  ;;  %v11196_v16 = vor.u32 %v9425_v25, %v8819_v24  ;;  %v9416_v15 = vld [vmem:[#allocation6 + $0x70] sm:$0xf0]  ;;  %v11219_v24 = vor.u32 %v9414_v63, %v8777_v18  ;;  %v8727_v63 = vld [vmem:[#allocation6] sm:$0xf] }
  0xcc   : > { %1431 = vadd.xlane.f32.xlu2 %v1430_v8  ;;  %v1252_v48 = vmul.f32 %v11041_v50, %v1167_v13  ;;  %v11187_v20 = vpop.xlane.xlu1 %1175  ;;  %9525 = vmatpush.bf16.msra.mxu3 %v8788_v11  ;;  %v9408_v18 = vld [vmem:[#allocation6 + $0x34] sm:$0xf] }
  0xcd   : > { %2234 = vmatpush.bf16.msra.mxu0 %v8788_v11  ;;  %2321 = vmatpush.bf16.msra.mxu1 %v11194_v7  ;;  %v8783_v11 = vld [vmem:[#allocation6 + $0x68] sm:$0xf] }
  0xce   : > { %v11183_v53 = vsub.f32 %v11015_v34, %v1252_v48  ;;  %2410 = vmatpush.bf16.msra.mxu2 %v11196_v16  ;;  %v9417_v48 = vld [vmem:[#allocation6 + $0x7c] sm:$0xf]  ;;  %v11221_v25 = vor.u32 %v9416_v15, %v8783_v11  ;;  %v8753_v15 = vld [vmem:[#allocation6 + $0x3c] sm:$0xf0] }
  0xcf   : > { %v11210_v52 = vor.u32 %v9417_v48, %v8789_v49  ;;  %v11230_v48 = vpop.permute.xlu2 %9626 }
  0xd0   : > { %20548 = vst [vmem:[#allocation16_spill] sm:$0xff] %v11183_v53  ;;  %v1316_v61 = vmul.f32 %v11183_v53, %v11183_v53  ;;  %9526 = vmatpush.bf16.msra.mxu3 %v8776_v28 }
  0xd1   : > { %2235 = vmatpush.bf16.msra.mxu0 %v8776_v28 }
  0xd2   : > { %v1364_v8 = vsel %vm1140_vm0, %v1316_v61, 0.0  ;;  %v9409_v61 = vld [vmem:[#allocation6 + $0x38] sm:$0xf0] }
  0xd3   : > { %1353 = vadd.xlane.f32.xlu1 %v1352_v36  ;;  %v8807_v36 = vld [vmem:[#allocation6 + $0x98] sm:$0xf]  ;;  %v8752_v10 = vor.u32 %v9409_v61, %v8751_v19 }
  0xd4   : > { %1362 = vadd.xlane.f32.xlu2 %v1361_v33  ;;  %v8801_v33 = vld [vmem:[#allocation6 + $0x9c] sm:$0xf0] }
  0xdb   : > { %1359 = vadd.xlane.f32.xlu1 %v1358_v39 }
  0xdc   : > { %1181 = vadd.xlane.f32.xlu2 %v1180_v40  ;;  %v11203_v40 = vor.u32 %v9420_v2, %v8801_v33  ;;  %v9411_v2 = vld [vmem:[#allocation6 + $0x4c] sm:$0xf] }
  0xde   : > { %v11191_v62 = vpop.permute.xlu0 %9631  ;;  %2322 = vmatpush.bf16.msra.mxu1 %v11203_v40 }
  0xdf   : > { %9646 = vrot.lane.b32.xlu0 %v9645_v12, %s10783_s26  ;;  %v11205_v12 = vor.u32 %v9422_v37, %v8807_v36  ;;  %v1317_v36 = vmul.f32 %v11217_v3, %v11217_v3  ;;  %v8740_v37 = vor.u32 %v9406_v27, %v8739_v22  ;;  %v8759_v22 = vld [vmem:[#allocation6 + $0x38] sm:$0xf]  ;;  %v9410_v27 = vld [vmem:[#allocation6 + $0x40] sm:$0xf0] }
  0xe1   : > { %2411 = vmatpush.bf16.msra.mxu2 %v11205_v12  ;;  %v1367_v61 = vsel %vm1140_vm0, %v1317_v36, 0.0 }
  0xe2   : > { %2323 = vmatpush.bf16.msra.mxu1 %v11210_v52 }
  0xe3   : > { %1184 = vadd.xlane.f32.xlu1 %v1183_v14 }
  0xe4   : > { %v11201_v39 = vpop.permute.xlu1 %9636 }
  0xe6   : > { %2324 = vmatpush.bf16.msra.mxu1 %v11219_v24 }
  0xeb   : > { %1187 = vadd.xlane.f32.xlu1 %v1186_v44  ;;  %v8763_v44 = vld [vmem:[#allocation6 + $0x48] sm:$0xf] }
  0xf4   : > { %9651 = vrot.lane.b32.xlu2 %v9650_v47, %s10783_s26  ;;  %v9412_v47 = vld [vmem:[#allocation6 + $0x50] sm:$0xf0] }
  0xf5   : > { %v8764_v13 = vor.u32 %v9412_v47, %v8763_v44  ;;  %v8765_v44 = vld [vmem:[#allocation6 + $0x54] sm:$0xf0]  ;;  %v8771_v47 = vld [vmem:[#allocation6 + $0x50] sm:$0xf] }
  0xf6   : > { %v11233_v51 = vor.u32 %v9411_v2, %v8765_v44  ;;  %v9405_v44 = vld [vmem:[#allocation6 + $0x1c] sm:$0xf] }
  0xf7   : > { %9527 = vmatpush.bf16.msra.mxu3 %v8764_v13  ;;  %2236 = vmatpush.bf16.msra.mxu0 %v8764_v13  ;;  %v9413_v13 = vld [vmem:[#allocation6 + $0x58] sm:$0xf0] }
  0xf8   : > { %2325 = vmatpush.bf16.msra.mxu1 %v11233_v51 }
  0xfb   : > { %9528 = vmatpush.bf16.msra.mxu3 %v8752_v10  ;;  %2237 = vmatpush.bf16.msra.mxu0 %v8752_v10  ;;  %v9403_v10 = vld [vmem:[#allocation6 + $0x8] sm:$0xf0] }
  0xfc   : > { %v8728_v11 = vor.u32 %v9403_v10, %v8727_v63  ;;  %v1255_v10 = vmul.f32 %v11041_v50, %v11187_v20  ;;  %v9402_v20 = vld [vmem:[#allocation6 + $0x4] sm:$0xf] }
  0xff   : > { %9529 = vmatpush.bf16.msra.mxu3 %v8740_v37  ;;  %2238 = vmatpush.bf16.msra.mxu0 %v8740_v37 }
 0x103   : > { %9530 = vmatpush.bf16.msra.mxu3 %v8728_v11  ;;  %2239 = vmatpush.bf16.msra.mxu0 %v8728_v11 }
 0x104   : > { %9656 = vrot.lane.b32.xlu1 %v9655_v56, %s10783_s26  ;;  %v8795_v56 = vld [vmem:[#allocation6 + $0x80] sm:$0xf] }
 0x105   : > { %v11212_v60 = vor.u32 %v9419_v58, %v8795_v56  ;;  %v11235_v56 = vor.u32 %v9413_v13, %v8771_v47  ;;  %v8741_v47 = vld [vmem:[#allocation6 + $0x24] sm:$0xf0]  ;;  %v8747_v13 = vld [vmem:[#allocation6 + $0x20] sm:$0xf] }
 0x107   : > { %2412 = vmatpush.bf16.msra.mxu2 %v11212_v60  ;;  %9531 = vmatpush.bf16.msrb.mxu3 %v11194_v7  ;;  %v8729_v7 = vld [vmem:[#allocation6 + $0xc] sm:$0xf0] }
 0x109   : > { %1365 = vadd.xlane.f32.xlu0 %v1364_v8  ;;  %v1173_v14 = vpop.xlane.xlu0 %1172  ;;  %v11223_v8 = vpop.permute.xlu1 %9641 }
 0x10a   : > { %v1254_v28 = vmul.f32 %v11041_v50, %v1173_v14  ;;  %v9660_v14 = vpack.i.bf16 %v10996_v26, %v11005_v30  ;;  %v11249_v26 = vor.u32 %v9408_v18, %v8753_v15  ;;  %v11251_v30 = vor.u32 %v9410_v27, %v8759_v22 }
 0x10b   : > { %2413 = vmatpush.bf16.msra.mxu2 %v11221_v25  ;;  %9532 = vmatpush.bf16.msrb.mxu3 %v11203_v40 }
 0x10c   : > { %v11244_v19 = vsub.f32 %v11037_v46, %v1254_v28  ;;  %2326 = vmatpush.bf16.msra.mxu1 %v11249_v26 }
 0x10e   : > { %20550 = vst [vmem:[#allocation18_spill] sm:$0xff] %v11244_v19  ;;  %v1318_v28 = vmul.f32 %v11244_v19, %v11244_v19 }
 0x10f   : > { %2414 = vmatpush.bf16.msra.mxu2 %v11235_v56  ;;  %9533 = vmatpush.bf16.msrb.mxu3 %v11210_v52 }
 0x113   : > { %2415 = vmatpush.bf16.msra.mxu2 %v11251_v30  ;;  %9534 = vmatpush.bf16.msrb.mxu3 %v11219_v24 }
 0x116   : > { %v1414_v33 = vpop.xlane.xlu0 %1413 }
 0x117   : > { %v1460_v49 = vmul.f32 %v1414_v33, %v11041_v50  ;;  %9535 = vmatpush.bf16.msrb.mxu3 %v11233_v51 }
 0x119   : > { %v11237_v58 = vadd.f32 1e-05, %v1460_v49 }
 0x11b   : > { %9711 = vrsqrt.f32 %v11237_v58  ;;  %vm1746_vm2 = vweird.f32 %v11237_v58  ;;  %9536 = vmatpush.bf16.msrb.mxu3 %v11249_v26 }
 0x11d   : > { %1368 = vadd.xlane.f32.xlu2 %v1367_v61  ;;  %9661 = vrot.lane.b32.xlu0 %v9660_v14, %s10783_s26  ;;  %v11260_v14 = vor.u32 %v9405_v44, %v8741_v47  ;;  %v9407_v61 = vld [vmem:[#allocation6 + $0x28] sm:$0xf0] }
 0x11e   : > { %v1423_v46 = vpop.xlane.xlu0 %1422  ;;  %v1417_v2 = vpop.xlane.xlu1 %1416  ;;  %v11271_v15 = vor.u32 %v9407_v61, %v8747_v13 }
 0x11f   : > { %v1463_v33 = vmul.f32 %v1423_v46, %v11041_v50  ;;  %v1345_v36 = vpop.xlane.xlu2 %1344  ;;  %v1461_v37 = vmul.f32 %v1417_v2, %v11041_v50  ;;  %v1370_v46 = vsel %vm1140_vm0, %v1318_v28, 0.0  ;;  %2327 = vmatpush.bf16.msra.mxu1 %v11260_v14  ;;  %v11287_v28 = vsub.f32 %v11018_v35, %v1255_v10  ;;  %9537 = vmatpush.bf16.msrb.mxu3 %v11260_v14 }
 0x120   : > { %v1437_v49 = vmul.f32 %v1345_v36, %v11041_v50  ;;  %2416 = vmatpush.bf16.msra.mxu2 %v11271_v15  ;;  %v8735_v36 = vld [vmem:[#allocation6 + $0x8] sm:$0xf] }
 0x121   : > { %v11263_v63 = vpop.eup %9711  ;;  %v11267_v18 = vadd.f32 1e-05, %v1463_v33  ;;  %v11269_v11 = vadd.f32 1e-05, %v1461_v37  ;;  %v11283_v33 = vor.u32 %v9402_v20, %v8729_v7  ;;  %v9404_v37 = vld [vmem:[#allocation6 + $0x10] sm:$0xf0]  ;;  %v1319_v20 = vmul.f32 %v11287_v28, %v11287_v28 }
 0x122   : > { %v1741_v22 = vmul.f32 %v11263_v63, %v11237_v58  ;;  %v11275_v27 = vadd.f32 1e-05, %v1437_v49  ;;  %20551 = vst [vmem:[#allocation19_spill] sm:$0xff] %v11287_v28  ;;  %v11290_v44 = vor.u32 %v9404_v37, %v8735_v36  ;;  %vm1747_vm3 = vweird.f32 %v11263_v63 }
 0x123   : > { %9713 = vrsqrt.f32 %v11267_v18  ;;  %2328 = vmatpush.bf16.msra.mxu1 %v11283_v33  ;;  %vm11318_vm4 = vmor %vm1746_vm2, %vm1747_vm3  ;;  %vm1756_vm5 = vweird.f32 %v11269_v11  ;;  %vm1776_vm8 = vweird.f32 %v11267_v18  ;;  %9538 = vmatpush.bf16.msrb.mxu3 %v11283_v33 }
 0x124   : > { %v1742_v2 = vmul.f32 %v11263_v63, %v1741_v22  ;;  %9715 = vrsqrt.f32 %v11275_v27  ;;  %v11294_v22 = vld [vmem:[%s10927_s23 + $0x80] sm:$0xff]  ;;  %2417 = vmatpush.bf16.msra.mxu2 %v11290_v44  ;;  %vm1516_vm10 = vweird.f32 %v11275_v27 }
 0x125   : > { %9717 = vrsqrt.f32 %v11269_v11  ;;  %1371 = vadd.xlane.f32.xlu2 %v1370_v46  ;;  %20552 = vst [vmem:[#allocation20_spill] sm:$0xff] %v11294_v22  ;;  %v1189_v36 = vsel %vm1140_vm0, %v11294_v22, 0.0 }
 0x126   : > { %v1743_v47 = vmul.f32 0.5, %v1742_v2  ;;  %v1342_v13 = vpop.xlane.xlu1 %1341 }
 0x127   : > { %v1420_v49 = vpop.xlane.xlu2 %1419  ;;  %v1436_v61 = vmul.f32 %v1342_v13, %v11041_v50 }
 0x128   : > { %v1744_v40 = vsub.f32 1.5, %v1743_v47  ;;  %v1462_v35 = vmul.f32 %v1420_v49, %v11041_v50 }
 0x129   : > { %v11300_v10 = vpop.eup %9713  ;;  %v11304_v46 = vadd.f32 1e-05, %v1436_v61 }
 0x12a   : > { %v11308_v7 = vpop.eup %9715  ;;  %v11310_v2 = vadd.f32 1e-05, %v1462_v35  ;;  %v1745_v52 = vmul.f32 %v11263_v63, %v1744_v40  ;;  %v1771_v13 = vmul.f32 %v11300_v10, %v11267_v18  ;;  %v1373_v40 = vsel %vm1140_vm0, %v1319_v20, 0.0 }
 0x12b   : > { %v9718_v37 = vpop.eup %9717  ;;  %v1511_v58 = vmul.f32 %v11308_v7, %v11275_v27  ;;  %9719 = vrsqrt.f32 %v11304_v46  ;;  %vm1517_vm9 = vweird.f32 %v11308_v7  ;;  %vm1777_vm11 = vweird.f32 %v11300_v10 }
 0x12c   : > { %v1751_v49 = vmul.f32 %v9718_v37, %v11269_v11  ;;  %9721 = vrsqrt.f32 %v11310_v2  ;;  %v1749_v19 = vsel %vm11318_vm4, %v11263_v63, %v1745_v52  ;;  %vm1757_vm6 = vweird.f32 %v9718_v37  ;;  %vm11378_vm13 = vmor %vm1516_vm10, %vm1517_vm9 }
 0x12d   : > { %v1512_v61 = vmul.f32 %v11308_v7, %v1511_v58  ;;  %1190 = vadd.xlane.f32.xlu2 %v1189_v36  ;;  %v1772_v58 = vmul.f32 %v11300_v10, %v1771_v13  ;;  %v1844_v47 = vmul.f32 %v1749_v19, %v11045_v55  ;;  %vm11347_vm7 = vmor %vm1756_vm5, %vm1757_vm6  ;;  %vm1506_vm14 = vweird.f32 %v11304_v46 }
 0x12e   : > { %v1752_v35 = vmul.f32 %v9718_v37, %v1751_v49  ;;  %1374 = vadd.xlane.f32.xlu1 %v1373_v40  ;;  %v1348_v28 = vpop.xlane.xlu1 %1347  ;;  %vm1766_vm2 = vweird.f32 %v11310_v2  ;;  %vm11423_vm4 = vmor %vm1776_vm8, %vm1777_vm11  ;;  %v9633_v18 = vunpack.i.l.bf16 %v11191_v62 }
 0x12f   : > { %v1513_v3 = vmul.f32 0.5, %v1512_v61  ;;  %v1351_v53 = vpop.xlane.xlu2 %1350  ;;  %v1438_v24 = vmul.f32 %v1348_v28, %v11041_v50  ;;  %v11341_v61 = vld [vmem:[#allocation3] ss:$0 sm:$0xff]  ;;  %v1773_v51 = vmul.f32 0.5, %v1772_v58 }
 0x130   : > { %v1753_v22 = vmul.f32 0.5, %v1752_v35  ;;  %v1439_v36 = vmul.f32 %v1351_v53, %v11041_v50 }
 0x131   : > { %v9720_v20 = vpop.eup %9719  ;;  %v11337_v49 = vadd.f32 1e-05, %v1438_v24  ;;  %v1514_v28 = vsub.f32 1.5, %v1513_v3  ;;  %v9628_v3 = vunpack.i.l.bf16 %v11230_v48  ;;  %v1774_v21 = vsub.f32 1.5, %v1773_v51 }
 0x132   : > { %v1754_v63 = vsub.f32 1.5, %v1753_v22  ;;  %v1501_v52 = vmul.f32 %v9720_v20, %v11304_v46  ;;  %v11343_v40 = vpop.eup %9721  ;;  %v11351_v53 = vadd.f32 1e-05, %v1439_v36  ;;  %v9629_v22 = vunpack.i.h.bf16 %v11230_v48 }
 0x133   : > { %9723 = vrsqrt.f32 %v11337_v49  ;;  %v1761_v19 = vmul.f32 %v11343_v40, %v11310_v2  ;;  %v1880_v36 = vmul.f32 %v11341_v61, %v1844_v47  ;;  %v1515_v26 = vmul.f32 %v11308_v7, %v1514_v28 }
 0x134   : > { %v1755_v55 = vmul.f32 %v9718_v37, %v1754_v63  ;;  %v1502_v11 = vmul.f32 %v9720_v20, %v1501_v52  ;;  %9725 = vrsqrt.f32 %v11351_v53  ;;  %vm1507_vm12 = vweird.f32 %v9720_v20 }
 0x135   : > { %v1762_v24 = vmul.f32 %v11343_v40, %v1761_v19  ;;  %v1519_v19 = vsel %vm11378_vm13, %v11308_v7, %v1515_v26  ;;  %vm1767_vm15 = vweird.f32 %v11343_v40  ;;  %vm1508_vm1 = vmor %vm1506_vm14, %vm1507_vm12  ;;  %v9665_v28 = vpack.i.bf16 %v11008_v31, %v11015_v34 }
 0x136   : > { %v1759_v35 = vsel %vm11347_vm7, %v9718_v37, %v1755_v55  ;;  %v1426_v58 = vpop.xlane.xlu1 %1425  ;;  %v1503_v48 = vmul.f32 0.5, %v1502_v11  ;;  %vm11414_vm3 = vmor %vm1766_vm2, %vm1767_vm15  ;;  %vm1526_vm5 = vweird.f32 %v11337_v49  ;;  %vm1536_vm8 = vweird.f32 %v11351_v53 }
 0x137   : > { %v1845_v63 = vmul.f32 %v1759_v35, %v11058_v4  ;;  %v1357_v52 = vpop.xlane.xlu2 %1356  ;;  %v1464_v29 = vmul.f32 %v1426_v58, %v11041_v50  ;;  %v1763_v59 = vmul.f32 0.5, %v1762_v24  ;;  %v2040_v24 = vsel %vm1140_vm0, %v1880_v36, %v9628_v3 }
 0x138   : > { %v1441_v13 = vmul.f32 %v1357_v52, %v11041_v50  ;;  %v1504_v47 = vsub.f32 1.5, %v1503_v48  ;;  %v1821_v3 = vmul.f32 %v1519_v19, %v11062_v9 }
 0x139   : > { %v11372_v37 = vpop.eup %9723  ;;  %v1881_v4 = vmul.f32 %v11341_v61, %v1845_v63  ;;  %v1764_v27 = vsub.f32 1.5, %v1763_v59  ;;  %v11392_v35 = vadd.f32 1e-05, %v1464_v29  ;;  %v1775_v59 = vmul.f32 %v11300_v10, %v1774_v21 }
 0x13a   : > { %v1521_v14 = vmul.f32 %v11372_v37, %v11337_v49  ;;  %v11385_v51 = vadd.f32 1e-05, %v1441_v13  ;;  %v11387_v55 = vpop.eup %9725  ;;  %v1505_v11 = vmul.f32 %v9720_v20, %v1504_v47  ;;  %vm1527_vm7 = vweird.f32 %v11372_v37 }
 0x13b   : > { %v1531_v46 = vmul.f32 %v11387_v55, %v11351_v53  ;;  %v1765_v63 = vmul.f32 %v11343_v40, %v1764_v27  ;;  %v2041_v29 = vsel %vm1140_vm0, %v1881_v4, %v9629_v22  ;;  %v11436_v27 = vld [vmem:[%s10927_s23 + $0x88] sm:$0xff]  ;;  %vm1537_vm6 = vweird.f32 %v11387_v55  ;;  %vm11474_vm9 = vmor %vm1526_vm5, %vm1527_vm7 }
 0x13c   : > { %v1522_v58 = vmul.f32 %v11372_v37, %v1521_v14  ;;  %v1509_v7 = vsel %vm1508_vm1, %v9720_v20, %v1505_v11  ;;  %9727 = vrsqrt.f32 %v11385_v51  ;;  %v11409_v33 = vpack.c.bf16 %v2041_v29, %v2040_v24  ;;  %vm11485_vm10 = vmor %vm1536_vm8, %vm1537_vm6 }
 0x13d   : > { %v1820_v21 = vmul.f32 %v1509_v7, %v11071_v6  ;;  %v1532_v36 = vmul.f32 %v11387_v55, %v1531_v46  ;;  %9729 = vrsqrt.f32 %v11392_v35  ;;  %v1769_v13 = vsel %vm11414_vm3, %v11343_v40, %v1765_v63  ;;  %v1435_v46 = vpop.xlane.xlu0 %1434 }
 0x13e   : > { %v1523_v26 = vmul.f32 0.5, %v1522_v58  ;;  %v1429_v48 = vpop.xlane.xlu1 %1428  ;;  %2300 = vmatmul.bf16.vlgmr.msra.gmra.mxu3 %v11409_v33  ;;  %v1779_v14 = vsel %vm11423_vm4, %v11300_v10, %v1775_v59  ;;  %v1857_v11 = vmul.f32 %v11341_v61, %v1821_v3  ;;  %v9634_v24 = vunpack.i.h.bf16 %v11191_v62 }
 0x13f   : > { %v1432_v20 = vpop.xlane.xlu2 %1431  ;;  %v1465_v52 = vmul.f32 %v1429_v48, %v11041_v50  ;;  %v1533_v6 = vmul.f32 0.5, %v1532_v36  ;;  %v1856_v22 = vmul.f32 %v11341_v61, %v1820_v21  ;;  %9539 = vmatpush.bf16.msra.mxu3 %v11196_v16  ;;  %v1846_v31 = vmul.f32 %v1769_v13, %v11076_v17 }
 0x140   : > { %v1524_v47 = vsub.f32 1.5, %v1523_v26  ;;  %v1192_v10 = vsel %vm1140_vm0, %v11436_v27, 0.0  ;;  %v1847_v16 = vmul.f32 %v1779_v14, %v11055_v1  ;;  %v2017_v7 = vsel %vm1140_vm0, %v1857_v11, %v9634_v24 }
 0x141   : > { %v11431_v4 = vadd.f32 1e-05, %v1465_v52  ;;  %v1534_v19 = vsub.f32 1.5, %v1533_v6  ;;  %v2016_v34 = vsel %vm1140_vm0, %v1856_v22, %v9633_v18  ;;  %v9638_v1 = vunpack.i.l.bf16 %v11201_v39 }
 0x142   : > { %v11444_v40 = vpop.eup %9727  ;;  %v1525_v62 = vmul.f32 %v11372_v37, %v1524_v47  ;;  %v2048_v3 = vpack.c.bf16 %v2017_v7, %v2016_v34  ;;  %v1467_v48 = vmul.f32 %v1435_v46, %v11041_v50  ;;  %v1882_v52 = vmul.f32 %v11341_v61, %v1846_v31 }
 0x143   : > { %9731 = vrsqrt.f32 %v11431_v4  ;;  %v11453_v59 = vpop.eup %9729  ;;  %v1535_v17 = vmul.f32 %v11387_v55, %v1534_v19  ;;  %v1551_v58 = vmul.f32 %v11444_v40, %v11385_v51  ;;  %9540 = vmatpush.bf16.msra.mxu3 %v11205_v12  ;;  %v1466_v53 = vmul.f32 %v1432_v20, %v11041_v50 }
 0x144   : > { %v1781_v63 = vmul.f32 %v11453_v59, %v11392_v35  ;;  %v1529_v49 = vsel %vm11474_vm9, %v11372_v37, %v1525_v62  ;;  %2240 = vmatmul.bf16.vlgmr.msra.gmra.mxu0 %v2048_v3  ;;  %2329 = vmatmul.bf16.vlgmr.msra.gmra.mxu1 %v2048_v3  ;;  %v1883_v2 = vmul.f32 %v11341_v61, %v1847_v16  ;;  %v9639_v20 = vunpack.i.h.bf16 %v11201_v39 }
 0x145   : > { %9666 = vrot.lane.b32.xlu2 %v9665_v28, %s10783_s26  ;;  %v1539_v13 = vsel %vm11485_vm10, %v11387_v55, %v1535_v17  ;;  %v1552_v47 = vmul.f32 %v11444_v40, %v1551_v58  ;;  %2418 = vmatmul.bf16.vlgmr.msra.gmra.mxu2 %v2048_v3  ;;  %v11504_v37 = vpop.xlane.xlu0 %1178  ;;  %v2042_v19 = vsel %vm1140_vm0, %v1882_v52, %v9638_v1  ;;  %v11511_v46 = vadd.f32 1e-05, %v1467_v48 }
 0x146   : > { %v1354_v29 = vpop.xlane.xlu1 %1353  ;;  %v1782_v12 = vmul.f32 %v11453_v59, %v1781_v63  ;;  %v1823_v55 = vmul.f32 %v1539_v13, %v11089_v32  ;;  %v1822_v11 = vmul.f32 %v1529_v49, %v11086_v0  ;;  %v11513_v34 = vadd.f32 1e-05, %v1466_v53 }
 0x147   : > { %v11468_v21 = vpop.xlane.xlu2 %1362  ;;  %v1440_v36 = vmul.f32 %v1354_v29, %v11041_v50  ;;  %1193 = vadd.xlane.f32.xlu0 %v1192_v10  ;;  %9541 = vmatpush.bf16.msra.mxu3 %v11212_v60  ;;  %v1553_v31 = vmul.f32 0.5, %v1552_v47  ;;  %v2043_v60 = vsel %vm1140_vm0, %v1883_v2, %v9639_v20  ;;  %vm1787_vm11 = vweird.f32 %v11453_v59 }
 0x148   : > { %v1783_v28 = vmul.f32 0.5, %v1782_v12  ;;  %v11521_v16 = vpack.c.bf16 %v2043_v60, %v2042_v19  ;;  %v9644_v62 = vunpack.i.h.bf16 %v11223_v8  ;;  %v9643_v17 = vunpack.i.l.bf16 %v11223_v8 }
 0x149   : > { %v11481_v9 = vpop.eup %9731  ;;  %v11493_v22 = vadd.f32 1e-05, %v1440_v36  ;;  %vm1786_vm12 = vweird.f32 %v11392_v35  ;;  %v1859_v29 = vmul.f32 %v11341_v61, %v1823_v55  ;;  %v1554_v1 = vsub.f32 1.5, %v1553_v31 }
 0x14a   : > { %v1791_v18 = vmul.f32 %v11481_v9, %v11431_v4  ;;  %v1784_v14 = vsub.f32 1.5, %v1783_v28  ;;  %vm1797_vm13 = vweird.f32 %v11481_v9  ;;  %vm11536_vm14 = vmor %vm1786_vm12, %vm1787_vm11  ;;  %vm1796_vm15 = vweird.f32 %v11431_v4  ;;  %v11554_v4 = vld [vmem:[%s10927_s23 + $0x98] sm:$0xff] }
 0x14b   : > { %9733 = vrsqrt.f32 %v11493_v22  ;;  %9542 = vmatpush.bf16.msra.mxu3 %v11221_v25  ;;  %v1858_v25 = vmul.f32 %v11341_v61, %v1822_v11  ;;  %vm1798_vm1 = vmor %vm1796_vm15, %vm1797_vm13  ;;  %vm1557_vm2 = vweird.f32 %v11444_v40  ;;  %v1555_v6 = vmul.f32 %v11444_v40, %v1554_v1  ;;  %v20571_v11 = vld [vmem:[#allocation13_spill] sm:$0xff] }
 0x14c   : > { %v1792_v24 = vmul.f32 %v11481_v9, %v1791_v18  ;;  %v1785_v39 = vmul.f32 %v11453_v59, %v1784_v14  ;;  %9735 = vrsqrt.f32 %v11511_v46  ;;  %vm1556_vm4 = vweird.f32 %v11385_v51 }
 0x14d   : > { %9737 = vrsqrt.f32 %v11513_v34  ;;  %v2018_v52 = vsel %vm1140_vm0, %v1858_v25, %v9643_v17  ;;  %vm11579_vm5 = vmor %vm1556_vm4, %vm1557_vm2  ;;  %vm1546_vm6 = vweird.f32 %v11493_v22  ;;  %vm1816_vm8 = vweird.f32 %v11511_v46 }
 0x14e   : > { %v11516_v10 = vpop.xlane.xlu1 %1359  ;;  %v1793_v32 = vmul.f32 0.5, %v1792_v24  ;;  %2305 = vmatmul.bf16.gmra.mxu3 %v11521_v16  ;;  %v1789_v3 = vsel %vm11536_vm14, %v11453_v59, %v1785_v39  ;;  %v2019_v59 = vsel %vm1140_vm0, %v1859_v29, %v9644_v62  ;;  %v1559_v31 = vsel %vm11579_vm5, %v11444_v40, %v1555_v6  ;;  %v11603_v62 = vld [vmem:[%s10927_s23 + $0x90] sm:$0xff] }
 0x14f   : > { %v1182_v0 = vpop.xlane.xlu2 %1181  ;;  %9543 = vmatpush.bf16.msra.mxu3 %v11235_v56  ;;  %v1848_v49 = vmul.f32 %v1789_v3, %v11105_v45  ;;  %v2049_v28 = vpack.c.bf16 %v2019_v59, %v2018_v52  ;;  %v1195_v29 = vsel %vm1140_vm0, %v11603_v62, 0.0  ;;  %vm1806_vm12 = vweird.f32 %v11513_v34 }
 0x150   : > { %v1257_v58 = vmul.f32 %v11041_v50, %v1182_v0  ;;  %v1794_v7 = vsub.f32 1.5, %v1793_v32 }
 0x151   : > { %v11527_v63 = vpop.eup %9733  ;;  %v9647_v12 = vpop.permute.xlu0 %9646  ;;  %v1884_v51 = vmul.f32 %v11341_v61, %v1848_v49 }
 0x152   : > { %v1541_v35 = vmul.f32 %v11527_v63, %v11493_v22  ;;  %v1795_v36 = vmul.f32 %v11481_v9, %v1794_v7  ;;  %v11550_v26 = vsub.f32 %v11160_v38, %v1257_v58  ;;  %v9649_v47 = vunpack.i.h.bf16 %v9647_v12  ;;  %v11568_v20 = vpop.eup %9735 }
 0x153   : > { %9544 = vmatpush.bf16.msra.mxu3 %v11251_v30  ;;  %vm1547_vm3 = vweird.f32 %v11527_v63  ;;  %v9648_v45 = vunpack.i.l.bf16 %v9647_v12  ;;  %v1811_v22 = vmul.f32 %v11568_v20, %v11511_v46  ;;  %v1825_v7 = vmul.f32 %v1559_v31, %v11101_v43 }
 0x154   : > { %v1542_v48 = vmul.f32 %v11527_v63, %v1541_v35  ;;  %v1799_v56 = vsel %vm1798_vm1, %v11481_v9, %v1795_v36  ;;  %v1198_v9 = vsel %vm1140_vm0, %v11554_v4, 0.0  ;;  %v1321_v18 = vmul.f32 %v11550_v26, %v11550_v26  ;;  %2245 = vmatmul.bf16.gmra.mxu0 %v2049_v28  ;;  %2334 = vmatmul.bf16.gmra.mxu1 %v2049_v28  ;;  %vm1548_vm7 = vmor %vm1546_vm6, %vm1547_vm3 }
 0x155   : > { %v1849_v53 = vmul.f32 %v1799_v56, %v11118_v57  ;;  %1199 = vadd.xlane.f32.xlu0 %v1198_v9  ;;  %v11571_v57 = vpop.eup %9737  ;;  %2423 = vmatmul.bf16.gmra.mxu2 %v2049_v28  ;;  %v2044_v40 = vsel %vm1140_vm0, %v1884_v51, %v9648_v45  ;;  %v1256_v43 = vmul.f32 %v11041_v50, %v11504_v37  ;;  %vm1817_vm9 = vweird.f32 %v11568_v20  ;;  %v11653_v45 = vld [vmem:[%s10927_s23 + $0xa8] sm:$0xff] }
 0x156   : > { %v1543_v2 = vmul.f32 0.5, %v1542_v48  ;;  %v1185_v13 = vpop.xlane.xlu1 %1184  ;;  %v1379_v30 = vsel %vm1140_vm0, %v1321_v18, 0.0  ;;  %v1801_v32 = vmul.f32 %v11571_v57, %v11513_v34  ;;  %v1861_v56 = vmul.f32 %v11341_v61, %v1825_v7  ;;  %vm1818_vm11 = vmor %vm1816_vm8, %vm1817_vm9 }
 0x157   : > { %v1258_v19 = vmul.f32 %v11041_v50, %v1185_v13  ;;  %v1885_v55 = vmul.f32 %v11341_v61, %v1849_v53  ;;  %1380 = vadd.xlane.f32.xlu1 %v1379_v30  ;;  %9545 = vmatpush.bf16.msra.mxu3 %v11271_v15  ;;  %v1443_v12 = vmul.f32 %v11468_v21, %v11041_v50  ;;  %vm1807_vm10 = vweird.f32 %v11571_v57 }
 0x158   : > { %v1544_v14 = vsub.f32 1.5, %v1543_v2  ;;  %v1802_v35 = vmul.f32 %v11571_v57, %v1801_v32  ;;  %v1442_v37 = vmul.f32 %v11516_v10, %v11041_v50  ;;  %vm1808_vm13 = vmor %vm1806_vm12, %vm1807_vm10  ;;  %v1204_v51 = vsel %vm1140_vm0, %v11653_v45, 0.0 }
 0x159   : > { %v11592_v60 = vsub.f32 %v11168_v41, %v1258_v19  ;;  %v2045_v39 = vsel %vm1140_vm0, %v1885_v55, %v9649_v47  ;;  %v9652_v41 = vpop.permute.xlu2 %9651  ;;  %v11638_v13 = vadd.f32 1e-05, %v1443_v12 }
 0x15a   : > { %v1545_v24 = vmul.f32 %v11527_v63, %v1544_v14  ;;  %v11606_v58 = vpack.c.bf16 %v2045_v39, %v2044_v40  ;;  %v9654_v3 = vunpack.i.h.bf16 %v9652_v41  ;;  %v9653_v36 = vunpack.i.l.bf16 %v9652_v41 }
 0x15b   : > { %v1322_v15 = vmul.f32 %v11592_v60, %v11592_v60  ;;  %9546 = vmatpush.bf16.msra.mxu3 %v11290_v44  ;;  %v1803_v6 = vmul.f32 0.5, %v1802_v35  ;;  %v1474_v28 = vadd.f32 1e-05, %v1442_v37  ;;  %9739 = vrsqrt.f32 %v11638_v13  ;;  %v20573_v37 = vld [vmem:[#allocation15_spill] sm:$0xff] }
 0x15c   : > { %v1549_v0 = vsel %vm1548_vm7, %v11527_v63, %v1545_v24  ;;  %v2021_v49 = vsel %vm1140_vm0, %v1861_v56, %v9654_v3  ;;  %vm1576_vm1 = vweird.f32 %v11638_v13 }
 0x15d   : > { %v1824_v17 = vmul.f32 %v1549_v0, %v11145_v23  ;;  %v1382_v63 = vsel %vm1140_vm0, %v1322_v15, 0.0  ;;  %v1812_v23 = vmul.f32 %v11568_v20, %v1811_v22  ;;  %v1804_v21 = vsub.f32 1.5, %v1803_v6  ;;  %v10609_v22 = vld [vmem:[%s10927_s23 + $0x58] sm:$0xff] }
 0x15e   : > { %v1188_v25 = vpop.xlane.xlu1 %1187  ;;  %1383 = vadd.xlane.f32.xlu0 %v1382_v63  ;;  %2310 = vmatmul.bf16.gmra.mxu3 %v11606_v58  ;;  %9741 = vrsqrt.f32 %v1474_v28  ;;  %vm1566_vm3 = vweird.f32 %v1474_v28 }
 0x15f   : > { %v1259_v1 = vmul.f32 %v11041_v50, %v1188_v25  ;;  %v1860_v8 = vmul.f32 %v11341_v61, %v1824_v17  ;;  %1196 = vadd.xlane.f32.xlu1 %v1195_v29  ;;  %v1813_v59 = vmul.f32 0.5, %v1812_v23  ;;  %v1805_v10 = vmul.f32 %v11571_v57, %v1804_v21  ;;  %v10611_v23 = vld [vmem:[%s10927_s23 + $0x60] sm:$0xff] }
 0x160   : > { %v9675_v35 = vpack.i.bf16 %v11160_v38, %v10611_v23  ;;  %v20572_v38 = vld [vmem:[#allocation14_spill] sm:$0xff] }
 0x161   : > { %v11623_v48 = vsub.f32 %v11174_v42, %v1259_v1  ;;  %v2020_v44 = vsel %vm1140_vm0, %v1860_v8, %v9653_v36  ;;  %v11635_v42 = vsub.f32 %v11131_v5, %v1256_v43  ;;  %v1814_v47 = vsub.f32 1.5, %v1813_v59  ;;  %v9740_v30 = vpop.eup %9739 }
 0x162   : > { %v2050_v53 = vpack.c.bf16 %v2021_v49, %v2020_v44  ;;  %v1809_v14 = vsel %vm1808_vm13, %v11571_v57, %v1805_v10  ;;  %v1571_v34 = vmul.f32 %v9740_v30, %v11638_v13  ;;  %vm1577_vm14 = vweird.f32 %v9740_v30 }
 0x163   : > { %v1323_v52 = vmul.f32 %v11623_v48, %v11623_v48  ;;  %v1320_v9 = vmul.f32 %v11635_v42, %v11635_v42  ;;  %v1815_v5 = vmul.f32 %v11568_v20, %v1814_v47  ;;  %v1850_v24 = vmul.f32 %v1809_v14, %v20571_v11  ;;  %vm1578_vm2 = vmor %vm1576_vm1, %vm1577_vm14 }
 0x164   : > { %2250 = vmatmul.bf16.gmra.mxu0 %v2050_v53  ;;  %2339 = vmatmul.bf16.gmra.mxu1 %v2050_v53  ;;  %v9742_v19 = vpop.eup %9741  ;;  %v1572_v17 = vmul.f32 %v9740_v30, %v1571_v34 }
 0x165   : > { %v1385_v2 = vsel %vm1140_vm0, %v1323_v52, 0.0  ;;  %2428 = vmatmul.bf16.gmra.mxu2 %v2050_v53  ;;  %v1376_v18 = vsel %vm1140_vm0, %v1320_v9, 0.0  ;;  %v1819_v46 = vsel %vm1818_vm11, %v11568_v20, %v1815_v5  ;;  %v1561_v31 = vmul.f32 %v9742_v19, %v1474_v28  ;;  %v10610_v20 = vld [vmem:[%s10927_s23 + $0x50] sm:$0xff]  ;;  %v11679_v53 = vld [vmem:[%s10927_s23 + $0xa0] sm:$0xff] }
 0x166   : > { %1386 = vadd.xlane.f32.xlu0 %v1385_v2  ;;  %v1851_v55 = vmul.f32 %v1819_v46, %v11113_v54  ;;  %v9670_v32 = vpack.i.bf16 %v10609_v22, %v10610_v20  ;;  %v1886_v40 = vmul.f32 %v11341_v61, %v1850_v24  ;;  %v1573_v63 = vmul.f32 0.5, %v1572_v17 }
 0x167   : > { %v1562_v41 = vmul.f32 %v9742_v19, %v1561_v31  ;;  %vm1567_vm15 = vweird.f32 %v9742_v19  ;;  %v1201_v2 = vsel %vm1140_vm0, %v11679_v53, 0.0 }
 0x168   : > { %v1887_v54 = vmul.f32 %v11341_v61, %v1851_v55  ;;  %v1574_v3 = vsub.f32 1.5, %v1573_v63  ;;  %vm1568_vm4 = vmor %vm1566_vm3, %vm1567_vm15 }
 0x169   : > { %v1563_v1 = vmul.f32 0.5, %v1562_v41 }
 0x16a   : > { %v1575_v56 = vmul.f32 %v9740_v30, %v1574_v3 }
 0x16b   : > { %v1564_v36 = vsub.f32 1.5, %v1563_v1  ;;  %v20576_v1 = vld [vmem:[#allocation17_spill] sm:$0xff] }
 0x16c   : > { %v1579_v12 = vsel %vm1578_vm2, %v9740_v30, %v1575_v56 }
 0x16d   : > { %v1565_v44 = vmul.f32 %v9742_v19, %v1564_v36  ;;  %v1827_v6 = vmul.f32 %v1579_v12, %v20572_v38 }
 0x16e   : > { %1377 = vadd.xlane.f32.xlu2 %v1376_v18  ;;  %1202 = vadd.xlane.f32.xlu0 %v1201_v2 }
 0x16f   : > { %v1569_v52 = vsel %vm1568_vm4, %v9742_v19, %v1565_v44  ;;  %v1863_v10 = vmul.f32 %v11341_v61, %v1827_v6 }
 0x170   : > { %v1826_v49 = vmul.f32 %v1569_v52, %v20573_v37  ;;  %v11706_v52 = vld [vmem:[%s10927_s23 + $0xb8] sm:$0xff] }
 0x171   : > { %v1210_v37 = vsel %vm1140_vm0, %v11706_v52, 0.0 }
 0x172   : > { %v1862_v5 = vmul.f32 %v11341_v61, %v1826_v49  ;;  %v11720_v49 = vld [vmem:[%s11717_s13] sm:$0xff] }
 0x176   : > { %1205 = vadd.xlane.f32.xlu2 %v1204_v51  ;;  %v9657_v39 = vpop.permute.xlu1 %9656 }
 0x177   : > { %v9659_v57 = vunpack.i.h.bf16 %v9657_v39  ;;  %v9658_v0 = vunpack.i.l.bf16 %v9657_v39 }
 0x178   : > { %9671 = vrot.lane.b32.xlu1 %v9670_v32, %s10783_s26 }
 0x179   : > { %v2046_v15 = vsel %vm1140_vm0, %v1886_v40, %v9658_v0  ;;  %v2047_v7 = vsel %vm1140_vm0, %v1887_v54, %v9659_v57  ;;  %v20574_v54 = vld [vmem:[#allocation20_spill] sm:$0xff] }
 0x17a   : > { %v11666_v25 = vpack.c.bf16 %v2047_v7, %v2046_v15  ;;  %v20575_v15 = vld [vmem:[#allocation16_spill] sm:$0xff] }
 0x17c   : > { %v1366_v29 = vpop.xlane.xlu0 %1365  ;;  %2315 = vmatmul.bf16.gmra.mxu3 %v11666_v25 }
 0x17d   : > { %v1444_v8 = vmul.f32 %v1366_v29, %v11041_v50 }
 0x17f   : > { %v1476_v43 = vadd.f32 1e-05, %v1444_v8 }
 0x180   : > { %9676 = vrot.lane.b32.xlu1 %v9675_v35, %s10783_s26  ;;  %v11699_v35 = vld [vmem:[%s10927_s23 + $0xb0] sm:$0xff] }
 0x181   : > { %9743 = vrsqrt.f32 %v1476_v43  ;;  %vm1586_vm6 = vweird.f32 %v1476_v43  ;;  %v1207_v12 = vsel %vm1140_vm0, %v11699_v35, 0.0 }
 0x187   : > { %v9744_v59 = vpop.eup %9743 }
 0x188   : > { %v1581_v47 = vmul.f32 %v9744_v59, %v1476_v43  ;;  %vm1587_vm5 = vweird.f32 %v9744_v59 }
 0x189   : > { %vm1588_vm7 = vmor %vm1586_vm6, %vm1587_vm5 }
 0x18a   : > { %v1582_v46 = vmul.f32 %v9744_v59, %v1581_v47 }
 0x18c   : > { %2389 = vmatmul.bf16.vlgmr.msrb.gmra.mxu3 %v11409_v33  ;;  %v1583_v11 = vmul.f32 0.5, %v1582_v46 }
 0x18e   : > { %v1584_v51 = vsub.f32 1.5, %v1583_v11  ;;  %v10613_v11 = vld [vmem:[%s10927_s23 + $0x78] sm:$0xff] }
 0x18f   : > { %v9662_v13 = vpop.permute.xlu0 %9661 }
 0x190   : > { %v9664_v21 = vunpack.i.h.bf16 %v9662_v13  ;;  %v9663_v28 = vunpack.i.l.bf16 %v9662_v13  ;;  %v1369_v9 = vpop.xlane.xlu2 %1368  ;;  %v1585_v39 = vmul.f32 %v9744_v59, %v1584_v51 }
 0x191   : > { %v1445_v18 = vmul.f32 %v1369_v9, %v11041_v50 }
 0x192   : > { %v2022_v14 = vsel %vm1140_vm0, %v1862_v5, %v9663_v28  ;;  %v2023_v30 = vsel %vm1140_vm0, %v1863_v10, %v9664_v21  ;;  %v1589_v0 = vsel %vm1588_vm7, %v9744_v59, %v1585_v39  ;;  %v11729_v21 = vld [vmem:[%s11717_s13 + $0x8] sm:$0xff]  ;;  %v11736_v5 = vld [vmem:[%s11717_s13 + $0x10] sm:$0xff] }
 0x193   : > { %v1477_v19 = vadd.f32 1e-05, %v1445_v18  ;;  %v2051_v55 = vpack.c.bf16 %v2023_v30, %v2022_v14  ;;  %v1828_v7 = vmul.f32 %v1589_v0, %v20575_v15 }
 0x195   : > { %9745 = vrsqrt.f32 %v1477_v19  ;;  %2255 = vmatmul.bf16.gmra.mxu0 %v2051_v55  ;;  %2344 = vmatmul.bf16.gmra.mxu1 %v2051_v55  ;;  %vm1596_vm9 = vweird.f32 %v1477_v19  ;;  %v1864_v56 = vmul.f32 %v11341_v61, %v1828_v7 }
 0x196   : > { %2433 = vmatmul.bf16.gmra.mxu2 %v2051_v55  ;;  %v10612_v55 = vld [vmem:[%s10927_s23 + $0x70] sm:$0xff]  ;;  %s10720_s23 = sshra.s32 %s8591_s22, 4  ;;  %s10721_s23 = int_to_ptr.hbm [resolvable:$true] %s10720_s23 }
 0x197   : > { %v9680_v51 = vpack.i.bf16 %v10613_v11, %v10612_v55  ;;  %s10722_s10 = scalar_lea.hbm %s10721_s23, 256  ;;  %p10727_p3 = scmp.lt.s32.totalorder %s10721_s23, %s20377_s8 }
 0x198   : > { %v1372_v24 = vpop.xlane.xlu2 %1371  ;;  %p10723_p0 = scmp.ne.s32.totalorder %s10721_s23, %s10722_s10  ;;  %p10728_p4 = scmp.lt.s32.totalorder %s10726_s19, %s10722_s10 }
 0x199   : > { %v1446_v18 = vmul.f32 %v1372_v24, %v11041_v50 }
 0x19a   : > { %p10724_p1 = pnand %p10723_p0, %p10872_p5  ;;  %p10729_p7 = por %p10728_p4, %p10727_p3 }
 0x19b   : > { %v9746_v34 = vpop.eup %9745  ;;  %v1478_v14 = vadd.f32 1e-05, %v1446_v18 }
 0x19c   : > { %v1591_v31 = vmul.f32 %v9746_v34, %v1477_v19  ;;  %2394 = vmatmul.bf16.gmra.mxu3 %v11521_v16  ;;  %vm1597_vm8 = vweird.f32 %v9746_v34  ;;  %p10725_p2 = pneg %p10724_p1 }
 0x19d   : > { %vm1598_vm10 = vmor %vm1596_vm9, %vm1597_vm8  ;;  %9747 = vrsqrt.f32 %v1478_v14  ;;  %vm1606_vm13 = vweird.f32 %v1478_v14 }
 0x19e   : > { %v1592_v22 = vmul.f32 %v9746_v34, %v1591_v31  ;;  %p10730_p8 = pnand %p10729_p7, %p10725_p2 }
 0x1a0   : > { %v1593_v20 = vmul.f32 0.5, %v1592_v22  ;;  %v1191_v32 = vpop.xlane.xlu2 %1190 }
 0x1a1   : > { %v1260_v57 = vmul.f32 %v11041_v50, %v1191_v32  ;;  %v1375_v10 = vpop.xlane.xlu1 %1374 }
 0x1a2   : > { %v1594_v40 = vsub.f32 1.5, %v1593_v20  ;;  %v1447_v46 = vmul.f32 %v1375_v10, %v11041_v50 }
 0x1a3   : > { %v11691_v17 = vsub.f32 %v20574_v54, %v1260_v57  ;;  %v9748_v31 = vpop.eup %9747 }
 0x1a4   : > { %v1595_v41 = vmul.f32 %v9746_v34, %v1594_v40  ;;  %v1479_v19 = vadd.f32 1e-05, %v1447_v46  ;;  %v1601_v20 = vmul.f32 %v9748_v31, %v1478_v14  ;;  %vm1607_vm11 = vweird.f32 %v9748_v31 }
 0x1a5   : > { %v1324_v29 = vmul.f32 %v11691_v17, %v11691_v17  ;;  %vm1608_vm14 = vmor %vm1606_vm13, %vm1607_vm11 }
 0x1a6   : > { %v1599_v63 = vsel %vm1598_vm10, %v9746_v34, %v1595_v41  ;;  %9749 = vrsqrt.f32 %v1479_v19  ;;  %v11745_v34 = vld [vmem:[%s11717_s13 + $0x18] sm:$0xff]  ;;  %v1602_v40 = vmul.f32 %v9748_v31, %v1601_v20  ;;  %vm1616_vm15 = vweird.f32 %v1479_v19 }
 0x1a7   : > { %v1829_v8 = vmul.f32 %v1599_v63, %v20576_v1  ;;  %v1388_v23 = vsel %vm1140_vm0, %v1324_v29, 0.0 }
 0x1a8   : > { %v9667_v3 = vpop.permute.xlu2 %9666  ;;  %1389 = vadd.xlane.f32.xlu0 %v1388_v23  ;;  %v1603_v7 = vmul.f32 0.5, %v1602_v40 }
 0x1a9   : > { %v9669_v36 = vunpack.i.h.bf16 %v9667_v3  ;;  %v9668_v43 = vunpack.i.l.bf16 %v9667_v3  ;;  %v1865_v44 = vmul.f32 %v11341_v61, %v1829_v8 }
 0x1aa   : > { %1208 = vadd.xlane.f32.xlu1 %v1207_v12  ;;  %v1604_v8 = vsub.f32 1.5, %v1603_v7 }
 0x1ab   : > { %v2024_v59 = vsel %vm1140_vm0, %v1864_v56, %v9668_v43  ;;  %v2025_v38 = vsel %vm1140_vm0, %v1865_v44, %v9669_v36 }
 0x1ac   : > { %2399 = vmatmul.bf16.gmra.mxu3 %v11606_v58  ;;  %v2052_v6 = vpack.c.bf16 %v2025_v38, %v2024_v59  ;;  %v9750_v39 = vpop.eup %9749  ;;  %v1605_v43 = vmul.f32 %v9748_v31, %v1604_v8 }
 0x1ad   : > { %v1611_v32 = vmul.f32 %v9750_v39, %v1479_v19  ;;  %vm1617_vm12 = vweird.f32 %v9750_v39 }
 0x1ae   : > { %2260 = vmatmul.bf16.gmra.mxu0 %v2052_v6  ;;  %2349 = vmatmul.bf16.gmra.mxu1 %v2052_v6  ;;  %vm1618_vm1 = vmor %vm1616_vm15, %vm1617_vm12  ;;  %v1609_v59 = vsel %vm1608_vm14, %v9748_v31, %v1605_v43 }
 0x1af   : > { %2438 = vmatmul.bf16.gmra.mxu2 %v2052_v6  ;;  %v1612_v41 = vmul.f32 %v9750_v39, %v1611_v32 }
 0x1b0   : > { %1211 = vadd.xlane.f32.xlu0 %v1210_v37 }
 0x1b1   : > { %v1613_v29 = vmul.f32 0.5, %v1612_v41 }
 0x1b2   : > { %497 = vadd.xlane.f32.xlu1 %v11736_v5 }
 0x1b3   : > { %v1614_v23 = vsub.f32 1.5, %v1613_v29 }
 0x1b5   : > { %v1615_v56 = vmul.f32 %v9750_v39, %v1614_v23 }
 0x1b7   : > { %v1619_v38 = vsel %vm1618_vm1, %v9750_v39, %v1615_v56 }
 0x1b8   : > { %493 = vadd.xlane.f32.xlu0 %v11720_v49 }
 0x1ba   : > { %v1194_v2 = vpop.xlane.xlu0 %1193  ;;  %499 = vadd.xlane.f32.xlu1 %v11745_v34 }
 0x1bb   : > { %v1261_v47 = vmul.f32 %v11041_v50, %v1194_v2 }
 0x1bc   : > { %2404 = vmatmul.bf16.gmra.mxu3 %v11666_v25 }
 0x1bd   : > { %v11726_v13 = vsub.f32 %v11436_v27, %v1261_v47  ;;  %v20577_v47 = vld [vmem:[#allocation18_spill] sm:$0xff] }
 0x1bf   : > { %v1325_v28 = vmul.f32 %v11726_v13, %v11726_v13 }
 0x1c0   : > { %495 = vadd.xlane.f32.xlu0 %v11729_v21 }
 0x1c1   : > { %v1391_v9 = vsel %vm1140_vm0, %v1325_v28, 0.0  ;;  %v1830_v28 = vmul.f32 %v1609_v59, %v20577_v47  ;;  %v11797_v47 = vld [vmem:[%s11717_s13 + $0x28] sm:$0xff] }
 0x1c2   : > { %1392 = vadd.xlane.f32.xlu2 %v1391_v9 }
 0x1c3   : > { %v1866_v11 = vmul.f32 %v11341_v61, %v1830_v28 }
 0x1c8   : > { %v1200_v10 = vpop.xlane.xlu0 %1199 }
 0x1c9   : > { %v1263_v31 = vmul.f32 %v11041_v50, %v1200_v10 }
 0x1ca   : > { %v1381_v30 = vpop.xlane.xlu1 %1380 }
 0x1cb   : > { %v1449_v24 = vmul.f32 %v1381_v30, %v11041_v50 }
 0x1cc   : > { %2478 = vmatmul.bf16.vlgmr.msra.gmra.mxu3 %v11409_v33 }
 0x1cd   : > { %v1481_v57 = vadd.f32 1e-05, %v1449_v24  ;;  %v9685_v24 = vpack.i.bf16 %v11436_v27, %v20574_v54  ;;  %v11778_v27 = vsub.f32 %v11554_v4, %v1263_v31 }
 0x1cf   : > { %9751 = vrsqrt.f32 %v1481_v57  ;;  %vm1636_vm3 = vweird.f32 %v1481_v57  ;;  %v1327_v23 = vmul.f32 %v11778_v27, %v11778_v27 }
 0x1d1   : > { %v1384_v7 = vpop.xlane.xlu0 %1383 }
 0x1d2   : > { %v1197_v33 = vpop.xlane.xlu1 %1196 }
 0x1d3   : > { %v1262_v22 = vmul.f32 %v11041_v50, %v1197_v33 }
 0x1d5   : > { %v11753_v0 = vsub.f32 %v11603_v62, %v1262_v22 }
 0x1d7   : > { %v1326_v15 = vmul.f32 %v11753_v0, %v11753_v0 }
 0x1d9   : > { %v1394_v63 = vsel %vm1140_vm0, %v1326_v15, 0.0  ;;  %v1387_v59 = vpop.xlane.xlu0 %1386 }
 0x1da   : > { %9681 = vrot.lane.b32.xlu2 %v9680_v51, %s10783_s26  ;;  %1395 = vadd.xlane.f32.xlu0 %v1394_v63 }
 0x1dc   : > { %2483 = vmatmul.bf16.gmra.mxu3 %v11521_v16  ;;  %v9752_v16 = vpop.eup %9751 }
 0x1dd   : > { %v1631_v36 = vmul.f32 %v9752_v16, %v1481_v57  ;;  %vm1637_vm2 = vweird.f32 %v9752_v16 }
 0x1de   : > { %vm1638_vm4 = vmor %vm1636_vm3, %vm1637_vm2 }
 0x1df   : > { %v1632_v12 = vmul.f32 %v9752_v16, %v1631_v36 }
 0x1e1   : > { %v1378_v1 = vpop.xlane.xlu2 %1377  ;;  %v1633_v37 = vmul.f32 0.5, %v1632_v12 }
 0x1e2   : > { %v1448_v3 = vmul.f32 %v1378_v1, %v11041_v50 }
 0x1e3   : > { %v1634_v14 = vsub.f32 1.5, %v1633_v37  ;;  %v1203_v37 = vpop.xlane.xlu0 %1202 }
 0x1e4   : > { %v1480_v44 = vadd.f32 1e-05, %v1448_v3 }
 0x1e5   : > { %v1635_v32 = vmul.f32 %v9752_v16, %v1634_v14 }
 0x1e6   : > { %9753 = vrsqrt.f32 %v1480_v44  ;;  %vm1626_vm6 = vweird.f32 %v1480_v44 }
 0x1e9   : > { %v1206_v6 = vpop.xlane.xlu2 %1205 }
 0x1ea   : > { %v9672_v2 = vpop.permute.xlu1 %9671  ;;  %v1265_v18 = vmul.f32 %v11041_v50, %v1206_v6  ;;  %v11791_v6 = vld [vmem:[%s11717_s13 + $0x20] sm:$0xff] }
 0x1eb   : > { %v9674_v46 = vunpack.i.h.bf16 %v9672_v2  ;;  %v9673_v19 = vunpack.i.l.bf16 %v9672_v2  ;;  %v1451_v2 = vmul.f32 %v1387_v59, %v11041_v50 }
 0x1ec   : > { %2488 = vmatmul.bf16.gmra.mxu3 %v11606_v58  ;;  %v20578_v58 = vld [vmem:[#allocation19_spill] sm:$0xff]  ;;  %v9754_v30 = vpop.eup %9753  ;;  %v11767_v33 = vsub.f32 %v11653_v45, %v1265_v18 }
 0x1ed   : > { %v1831_v9 = vmul.f32 %v1619_v38, %v20578_v58  ;;  %v1621_v55 = vmul.f32 %v9754_v30, %v1480_v44  ;;  %v2026_v22 = vsel %vm1140_vm0, %v1866_v11, %v9673_v19  ;;  %vm1627_vm5 = vweird.f32 %v9754_v30 }
 0x1ee   : > { %9686 = vrot.lane.b32.xlu0 %v9685_v24, %s10783_s26  ;;  %v1329_v15 = vmul.f32 %v11767_v33, %v11767_v33  ;;  %vm1628_vm7 = vmor %vm1626_vm6, %vm1627_vm5  ;;  %v1483_v28 = vadd.f32 1e-05, %v1451_v2  ;;  %v9690_v58 = vpack.i.bf16 %v11554_v4, %v11603_v62 }
 0x1ef   : > { %v1867_v51 = vmul.f32 %v11341_v61, %v1831_v9  ;;  %v1622_v39 = vmul.f32 %v9754_v30, %v1621_v55  ;;  %v1264_v9 = vmul.f32 %v11041_v50, %v1203_v37 }
 0x1f0   : > { %v1403_v63 = vsel %vm1140_vm0, %v1329_v15, 0.0  ;;  %vm1656_vm11 = vweird.f32 %v1483_v28 }
 0x1f1   : > { %v2027_v20 = vsel %vm1140_vm0, %v1867_v51, %v9674_v46  ;;  %v1623_v41 = vmul.f32 0.5, %v1622_v39  ;;  %1404 = vadd.xlane.f32.xlu1 %v1403_v63  ;;  %v11807_v18 = vsub.f32 %v11679_v53, %v1264_v9  ;;  %v10785_v46 = vmov 128.0  }
 0x1f2   : > { %v2053_v40 = vpack.c.bf16 %v2027_v20, %v2026_v22  ;;  %v9677_v57 = vpop.permute.xlu1 %9676 }
 0x1f3   : > { %v1624_v54 = vsub.f32 1.5, %v1623_v41  ;;  %v9678_v36 = vunpack.i.l.bf16 %v9677_v57  ;;  %v9679_v43 = vunpack.i.h.bf16 %v9677_v57  ;;  %v1328_v55 = vmul.f32 %v11807_v18, %v11807_v18 }
 0x1f4   : > { %2265 = vmatmul.bf16.gmra.mxu0 %v2053_v40  ;;  %2354 = vmatmul.bf16.gmra.mxu1 %v2053_v40 }
 0x1f5   : > { %2443 = vmatmul.bf16.gmra.mxu2 %v2053_v40  ;;  %v1625_v29 = vmul.f32 %v9754_v30, %v1624_v54  ;;  %v1400_v22 = vsel %vm1140_vm0, %v1328_v55, 0.0 }
 0x1f7   : > { %v1629_v8 = vsel %vm1628_vm7, %v9754_v30, %v1625_v29 }
 0x1f8   : > { %v1832_v3 = vmul.f32 %v1629_v8, %v11635_v42  ;;  %v1450_v42 = vmul.f32 %v1384_v7, %v11041_v50 }
 0x1fa   : > { %v1868_v56 = vmul.f32 %v11341_v61, %v1832_v3 }
 0x1fc   : > { %2493 = vmatmul.bf16.gmra.mxu3 %v11666_v25  ;;  %v1639_v25 = vsel %vm1638_vm4, %v9752_v16, %v1635_v32  ;;  %v1397_v16 = vsel %vm1140_vm0, %v1327_v23, 0.0  ;;  %v2028_v12 = vsel %vm1140_vm0, %v1868_v56, %v9678_v36 }
 0x1fd   : > { %v1833_v1 = vmul.f32 %v1639_v25, %v11550_v26 }
 0x1ff   : > { %v1869_v44 = vmul.f32 %v11341_v61, %v1833_v1  ;;  %v1482_v61 = vadd.f32 1e-05, %v1450_v42 }
 0x201   : > { %v2029_v26 = vsel %vm1140_vm0, %v1869_v44, %v9679_v43  ;;  %9755 = vrsqrt.f32 %v1482_v61  ;;  %vm1646_vm9 = vweird.f32 %v1482_v61 }
 0x202   : > { %v2054_v38 = vpack.c.bf16 %v2029_v26, %v2028_v12  ;;  %9757 = vrsqrt.f32 %v1483_v28 }
 0x203   : > { %1398 = vadd.xlane.f32.xlu2 %v1397_v16  ;;  %9759 = vrcp.f32 %v10785_v46  ;;  %v11842_v46 = vld [vmem:[#allocation3] ss:$0 sm:$0xff] }
 0x204   : > { %2270 = vmatmul.bf16.gmra.mxu0 %v2054_v38  ;;  %2359 = vmatmul.bf16.gmra.mxu1 %v2054_v38 }
 0x205   : > { %2448 = vmatmul.bf16.gmra.mxu2 %v2054_v38 }
 0x207   : > { %v9756_v14 = vpop.eup %9755 }
 0x208   : > { %v9758_v62 = vpop.eup %9757  ;;  %v1641_v39 = vmul.f32 %v9756_v14, %v1482_v61  ;;  %vm1647_vm10 = vweird.f32 %v9756_v14 }
 0x209   : > { %v9760_v19 = vpop.eup %9759  ;;  %v1651_v24 = vmul.f32 %v9758_v62, %v1483_v28  ;;  %vm1657_vm12 = vweird.f32 %v9758_v62  ;;  %vm1648_vm13 = vmor %vm1646_vm9, %vm1647_vm10 }
 0x20a   : > { %9691 = vrot.lane.b32.xlu1 %v9690_v58, %s10783_s26  ;;  %v558_v31 = vmul.f32 128.0, %v9760_v19  ;;  %v1642_v41 = vmul.f32 %v9756_v14, %v1641_v39  ;;  %vm562_vm8 = vweird.f32 %v9760_v19  ;;  %vm1658_vm14 = vmor %vm1656_vm11, %vm1657_vm12 }
 0x20b   : > { %501 = vadd.xlane.f32.xlu2 %v11791_v6  ;;  %v1652_v15 = vmul.f32 %v9758_v62, %v1651_v24  ;;  %v9695_v24 = vpack.i.bf16 %v11653_v45, %v11679_v53 }
 0x20c   : > { %v559_v32 = vsub.f32 1.0, %v558_v31  ;;  %v1643_v29 = vmul.f32 0.5, %v1642_v41  ;;  %v11869_v41 = vld [vmem:[%s11717_s13 + $0x40] sm:$0xff] }
 0x20d   : > { %v1653_v63 = vmul.f32 0.5, %v1652_v15 }
 0x20e   : > { %v560_v54 = vmul.f32 %v9760_v19, %v559_v32  ;;  %v1644_v23 = vsub.f32 1.5, %v1643_v29 }
 0x20f   : > { %v1654_v3 = vsub.f32 1.5, %v1653_v63 }
 0x210   : > { %v561_v25 = vadd.f32 %v9760_v19, %v560_v54  ;;  %v1645_v16 = vmul.f32 %v9756_v14, %v1644_v23 }
 0x211   : > { %v1655_v56 = vmul.f32 %v9758_v62, %v1654_v3  ;;  %v9700_v3 = vpack.i.bf16 %v11706_v52, %v11699_v35 }
 0x212   : > { %v11819_v57 = vsel %vm562_vm8, %v9760_v19, %v561_v25  ;;  %v1649_v26 = vsel %vm1648_vm13, %v9756_v14, %v1645_v16  ;;  %v11873_v25 = vld [vmem:[%s11717_s13 + $0x48] sm:$0xff] }
 0x213   : > { %503 = vadd.xlane.f32.xlu2 %v11797_v47  ;;  %v1659_v59 = vsel %vm1658_vm14, %v9758_v62, %v1655_v56  ;;  %v1834_v37 = vmul.f32 %v1649_v26, %v11592_v60 }
 0x214   : > { %v1835_v2 = vmul.f32 %v1659_v59, %v11623_v48 }
 0x216   : > { %v1871_v14 = vmul.f32 %v11842_v46, %v1835_v2 }
 0x218   : > { %1401 = vadd.xlane.f32.xlu0 %v1400_v22  ;;  %v11858_v22 = vld [vmem:[%s11717_s13 + $0x38] sm:$0xff] }
 0x21b   : > { %v11803_v10 = vpop.xlane.xlu0 %1389 }
 0x21c   : > { %v1452_v62 = vmul.f32 %v11803_v10, %v11041_v50 }
 0x21d   : > { %v1209_v30 = vpop.xlane.xlu1 %1208 }
 0x21e   : > { %v1266_v4 = vmul.f32 %v11041_v50, %v1209_v30  ;;  %v1870_v30 = vmul.f32 %v11842_v46, %v1834_v37  ;;  %v1484_v39 = vadd.f32 1e-05, %v1452_v62 }
 0x220   : > { %v11813_v11 = vsub.f32 %v11699_v35, %v1266_v4  ;;  %9761 = vrsqrt.f32 %v1484_v39  ;;  %vm1666_vm3 = vweird.f32 %v1484_v39 }
 0x222   : > { %v1330_v20 = vmul.f32 %v11813_v11, %v11813_v11 }
 0x223   : > { %v1212_v51 = vpop.xlane.xlu0 %1211 }
 0x224   : > { %v1406_v40 = vsel %vm1140_vm0, %v1330_v20, 0.0  ;;  %v1267_v42 = vmul.f32 %v11041_v50, %v1212_v51 }
 0x225   : > { %1407 = vadd.xlane.f32.xlu2 %v1406_v40  ;;  %v498_v51 = vpop.xlane.xlu1 %497 }
 0x226   : > { %v11837_v28 = vsub.f32 %v11706_v52, %v1267_v42  ;;  %v566_v20 = vmul.f32 %v11819_v57, %v498_v51  ;;  %v9762_v45 = vpop.eup %9761 }
 0x227   : > { %v1661_v15 = vmul.f32 %v9762_v45, %v1484_v39  ;;  %vm1667_vm2 = vweird.f32 %v9762_v45 }
 0x228   : > { %v1331_v60 = vmul.f32 %v11837_v28, %v11837_v28  ;;  %v11864_v32 = vsub.f32 %v11736_v5, %v566_v20  ;;  %vm1668_vm5 = vmor %vm1666_vm3, %vm1667_vm2 }
 0x22a   : > { %v1409_v31 = vsel %vm1140_vm0, %v1331_v60, 0.0  ;;  %v630_v40 = vmul.f32 %v11864_v32, %v11864_v32 }
 0x22b   : > { %v494_v7 = vpop.xlane.xlu0 %493 }
 0x22c   : > { %v564_v1 = vmul.f32 %v11819_v57, %v494_v7  ;;  %v1662_v7 = vmul.f32 %v9762_v45, %v1661_v15 }
 0x22e   : > { %v11823_v8 = vsub.f32 %v11720_v49, %v564_v1  ;;  %v1663_v5 = vmul.f32 0.5, %v1662_v7 }
 0x230   : > { %v628_v36 = vmul.f32 %v11823_v8, %v11823_v8  ;;  %v1664_v1 = vsub.f32 1.5, %v1663_v5 }
 0x232   : > { %660 = vadd.xlane.f32.xlu2 %v628_v36  ;;  %v1665_v36 = vmul.f32 %v9762_v45, %v1664_v1 }
 0x233   : > { %v496_v43 = vpop.xlane.xlu0 %495 }
 0x234   : > { %v565_v44 = vmul.f32 %v11819_v57, %v496_v43  ;;  %1410 = vadd.xlane.f32.xlu1 %v1409_v31 }
 0x235   : > { %v1393_v12 = vpop.xlane.xlu2 %1392 }
 0x236   : > { %v11829_v49 = vsub.f32 %v11729_v21, %v565_v44  ;;  %v11840_v21 = vld [vmem:[%s11717_s13 + $0x30] sm:$0xff]  ;;  %v1453_v19 = vmul.f32 %v1393_v12, %v11041_v50  ;;  %v500_v44 = vpop.xlane.xlu1 %499  ;;  %v1669_v12 = vsel %vm1668_vm5, %v9762_v45, %v1665_v36 }
 0x237   : > { %v567_v26 = vmul.f32 %v11819_v57, %v500_v44 }
 0x238   : > { %v629_v38 = vmul.f32 %v11829_v49, %v11829_v49  ;;  %v1485_v10 = vadd.f32 1e-05, %v1453_v19 }
 0x239   : > { %v11884_v52 = vsub.f32 %v11745_v34, %v567_v26 }
 0x23a   : > { %662 = vadd.xlane.f32.xlu0 %v629_v38  ;;  %9763 = vrsqrt.f32 %v1485_v10  ;;  %vm1676_vm15 = vweird.f32 %v1485_v10  ;;  %v1836_v38 = vmul.f32 %v1669_v12, %v11691_v17 }
 0x23c   : > { %509 = vadd.xlane.f32.xlu1 %v11869_v41  ;;  %v1872_v2 = vmul.f32 %v11842_v46, %v1836_v38 }
 0x23d   : > { %v9682_v61 = vpop.permute.xlu2 %9681 }
 0x23e   : > { %v9684_v58 = vunpack.i.h.bf16 %v9682_v61  ;;  %v9683_v9 = vunpack.i.l.bf16 %v9682_v61 }
 0x240   : > { %v2030_v48 = vsel %vm1140_vm0, %v1870_v30, %v9683_v9  ;;  %v2031_v55 = vsel %vm1140_vm0, %v1871_v14, %v9684_v58  ;;  %v9764_v53 = vpop.eup %9763  ;;  %v631_v30 = vmul.f32 %v11884_v52, %v11884_v52 }
 0x241   : > { %v2055_v4 = vpack.c.bf16 %v2031_v55, %v2030_v48  ;;  %v1671_v54 = vmul.f32 %v9764_v53, %v1485_v10  ;;  %vm1677_vm1 = vweird.f32 %v9764_v53 }
 0x242   : > { %505 = vadd.xlane.f32.xlu0 %v11840_v21  ;;  %vm1678_vm4 = vmor %vm1676_vm15, %vm1677_vm1 }
 0x243   : > { %2275 = vmatmul.bf16.gmra.mxu0 %v2055_v4  ;;  %2364 = vmatmul.bf16.gmra.mxu1 %v2055_v4  ;;  %v1672_v29 = vmul.f32 %v9764_v53, %v1671_v54 }
 0x244   : > { %2453 = vmatmul.bf16.gmra.mxu2 %v2055_v4  ;;  %511 = vadd.xlane.f32.xlu1 %v11873_v25 }
 0x245   : > { %v1673_v63 = vmul.f32 0.5, %v1672_v29 }
 0x247   : > { %v1674_v23 = vsub.f32 1.5, %v1673_v63 }
 0x249   : > { %v1675_v16 = vmul.f32 %v9764_v53, %v1674_v23 }
 0x24a   : > { %507 = vadd.xlane.f32.xlu0 %v11858_v22  ;;  %9696 = vrot.lane.b32.xlu2 %v9695_v24, %s10783_s26 }
 0x24b   : > { %v1679_v59 = vsel %vm1678_vm4, %v9764_v53, %v1675_v16 }
 0x24c   : > { %v1837_v35 = vmul.f32 %v1679_v59, %v11726_v13 }
 0x24d   : > { %v1396_v43 = vpop.xlane.xlu0 %1395 }
 0x24e   : > { %v1454_v56 = vmul.f32 %v1396_v43, %v11041_v50  ;;  %v1873_v9 = vmul.f32 %v11842_v46, %v1837_v35 }
 0x250   : > { %v1486_v42 = vadd.f32 1e-05, %v1454_v56 }
 0x252   : > { %664 = vadd.xlane.f32.xlu0 %v630_v40  ;;  %9765 = vrsqrt.f32 %v1486_v42  ;;  %vm1686_vm6 = vweird.f32 %v1486_v42  ;;  %v2241_v40 = vpop.f32.mrf.mxu0 }
 0x258   : > { %v9766_v13 = vpop.eup %9765 }
 0x259   : > { %v1681_v34 = vmul.f32 %v9766_v13, %v1486_v42  ;;  %vm1687_vm7 = vweird.f32 %v9766_v13 }
 0x25a   : > { %vm11894_vm8 = vmor %vm1686_vm6, %vm1687_vm7  ;;  %v2243_v38 = vpop.f32.mrf.mxu0 }
 0x25b   : > { %v1682_v4 = vmul.f32 %v9766_v13, %v1681_v34 }
 0x25d   : > { %v1683_v19 = vmul.f32 0.5, %v1682_v4 }
 0x25f   : > { %v1684_v24 = vsub.f32 1.5, %v1683_v19 }
 0x260   : > { %v9687_v37 = vpop.permute.xlu0 %9686 }
 0x261   : > { %v9689_v61 = vunpack.i.h.bf16 %v9687_v37  ;;  %v9688_v58 = vunpack.i.l.bf16 %v9687_v37  ;;  %v1685_v53 = vmul.f32 %v9766_v13, %v1684_v24 }
 0x263   : > { %v2032_v14 = vsel %vm1140_vm0, %v1872_v2, %v9688_v58  ;;  %v2033_v17 = vsel %vm1140_vm0, %v1873_v9, %v9689_v61  ;;  %v1689_v1 = vsel %vm11894_vm8, %v9766_v13, %v1685_v53  ;;  %v11930_v13 = vld [vmem:[%s11717_s13 + $0x50] sm:$0xff] }
 0x264   : > { %v2056_v60 = vpack.c.bf16 %v2033_v17, %v2032_v14  ;;  %v1405_v31 = vpop.xlane.xlu1 %1404  ;;  %v1838_v44 = vmul.f32 %v1689_v1, %v11753_v0 }
 0x265   : > { %v1457_v10 = vmul.f32 %v1405_v31, %v11041_v50  ;;  %v11935_v31 = vld [vmem:[%s11717_s13 + $0x58] sm:$0xff] }
 0x266   : > { %9701 = vrot.lane.b32.xlu0 %v9700_v3, %s10783_s26  ;;  %2280 = vmatmul.bf16.gmra.mxu0 %v2056_v60  ;;  %v11904_v3 = vld [vmem:[#allocation8] sm:$0x7]  ;;  %v1874_v0 = vmul.f32 %v11842_v46, %v1838_v44  ;;  %s13656_s26 = scalar_lea.vmem %s20371_s2, %s10921_s4  ;;  %s19642_s4 = scalar_lea.vmem [#allocation9], %s8718_s24 }
 0x267   : > { %2369 = vmatmul.bf16.gmra.mxu1 %v2056_v60  ;;  %2458 = vmatmul.bf16.gmra.mxu2 %v2056_v60  ;;  %v11898_v7 = vadd.f32 1e-05, %v1457_v10  ;;  %v11915_v26 = vperm.slane %v11904_v3, 0  ;;  %s8588_s9 = sshll.u32 %s19642_s4, 4  ;;  %s8589_s9 = int_to_ptr.vmem [resolvable:$true] %s8588_s9 }
 0x269   : > { %v2242_v37 = vadd.f32 %v2241_v40, %v11915_v26  ;;  %v2244_v58 = vadd.f32 %v2243_v38, %v11915_v26  ;;  %vm1716_vm12 = vweird.f32 %v11898_v7 }
 0x26b   : > { %v8822_v60 = vmul.f32 -1.442695, %v2244_v58  ;;  %v8983_v58 = vld [vmem:[%s20375_s6 + $0x180] sm:$0xf] }
 0x273   : > { %666 = vadd.xlane.f32.xlu2 %v631_v30  ;;  %v8821_v30 = vmul.f32 -1.442695, %v2242_v37 }
 0x276   : > { %v1399_v48 = vpop.xlane.xlu2 %1398 }
 0x277   : > { %v1455_v55 = vmul.f32 %v1399_v48, %v11041_v50 }
 0x279   : > { %v1487_v62 = vadd.f32 1e-05, %v1455_v55 }
 0x27b   : > { %9767 = vrsqrt.f32 %v1487_v62  ;;  %vm1696_vm10 = vweird.f32 %v1487_v62 }
 0x27c   : > { %9769 = vrsqrt.f32 %v11898_v7  ;;  %v9692_v43 = vpop.permute.xlu1 %9691 }
 0x27d   : > { %v9694_v42 = vunpack.i.h.bf16 %v9692_v43  ;;  %v9693_v35 = vunpack.i.l.bf16 %v9692_v43  ;;  %9771 = vpow2.f32 %v8821_v30 }
 0x27e   : > { %v502_v51 = vpop.xlane.xlu2 %501  ;;  %9773 = vpow2.f32 %v8822_v60 }
 0x27f   : > { %v568_v29 = vmul.f32 %v11819_v57, %v502_v51 }
 0x281   : > { %v9768_v39 = vpop.eup %9767  ;;  %v11908_v16 = vsub.f32 %v11791_v6, %v568_v29 }
 0x282   : > { %v1691_v20 = vmul.f32 %v9768_v39, %v1487_v62  ;;  %vm1697_vm9 = vweird.f32 %v9768_v39  ;;  %v9770_v61 = vpop.eup %9769 }
 0x283   : > { %vm1698_vm11 = vmor %vm1696_vm10, %vm1697_vm9  ;;  %v1711_v17 = vmul.f32 %v9770_v61, %v11898_v7  ;;  %v9772_v51 = vpop.eup %9771  ;;  %vm1717_vm13 = vweird.f32 %v9770_v61 }
 0x284   : > { %v1692_v45 = vmul.f32 %v9768_v39, %v1691_v20  ;;  %v11937_v24 = vadd.f32 1.0, %v9772_v51  ;;  %vm1718_vm14 = vmor %vm1716_vm12, %vm1717_vm13  ;;  %v9448_v51 = vld [vmem:[%s20375_s6 + $0x15c] sm:$0xf0] }
 0x285   : > { %v1712_v48 = vmul.f32 %v9770_v61, %v1711_v17 }
 0x286   : > { %v1693_v54 = vmul.f32 0.5, %v1692_v45  ;;  %v504_v5 = vpop.xlane.xlu2 %503  ;;  %vm2632_vm3 = vweird.f32 %v11937_v24 }
 0x287   : > { %v569_v23 = vmul.f32 %v11819_v57, %v504_v5  ;;  %v1713_v19 = vmul.f32 0.5, %v1712_v48 }
 0x288   : > { %v1694_v63 = vsub.f32 1.5, %v1693_v54 }
 0x289   : > { %v11911_v56 = vsub.f32 %v11797_v47, %v569_v23  ;;  %v632_v47 = vmul.f32 %v11908_v16, %v11908_v16  ;;  %v1714_v20 = vsub.f32 1.5, %v1713_v19  ;;  %v8967_v19 = vld [vmem:[%s20375_s6 + $0x140] sm:$0xf] }
 0x28a   : > { %v1695_v36 = vmul.f32 %v9768_v39, %v1694_v63 }
 0x28b   : > { %v633_v6 = vmul.f32 %v11911_v56, %v11911_v56  ;;  %v1402_v34 = vpop.xlane.xlu0 %1401  ;;  %v1715_v53 = vmul.f32 %v9770_v61, %v1714_v20 }
 0x28c   : > { %v1699_v12 = vsel %vm1698_vm11, %v9768_v39, %v1695_v36  ;;  %v1456_v55 = vmul.f32 %v1402_v34, %v11041_v50  ;;  %v9774_v39 = vpop.eup %9773 }
 0x28d   : > { %v1839_v59 = vmul.f32 %v1699_v12, %v11778_v27  ;;  %670 = vadd.xlane.f32.xlu1 %v633_v6  ;;  %v2034_v27 = vsel %vm1140_vm0, %v1874_v0, %v9693_v35  ;;  %v11940_v10 = vadd.f32 1.0, %v9774_v39  ;;  %v1719_v63 = vsel %vm1718_vm14, %v9770_v61, %v1715_v53  ;;  %v9456_v35 = vld [vmem:[%s20375_s6 + $0x1dc] sm:$0xf0]  ;;  %v11966_v6 = vld [vmem:[%s11717_s13 + $0x78] sm:$0xff] }
 0x28e   : > { %v1488_v4 = vadd.f32 1e-05, %v1456_v55  ;;  %v1841_v36 = vmul.f32 %v1719_v63, %v11767_v33 }
 0x28f   : > { %v1875_v2 = vmul.f32 %v11842_v46, %v1839_v59  ;;  %vm2647_vm10 = vweird.f32 %v11940_v10 }
 0x290   : > { %668 = vadd.xlane.f32.xlu0 %v632_v47  ;;  %9775 = vrsqrt.f32 %v1488_v4  ;;  %vm1706_vm1 = vweird.f32 %v1488_v4  ;;  %v1877_v17 = vmul.f32 %v11842_v46, %v1841_v36 }
 0x291   : > { %v2035_v9 = vsel %vm1140_vm0, %v1875_v2, %v9694_v42  ;;  %9777 = vrcp.f32 %v11937_v24  ;;  %v8999_v42 = vld [vmem:[%s20375_s6 + $0x1c0] sm:$0xf] }
 0x292   : > { %v2057_v14 = vpack.c.bf16 %v2035_v9, %v2034_v27  ;;  %9779 = vrcp.f32 %v11940_v10  ;;  %v9000_v0 = vor.u32 %v9456_v35, %v8999_v42  ;;  %v9452_v27 = vld [vmem:[%s20375_s6 + $0x19c] sm:$0xf0]  ;;  %v12014_v42 = vperm.slane %v11904_v3, 1  ;;  %v12026_v3 = vpop.f32.mrf.mxu1 }
 0x293   : > { %v8984_v55 = vor.u32 %v9452_v27, %v8983_v58 }
 0x294   : > { %2285 = vmatmul.bf16.gmra.mxu0 %v2057_v14  ;;  %2374 = vmatmul.bf16.gmra.mxu1 %v2057_v14 }
 0x295   : > { %2463 = vmatmul.bf16.gmra.mxu2 %v2057_v14  ;;  %513 = vadd.xlane.f32.xlu1 %v11930_v13 }
 0x296   : > { %v9776_v45 = vpop.eup %9775  ;;  %3987 = vmatpush.bf16.msrb.mxu3 %v9000_v0  ;;  %v2638_v0 = vand.u32 2147483648, %v11937_v24 }
 0x297   : > { %v1701_v54 = vmul.f32 %v9776_v45, %v1488_v4  ;;  %v11950_v23 = vpop.eup %9777  ;;  %vm1707_vm15 = vweird.f32 %v9776_v45 }
 0x298   : > { %v1408_v62 = vpop.xlane.xlu2 %1407  ;;  %v11953_v44 = vpop.eup %9779  ;;  %v2628_v59 = vmul.f32 %v11950_v23, %v11937_v24  ;;  %vm1708_vm2 = vmor %vm1706_vm1, %vm1707_vm15  ;;  %523 = vadd.xlane.f32.xlu0 %v11966_v6  ;;  %vm2633_vm4 = vweird.f32 %v11950_v23 }
 0x299   : > { %v1702_v5 = vmul.f32 %v9776_v45, %v1701_v54  ;;  %v1458_v1 = vmul.f32 %v1408_v62, %v11041_v50  ;;  %v2643_v9 = vmul.f32 %v11953_v44, %v11940_v10  ;;  %vm12053_vm6 = vmor %vm2632_vm3, %vm2633_vm4  ;;  %vm2648_vm8 = vweird.f32 %v11953_v44 }
 0x29a   : > { %v2629_v4 = vsub.f32 1.0, %v2628_v59  ;;  %3988 = vmatpush.bf16.msrb.mxu3 %v8984_v55  ;;  %vm12085_vm12 = vmor %vm2647_vm10, %vm2648_vm8 }
 0x29b   : > { %v1703_v7 = vmul.f32 0.5, %v1702_v5  ;;  %v11955_v12 = vadd.f32 1e-05, %v1458_v1  ;;  %v2644_v20 = vsub.f32 1.0, %v2643_v9  ;;  %v8951_v1 = vld [vmem:[%s20375_s6 + $0x100] sm:$0xf] }
 0x29c   : > { %v2630_v54 = vmul.f32 %v11950_v23, %v2629_v4 }
 0x29d   : > { %515 = vadd.xlane.f32.xlu1 %v11935_v31  ;;  %v1704_v43 = vsub.f32 1.5, %v1703_v7  ;;  %v9444_v7 = vld [vmem:[%s20375_s6 + $0x11c] sm:$0xf0]  ;;  %v2645_v35 = vmul.f32 %v11953_v44, %v2644_v20 }
 0x29e   : > { %v8952_v58 = vor.u32 %v9444_v7, %v8951_v1 }
 0x29f   : > { %v1705_v38 = vmul.f32 %v9776_v45, %v1704_v43  ;;  %v2646_v55 = vadd.f32 %v11953_v44, %v2645_v35  ;;  %v9432_v35 = vld [vmem:[%s20375_s6 + $0x5c] sm:$0xf0] }
 0x2a1   : > { %v1709_v30 = vsel %vm1708_vm2, %v9776_v45, %v1705_v38  ;;  %v11998_v45 = vld [vmem:[%s11717_s13 + $0x80] sm:$0xff]  ;;  %vm1726_vm2 = vweird.f32 %v11955_v12 }
 0x2a2   : > { %v1840_v60 = vmul.f32 %v1709_v30, %v11807_v18  ;;  %525 = vadd.xlane.f32.xlu0 %v11998_v45  ;;  %v8935_v30 = vld [vmem:[%s20375_s6 + $0xc0] sm:$0xf] }
 0x2a4   : > { %v1876_v18 = vmul.f32 %v11842_v46, %v1840_v60 }
 0x2a5   : > { %v661_v40 = vpop.xlane.xlu2 %660 }
 0x2a6   : > { %v724_v15 = vmul.f32 %v661_v40, %v11819_v57 }
 0x2a7   : > { %v1411_v43 = vpop.xlane.xlu1 %1410 }
 0x2a8   : > { %v11946_v29 = vadd.f32 1e-05, %v724_v15  ;;  %v8968_v15 = vor.u32 %v9448_v51, %v8967_v19  ;;  %v2651_v19 = vand.u32 2147483647, %v11940_v10 }
 0x2aa   : > { %9781 = vrsqrt.f32 %v11946_v29  ;;  %3989 = vmatpush.bf16.msrb.mxu3 %v8968_v15  ;;  %vm794_vm7 = vweird.f32 %v11946_v29  ;;  %vm2652_vm14 = vcmp.eq.f32.partialorder %v2651_v19, 8.507059e+37  ;;  %v9457_v19 = vld [vmem:[%s20375_s6 + $0x1e4] sm:$0xf0] }
 0x2ab   : > { %9783 = vrsqrt.f32 %v11955_v12 }
 0x2ad   : > { %v9697_v33 = vpop.permute.xlu2 %9696  ;;  %v663_v37 = vpop.xlane.xlu0 %662 }
 0x2ae   : > { %v9699_v2 = vunpack.i.h.bf16 %v9697_v33  ;;  %v725_v61 = vmul.f32 %v663_v37, %v11819_v57  ;;  %v9698_v34 = vunpack.i.l.bf16 %v9697_v33  ;;  %v1459_v33 = vmul.f32 %v1411_v43, %v11041_v50  ;;  %3990 = vmatpush.bf16.msrb.mxu3 %v8952_v58 }
 0x2af   : > { %v2631_v50 = vadd.f32 %v11950_v23, %v2630_v54 }
 0x2b0   : > { %v11968_v47 = vpop.eup %9781  ;;  %v11984_v48 = vadd.f32 1e-05, %v725_v61  ;;  %v2037_v39 = vsel %vm1140_vm0, %v1877_v17, %v9699_v2  ;;  %v2036_v53 = vsel %vm1140_vm0, %v1876_v18, %v9698_v34  ;;  %v2653_v2 = vand.u32 2147483648, %v11940_v10 }
 0x2b1   : > { %v789_v14 = vmul.f32 %v11968_v47, %v11946_v29  ;;  %v2058_v5 = vpack.c.bf16 %v2037_v39, %v2036_v53  ;;  %v12010_v38 = vpop.eup %9783  ;;  %v12029_v27 = vadd.f32 1e-05, %v1459_v33  ;;  %vm795_vm5 = vweird.f32 %v11968_v47  ;;  %v9436_v53 = vld [vmem:[%s20375_s6 + $0x9c] sm:$0xf0] }
 0x2b2   : > { %9785 = vrsqrt.f32 %v11984_v48  ;;  %v2636_v34 = vand.u32 2147483647, %v11937_v24  ;;  %v2639_v18 = vor.u32 1.1754944e-38, %v2638_v0  ;;  %v2635_v39 = vsel %vm12053_vm6, %v11950_v23, %v2631_v50  ;;  %vm12065_vm9 = vmor %vm794_vm7, %vm795_vm5  ;;  %v9009_v24 = vld [vmem:[%s20375_s6 + $0x1e8] sm:$0xf0] }
 0x2b3   : > { %v790_v62 = vmul.f32 %v11968_v47, %v789_v14  ;;  %2290 = vmatmul.bf16.gmra.mxu0 %v2058_v5  ;;  %2379 = vmatmul.bf16.gmra.mxu1 %v2058_v5  ;;  %v1721_v14 = vmul.f32 %v12010_v38, %v11955_v12  ;;  %9787 = vrsqrt.f32 %v12029_v27  ;;  %v2654_v1 = vor.u32 1.1754944e-38, %v2653_v2  ;;  %v510_v2 = vpop.xlane.xlu1 %509  ;;  %v9445_v12 = vld [vmem:[%s20375_s6 + $0x124] sm:$0xf0] }
 0x2b4   : > { %2468 = vmatmul.bf16.gmra.mxu2 %v2058_v5  ;;  %v12081_v5 = vpop.f32.mrf.mxu0  ;;  %vm2637_vm11 = vcmp.eq.f32.partialorder %v2636_v34, 8.507059e+37  ;;  %vm804_vm15 = vweird.f32 %v11984_v48  ;;  %v8887_v34 = vld [vmem:[%s20375_s6] sm:$0xf]  ;;  %vm1727_vm3 = vweird.f32 %v12010_v38  ;;  %vm1736_vm6 = vweird.f32 %v12029_v27 }
 0x2b5   : > { %v791_v40 = vmul.f32 0.5, %v790_v62  ;;  %v506_v63 = vpop.xlane.xlu0 %505  ;;  %v1722_v23 = vmul.f32 %v12010_v38, %v1721_v14  ;;  %v2640_v7 = vsel %vm2637_vm11, %v2639_v18, %v2635_v39  ;;  %v9007_v62 = vld [vmem:[%s20375_s6 + $0x1c8] sm:$0xf]  ;;  %v9455_v39 = vld [vmem:[%s20375_s6 + $0x1cc] sm:$0xf]  ;;  %vm12218_vm5 = vmor %vm1726_vm2, %vm1727_vm3 }
 0x2b6   : > { %v570_v59 = vmul.f32 %v11819_v57, %v506_v63 }
 0x2b7   : > { %v792_v36 = vsub.f32 1.5, %v791_v40  ;;  %v8919_v40 = vld [vmem:[%s20375_s6 + $0x80] sm:$0xf]  ;;  %v12110_v58 = vmul.f32 0.5, %v1722_v23  ;;  %v8991_v23 = vld [vmem:[%s20375_s6 + $0x188] sm:$0xf] }
 0x2b8   : > { %v12018_v37 = vpop.eup %9785  ;;  %v12023_v61 = vsub.f32 %v11840_v21, %v570_v59  ;;  %v9440_v21 = vld [vmem:[%s20375_s6 + $0xdc] sm:$0xf0]  ;;  %v8920_v43 = vor.u32 %v9436_v53, %v8919_v40  ;;  %v9008_v40 = vor.u32 %v9457_v19, %v9007_v62  ;;  %v8985_v53 = vld [vmem:[%s20375_s6 + $0x1a0] sm:$0xf0]  ;;  %v9447_v19 = vld [vmem:[%s20375_s6 + $0x14c] sm:$0xf] }
 0x2b9   : > { %v799_v9 = vmul.f32 %v12018_v37, %v11984_v48  ;;  %v793_v17 = vmul.f32 %v11968_v47, %v792_v36  ;;  %v8936_v51 = vor.u32 %v9440_v21, %v8935_v30  ;;  %vm805_vm13 = vweird.f32 %v12018_v37  ;;  %v8903_v59 = vld [vmem:[%s20375_s6 + $0x40] sm:$0xf]  ;;  %v12102_v33 = vpop.eup %9787  ;;  %v9454_v48 = vld [vmem:[%s20375_s6 + $0x1c4] sm:$0xf]  ;;  %v2332_v21 = vpop.f32.mrf.mxu1 }
 0x2ba   : > { %v634_v60 = vmul.f32 %v12023_v61, %v12023_v61  ;;  %v1731_v50 = vmul.f32 %v12102_v33, %v12029_v27  ;;  %vm806_vm1 = vmor %vm804_vm15, %vm805_vm13  ;;  %v9001_v30 = vld [vmem:[%s20375_s6 + $0x1e0] sm:$0xf0]  ;;  %4165 = vmatpush.bf16.msrb.mxu1 %v9008_v40  ;;  %vm1737_vm4 = vweird.f32 %v12102_v33 }
 0x2bb   : > { %v800_v4 = vmul.f32 %v12018_v37, %v799_v9  ;;  %v797_v15 = vsel %vm12065_vm9, %v11968_v47, %v793_v17  ;;  %v2650_v47 = vsel %vm12085_vm12, %v11953_v44, %v2646_v55  ;;  %3991 = vmatpush.bf16.msrb.mxu3 %v8936_v51  ;;  %v9428_v55 = vld [vmem:[%s20375_s6 + $0x1c] sm:$0xf0]  ;;  %vm12235_vm7 = vmor %vm1736_vm6, %vm1737_vm4 }
 0x2bc   : > { %672 = vadd.xlane.f32.xlu2 %v634_v60  ;;  %v1108_v0 = vmul.f32 %v797_v15, %v11823_v8  ;;  %v572_v8 = vmul.f32 %v11819_v57, %v510_v2  ;;  %v2655_v14 = vsel %vm2652_vm14, %v2654_v1, %v2650_v47  ;;  %v8904_v60 = vor.u32 %v9432_v35, %v8903_v59  ;;  %v9453_v15 = vld [vmem:[%s20375_s6 + $0x1a4] sm:$0xf0]  ;;  %v9446_v2 = vld [vmem:[%s20375_s6 + $0x144] sm:$0xf] }
 0x2bd   : > { %v801_v20 = vmul.f32 0.5, %v800_v4  ;;  %v508_v29 = vpop.xlane.xlu0 %507  ;;  %v9004_v4 = vor.u32 %v9454_v48, %v9001_v30  ;;  %v2331_v47 = vadd.f32 %v12026_v3, %v12014_v42  ;;  %v8969_v3 = vld [vmem:[%s20375_s6 + $0x160] sm:$0xf0]  ;;  %v8992_v48 = vor.u32 %v9453_v15, %v8991_v23  ;;  %v9443_v15 = vld [vmem:[%s20375_s6 + $0x10c] sm:$0xf] }
 0x2be   : > { %v571_v54 = vmul.f32 %v11819_v57, %v508_v29  ;;  %v12142_v18 = vsub.f32 %v11869_v41, %v572_v8  ;;  %v12153_v29 = vpop.f32.mrf.mxu3  ;;  %v9012_v41 = vor.u32 %v9455_v39, %v9009_v24  ;;  %v8972_v62 = vor.u32 %v9446_v2, %v8969_v3  ;;  %v9442_v24 = vld [vmem:[%s20375_s6 + $0x104] sm:$0xf]  ;;  %v9441_v3 = vld [vmem:[%s20375_s6 + $0xe4] sm:$0xf0] }
 0x2bf   : > { %v802_v10 = vsub.f32 1.5, %v801_v20  ;;  %3992 = vmatpush.bf16.msrb.mxu3 %v8920_v43  ;;  %v9450_v20 = vld [vmem:[%s20375_s6 + $0x184] sm:$0xf]  ;;  %4076 = vmatpush.bf16.msrb.mxu0 %v9004_v4  ;;  %v1724_v43 = vsub.f32 1.5, %v12110_v58 }
 0x2c0   : > { %v12094_v36 = vsub.f32 %v11858_v22, %v571_v54  ;;  %v12108_v22 = vld [vmem:[%s11717_s13 + $0x60] sm:$0xff]  ;;  %v2333_v54 = vadd.f32 %v2332_v21, %v12014_v42  ;;  %4254 = vmatpush.bf16.msrb.mxu2 %v9012_v41  ;;  %v8988_v8 = vor.u32 %v9450_v20, %v8985_v53  ;;  %v2247_v21 = vadd.f32 %v12081_v5, %v11915_v26  ;;  %v8959_v53 = vld [vmem:[%s20375_s6 + $0x108] sm:$0xf] }
 0x2c1   : > { %v803_v44 = vmul.f32 %v12018_v37, %v802_v10  ;;  %v9451_v10 = vld [vmem:[%s20375_s6 + $0x18c] sm:$0xf]  ;;  %4166 = vmatpush.bf16.msrb.mxu1 %v8992_v48  ;;  %v1725_v39 = vmul.f32 %v12010_v38, %v1724_v43  ;;  %v8953_v20 = vld [vmem:[%s20375_s6 + $0x120] sm:$0xf0] }
 0x2c2   : > { %v635_v9 = vmul.f32 %v12094_v36, %v12094_v36 }
 0x2c3   : > { %v807_v17 = vsel %vm806_vm1, %v12018_v37, %v803_v44  ;;  %v1732_v37 = vmul.f32 %v12102_v33, %v1731_v50  ;;  %3993 = vmatpush.bf16.msrb.mxu3 %v8904_v60  ;;  %v636_v44 = vmul.f32 %v12142_v18, %v12142_v18  ;;  %v2248_v50 = vpop.f32.mrf.mxu0  ;;  %v8975_v60 = vld [vmem:[%s20375_s6 + $0x148] sm:$0xf]  ;;  %4077 = vmatpush.bf16.msrb.mxu0 %v8988_v8  ;;  %v8945_v8 = vld [vmem:[%s20375_s6 + $0xe8] sm:$0xf0] }
 0x2c4   : > { %v1109_v51 = vmul.f32 %v807_v17, %v11829_v49  ;;  %517 = vadd.xlane.f32.xlu2 %v12108_v22  ;;  %v3715_v49 = vmul.f32 %v2640_v7, %v1108_v0  ;;  %674 = vadd.xlane.f32.xlu1 %v635_v9  ;;  %v8993_v7 = vld [vmem:[%s20375_s6 + $0x1a8] sm:$0xf0]  ;;  %v8888_v0 = vor.u32 %v9428_v55, %v8887_v34  ;;  %v512_v9 = vpop.xlane.xlu1 %511  ;;  %v9449_v34 = vld [vmem:[%s20375_s6 + $0x164] sm:$0xf0] }
 0x2c5   : > { %v1733_v63 = vmul.f32 0.5, %v1732_v37  ;;  %v8996_v30 = vor.u32 %v9451_v10, %v8993_v7  ;;  %v12188_v17 = vld [vmem:[%s11717_s13 + $0x68] sm:$0xff]  ;;  %v665_v5 = vpop.xlane.xlu0 %664  ;;  %v573_v4 = vmul.f32 %v11819_v57, %v512_v9  ;;  %v8976_v41 = vor.u32 %v9449_v34, %v8975_v60 }
 0x2c6   : > { %v3716_v1 = vmul.f32 %v2655_v14, %v1109_v51  ;;  %v3747_v58 = vadd.f32 %v3715_v49, %v2331_v47  ;;  %v8977_v37 = vld [vmem:[%s20375_s6 + $0x168] sm:$0xf0]  ;;  %v2249_v51 = vadd.f32 %v2248_v50, %v11915_v26  ;;  %v726_v27 = vmul.f32 %v665_v5, %v11819_v57 }
 0x2c7   : > { %v1734_v59 = vsub.f32 1.5, %v1733_v63  ;;  %3994 = vmatpush.bf16.msrb.mxu3 %v8888_v0  ;;  %v12225_v40 = vsub.f32 %v11873_v25, %v573_v4  ;;  %4255 = vmatpush.bf16.msrb.mxu2 %v8996_v30  ;;  %v8980_v25 = vor.u32 %v9447_v19, %v8977_v37  ;;  %v12246_v63 = vpop.f32.mrf.mxu3  ;;  %v8956_v7 = vor.u32 %v9442_v24, %v8953_v20  ;;  %v8937_v0 = vld [vmem:[%s20375_s6 + $0xe0] sm:$0xf0]  ;;  %v9439_v9 = vld [vmem:[%s20375_s6 + $0xcc] sm:$0xf] }
 0x2c8   : > { %v3748_v35 = vadd.f32 %v3716_v1, %v2333_v54  ;;  %v8961_v54 = vld [vmem:[%s20375_s6 + $0x128] sm:$0xf0]  ;;  %v8823_v1 = vmul.f32 -1.442695, %v2247_v21  ;;  %4078 = vmatpush.bf16.msrb.mxu0 %v8972_v62  ;;  %v8824_v47 = vmul.f32 -1.442695, %v2249_v51  ;;  %v1729_v43 = vsel %vm12218_vm5, %v12010_v38, %v1725_v39  ;;  %4167 = vmatpush.bf16.msrb.mxu1 %v8976_v41 }
 0x2c9   : > { %v1735_v14 = vmul.f32 %v12102_v33, %v1734_v59  ;;  %v8960_v59 = vor.u32 %v9445_v12, %v8959_v53  ;;  %v8964_v2 = vor.u32 %v9443_v15, %v8961_v54  ;;  %v8943_v38 = vld [vmem:[%s20375_s6 + $0xc8] sm:$0xf]  ;;  %v1842_v48 = vmul.f32 %v1729_v43, %v11813_v11  ;;  %v8921_v15 = vld [vmem:[%s20375_s6 + $0xa0] sm:$0xf0]  ;;  %v8929_v43 = vld [vmem:[%s20375_s6 + $0xa8] sm:$0xf0] }
 0x2ca   : > { %v12197_v55 = vpack.c.bf16 %v3748_v35, %v3747_v58  ;;  %v9438_v35 = vld [vmem:[%s20375_s6 + $0xc4] sm:$0xf]  ;;  %v12273_v58 = vadd.f32 1e-05, %v726_v27  ;;  %9789 = vpow2.f32 %v8823_v1  ;;  %v8944_v21 = vor.u32 %v9441_v3, %v8943_v38  ;;  %v8927_v54 = vld [vmem:[%s20375_s6 + $0x88] sm:$0xf] }
 0x2cb   : > { %v1739_v10 = vsel %vm12235_vm7, %v12102_v33, %v1735_v14  ;;  %v12262_v33 = vld [vmem:[%s11717_s13 + $0x70] sm:$0xff]  ;;  %4256 = vmatpush.bf16.msrb.mxu2 %v8980_v25  ;;  %v8940_v30 = vor.u32 %v9438_v35, %v8937_v0  ;;  %9791 = vpow2.f32 %v8824_v47  ;;  %v8948_v14 = vor.u32 %v9439_v9, %v8945_v8  ;;  %v9434_v25 = vld [vmem:[%s20375_s6 + $0x84] sm:$0xf]  ;;  %v9435_v47 = vld [vmem:[%s20375_s6 + $0x8c] sm:$0xf]  ;;  %v12322_v35 = vpop.f32.mrf.mxu2 }
 0x2cc   : > { %20587 = vst [vmem:[#allocation13_spill] sm:$0xff] %v12197_v55  ;;  %676 = vadd.xlane.f32.xlu2 %v636_v44  ;;  %519 = vadd.xlane.f32.xlu1 %v12188_v17  ;;  %v637_v44 = vmul.f32 %v12225_v40, %v12225_v40  ;;  %v1843_v50 = vmul.f32 %v1739_v10, %v11837_v28  ;;  %9793 = vrsqrt.f32 %v12273_v58  ;;  %v9430_v3 = vld [vmem:[%s20375_s6 + $0x44] sm:$0xf]  ;;  %v8911_v9 = vld [vmem:[%s20375_s6 + $0x48] sm:$0xf] }
 0x2cd   : > { %3995 = vmatmul.bf16.vlgmr.msrb.gmra.mxu3 %v12197_v55  ;;  %4079 = vmatpush.bf16.msrb.mxu0 %v8956_v7  ;;  %v1878_v11 = vmul.f32 %v11842_v46, %v1842_v48  ;;  %v8924_v10 = vor.u32 %v9434_v25, %v8921_v15  ;;  %v9437_v7 = vld [vmem:[%s20375_s6 + $0xa4] sm:$0xf0]  ;;  %20592 = vst [vmem:[#allocation14_spill] sm:$0xff] %v12322_v35  ;;  %v8897_v25 = vld [vmem:[%s20375_s6 + $0x28] sm:$0xf0] }
 0x2ce   : > { %4168 = vmatpush.bf16.msrb.mxu1 %v8960_v59  ;;  %v1879_v34 = vmul.f32 %v11842_v46, %v1843_v50  ;;  %v2251_v46 = vpop.f32.mrf.mxu0  ;;  %v8932_v38 = vor.u32 %v9435_v47, %v8929_v43  ;;  %v8905_v50 = vld [vmem:[%s20375_s6 + $0x60] sm:$0xf0]  ;;  %v2335_v47 = vpop.f32.mrf.mxu1 }
 0x2cf   : > { %4257 = vmatpush.bf16.msrb.mxu2 %v8964_v2  ;;  %v8928_v2 = vor.u32 %v9437_v7, %v8927_v54 }
 0x2d0   : > { %v9790_v19 = vpop.eup %9789 }
 0x2d1   : > { %4080 = vmatpush.bf16.msrb.mxu0 %v8940_v30  ;;  %v9792_v51 = vpop.eup %9791  ;;  %v12290_v24 = vadd.f32 1.0, %v9790_v19 }
 0x2d2   : > { %4169 = vmatpush.bf16.msrb.mxu1 %v8944_v21  ;;  %v12288_v39 = vpop.eup %9793  ;;  %v12292_v20 = vadd.f32 1.0, %v9792_v51  ;;  %v8908_v21 = vor.u32 %v9430_v3, %v8905_v50  ;;  %v9426_v51 = vld [vmem:[%s20375_s6 + $0x4] sm:$0xf] }
 0x2d3   : > { %4258 = vmatpush.bf16.msrb.mxu2 %v8948_v14  ;;  %v809_v49 = vmul.f32 %v12288_v39, %v12273_v58  ;;  %9795 = vrcp.f32 %v12290_v24  ;;  %v9431_v14 = vld [vmem:[%s20375_s6 + $0x4c] sm:$0xf]  ;;  %vm815_vm8 = vweird.f32 %v12288_v39  ;;  %v12372_v7 = vpop.f32.mrf.mxu2  ;;  %v2668_v3 = vand.u32 2147483648, %v12290_v24 }
 0x2d4   : > { %521 = vadd.xlane.f32.xlu2 %v12262_v33  ;;  %678 = vadd.xlane.f32.xlu1 %v637_v44  ;;  %9797 = vrcp.f32 %v12292_v20  ;;  %v2252_v44 = vadd.f32 %v2251_v46, %v11915_v26  ;;  %v8889_v46 = vld [vmem:[%s20375_s6 + $0x20] sm:$0xf0]  ;;  %20593 = vst [vmem:[#allocation15_spill] sm:$0xff] %v12372_v7  ;;  %vm2662_vm11 = vweird.f32 %v12290_v24  ;;  %vm2677_vm1 = vweird.f32 %v12292_v20 }
 0x2d5   : > { %v810_v41 = vmul.f32 %v12288_v39, %v809_v49  ;;  %4081 = vmatpush.bf16.msrb.mxu0 %v8924_v10  ;;  %v8895_v49 = vld [vmem:[%s20375_s6 + $0x8] sm:$0xf] }
 0x2d6   : > { %v2253_v27 = vpop.f32.mrf.mxu0  ;;  %4170 = vmatpush.bf16.msrb.mxu1 %v8928_v2 }
 0x2d7   : > { %v811_v12 = vmul.f32 0.5, %v810_v41  ;;  %v2254_v48 = vadd.f32 %v2253_v27, %v11915_v26  ;;  %4259 = vmatpush.bf16.msrb.mxu2 %v8932_v38  ;;  %v8892_v41 = vor.u32 %v9426_v51, %v8889_v46  ;;  %v9427_v27 = vld [vmem:[%s20375_s6 + $0xc] sm:$0xf] }
 0x2d8   : > { %v9702_v28 = vpop.permute.xlu0 %9701  ;;  %v8900_v54 = vor.u32 %v9427_v27, %v8897_v25  ;;  %v2336_v27 = vadd.f32 %v2335_v47, %v12014_v42 }
 0x2d9   : > { %v9704_v60 = vunpack.i.h.bf16 %v9702_v28  ;;  %v9703_v5 = vunpack.i.l.bf16 %v9702_v28  ;;  %v12299_v53 = vpop.eup %9795  ;;  %v9433_v28 = vld [vmem:[%s20375_s6 + $0x64] sm:$0xf0]  ;;  %v8826_v19 = vmul.f32 -1.442695, %v2254_v48  ;;  %4082 = vmatpush.bf16.msrb.mxu0 %v8908_v21 }
 0x2da   : > { %v12301_v23 = vpop.eup %9797  ;;  %v2658_v0 = vmul.f32 %v12299_v53, %v12290_v24  ;;  %vm2663_vm10 = vweird.f32 %v12299_v53 }
 0x2db   : > { %v2039_v4 = vsel %vm1140_vm0, %v1879_v34, %v9704_v60  ;;  %v2038_v62 = vsel %vm1140_vm0, %v1878_v11, %v9703_v5  ;;  %v2673_v8 = vmul.f32 %v12301_v23, %v12292_v20  ;;  %v8912_v60 = vor.u32 %v9433_v28, %v8911_v9  ;;  %v8913_v34 = vld [vmem:[%s20375_s6 + $0x68] sm:$0xf0]  ;;  %vm12398_vm13 = vmor %vm2662_vm11, %vm2663_vm10 }
 0x2dc   : > { %v2059_v37 = vpack.c.bf16 %v2039_v4, %v2038_v62  ;;  %v8916_v5 = vor.u32 %v9431_v14, %v8913_v34  ;;  %v2659_v11 = vsub.f32 1.0, %v2658_v0  ;;  %v8825_v62 = vmul.f32 -1.442695, %v2252_v44 }
 0x2dd   : > { %v2674_v4 = vsub.f32 1.0, %v2673_v8  ;;  %4171 = vmatpush.bf16.msrb.mxu1 %v8912_v60  ;;  %vm814_vm0 = vweird.f32 %v12273_v58  ;;  %4083 = vmatpush.bf16.msrb.mxu0 %v8892_v41  ;;  %v2666_v9 = vand.u32 2147483647, %v12290_v24  ;;  %vm2678_vm12 = vweird.f32 %v12301_v23 }
 0x2de   : > { %2295 = vmatmul.bf16.gmra.mxu0 %v2059_v37  ;;  %2384 = vmatmul.bf16.gmra.mxu1 %v2059_v37  ;;  %v2660_v10 = vmul.f32 %v12299_v53, %v2659_v11  ;;  %vm12381_vm9 = vmor %vm814_vm0, %vm815_vm8  ;;  %v2683_v28 = vand.u32 2147483648, %v12292_v20  ;;  %v2681_v34 = vand.u32 2147483647, %v12292_v20 }
 0x2df   : > { %2473 = vmatmul.bf16.gmra.mxu2 %v2059_v37  ;;  %v812_v37 = vsub.f32 1.5, %v811_v12  ;;  %v9429_v12 = vld [vmem:[%s20375_s6 + $0x24] sm:$0xf0]  ;;  %v2675_v0 = vmul.f32 %v12301_v23, %v2674_v4  ;;  %vm12410_vm2 = vmor %vm2677_vm1, %vm2678_vm12  ;;  %vm2667_vm3 = vcmp.eq.f32.partialorder %v2666_v9, 8.507059e+37 }
 0x2e0   : > { %4260 = vmatpush.bf16.msrb.mxu2 %v8916_v5  ;;  %v8896_v15 = vor.u32 %v9429_v12, %v8895_v49  ;;  %v2661_v38 = vadd.f32 %v12299_v53, %v2660_v10  ;;  %v2669_v5 = vor.u32 1.1754944e-38, %v2668_v3  ;;  %v2684_v51 = vor.u32 1.1754944e-38, %v2683_v28 }
 0x2e1   : > { %v813_v43 = vmul.f32 %v12288_v39, %v812_v37  ;;  %v2676_v8 = vadd.f32 %v12301_v23, %v2675_v0  ;;  %vm2682_vm5 = vcmp.eq.f32.partialorder %v2681_v34, 8.507059e+37 }
 0x2e2   : > { %4172 = vmatpush.bf16.msrb.mxu1 %v8896_v15  ;;  %v2665_v24 = vsel %vm12398_vm13, %v12299_v53, %v2661_v38  ;;  %v12421_v53 = vpop.f32.mrf.mxu2 }
 0x2e3   : > { %v817_v58 = vsel %vm12381_vm9, %v12288_v39, %v813_v43  ;;  %20600 = vst [vmem:[#allocation20_spill] sm:$0xff] %v12421_v53  ;;  %v2670_v37 = vsel %vm2667_vm3, %v2669_v5, %v2665_v24  ;;  %v2256_v24 = vpop.f32.mrf.mxu0 }
 0x2e4   : > { %4261 = vmatpush.bf16.msrb.mxu2 %v8900_v54  ;;  %v1110_v60 = vmul.f32 %v817_v58, %v11864_v32  ;;  %v2337_v32 = vpop.f32.mrf.mxu1 }
 0x2e5   : > { %v2338_v25 = vadd.f32 %v2337_v32, %v12014_v42 }
 0x2e6   : > { %v667_v1 = vpop.xlane.xlu2 %666  ;;  %v3717_v49 = vmul.f32 %v2670_v37, %v1110_v60 }
 0x2e7   : > { %v727_v59 = vmul.f32 %v667_v1, %v11819_v57 }
 0x2e8   : > { %v3749_v15 = vadd.f32 %v3717_v49, %v2336_v27 }
 0x2e9   : > { %v12339_v30 = vadd.f32 1e-05, %v727_v59 }
 0x2eb   : > { %9799 = vrsqrt.f32 %v12339_v30  ;;  %vm824_vm14 = vweird.f32 %v12339_v30 }
 0x2ec   : > { %9801 = vpow2.f32 %v8826_v19  ;;  %v2680_v19 = vsel %vm12410_vm2, %v12301_v23, %v2676_v8  ;;  %v2340_v5 = vpop.f32.mrf.mxu1 }
 0x2ed   : > { %9803 = vpow2.f32 %v8825_v62  ;;  %v12414_v62 = vpop.f32.mrf.mxu3  ;;  %v2685_v12 = vsel %vm2682_vm5, %v2684_v51, %v2680_v19 }
 0x2ee   : > { %4084 = vmatmul.bf16.vlgmr.msrb.gmra.mxu0 %v12197_v55  ;;  %4173 = vmatmul.bf16.vlgmr.msrb.gmra.mxu1 %v12197_v55 }
 0x2ef   : > { %4262 = vmatmul.bf16.vlgmr.msrb.gmra.mxu2 %v12197_v55  ;;  %v12927_v55 = vld [vmem:[%s11717_s13 + $0xf8] sm:$0xff] }
 0x2f1   : > { %v9800_v1 = vpop.eup %9799 }
 0x2f2   : > { %v819_v59 = vmul.f32 %v9800_v1, %v12339_v30  ;;  %v9802_v48 = vpop.eup %9801  ;;  %vm825_vm15 = vweird.f32 %v9800_v1 }
 0x2f3   : > { %v9804_v39 = vpop.eup %9803  ;;  %v12416_v30 = vadd.f32 1.0, %v9802_v48  ;;  %vm826_vm4 = vmor %vm824_vm14, %vm825_vm15 }
 0x2f4   : > { %v820_v2 = vmul.f32 %v9800_v1, %v819_v59  ;;  %v12423_v20 = vadd.f32 1.0, %v9804_v39 }
 0x2f5   : > { %9805 = vrcp.f32 %v12416_v30  ;;  %v12436_v47 = vpop.f32.mrf.mxu3  ;;  %vm2707_vm7 = vweird.f32 %v12416_v30 }
 0x2f6   : > { %v821_v50 = vmul.f32 0.5, %v820_v2  ;;  %9807 = vrcp.f32 %v12423_v20  ;;  %v12442_v2 = vpop.f32.mrf.mxu2  ;;  %vm2692_vm14 = vweird.f32 %v12423_v20 }
 0x2f7   : > { %20602 = vst [vmem:[#allocation17_spill] sm:$0xff] %v12442_v2 }
 0x2f8   : > { %v822_v14 = vsub.f32 1.5, %v821_v50 }
 0x2fa   : > { %v823_v4 = vmul.f32 %v9800_v1, %v822_v14 }
 0x2fb   : > { %v12434_v0 = vpop.eup %9805 }
 0x2fc   : > { %v827_v46 = vsel %vm826_vm4, %v9800_v1, %v823_v4  ;;  %v12440_v44 = vpop.eup %9807  ;;  %v2703_v58 = vmul.f32 %v12434_v0, %v12416_v30  ;;  %vm2708_vm0 = vweird.f32 %v12434_v0 }
 0x2fd   : > { %v1111_v41 = vmul.f32 %v827_v46, %v11884_v52  ;;  %v2688_v50 = vmul.f32 %v12440_v44, %v12423_v20  ;;  %vm2693_vm6 = vweird.f32 %v12440_v44  ;;  %vm12464_vm12 = vmor %vm2707_vm7, %vm2708_vm0 }
 0x2fe   : > { %v2704_v48 = vsub.f32 1.0, %v2703_v58  ;;  %v2696_v58 = vand.u32 2147483647, %v12423_v20  ;;  %vm12492_vm1 = vmor %vm2692_vm14, %vm2693_vm6 }
 0x2ff   : > { %v3718_v23 = vmul.f32 %v2685_v12, %v1111_v41  ;;  %v2689_v21 = vsub.f32 1.0, %v2688_v50  ;;  %v2713_v12 = vand.u32 2147483648, %v12416_v30 }
 0x300   : > { %v671_v10 = vpop.xlane.xlu1 %670  ;;  %v2705_v11 = vmul.f32 %v12434_v0, %v2704_v48  ;;  %vm2697_vm3 = vcmp.eq.f32.partialorder %v2696_v58, 8.507059e+37 }
 0x301   : > { %v3750_v54 = vadd.f32 %v3718_v23, %v2338_v25  ;;  %v729_v1 = vmul.f32 %v671_v10, %v11819_v57  ;;  %v2690_v19 = vmul.f32 %v12440_v44, %v2689_v21  ;;  %v2711_v10 = vand.u32 2147483647, %v12416_v30 }
 0x302   : > { %v2706_v49 = vadd.f32 %v12434_v0, %v2705_v11  ;;  %v2714_v48 = vor.u32 1.1754944e-38, %v2713_v12  ;;  %v12507_v11 = vpop.f32.mrf.mxu2  ;;  %v12518_v12 = vld [vmem:[%s11717_s13 + $0x90] sm:$0xff] }
 0x303   : > { %v669_v43 = vpop.xlane.xlu0 %668  ;;  %v12430_v59 = vpack.c.bf16 %v3750_v54, %v3749_v15  ;;  %v761_v38 = vadd.f32 1e-05, %v729_v1  ;;  %v2691_v23 = vadd.f32 %v12440_v44, %v2690_v19  ;;  %v2698_v54 = vand.u32 2147483648, %v12423_v20  ;;  %v12499_v20 = vpop.f32.mrf.mxu3  ;;  %20611 = vst [vmem:[#allocation18_spill] sm:$0xff] %v12507_v11 }
 0x304   : > { %v728_v52 = vmul.f32 %v669_v43, %v11819_v57  ;;  %vm2712_vm2 = vcmp.eq.f32.partialorder %v2711_v10, 8.507059e+37 }
 0x305   : > { %20601 = vst [vmem:[#allocation16_spill] sm:$0xff] %v12430_v59  ;;  %4000 = vmatmul.bf16.gmra.mxu3 %v12430_v59  ;;  %4089 = vmatmul.bf16.gmra.mxu0 %v12430_v59  ;;  %9809 = vrsqrt.f32 %v761_v38  ;;  %vm844_vm8 = vweird.f32 %v761_v38 }
 0x306   : > { %v760_v3 = vadd.f32 1e-05, %v728_v52  ;;  %4178 = vmatmul.bf16.gmra.mxu1 %v12430_v59  ;;  %4267 = vmatmul.bf16.gmra.mxu2 %v12430_v59  ;;  %v12479_v52 = vld [vmem:[%s11717_s13 + $0x88] sm:$0xff] }
 0x308   : > { %9811 = vrsqrt.f32 %v760_v3  ;;  %v514_v9 = vpop.xlane.xlu1 %513  ;;  %vm834_vm10 = vweird.f32 %v760_v3 }
 0x309   : > { %v574_v8 = vmul.f32 %v11819_v57, %v514_v9  ;;  %v2710_v9 = vsel %vm12464_vm12, %v12434_v0, %v2706_v49  ;;  %v2342_v0 = vpop.f32.mrf.mxu1 }
 0x30a   : > { %v2343_v49 = vadd.f32 %v2342_v0, %v12014_v42  ;;  %v12531_v43 = vpop.f32.mrf.mxu2 }
 0x30b   : > { %v12452_v28 = vsub.f32 %v11930_v13, %v574_v8  ;;  %v9810_v14 = vpop.eup %9809  ;;  %20613 = vst [vmem:[#allocation21_spill] sm:$0xff] %v12531_v43 }
 0x30c   : > { %v839_v60 = vmul.f32 %v9810_v14, %v761_v38  ;;  %vm845_vm9 = vweird.f32 %v9810_v14 }
 0x30d   : > { %v638_v34 = vmul.f32 %v12452_v28, %v12452_v28  ;;  %vm12474_vm13 = vmor %vm844_vm8, %vm845_vm9 }
 0x30e   : > { %v9812_v39 = vpop.eup %9811  ;;  %v840_v32 = vmul.f32 %v9810_v14, %v839_v60  ;;  %v2695_v60 = vsel %vm12492_vm1, %v12440_v44, %v2691_v23 }
 0x30f   : > { %v829_v4 = vmul.f32 %v9812_v39, %v760_v3  ;;  %680 = vadd.xlane.f32.xlu1 %v638_v34  ;;  %vm835_vm11 = vweird.f32 %v9812_v39  ;;  %v2258_v3 = vpop.f32.mrf.mxu0  ;;  %v2699_v34 = vor.u32 1.1754944e-38, %v2698_v54 }
 0x310   : > { %v516_v37 = vpop.xlane.xlu1 %515  ;;  %v841_v51 = vmul.f32 0.5, %v840_v32  ;;  %vm12484_vm15 = vmor %vm834_vm10, %vm835_vm11  ;;  %v2715_v32 = vsel %vm2712_vm2, %v2714_v48, %v2710_v9 }
 0x311   : > { %v830_v13 = vmul.f32 %v9812_v39, %v829_v4  ;;  %v575_v46 = vmul.f32 %v11819_v57, %v516_v37 }
 0x312   : > { %v842_v25 = vsub.f32 1.5, %v841_v51  ;;  %v2700_v51 = vsel %vm2697_vm3, %v2699_v34, %v2695_v60 }
 0x313   : > { %v831_v41 = vmul.f32 0.5, %v830_v13  ;;  %v12470_v15 = vsub.f32 %v11935_v31, %v575_v46  ;;  %v2259_v13 = vadd.f32 %v2258_v3, %v11915_v26  ;;  %v2341_v46 = vadd.f32 %v2340_v5, %v12014_v42  ;;  %v12527_v5 = vpop.f32.mrf.mxu3 }
 0x314   : > { %v843_v38 = vmul.f32 %v9810_v14, %v842_v25  ;;  %v524_v25 = vpop.xlane.xlu0 %523 }
 0x315   : > { %v832_v1 = vsub.f32 1.5, %v831_v41  ;;  %v639_v30 = vmul.f32 %v12470_v15, %v12470_v15  ;;  %v579_v23 = vmul.f32 %v11819_v57, %v524_v25 }
 0x316   : > { %v847_v21 = vsel %vm12474_vm13, %v9810_v14, %v843_v38  ;;  %v2257_v14 = vadd.f32 %v2256_v24, %v11915_v26  ;;  %v8828_v24 = vmul.f32 -1.442695, %v2259_v13  ;;  %v12556_v13 = vld [vmem:[%s11717_s13 + $0xb8] sm:$0xff] }
 0x317   : > { %v833_v8 = vmul.f32 %v9812_v39, %v832_v1  ;;  %682 = vadd.xlane.f32.xlu2 %v639_v30  ;;  %527 = vadd.xlane.f32.xlu1 %v12479_v52  ;;  %v1113_v4 = vmul.f32 %v847_v21, %v11911_v56  ;;  %v12525_v10 = vsub.f32 %v11966_v6, %v579_v23 }
 0x318   : > { %v8827_v56 = vmul.f32 -1.442695, %v2257_v14 }
 0x319   : > { %v837_v19 = vsel %vm12484_vm15, %v9812_v39, %v833_v8  ;;  %v3720_v37 = vmul.f32 %v2715_v32, %v1113_v4  ;;  %v643_v1 = vmul.f32 %v12525_v10, %v12525_v10 }
 0x31a   : > { %v1112_v44 = vmul.f32 %v837_v19, %v11908_v16  ;;  %v2261_v16 = vpop.f32.mrf.mxu0  ;;  %9813 = vpow2.f32 %v8827_v56 }
 0x31b   : > { %v3752_v27 = vadd.f32 %v3720_v37, %v2343_v49  ;;  %9815 = vpow2.f32 %v8828_v24  ;;  %v2262_v9 = vadd.f32 %v2261_v16, %v11915_v26 }
 0x31c   : > { %v3719_v41 = vmul.f32 %v2700_v51, %v1112_v44  ;;  %v526_v38 = vpop.xlane.xlu0 %525 }
 0x31d   : > { %v580_v6 = vmul.f32 %v11819_v57, %v526_v38 }
 0x31e   : > { %v3751_v39 = vadd.f32 %v3719_v41, %v2341_v46 }
 0x31f   : > { %529 = vadd.xlane.f32.xlu1 %v12518_v12  ;;  %v12539_v30 = vsub.f32 %v11998_v45, %v580_v6  ;;  %v8829_v45 = vmul.f32 -1.442695, %v2262_v9  ;;  %v12582_v9 = vld [vmem:[%s11717_s13 + $0xc0] sm:$0xff] }
 0x320   : > { %v12521_v54 = vpack.c.bf16 %v3752_v27, %v3751_v39  ;;  %v9814_v58 = vpop.eup %9813 }
 0x321   : > { %v9816_v31 = vpop.eup %9815  ;;  %v12541_v50 = vadd.f32 1.0, %v9814_v58  ;;  %v644_v21 = vmul.f32 %v12539_v30, %v12539_v30 }
 0x322   : > { %20612 = vst [vmem:[#allocation19_spill] sm:$0xff] %v12521_v54  ;;  %4005 = vmatmul.bf16.gmra.mxu3 %v12521_v54  ;;  %4094 = vmatmul.bf16.gmra.mxu0 %v12521_v54  ;;  %v2263_v8 = vpop.f32.mrf.mxu0  ;;  %v12544_v3 = vadd.f32 1.0, %v9816_v31 }
 0x323   : > { %4183 = vmatmul.bf16.gmra.mxu1 %v12521_v54  ;;  %4272 = vmatmul.bf16.gmra.mxu2 %v12521_v54  ;;  %v2264_v34 = vadd.f32 %v2263_v8, %v11915_v26  ;;  %9817 = vrcp.f32 %v12541_v50  ;;  %vm2722_vm6 = vweird.f32 %v12541_v50 }
 0x324   : > { %9819 = vrcp.f32 %v12544_v3  ;;  %vm2737_vm8 = vweird.f32 %v12544_v3 }
 0x325   : > { %v8830_v4 = vmul.f32 -1.442695, %v2264_v34 }
 0x327   : > { %690 = vadd.xlane.f32.xlu1 %v643_v1 }
 0x329   : > { %v12552_v14 = vpop.eup %9817 }
 0x32a   : > { %v12558_v37 = vpop.eup %9819  ;;  %v2718_v41 = vmul.f32 %v12552_v14, %v12541_v50  ;;  %vm2723_vm7 = vweird.f32 %v12552_v14 }
 0x32b   : > { %v2733_v24 = vmul.f32 %v12558_v37, %v12544_v3  ;;  %vm2738_vm9 = vweird.f32 %v12558_v37  ;;  %vm12636_vm10 = vmor %vm2722_vm6, %vm2723_vm7 }
 0x32c   : > { %v2719_v16 = vsub.f32 1.0, %v2718_v41  ;;  %vm12669_vm13 = vmor %vm2737_vm8, %vm2738_vm9 }
 0x32d   : > { %v2734_v8 = vsub.f32 1.0, %v2733_v24 }
 0x32f   : > { %v673_v48 = vpop.xlane.xlu2 %672  ;;  %692 = vadd.xlane.f32.xlu1 %v644_v21 }
 0x330   : > { %v730_v60 = vmul.f32 %v673_v48, %v11819_v57 }
 0x332   : > { %v762_v0 = vadd.f32 1e-05, %v730_v60 }
 0x334   : > { %9821 = vrsqrt.f32 %v762_v0  ;;  %vm854_vm5 = vweird.f32 %v762_v0 }
 0x335   : > { %9823 = vpow2.f32 %v8829_v45 }
 0x336   : > { %9825 = vpow2.f32 %v8830_v4  ;;  %v2720_v4 = vmul.f32 %v12552_v14, %v2719_v16 }
 0x337   : > { %v518_v19 = vpop.xlane.xlu2 %517  ;;  %v675_v44 = vpop.xlane.xlu1 %674  ;;  %539 = vadd.xlane.f32.xlu1 %v12556_v13 }
 0x338   : > { %v576_v32 = vmul.f32 %v11819_v57, %v518_v19  ;;  %v731_v51 = vmul.f32 %v675_v44, %v11819_v57  ;;  %v2728_v44 = vand.u32 2147483648, %v12541_v50 }
 0x33a   : > { %v12561_v46 = vpop.eup %9821  ;;  %v12564_v49 = vsub.f32 %v12108_v22, %v576_v32  ;;  %v12569_v27 = vadd.f32 1e-05, %v731_v51  ;;  %v12598_v32 = vld [vmem:[%s11717_s13 + $0x98] sm:$0xff]  ;;  %v12601_v51 = vpop.f32.mrf.mxu1 }
 0x33b   : > { %v849_v56 = vmul.f32 %v12561_v46, %v762_v0  ;;  %v9824_v39 = vpop.eup %9823  ;;  %vm855_vm4 = vweird.f32 %v12561_v46 }
 0x33c   : > { %v640_v25 = vmul.f32 %v12564_v49, %v12564_v49  ;;  %9827 = vrsqrt.f32 %v12569_v27  ;;  %v9826_v23 = vpop.eup %9825  ;;  %v12578_v1 = vadd.f32 1.0, %v9824_v39  ;;  %v2735_v39 = vmul.f32 %v12558_v37, %v2734_v8  ;;  %vm12618_vm0 = vmor %vm854_vm5, %vm855_vm4 }
 0x33d   : > { %v850_v22 = vmul.f32 %v12561_v46, %v849_v56  ;;  %v12585_v60 = vadd.f32 1.0, %v9826_v23  ;;  %v12659_v23 = vld [vmem:[%s11717_s13 + $0xa0] sm:$0xff]  ;;  %vm864_vm14 = vweird.f32 %v12569_v27 }
 0x33e   : > { %684 = vadd.xlane.f32.xlu2 %v640_v25  ;;  %9829 = vrcp.f32 %v12578_v1  ;;  %v2726_v25 = vand.u32 2147483647, %v12541_v50  ;;  %v2736_v8 = vadd.f32 %v12558_v37, %v2735_v39  ;;  %v12648_v39 = vpop.f32.mrf.mxu3 }
 0x33f   : > { %v851_v38 = vmul.f32 0.5, %v850_v22  ;;  %v677_v6 = vpop.xlane.xlu2 %676  ;;  %v520_v31 = vpop.xlane.xlu1 %519  ;;  %541 = vadd.xlane.f32.xlu1 %v12582_v9  ;;  %v2721_v22 = vadd.f32 %v12552_v14, %v2720_v4 }
 0x340   : > { %v732_v58 = vmul.f32 %v677_v6, %v11819_v57  ;;  %v577_v21 = vmul.f32 %v11819_v57, %v520_v31  ;;  %vm12641_vm11 = vcmp.eq.f32.partialorder %v2726_v25, 8.507059e+37 }
 0x341   : > { %v852_v48 = vsub.f32 1.5, %v851_v38  ;;  %v2729_v38 = vor.u32 1.1754944e-38, %v2728_v44  ;;  %v2725_v50 = vsel %vm12636_vm10, %v12552_v14, %v2721_v22  ;;  %v2740_v22 = vsel %vm12669_vm13, %v12558_v37, %v2736_v8 }
 0x342   : > { %v12587_v34 = vadd.f32 1e-05, %v732_v58  ;;  %v12589_v45 = vpop.eup %9827  ;;  %v12594_v19 = vsub.f32 %v12188_v17, %v577_v21  ;;  %vm2767_vm10 = vweird.f32 %v12585_v60 }
 0x343   : > { %v853_v41 = vmul.f32 %v12561_v46, %v852_v48  ;;  %v859_v56 = vmul.f32 %v12589_v45, %v12569_v27  ;;  %v2741_v48 = vand.u32 2147483647, %v12544_v3  ;;  %vm865_vm12 = vweird.f32 %v12589_v45  ;;  %v2347_v27 = vpop.f32.mrf.mxu1 }
 0x344   : > { %9831 = vrsqrt.f32 %v12587_v34  ;;  %v641_v17 = vmul.f32 %v12594_v19, %v12594_v19  ;;  %v12626_v31 = vpop.eup %9829  ;;  %vm866_vm1 = vmor %vm864_vm14, %vm865_vm12  ;;  %v2730_v4 = vsel %vm12641_vm11, %v2729_v38, %v2725_v50  ;;  %vm874_vm3 = vweird.f32 %v12587_v34 }
 0x345   : > { %9833 = vrcp.f32 %v12585_v60  ;;  %v860_v24 = vmul.f32 %v12589_v45, %v859_v56  ;;  %v857_v0 = vsel %vm12618_vm0, %v12561_v46, %v853_v41  ;;  %v2743_v46 = vand.u32 2147483648, %v12544_v3 }
 0x346   : > { %531 = vadd.xlane.f32.xlu2 %v12598_v32  ;;  %686 = vadd.xlane.f32.xlu0 %v641_v17  ;;  %v1114_v17 = vmul.f32 %v857_v0, %v12023_v61  ;;  %vm12680_vm15 = vcmp.eq.f32.partialorder %v2741_v48, 8.507059e+37  ;;  %vm2753_vm4 = vweird.f32 %v12626_v31  ;;  %vm2752_vm0 = vweird.f32 %v12578_v1 }
 0x347   : > { %v522_v16 = vpop.xlane.xlu2 %521  ;;  %v861_v6 = vmul.f32 0.5, %v860_v24  ;;  %v679_v58 = vpop.xlane.xlu1 %678  ;;  %vm12736_vm9 = vmor %vm2752_vm0, %vm2753_vm4 }
 0x348   : > { %v578_v21 = vmul.f32 %v11819_v57, %v522_v16  ;;  %v733_v25 = vmul.f32 %v679_v58, %v11819_v57 }
 0x349   : > { %v862_v41 = vsub.f32 1.5, %v861_v6  ;;  %v2748_v6 = vmul.f32 %v12626_v31, %v12578_v1 }
 0x34a   : > { %v12646_v56 = vpop.eup %9831  ;;  %v12655_v24 = vsub.f32 %v12262_v33, %v578_v21  ;;  %v765_v3 = vadd.f32 1e-05, %v733_v25  ;;  %v12688_v21 = vpop.f32.mrf.mxu2  ;;  %v3721_v25 = vmul.f32 %v2730_v4, %v1114_v17  ;;  %v12704_v17 = vld [vmem:[%s11717_s13 + $0xa8] sm:$0xff] }
 0x34b   : > { %v12661_v16 = vpop.eup %9833  ;;  %v863_v61 = vmul.f32 %v12589_v45, %v862_v41  ;;  %v869_v33 = vmul.f32 %v12646_v56, %v12587_v34  ;;  %20624 = vst [vmem:[#allocation22_spill] sm:$0xff] %v12688_v21  ;;  %v2744_v41 = vor.u32 1.1754944e-38, %v2743_v46  ;;  %v2348_v46 = vadd.f32 %v2347_v27, %v12014_v42  ;;  %v12706_v4 = vpop.f32.mrf.mxu3 }
 0x34c   : > { %v642_v58 = vmul.f32 %v12655_v24, %v12655_v24  ;;  %v2763_v48 = vmul.f32 %v12661_v16, %v12585_v60  ;;  %9835 = vrsqrt.f32 %v765_v3  ;;  %v2749_v50 = vsub.f32 1.0, %v2748_v6  ;;  %20625 = vst [vmem:[#allocation23_spill] sm:$0xff] %v12706_v4 }
 0x34d   : > { %v867_v37 = vsel %vm866_vm1, %v12589_v45, %v863_v61  ;;  %v870_v8 = vmul.f32 %v12646_v56, %v869_v33  ;;  %v2745_v44 = vsel %vm12680_vm15, %v2744_v41, %v2740_v22  ;;  %v2346_v45 = vadd.f32 %v12601_v51, %v12014_v42 }
 0x34e   : > { %533 = vadd.xlane.f32.xlu2 %v12659_v23  ;;  %v1115_v14 = vmul.f32 %v867_v37, %v12094_v36  ;;  %688 = vadd.xlane.f32.xlu0 %v642_v58  ;;  %v2764_v21 = vsub.f32 1.0, %v2763_v48  ;;  %v2750_v0 = vmul.f32 %v12626_v31, %v2749_v50  ;;  %v2350_v58 = vpop.f32.mrf.mxu1  ;;  %vm875_vm2 = vweird.f32 %v12646_v56 }
 0x34f   : > { %v871_v38 = vmul.f32 0.5, %v870_v8  ;;  %v3753_v43 = vadd.f32 %v3721_v25, %v2346_v45  ;;  %vm12724_vm5 = vmor %vm874_vm3, %vm875_vm2  ;;  %vm884_vm6 = vweird.f32 %v765_v3  ;;  %v2756_v48 = vand.u32 2147483647, %v12578_v1  ;;  %v12742_v45 = vld [vmem:[%s11717_s13 + $0xb0] sm:$0xff] }
 0x350   : > { %v3722_v61 = vmul.f32 %v2745_v44, %v1115_v14  ;;  %v2765_v27 = vmul.f32 %v12661_v16, %v2764_v21  ;;  %vm2768_vm8 = vweird.f32 %v12661_v16  ;;  %v2773_v44 = vand.u32 2147483648, %v12585_v60 }
 0x351   : > { %v872_v33 = vsub.f32 1.5, %v871_v38  ;;  %vm2769_vm12 = vmor %vm2767_vm10, %vm2768_vm8  ;;  %vm2757_vm13 = vcmp.eq.f32.partialorder %v2756_v48, 8.507059e+37 }
 0x352   : > { %v3754_v54 = vadd.f32 %v3722_v61, %v2348_v46  ;;  %v9836_v36 = vpop.eup %9835  ;;  %v12716_v41 = vpop.f32.mrf.mxu2  ;;  %v2766_v25 = vadd.f32 %v12661_v16, %v2765_v27 }
 0x353   : > { %v873_v51 = vmul.f32 %v12646_v56, %v872_v33  ;;  %v879_v6 = vmul.f32 %v9836_v36, %v765_v3  ;;  %20627 = vst [vmem:[#allocation25_spill] sm:$0xff] %v12716_v41  ;;  %vm885_vm7 = vweird.f32 %v9836_v36  ;;  %v2771_v3 = vand.u32 2147483647, %v12585_v60  ;;  %v12750_v61 = vpop.f32.mrf.mxu3 }
 0x354   : > { %v12709_v22 = vpack.c.bf16 %v3754_v54, %v3753_v43  ;;  %v2758_v54 = vand.u32 2147483648, %v12578_v1  ;;  %v2751_v43 = vadd.f32 %v12626_v31, %v2750_v0  ;;  %vm886_vm11 = vmor %vm884_vm6, %vm885_vm7  ;;  %v2770_v33 = vsel %vm2769_vm12, %v12661_v16, %v2766_v25 }
 0x355   : > { %v880_v37 = vmul.f32 %v9836_v36, %v879_v6  ;;  %v877_v34 = vsel %vm12724_vm5, %v12646_v56, %v873_v51  ;;  %vm2772_vm14 = vcmp.eq.f32.partialorder %v2771_v3, 8.507059e+37 }
 0x356   : > { %20626 = vst [vmem:[#allocation24_spill] sm:$0xff] %v12709_v22  ;;  %535 = vadd.xlane.f32.xlu0 %v12704_v17  ;;  %4010 = vmatmul.bf16.gmra.mxu3 %v12709_v22  ;;  %v2755_v56 = vsel %vm12736_vm9, %v12626_v31, %v2751_v43  ;;  %v1116_v1 = vmul.f32 %v877_v34, %v12142_v18  ;;  %v2759_v46 = vor.u32 1.1754944e-38, %v2758_v54  ;;  %v2352_v51 = vpop.f32.mrf.mxu1  ;;  %v2774_v31 = vor.u32 1.1754944e-38, %v2773_v44 }
 0x357   : > { %4099 = vmatmul.bf16.gmra.mxu0 %v12709_v22  ;;  %4188 = vmatmul.bf16.gmra.mxu1 %v12709_v22  ;;  %v881_v8 = vmul.f32 0.5, %v880_v37  ;;  %v2351_v54 = vadd.f32 %v2350_v58, %v12014_v42  ;;  %v2353_v43 = vadd.f32 %v2352_v51, %v12014_v42 }
 0x358   : > { %4277 = vmatmul.bf16.gmra.mxu2 %v12709_v22  ;;  %v2760_v6 = vsel %vm2757_vm13, %v2759_v46, %v2755_v56  ;;  %v2775_v37 = vsel %vm2772_vm14, %v2774_v31, %v2770_v33 }
 0x359   : > { %v882_v38 = vsub.f32 1.5, %v881_v8  ;;  %v3723_v18 = vmul.f32 %v2760_v6, %v1116_v1 }
 0x35a   : > { %v12754_v0 = vpop.f32.mrf.mxu2 }
 0x35b   : > { %v883_v50 = vmul.f32 %v9836_v36, %v882_v38  ;;  %20632 = vst [vmem:[#allocation26_spill] sm:$0xff] %v12754_v0  ;;  %v3755_v34 = vadd.f32 %v3723_v18, %v2351_v54  ;;  %v12761_v48 = vpop.f32.mrf.mxu3 }
 0x35c   : > { %20634 = vst [vmem:[#allocation28_spill] sm:$0xff] %v12761_v48 }
 0x35d   : > { %v887_v27 = vsel %vm886_vm11, %v9836_v36, %v883_v50 }
 0x35e   : > { %537 = vadd.xlane.f32.xlu0 %v12742_v45  ;;  %v1117_v60 = vmul.f32 %v887_v27, %v12225_v40  ;;  %v2266_v40 = vpop.f32.mrf.mxu0 }
 0x35f   : > { %v2267_v25 = vadd.f32 %v2266_v40, %v11915_v26 }
 0x360   : > { %v3724_v21 = vmul.f32 %v2775_v37, %v1117_v60 }
 0x361   : > { %v8831_v44 = vmul.f32 -1.442695, %v2267_v25 }
 0x362   : > { %v3756_v16 = vadd.f32 %v3724_v21, %v2353_v43  ;;  %v12765_v36 = vpop.f32.mrf.mxu2 }
 0x363   : > { %20635 = vst [vmem:[#allocation29_spill] sm:$0xff] %v12765_v36  ;;  %9837 = vpow2.f32 %v8831_v44 }
 0x364   : > { %v12759_v8 = vpack.c.bf16 %v3756_v16, %v3755_v34 }
 0x366   : > { %20633 = vst [vmem:[#allocation27_spill] sm:$0xff] %v12759_v8  ;;  %4015 = vmatmul.bf16.gmra.mxu3 %v12759_v8  ;;  %v2268_v58 = vpop.f32.mrf.mxu0 }
 0x367   : > { %4104 = vmatmul.bf16.gmra.mxu0 %v12759_v8  ;;  %4193 = vmatmul.bf16.gmra.mxu1 %v12759_v8  ;;  %v2269_v14 = vadd.f32 %v2268_v58, %v11915_v26 }
 0x368   : > { %4282 = vmatmul.bf16.gmra.mxu2 %v12759_v8 }
 0x369   : > { %v8832_v56 = vmul.f32 -1.442695, %v2269_v14  ;;  %v9838_v46 = vpop.eup %9837 }
 0x36a   : > { %v2605_v33 = vadd.f32 1.0, %v9838_v46  ;;  %v2355_v46 = vpop.f32.mrf.mxu1  ;;  %v12801_v36 = vpop.f32.mrf.mxu2 }
 0x36b   : > { %9839 = vpow2.f32 %v8832_v56  ;;  %20641 = vst [vmem:[#allocation31_spill] sm:$0xff] %v12801_v36 }
 0x36c   : > { %vm2782_vm6 = vweird.f32 %v2605_v33 }
 0x371   : > { %v9840_v50 = vpop.eup %9839 }
 0x372   : > { %v12772_v51 = vadd.f32 1.0, %v9840_v50 }
 0x374   : > { %vm2797_vm8 = vweird.f32 %v12772_v51 }
 0x382   : > { %v681_v38 = vpop.xlane.xlu1 %680 }
 0x383   : > { %v734_v1 = vmul.f32 %v681_v38, %v11819_v57 }
 0x385   : > { %v766_v3 = vadd.f32 1e-05, %v734_v1 }
 0x387   : > { %9841 = vrsqrt.f32 %v766_v3  ;;  %vm894_vm15 = vweird.f32 %v766_v3 }
 0x388   : > { %9843 = vrcp.f32 %v2605_v33 }
 0x389   : > { %9845 = vrcp.f32 %v12772_v51 }
 0x38a   : > { %v683_v6 = vpop.xlane.xlu2 %682  ;;  %v528_v21 = vpop.xlane.xlu1 %527 }
 0x38b   : > { %v735_v18 = vmul.f32 %v683_v6, %v11819_v57  ;;  %v581_v58 = vmul.f32 %v11819_v57, %v528_v21 }
 0x38d   : > { %v9842_v31 = vpop.eup %9841  ;;  %v767_v60 = vadd.f32 1e-05, %v735_v18  ;;  %v12779_v56 = vsub.f32 %v12479_v52, %v581_v58  ;;  %v2357_v18 = vpop.f32.mrf.mxu1 }
 0x38e   : > { %v889_v27 = vmul.f32 %v9842_v31, %v766_v3  ;;  %v9844_v37 = vpop.eup %9843  ;;  %vm895_vm1 = vweird.f32 %v9842_v31 }
 0x38f   : > { %v9846_v43 = vpop.eup %9845  ;;  %v2778_v34 = vmul.f32 %v9844_v37, %v2605_v33  ;;  %9847 = vrsqrt.f32 %v767_v60  ;;  %vm12781_vm2 = vmor %vm894_vm15, %vm895_vm1  ;;  %vm2783_vm3 = vweird.f32 %v9844_v37  ;;  %vm904_vm4 = vweird.f32 %v767_v60 }
 0x390   : > { %v890_v54 = vmul.f32 %v9842_v31, %v889_v27  ;;  %v2793_v40 = vmul.f32 %v9846_v43, %v12772_v51  ;;  %vm2798_vm7 = vweird.f32 %v9846_v43  ;;  %vm12789_vm0 = vmor %vm2782_vm6, %vm2783_vm3 }
 0x391   : > { %v2779_v25 = vsub.f32 1.0, %v2778_v34  ;;  %v2788_v34 = vand.u32 2147483648, %v2605_v33  ;;  %vm2799_vm10 = vmor %vm2797_vm8, %vm2798_vm7 }
 0x392   : > { %v891_v16 = vmul.f32 0.5, %v890_v54  ;;  %v2794_v38 = vsub.f32 1.0, %v2793_v40  ;;  %v645_v54 = vmul.f32 %v12779_v56, %v12779_v56  ;;  %v2786_v40 = vand.u32 2147483647, %v2605_v33 }
 0x393   : > { %v2780_v1 = vmul.f32 %v9844_v37, %v2779_v25  ;;  %v2789_v33 = vor.u32 1.1754944e-38, %v2788_v34  ;;  %v2356_v34 = vadd.f32 %v2355_v46, %v12014_v42  ;;  %v12819_v46 = vpop.f32.mrf.mxu2 }
 0x394   : > { %v892_v14 = vsub.f32 1.5, %v891_v16  ;;  %v2795_v27 = vmul.f32 %v9846_v43, %v2794_v38  ;;  %694 = vadd.xlane.f32.xlu2 %v645_v54  ;;  %vm2787_vm11 = vcmp.eq.f32.partialorder %v2786_v40, 8.507059e+37  ;;  %20644 = vst [vmem:[#allocation34_spill] sm:$0xff] %v12819_v46 }
 0x395   : > { %v9848_v44 = vpop.eup %9847  ;;  %v2781_v16 = vadd.f32 %v9844_v37, %v2780_v1 }
 0x396   : > { %v893_v50 = vmul.f32 %v9842_v31, %v892_v14  ;;  %v899_v6 = vmul.f32 %v9848_v44, %v767_v60  ;;  %vm905_vm5 = vweird.f32 %v9848_v44  ;;  %v2796_v58 = vadd.f32 %v9846_v43, %v2795_v27 }
 0x397   : > { %v2803_v14 = vand.u32 2147483648, %v12772_v51  ;;  %v2785_v1 = vsel %vm12789_vm0, %v9844_v37, %v2781_v16  ;;  %v2801_v60 = vand.u32 2147483647, %v12772_v51  ;;  %vm906_vm9 = vmor %vm904_vm4, %vm905_vm5  ;;  %v530_v37 = vpop.xlane.xlu1 %529  ;;  %v2358_v16 = vadd.f32 %v2357_v18, %v12014_v42 }
 0x398   : > { %v900_v21 = vmul.f32 %v9848_v44, %v899_v6  ;;  %v897_v52 = vsel %vm12781_vm2, %v9842_v31, %v893_v50  ;;  %v12799_v6 = vpop.f32.mrf.mxu3  ;;  %v2800_v27 = vsel %vm2799_vm10, %v9846_v43, %v2796_v58  ;;  %v2790_v54 = vsel %vm2787_vm11, %v2789_v33, %v2785_v1  ;;  %v2271_v43 = vpop.f32.mrf.mxu0 }
 0x399   : > { %v1118_v31 = vmul.f32 %v897_v52, %v12452_v28  ;;  %20640 = vst [vmem:[#allocation30_spill] sm:$0xff] %v12799_v6  ;;  %vm2802_vm12 = vcmp.eq.f32.partialorder %v2801_v60, 8.507059e+37  ;;  %v582_v40 = vmul.f32 %v11819_v57, %v530_v37  ;;  %v12823_v60 = vld [vmem:[%s11717_s13 + $0xc8] sm:$0xff]  ;;  %v2272_v33 = vadd.f32 %v2271_v43, %v11915_v26 }
 0x39a   : > { %v901_v3 = vmul.f32 0.5, %v900_v21  ;;  %v2804_v21 = vor.u32 1.1754944e-38, %v2803_v14 }
 0x39b   : > { %v3725_v25 = vmul.f32 %v2790_v54, %v1118_v31  ;;  %v8833_v18 = vmul.f32 -1.442695, %v2272_v33  ;;  %v12984_v7 = vpop.f32.mrf.mxu2 }
 0x39c   : > { %v902_v38 = vsub.f32 1.5, %v901_v3  ;;  %v2805_v51 = vsel %vm2802_vm12, %v2804_v21, %v2800_v27  ;;  %v12831_v21 = vld [vmem:[%s11717_s13 + $0xd0] sm:$0xff]  ;;  %20650 = vst [vmem:[#allocation36_spill] sm:$0xff] %v12984_v7 }
 0x39d   : > { %v3757_v58 = vadd.f32 %v3725_v25, %v2356_v34  ;;  %9849 = vpow2.f32 %v8833_v18 }
 0x39e   : > { %v903_v50 = vmul.f32 %v9848_v44, %v902_v38 }
 0x39f   : > { %v691_v31 = vpop.xlane.xlu1 %690 }
 0x3a0   : > { %v907_v3 = vsel %vm906_vm9, %v9848_v44, %v903_v50  ;;  %v12808_v44 = vsub.f32 %v12518_v12, %v582_v40  ;;  %v12814_v1 = vpop.f32.mrf.mxu3  ;;  %v2273_v12 = vpop.f32.mrf.mxu0 }
 0x3a1   : > { %v1119_v28 = vmul.f32 %v907_v3, %v12470_v15  ;;  %20643 = vst [vmem:[#allocation33_spill] sm:$0xff] %v12814_v1  ;;  %v2274_v27 = vadd.f32 %v2273_v12, %v11915_v26 }
 0x3a2   : > { %v646_v15 = vmul.f32 %v12808_v44, %v12808_v44 }
 0x3a3   : > { %v3726_v52 = vmul.f32 %v2805_v51, %v1119_v28  ;;  %v8834_v25 = vmul.f32 -1.442695, %v2274_v27  ;;  %v9850_v51 = vpop.eup %9849 }
 0x3a4   : > { %696 = vadd.xlane.f32.xlu2 %v646_v15 }
 0x3a5   : > { %v3758_v14 = vadd.f32 %v3726_v52, %v2358_v16  ;;  %9851 = vpow2.f32 %v8834_v25 }
 0x3a7   : > { %v12810_v38 = vpack.c.bf16 %v3758_v14, %v3757_v58  ;;  %v12827_v50 = vpop.xlane.xlu1 %692  ;;  %v12837_v14 = vadd.f32 1.0, %v9850_v51 }
 0x3a8   : > { %v2276_v54 = vpop.f32.mrf.mxu0 }
 0x3a9   : > { %20642 = vst [vmem:[#allocation32_spill] sm:$0xff] %v12810_v38  ;;  %4020 = vmatmul.bf16.gmra.mxu3 %v12810_v38  ;;  %4109 = vmatmul.bf16.gmra.mxu0 %v12810_v38  ;;  %v2277_v34 = vadd.f32 %v2276_v54, %v11915_v26  ;;  %9853 = vrcp.f32 %v12837_v14  ;;  %vm2812_vm14 = vweird.f32 %v12837_v14  ;;  %v2816_v6 = vand.u32 2147483647, %v12837_v14 }
 0x3aa   : > { %4198 = vmatmul.bf16.gmra.mxu1 %v12810_v38  ;;  %4287 = vmatmul.bf16.gmra.mxu2 %v12810_v38 }
 0x3ab   : > { %v9852_v58 = vpop.eup %9851  ;;  %v8835_v12 = vmul.f32 -1.442695, %v2277_v34  ;;  %vm2817_vm8 = vcmp.eq.f32.partialorder %v2816_v6, 8.507059e+37 }
 0x3ac   : > { %543 = vadd.xlane.f32.xlu2 %v12823_v60  ;;  %v12842_v18 = vadd.f32 1.0, %v9852_v58 }
 0x3ad   : > { %9855 = vpow2.f32 %v8835_v12 }
 0x3ae   : > { %vm2827_vm2 = vweird.f32 %v12842_v18  ;;  %v2831_v53 = vand.u32 2147483647, %v12842_v18 }
 0x3af   : > { %v540_v37 = vpop.xlane.xlu1 %539 }
 0x3b0   : > { %v2278_v16 = vpop.f32.mrf.mxu0  ;;  %v587_v43 = vmul.f32 %v11819_v57, %v540_v37  ;;  %vm2832_vm10 = vcmp.eq.f32.partialorder %v2831_v53, 8.507059e+37 }
 0x3b1   : > { %v685_v28 = vpop.xlane.xlu2 %684  ;;  %v2279_v15 = vadd.f32 %v2278_v16, %v11915_v26 }
 0x3b2   : > { %v736_v52 = vmul.f32 %v685_v28, %v11819_v57  ;;  %v12845_v25 = vsub.f32 %v12556_v13, %v587_v43  ;;  %v739_v28 = vmul.f32 %v691_v31, %v11819_v57  ;;  %v12857_v43 = vpop.eup %9853 }
 0x3b3   : > { %v8836_v54 = vmul.f32 -1.442695, %v2279_v15  ;;  %v9856_v58 = vpop.eup %9855  ;;  %vm2813_vm1 = vweird.f32 %v12857_v43 }
 0x3b4   : > { %545 = vadd.xlane.f32.xlu2 %v12831_v21  ;;  %v12840_v27 = vadd.f32 1e-05, %v736_v52  ;;  %v651_v51 = vmul.f32 %v12845_v25, %v12845_v25  ;;  %v12855_v52 = vadd.f32 1e-05, %v739_v28  ;;  %v12883_v36 = vadd.f32 1.0, %v9856_v58  ;;  %vm12967_vm5 = vmor %vm2812_vm14, %vm2813_vm1 }
 0x3b6   : > { %9857 = vrsqrt.f32 %v12840_v27  ;;  %vm914_vm15 = vweird.f32 %v12840_v27  ;;  %vm944_vm11 = vweird.f32 %v12855_v52 }
 0x3b7   : > { %v542_v37 = vpop.xlane.xlu1 %541  ;;  %9859 = vrcp.f32 %v12842_v18 }
 0x3b8   : > { %9861 = vpow2.f32 %v8836_v54  ;;  %v588_v34 = vmul.f32 %v11819_v57, %v542_v37 }
 0x3b9   : > { %v687_v3 = vpop.xlane.xlu0 %686  ;;  %v532_v33 = vpop.xlane.xlu2 %531  ;;  %9863 = vrsqrt.f32 %v12855_v52 }
 0x3ba   : > { %v583_v13 = vmul.f32 %v11819_v57, %v532_v33  ;;  %v12860_v31 = vsub.f32 %v12582_v9, %v588_v34  ;;  %v737_v54 = vmul.f32 %v687_v3, %v11819_v57  ;;  %v2808_v33 = vmul.f32 %v12857_v43, %v12837_v14 }
 0x3bc   : > { %706 = vadd.xlane.f32.xlu2 %v651_v51  ;;  %v12863_v15 = vsub.f32 %v12598_v32, %v583_v13  ;;  %v12865_v46 = vpop.eup %9857  ;;  %v652_v28 = vmul.f32 %v12860_v31, %v12860_v31  ;;  %v12877_v51 = vadd.f32 1e-05, %v737_v54 }
 0x3bd   : > { %v12868_v37 = vpop.eup %9859  ;;  %v909_v9 = vmul.f32 %v12865_v46, %v12840_v27  ;;  %vm915_vm13 = vweird.f32 %v12865_v46 }
 0x3be   : > { %v9862_v32 = vpop.eup %9861  ;;  %v647_v34 = vmul.f32 %v12863_v15, %v12863_v15  ;;  %v2823_v38 = vmul.f32 %v12868_v37, %v12842_v18  ;;  %9865 = vrsqrt.f32 %v12877_v51  ;;  %vm12943_vm3 = vmor %vm914_vm15, %vm915_vm13  ;;  %vm2828_vm4 = vweird.f32 %v12868_v37 }
 0x3bf   : > { %v910_v0 = vmul.f32 %v12865_v46, %v909_v9  ;;  %v12890_v54 = vadd.f32 1.0, %v9862_v32  ;;  %v12900_v22 = vpop.eup %9863  ;;  %9867 = vrcp.f32 %v12883_v36  ;;  %vm12988_vm7 = vmor %vm2827_vm2, %vm2828_vm4  ;;  %vm924_vm0 = vweird.f32 %v12877_v51 }
 0x3c0   : > { %698 = vadd.xlane.f32.xlu0 %v647_v34  ;;  %v2824_v34 = vsub.f32 1.0, %v2823_v38  ;;  %v939_v38 = vmul.f32 %v12900_v22, %v12855_v52  ;;  %vm945_vm12 = vweird.f32 %v12900_v22 }
 0x3c1   : > { %v689_v40 = vpop.xlane.xlu0 %688  ;;  %v534_v12 = vpop.xlane.xlu2 %533  ;;  %v911_v8 = vmul.f32 0.5, %v910_v0  ;;  %vm13020_vm14 = vmor %vm944_vm11, %vm945_vm12 }
 0x3c2   : > { %v584_v3 = vmul.f32 %v11819_v57, %v534_v12  ;;  %v738_v13 = vmul.f32 %v689_v40, %v11819_v57  ;;  %v2809_v40 = vsub.f32 1.0, %v2808_v33  ;;  %v12907_v33 = vpop.f32.mrf.mxu1 }
 0x3c3   : > { %v912_v59 = vsub.f32 1.5, %v911_v8 }
 0x3c4   : > { %708 = vadd.xlane.f32.xlu2 %v652_v28  ;;  %v12893_v12 = vsub.f32 %v12659_v23, %v584_v3  ;;  %v12895_v58 = vadd.f32 1e-05, %v738_v13  ;;  %v2818_v23 = vand.u32 2147483648, %v12837_v14  ;;  %v12913_v28 = vpop.eup %9865  ;;  %v2810_v8 = vmul.f32 %v12857_v43, %v2809_v40 }
 0x3c5   : > { %v913_v32 = vmul.f32 %v12865_v46, %v912_v59  ;;  %v919_v3 = vmul.f32 %v12913_v28, %v12877_v51  ;;  %v12929_v40 = vpop.eup %9867  ;;  %vm925_vm6 = vweird.f32 %v12913_v28 }
 0x3c6   : > { %9869 = vrsqrt.f32 %v12895_v58  ;;  %v648_v0 = vmul.f32 %v12893_v12, %v12893_v12  ;;  %v2819_v1 = vor.u32 1.1754944e-38, %v2818_v23  ;;  %v2838_v11 = vmul.f32 %v12929_v40, %v12883_v36  ;;  %vm926_vm9 = vmor %vm924_vm0, %vm925_vm6 }
 0x3c7   : > { %9871 = vrcp.f32 %v12890_v54  ;;  %v920_v59 = vmul.f32 %v12913_v28, %v919_v3  ;;  %v917_v23 = vsel %vm12943_vm3, %v12865_v46, %v913_v32  ;;  %v2833_v32 = vand.u32 2147483648, %v12842_v18 }
 0x3c8   : > { %700 = vadd.xlane.f32.xlu0 %v648_v0  ;;  %v1120_v48 = vmul.f32 %v917_v23, %v12564_v49  ;;  %vm934_vm15 = vweird.f32 %v12895_v58  ;;  %vm2843_vm1 = vweird.f32 %v12929_v40  ;;  %vm2842_vm3 = vweird.f32 %v12883_v36 }
 0x3c9   : > { %v536_v16 = vpop.xlane.xlu0 %535  ;;  %vm2857_vm6 = vweird.f32 %v12890_v54 }
 0x3ca   : > { %v585_v41 = vmul.f32 %v11819_v57, %v536_v16 }
 0x3cc   : > { %v12898_v9 = vsub.f32 %v12704_v17, %v585_v41  ;;  %555 = vadd.xlane.f32.xlu2 %v12927_v55 }
 0x3ce   : > { %v649_v17 = vmul.f32 %v12898_v9, %v12898_v9 }
 0x3d0   : > { %702 = vadd.xlane.f32.xlu1 %v649_v17  ;;  %v12935_v17 = vpop.eup %9869 }
 0x3d1   : > { %v538_v16 = vpop.xlane.xlu0 %537  ;;  %v12947_v27 = vpop.eup %9871  ;;  %v929_v3 = vmul.f32 %v12935_v17, %v12895_v58  ;;  %vm935_vm13 = vweird.f32 %v12935_v17 }
 0x3d2   : > { %v586_v41 = vmul.f32 %v11819_v57, %v538_v16  ;;  %v2825_v16 = vmul.f32 %v12868_v37, %v2824_v34  ;;  %v2811_v34 = vadd.f32 %v12857_v43, %v2810_v8  ;;  %vm13030_vm2 = vmor %vm934_vm15, %vm935_vm13  ;;  %vm2858_vm4 = vweird.f32 %v12947_v27 }
 0x3d3   : > { %v930_v0 = vmul.f32 %v12935_v17, %v929_v3 }
 0x3d4   : > { %v12923_v13 = vsub.f32 %v12742_v45, %v586_v41  ;;  %v940_v45 = vmul.f32 %v12900_v22, %v939_v38  ;;  %v921_v41 = vmul.f32 0.5, %v920_v59  ;;  %v12956_v38 = vpop.f32.mrf.mxu3  ;;  %v2826_v2 = vadd.f32 %v12868_v37, %v2825_v16 }
 0x3d5   : > { %20647 = vst [vmem:[#allocation35_spill] sm:$0xff] %v12956_v38  ;;  %v12975_v38 = vld [vmem:[%s11717_s13 + $0xd8] sm:$0xff]  ;;  %v2853_v16 = vmul.f32 %v12947_v27, %v12890_v54  ;;  %v2815_v14 = vsel %vm12967_vm5, %v12857_v43, %v2811_v34  ;;  %v931_v46 = vmul.f32 0.5, %v930_v0  ;;  %v2839_v43 = vsub.f32 1.0, %v2838_v11  ;;  %vm13047_vm5 = vmor %vm2842_vm3, %vm2843_vm1 }
 0x3d6   : > { %v650_v8 = vmul.f32 %v12923_v13, %v12923_v13  ;;  %v922_v59 = vsub.f32 1.5, %v921_v41  ;;  %v2362_v41 = vpop.f32.mrf.mxu1  ;;  %v941_v35 = vmul.f32 0.5, %v940_v45  ;;  %v2830_v49 = vsel %vm12988_vm7, %v12868_v37, %v2826_v2  ;;  %547 = vadd.xlane.f32.xlu0 %v12975_v38  ;;  %vm2859_vm7 = vmor %vm2857_vm6, %vm2858_vm4 }
 0x3d7   : > { %v2820_v18 = vsel %vm2817_vm8, %v2819_v1, %v2815_v14  ;;  %v2834_v45 = vor.u32 1.1754944e-38, %v2833_v32  ;;  %v932_v23 = vsub.f32 1.5, %v931_v46  ;;  %v2854_v51 = vsub.f32 1.0, %v2853_v16  ;;  %v13035_v46 = vpop.f32.mrf.mxu2 }
 0x3d8   : > { %v923_v4 = vmul.f32 %v12913_v28, %v922_v59  ;;  %704 = vadd.xlane.f32.xlu1 %v650_v8  ;;  %v3727_v8 = vmul.f32 %v2820_v18, %v1120_v48  ;;  %v2361_v2 = vadd.f32 %v12907_v33, %v12014_v42  ;;  %v2363_v6 = vadd.f32 %v2362_v41, %v12014_v42 }
 0x3d9   : > { %v942_v37 = vsub.f32 1.5, %v941_v35  ;;  %v2835_v59 = vsel %vm2832_vm10, %v2834_v45, %v2830_v49  ;;  %v2840_v1 = vmul.f32 %v12929_v40, %v2839_v43  ;;  %v933_v53 = vmul.f32 %v12935_v17, %v932_v23  ;;  %20658 = vst [vmem:[#allocation38_spill] sm:$0xff] %v13035_v46 }
 0x3da   : > { %v927_v34 = vsel %vm926_vm9, %v12913_v28, %v923_v4  ;;  %v13009_v28 = vld [vmem:[%s11717_s13 + $0xe8] sm:$0xff]  ;;  %v2855_v35 = vmul.f32 %v12947_v27, %v2854_v51  ;;  %v3759_v33 = vadd.f32 %v3727_v8, %v2361_v2  ;;  %v2848_v43 = vand.u32 2147483648, %v12883_v36  ;;  %v13064_v8 = vld [vmem:[%s11717_s13 + $0xf0] sm:$0xff] }
 0x3db   : > { %v1121_v11 = vmul.f32 %v927_v34, %v12594_v19  ;;  %v13014_v19 = vld [vmem:[%s11717_s13 + $0xe0] sm:$0xff]  ;;  %v943_v52 = vmul.f32 %v12900_v22, %v942_v37  ;;  %v2841_v41 = vadd.f32 %v12929_v40, %v2840_v1  ;;  %v937_v58 = vsel %vm13030_vm2, %v12935_v17, %v933_v53  ;;  %v2281_v53 = vpop.f32.mrf.mxu0  ;;  %s8576_s13 = scalar_lea.sflag [#allocation5], %s375_s21 }
 0x3dc   : > { %v13016_v48 = vpop.f32.mrf.mxu3  ;;  %v2856_v49 = vadd.f32 %v12947_v27, %v2855_v35  ;;  %v2846_v18 = vand.u32 2147483647, %v12883_v36  ;;  %v2863_v34 = vand.u32 2147483648, %v12890_v54  ;;  %v2861_v36 = vand.u32 2147483647, %v12890_v54 }
 0x3dd   : > { %v3728_v4 = vmul.f32 %v2835_v59, %v1121_v11  ;;  %v947_v17 = vsel %vm13020_vm14, %v12900_v22, %v943_v52  ;;  %v2845_v23 = vsel %vm13047_vm5, %v12929_v40, %v2841_v41  ;;  %v1122_v51 = vmul.f32 %v937_v58, %v12655_v24 }
 0x3de   : > { %v2365_v0 = vpop.f32.mrf.mxu1  ;;  %549 = vadd.xlane.f32.xlu0 %v13014_v19  ;;  %v2849_v11 = vor.u32 1.1754944e-38, %v2848_v43  ;;  %v2860_v22 = vsel %vm2859_vm7, %v12947_v27, %v2856_v49  ;;  %v1123_v2 = vmul.f32 %v947_v17, %v12525_v10  ;;  %vm2847_vm0 = vcmp.eq.f32.partialorder %v2846_v18, 8.507059e+37 }
 0x3df   : > { %v3760_v32 = vadd.f32 %v3728_v4, %v2363_v6  ;;  %v2864_v6 = vor.u32 1.1754944e-38, %v2863_v34  ;;  %vm2862_vm8 = vcmp.eq.f32.partialorder %v2861_v36, 8.507059e+37  ;;  %v13073_v24 = vpop.f32.mrf.mxu2  ;;  %v2366_v4 = vadd.f32 %v2365_v0, %v12014_v42 }
 0x3e0   : > { %551 = vadd.xlane.f32.xlu1 %v13009_v28  ;;  %v2850_v37 = vsel %vm2847_vm0, %v2849_v11, %v2845_v23  ;;  %20661 = vst [vmem:[#allocation39_spill] sm:$0xff] %v13073_v24  ;;  %v2282_v41 = vadd.f32 %v2281_v53, %v11915_v26  ;;  %v740_v49 = vmul.f32 %v12827_v50, %v11819_v57 }
 0x3e1   : > { %v13027_v14 = vpack.c.bf16 %v3760_v32, %v3759_v33  ;;  %v3729_v40 = vmul.f32 %v2850_v37, %v1122_v51  ;;  %v2865_v1 = vsel %vm2862_vm8, %v2864_v6, %v2860_v22  ;;  %v9127_v6 = vld [vmem:[%s20375_s6 + $0x1d0] sm:$0xf] }
 0x3e2   : > { %v3730_v35 = vmul.f32 %v2865_v1, %v1123_v2  ;;  %v8837_v43 = vmul.f32 -1.442695, %v2282_v41  ;;  %v772_v18 = vadd.f32 1e-05, %v740_v49  ;;  %v9488_v37 = vld [vmem:[%s20375_s6 + $0x1ec] sm:$0xf0] }
 0x3e3   : > { %20655 = vst [vmem:[#allocation37_spill] sm:$0xff] %v13027_v14  ;;  %4025 = vmatmul.bf16.gmra.mxu3 %v13027_v14  ;;  %4114 = vmatmul.bf16.gmra.mxu0 %v13027_v14  ;;  %v3761_v10 = vadd.f32 %v3729_v40, %v2366_v4  ;;  %v2283_v0 = vpop.f32.mrf.mxu0  ;;  %v9137_v1 = vld [vmem:[%s20375_s6 + $0x1f8] sm:$0xf0]  ;;  %v9486_v41 = vld [vmem:[%s20375_s6 + $0x1d4] sm:$0xf] }
 0x3e4   : > { %4203 = vmatmul.bf16.gmra.mxu1 %v13027_v14  ;;  %4292 = vmatmul.bf16.gmra.mxu2 %v13027_v14  ;;  %v13071_v54 = vpop.f32.mrf.mxu3  ;;  %v2284_v3 = vadd.f32 %v2283_v0, %v11915_v26  ;;  %9873 = vpow2.f32 %v8837_v43  ;;  %v9135_v49 = vld [vmem:[%s20375_s6 + $0x1d8] sm:$0xf]  ;;  %vm954_vm9 = vweird.f32 %v772_v18 }
 0x3e6   : > { %v2367_v59 = vpop.f32.mrf.mxu1  ;;  %v8838_v58 = vmul.f32 -1.442695, %v2284_v3  ;;  %v9129_v3 = vld [vmem:[%s20375_s6 + $0x1f0] sm:$0xf0] }
 0x3e7   : > { %v2368_v27 = vadd.f32 %v2367_v59, %v12014_v42  ;;  %v13083_v16 = vpop.f32.mrf.mxu2  ;;  %v9487_v59 = vld [vmem:[%s20375_s6 + $0x1dc] sm:$0xf] }
 0x3e8   : > { %553 = vadd.xlane.f32.xlu1 %v13064_v8  ;;  %20663 = vst [vmem:[#allocation41_spill] sm:$0xff] %v13083_v16  ;;  %9875 = vpow2.f32 %v8838_v58 }
 0x3e9   : > { %v3762_v33 = vadd.f32 %v3730_v35, %v2368_v27  ;;  %9877 = vrsqrt.f32 %v772_v18  ;;  %v9128_v27 = vor.u32 %v9488_v37, %v9127_v6 }
 0x3ea   : > { %v9874_v45 = vpop.eup %9873 }
 0x3eb   : > { %v13077_v32 = vpack.c.bf16 %v3762_v33, %v3761_v10  ;;  %v13091_v17 = vadd.f32 1.0, %v9874_v45  ;;  %v9140_v33 = vor.u32 %v9487_v59, %v9137_v1  ;;  %4535 = vmatpush.bf16.msra.mxu3 %v9128_v27  ;;  %v9489_v45 = vld [vmem:[%s20375_s6 + $0x1f4] sm:$0xf0]  ;;  %v13139_v1 = vpop.f32.mrf.mxu0 }
 0x3ec   : > { %v13079_v52 = vpop.f32.mrf.mxu3  ;;  %v9136_v6 = vor.u32 %v9489_v45, %v9135_v49 }
 0x3ed   : > { %20662 = vst [vmem:[#allocation40_spill] sm:$0xff] %v13077_v32  ;;  %9879 = vrcp.f32 %v13091_v17  ;;  %4802 = vmatpush.bf16.msra.mxu2 %v9140_v33  ;;  %vm2872_vm15 = vweird.f32 %v13091_v17 }
 0x3ee   : > { %v9876_v34 = vpop.eup %9875  ;;  %v2370_v59 = vpop.f32.mrf.mxu1  ;;  %4713 = vmatpush.bf16.msra.mxu1 %v9136_v6 }
 0x3ef   : > { %v13093_v23 = vadd.f32 1.0, %v9876_v34  ;;  %v13095_v51 = vpop.eup %9877 }
 0x3f0   : > { %v949_v11 = vmul.f32 %v13095_v51, %v772_v18  ;;  %vm955_vm10 = vweird.f32 %v13095_v51 }
 0x3f1   : > { %9881 = vrcp.f32 %v13093_v23  ;;  %vm13143_vm11 = vmor %vm954_vm9, %vm955_vm10  ;;  %vm2887_vm3 = vweird.f32 %v13093_v23 }
 0x3f2   : > { %v950_v2 = vmul.f32 %v13095_v51, %v949_v11 }
 0x3f3   : > { %4030 = vmatmul.bf16.gmra.mxu3 %v13077_v32  ;;  %4119 = vmatmul.bf16.gmra.mxu0 %v13077_v32  ;;  %v13101_v22 = vpop.eup %9879 }
 0x3f4   : > { %4208 = vmatmul.bf16.gmra.mxu1 %v13077_v32  ;;  %4297 = vmatmul.bf16.gmra.mxu2 %v13077_v32  ;;  %v2868_v53 = vmul.f32 %v13101_v22, %v13091_v17  ;;  %v951_v10 = vmul.f32 0.5, %v950_v2  ;;  %vm2873_vm12 = vweird.f32 %v13101_v22 }
 0x3f5   : > { %vm13164_vm2 = vmor %vm2872_vm15, %vm2873_vm12 }
 0x3f6   : > { %v2869_v43 = vsub.f32 1.0, %v2868_v53  ;;  %v952_v58 = vsub.f32 1.5, %v951_v10 }
 0x3f7   : > { %v13118_v4 = vpop.eup %9881 }
 0x3f8   : > { %v2883_v0 = vmul.f32 %v13118_v4, %v13093_v23  ;;  %v2870_v2 = vmul.f32 %v13101_v22, %v2869_v43  ;;  %v953_v53 = vmul.f32 %v13095_v51, %v952_v58  ;;  %vm2888_vm1 = vweird.f32 %v13118_v4 }
 0x3f9   : > { %vm13181_vm5 = vmor %vm2887_vm3, %vm2888_vm1 }
 0x3fa   : > { %v2884_v34 = vsub.f32 1.0, %v2883_v0  ;;  %v2302_v0 = vadd.f32 %v12153_v29, %v11915_v26  ;;  %v2871_v43 = vadd.f32 %v13101_v22, %v2870_v2  ;;  %v957_v49 = vsel %vm13143_vm11, %v13095_v51, %v953_v53 }
 0x3fb   : > { %v2876_v29 = vand.u32 2147483647, %v13091_v17  ;;  %v1124_v6 = vmul.f32 %v957_v49, %v12539_v30  ;;  %v2891_v53 = vand.u32 2147483647, %v13093_v23 }
 0x3fc   : > { %v2885_v10 = vmul.f32 %v13118_v4, %v2884_v34  ;;  %v8845_v30 = vmul.f32 -1.442695, %v2302_v0 }
 0x3fd   : > { %vm2877_vm6 = vcmp.eq.f32.partialorder %v2876_v29, 8.507059e+37  ;;  %vm2892_vm7 = vcmp.eq.f32.partialorder %v2891_v53, 8.507059e+37  ;;  %v2371_v29 = vadd.f32 %v2370_v59, %v12014_v42  ;;  %v9484_v59 = vld [vmem:[%s20375_s6 + $0x1ac] sm:$0xf0]  ;;  %v2287_v53 = vadd.f32 %v13139_v1, %v11915_v26 }
 0x3ff   : > { %v8839_v33 = vmul.f32 -1.442695, %v2287_v53  ;;  %v9113_v53 = vld [vmem:[%s20375_s6 + $0x1b0] sm:$0xf0] }
 0x407   : > { %v695_v36 = vpop.xlane.xlu2 %694 }
 0x408   : > { %v741_v50 = vmul.f32 %v695_v36, %v11819_v57  ;;  %v9132_v36 = vor.u32 %v9486_v41, %v9129_v3  ;;  %v2878_v3 = vand.u32 2147483648, %v13091_v17  ;;  %v2875_v17 = vsel %vm13164_vm2, %v13101_v22, %v2871_v43  ;;  %v13190_v22 = vpop.f32.mrf.mxu2 }
 0x409   : > { %20673 = vst [vmem:[#allocation43_spill] sm:$0xff] %v13190_v22  ;;  %v9485_v22 = vld [vmem:[%s20375_s6 + $0x1b4] sm:$0xf0] }
 0x40a   : > { %v773_v35 = vadd.f32 1e-05, %v741_v50  ;;  %4624 = vmatpush.bf16.msra.mxu0 %v9132_v36 }
 0x40c   : > { %9883 = vrsqrt.f32 %v773_v35  ;;  %vm964_vm13 = vweird.f32 %v773_v35 }
 0x40d   : > { %9885 = vpow2.f32 %v8845_v30 }
 0x412   : > { %v9884_v50 = vpop.eup %9883 }
 0x413   : > { %v959_v27 = vmul.f32 %v9884_v50, %v773_v35  ;;  %vm965_vm14 = vweird.f32 %v9884_v50 }
 0x414   : > { %vm13176_vm4 = vmor %vm964_vm13, %vm965_vm14 }
 0x415   : > { %v960_v41 = vmul.f32 %v9884_v50, %v959_v27  ;;  %v2879_v27 = vor.u32 1.1754944e-38, %v2878_v3  ;;  %v2288_v3 = vpop.f32.mrf.mxu0 }
 0x416   : > { %v2289_v30 = vadd.f32 %v2288_v3, %v11915_v26 }
 0x417   : > { %v13110_v40 = vpop.xlane.xlu2 %696  ;;  %v961_v45 = vmul.f32 0.5, %v960_v41  ;;  %v2880_v43 = vsel %vm2877_vm6, %v2879_v27, %v2875_v17 }
 0x418   : > { %v3731_v0 = vmul.f32 %v2880_v43, %v1124_v6  ;;  %v9886_v6 = vpop.eup %9885  ;;  %v742_v1 = vmul.f32 %v13110_v40, %v11819_v57 }
 0x419   : > { %v962_v51 = vsub.f32 1.5, %v961_v45 }
 0x41f   : > { %v544_v11 = vpop.xlane.xlu2 %543 }
 0x420   : > { %v589_v37 = vmul.f32 %v11819_v57, %v544_v11  ;;  %v2893_v11 = vand.u32 2147483648, %v13093_v23  ;;  %v2372_v23 = vpop.f32.mrf.mxu1 }
 0x422   : > { %v13148_v18 = vsub.f32 %v12823_v60, %v589_v37  ;;  %v2886_v60 = vadd.f32 %v13118_v4, %v2885_v10  ;;  %v963_v10 = vmul.f32 %v9884_v50, %v962_v51  ;;  %v2894_v45 = vor.u32 1.1754944e-38, %v2893_v11  ;;  %v13214_v37 = vpop.f32.mrf.mxu2 }
 0x423   : > { %v2373_v51 = vadd.f32 %v2372_v23, %v12014_v42  ;;  %20676 = vst [vmem:[#allocation46_spill] sm:$0xff] %v13214_v37  ;;  %v8840_v23 = vmul.f32 -1.442695, %v2289_v30  ;;  %v9119_v37 = vld [vmem:[%s20375_s6 + $0x198] sm:$0xf] }
 0x424   : > { %v653_v58 = vmul.f32 %v13148_v18, %v13148_v18  ;;  %v2890_v35 = vsel %vm13181_vm5, %v13118_v4, %v2886_v60  ;;  %v967_v49 = vsel %vm13176_vm4, %v9884_v50, %v963_v10  ;;  %v3763_v60 = vadd.f32 %v3731_v0, %v2371_v29  ;;  %v2291_v50 = vpop.f32.mrf.mxu0 }
 0x425   : > { %v2895_v36 = vsel %vm2892_vm7, %v2894_v45, %v2890_v35  ;;  %v13220_v10 = vadd.f32 1.0, %v9886_v6 }
 0x426   : > { %710 = vadd.xlane.f32.xlu0 %v653_v58  ;;  %v13188_v58 = vpop.f32.mrf.mxu3 }
 0x427   : > { %v546_v34 = vpop.xlane.xlu2 %545  ;;  %20672 = vst [vmem:[#allocation42_spill] sm:$0xff] %v13188_v58  ;;  %9887 = vrcp.f32 %v13220_v10  ;;  %vm2992_vm10 = vweird.f32 %v13220_v10 }
 0x428   : > { %v590_v2 = vmul.f32 %v11819_v57, %v546_v34  ;;  %v1125_v34 = vmul.f32 %v967_v49, %v12779_v56  ;;  %v9111_v56 = vld [vmem:[%s20375_s6 + $0x190] sm:$0xf]  ;;  %9889 = vpow2.f32 %v8839_v33  ;;  %v2292_v49 = vadd.f32 %v2291_v50, %v11915_v26  ;;  %v9483_v50 = vld [vmem:[%s20375_s6 + $0x19c] sm:$0xf] }
 0x429   : > { %v9112_v27 = vor.u32 %v9484_v59, %v9111_v56  ;;  %9891 = vpow2.f32 %v8840_v23  ;;  %v9121_v56 = vld [vmem:[%s20375_s6 + $0x1b8] sm:$0xf0]  ;;  %v9482_v59 = vld [vmem:[%s20375_s6 + $0x194] sm:$0xf] }
 0x42a   : > { %v13186_v41 = vsub.f32 %v12831_v21, %v590_v2  ;;  %v3732_v4 = vmul.f32 %v2895_v36, %v1125_v34  ;;  %v8841_v3 = vmul.f32 -1.442695, %v2292_v49  ;;  %v9124_v33 = vor.u32 %v9483_v50, %v9121_v56 }
 0x42b   : > { %4536 = vmatpush.bf16.msra.mxu3 %v9112_v27  ;;  %v9116_v30 = vor.u32 %v9482_v59, %v9113_v53 }
 0x42c   : > { %v654_v21 = vmul.f32 %v13186_v41, %v13186_v41  ;;  %v3764_v2 = vadd.f32 %v3732_v4, %v2373_v51  ;;  %v2293_v43 = vpop.f32.mrf.mxu0  ;;  %4803 = vmatpush.bf16.msra.mxu2 %v9124_v33 }
 0x42d   : > { %v2294_v45 = vadd.f32 %v2293_v43, %v11915_v26  ;;  %v13232_v34 = vpop.eup %9887  ;;  %4625 = vmatpush.bf16.msra.mxu0 %v9116_v30 }
 0x42e   : > { %712 = vadd.xlane.f32.xlu0 %v654_v21  ;;  %v13202_v17 = vpack.c.bf16 %v3764_v2, %v3763_v60  ;;  %v13204_v11 = vpop.f32.mrf.mxu3  ;;  %v13230_v21 = vadd.f32 1e-05, %v742_v1  ;;  %v9890_v29 = vpop.eup %9889  ;;  %v2988_v4 = vmul.f32 %v13232_v34, %v13220_v10  ;;  %vm2993_vm0 = vweird.f32 %v13232_v34 }
 0x42f   : > { %20675 = vst [vmem:[#allocation45_spill] sm:$0xff] %v13204_v11  ;;  %v13223_v35 = vpop.xlane.xlu2 %706  ;;  %v8842_v51 = vmul.f32 -1.442695, %v2294_v45  ;;  %v13238_v60 = vadd.f32 1.0, %v9890_v29  ;;  %v9892_v2 = vpop.eup %9891  ;;  %vm13277_vm11 = vmor %vm2992_vm10, %vm2993_vm0 }
 0x430   : > { %20674 = vst [vmem:[#allocation44_spill] sm:$0xff] %v13202_v17  ;;  %4035 = vmatmul.bf16.gmra.mxu3 %v13202_v17  ;;  %4124 = vmatmul.bf16.gmra.mxu0 %v13202_v17  ;;  %9893 = vrsqrt.f32 %v13230_v21  ;;  %v2989_v27 = vsub.f32 1.0, %v2988_v4  ;;  %v13253_v23 = vadd.f32 1.0, %v9892_v2  ;;  %vm974_vm14 = vweird.f32 %v13230_v21 }
 0x431   : > { %4213 = vmatmul.bf16.gmra.mxu1 %v13202_v17  ;;  %4302 = vmatmul.bf16.gmra.mxu2 %v13202_v17  ;;  %9895 = vpow2.f32 %v8841_v3  ;;  %vm2902_vm1 = vweird.f32 %v13238_v60 }
 0x432   : > { %v2990_v45 = vmul.f32 %v13232_v34, %v2989_v27  ;;  %vm2917_vm4 = vweird.f32 %v13253_v23 }
 0x434   : > { %v2296_v6 = vpop.f32.mrf.mxu0  ;;  %v2991_v53 = vadd.f32 %v13232_v34, %v2990_v45 }
 0x435   : > { %v2297_v59 = vadd.f32 %v2296_v6, %v11915_v26  ;;  %v2996_v6 = vand.u32 2147483647, %v13220_v10 }
 0x436   : > { %v13255_v43 = vpop.eup %9893 }
 0x437   : > { %v709_v0 = vpop.xlane.xlu2 %708  ;;  %v9896_v1 = vpop.eup %9895  ;;  %vm2997_vm13 = vcmp.eq.f32.partialorder %v2996_v6, 8.507059e+37  ;;  %vm975_vm15 = vweird.f32 %v13255_v43 }
 0x438   : > { %v748_v36 = vmul.f32 %v709_v0, %v11819_v57  ;;  %v2375_v0 = vpop.f32.mrf.mxu1  ;;  %v13263_v2 = vadd.f32 1.0, %v9896_v1  ;;  %v2998_v1 = vand.u32 2147483648, %v13220_v10  ;;  %vm13345_vm3 = vmor %vm974_vm14, %vm975_vm15 }
 0x43a   : > { %v780_v40 = vadd.f32 1e-05, %v748_v36  ;;  %v969_v36 = vmul.f32 %v13255_v43, %v13230_v21 }
 0x43c   : > { %9897 = vrsqrt.f32 %v780_v40  ;;  %v2298_v27 = vpop.f32.mrf.mxu0  ;;  %v970_v33 = vmul.f32 %v13255_v43, %v969_v36  ;;  %vm1034_vm8 = vweird.f32 %v780_v40  ;;  %v8843_v36 = vmul.f32 -1.442695, %v2297_v59 }
 0x43d   : > { %9899 = vpow2.f32 %v8842_v51  ;;  %v699_v51 = vpop.xlane.xlu0 %698 }
 0x43e   : > { %9901 = vrcp.f32 %v13238_v60  ;;  %v971_v10 = vmul.f32 0.5, %v970_v33  ;;  %v9120_v33 = vor.u32 %v9485_v22, %v9119_v37  ;;  %v2908_v37 = vand.u32 2147483648, %v13238_v60 }
 0x43f   : > { %9903 = vrcp.f32 %v13253_v23  ;;  %v556_v14 = vpop.xlane.xlu2 %555 }
 0x440   : > { %9905 = vrcp.f32 %v13263_v2  ;;  %v2377_v46 = vpop.f32.mrf.mxu1  ;;  %v972_v58 = vsub.f32 1.5, %v971_v10  ;;  %4714 = vmatpush.bf16.msra.mxu1 %v9120_v33 }
 0x441   : > { %v13314_v6 = vadd.f32 %v2377_v46, %v12014_v42 }
 0x442   : > { %v9898_v49 = vpop.eup %9897 }
 0x443   : > { %v9900_v3 = vpop.eup %9899  ;;  %v1029_v29 = vmul.f32 %v9898_v49, %v780_v40  ;;  %vm1035_vm9 = vweird.f32 %v9898_v49  ;;  %v743_v40 = vmul.f32 %v699_v51, %v11819_v57  ;;  %v2995_v51 = vsel %vm13277_vm11, %v13232_v34, %v2991_v53 }
 0x444   : > { %v13261_v4 = vpop.eup %9901  ;;  %v13266_v56 = vadd.f32 1.0, %v9900_v3  ;;  %vm13285_vm12 = vmor %vm1034_vm8, %vm1035_vm9  ;;  %v703_v3 = vpop.xlane.xlu1 %702 }
 0x445   : > { %v1030_v50 = vmul.f32 %v9898_v49, %v1029_v29  ;;  %v2898_v29 = vmul.f32 %v13261_v4, %v13238_v60  ;;  %v13275_v11 = vpop.eup %9903  ;;  %v13305_v17 = vadd.f32 1e-05, %v743_v40  ;;  %v701_v32 = vpop.xlane.xlu0 %700  ;;  %vm2903_vm2 = vweird.f32 %v13261_v4 }
 0x446   : > { %9907 = vrcp.f32 %v13266_v56  ;;  %v2913_v24 = vmul.f32 %v13275_v11, %v13253_v23  ;;  %vm13366_vm5 = vmor %vm2902_vm1, %vm2903_vm2  ;;  %vm2918_vm7 = vweird.f32 %v13275_v11 }
 0x447   : > { %v1031_v30 = vmul.f32 0.5, %v1030_v50  ;;  %v2299_v50 = vadd.f32 %v2298_v27, %v11915_v26  ;;  %v2999_v27 = vor.u32 1.1754944e-38, %v2998_v1  ;;  %v2899_v16 = vsub.f32 1.0, %v2898_v29  ;;  %vm13411_vm8 = vmor %vm2917_vm4, %vm2918_vm7 }
 0x448   : > { %9909 = vpow2.f32 %v8843_v36  ;;  %v13311_v29 = vadd.f32 %v2375_v0, %v12014_v42  ;;  %v2906_v36 = vand.u32 2147483647, %v13238_v60  ;;  %vm984_vm10 = vweird.f32 %v13305_v17 }
 0x449   : > { %v1032_v45 = vsub.f32 1.5, %v1031_v30  ;;  %v2391_v30 = vadd.f32 %v12750_v61, %v12014_v42  ;;  %v8844_v34 = vmul.f32 -1.442695, %v2299_v50  ;;  %v3000_v53 = vsel %vm2997_vm13, %v2999_v27, %v2995_v51  ;;  %v13308_v61 = vpop.eup %9905 }
 0x44a   : > { %9911 = vrsqrt.f32 %v13305_v17  ;;  %v2900_v22 = vmul.f32 %v13261_v4, %v2899_v16  ;;  %v2928_v46 = vmul.f32 %v13308_v61, %v13263_v2  ;;  %v747_v16 = vmul.f32 %v13223_v35, %v11819_v57 }
 0x44b   : > { %v1033_v59 = vmul.f32 %v9898_v49, %v1032_v45  ;;  %9913 = vpow2.f32 %v8844_v34  ;;  %vm13374_vm6 = vcmp.eq.f32.partialorder %v2906_v36, 8.507059e+37  ;;  %vm2933_vm9 = vweird.f32 %v13308_v61 }
 0x44c   : > { %v13319_v40 = vpop.eup %9907  ;;  %v2929_v34 = vsub.f32 1.0, %v2928_v46  ;;  %vm2932_vm13 = vweird.f32 %v13263_v2 }
 0x44d   : > { %v1037_v7 = vsel %vm13285_vm12, %v9898_v49, %v1033_v59  ;;  %v2914_v49 = vsub.f32 1.0, %v2913_v24  ;;  %v973_v24 = vmul.f32 %v13255_v43, %v972_v58  ;;  %v2943_v51 = vmul.f32 %v13319_v40, %v13266_v56  ;;  %v13360_v58 = vpop.f32.mrf.mxu3 }
 0x44e   : > { %v1132_v1 = vmul.f32 %v1037_v7, %v12860_v31  ;;  %v744_v7 = vmul.f32 %v701_v32, %v11819_v57  ;;  %v745_v31 = vmul.f32 %v703_v3, %v11819_v57  ;;  %v9910_v32 = vpop.eup %9909  ;;  %v2901_v59 = vadd.f32 %v13261_v4, %v2900_v22  ;;  %v548_v3 = vpop.xlane.xlu0 %547  ;;  %20683 = vst [vmem:[#allocation47_spill] sm:$0xff] %v13360_v58 }
 0x44f   : > { %v2915_v33 = vmul.f32 %v13275_v11, %v2914_v49  ;;  %v977_v49 = vsel %vm13345_vm3, %v13255_v43, %v973_v24  ;;  %v2944_v46 = vsub.f32 1.0, %v2943_v51  ;;  %v2930_v36 = vmul.f32 %v13308_v61, %v2929_v34 }
 0x450   : > { %v3739_v45 = vmul.f32 %v3000_v53, %v1132_v1  ;;  %v13333_v50 = vadd.f32 1e-05, %v744_v7  ;;  %v13335_v10 = vadd.f32 1e-05, %v745_v31  ;;  %v13350_v27 = vpop.eup %9911  ;;  %v13355_v53 = vadd.f32 1e-05, %v747_v16  ;;  %v705_v1 = vpop.xlane.xlu1 %704 }
 0x451   : > { %v979_v21 = vmul.f32 %v13350_v27, %v13305_v17  ;;  %v591_v7 = vmul.f32 %v11819_v57, %v548_v3  ;;  %v9914_v31 = vpop.eup %9913  ;;  %v13379_v16 = vadd.f32 1.0, %v9910_v32  ;;  %v2905_v60 = vsel %vm13366_vm5, %v13261_v4, %v2901_v59 }
 0x452   : > { %v13329_v0 = vadd.f32 %v3739_v45, %v2391_v30  ;;  %v2909_v30 = vor.u32 1.1754944e-38, %v2908_v37  ;;  %9915 = vrsqrt.f32 %v13333_v50  ;;  %v2923_v37 = vand.u32 2147483648, %v13253_v23 }
 0x453   : > { %9917 = vrsqrt.f32 %v13335_v10  ;;  %v980_v58 = vmul.f32 %v13350_v27, %v979_v21  ;;  %v2916_v43 = vadd.f32 %v13275_v11, %v2915_v33  ;;  %v746_v24 = vmul.f32 %v705_v1, %v11819_v57  ;;  %v13415_v1 = vpop.f32.mrf.mxu2 }
 0x454   : > { %v1126_v51 = vmul.f32 %v977_v49, %v12808_v44  ;;  %9919 = vrsqrt.f32 %v13355_v53  ;;  %v13394_v4 = vadd.f32 1.0, %v9914_v31  ;;  %v2910_v59 = vsel %vm13374_vm6, %v2909_v30, %v2905_v60  ;;  %20690 = vst [vmem:[#allocation48_spill] sm:$0xff] %v13415_v1 }
 0x455   : > { %v981_v32 = vmul.f32 0.5, %v980_v58  ;;  %v2921_v33 = vand.u32 2147483647, %v13253_v23  ;;  %v13400_v3 = vsub.f32 %v12975_v38, %v591_v7  ;;  %v2945_v34 = vmul.f32 %v13319_v40, %v2944_v46 }
 0x456   : > { %9921 = vrcp.f32 %v13379_v16  ;;  %vm985_vm0 = vweird.f32 %v13350_v27  ;;  %v2920_v38 = vsel %vm13411_vm8, %v13275_v11, %v2916_v43  ;;  %v2924_v58 = vor.u32 1.1754944e-38, %v2923_v37  ;;  %v550_v31 = vpop.xlane.xlu0 %549 }
 0x457   : > { %v982_v44 = vsub.f32 1.5, %v981_v32  ;;  %v13422_v49 = vadd.f32 1e-05, %v746_v24  ;;  %v3733_v45 = vmul.f32 %v2910_v59, %v1126_v51  ;;  %9923 = vrcp.f32 %v13394_v4  ;;  %vm986_vm11 = vmor %vm984_vm10, %vm985_vm0  ;;  %v13441_v51 = vpop.f32.mrf.mxu3 }
 0x458   : > { %v13392_v35 = vpop.eup %9915  ;;  %vm2922_vm12 = vcmp.eq.f32.partialorder %v2921_v33, 8.507059e+37  ;;  %v655_v37 = vmul.f32 %v13400_v3, %v13400_v3  ;;  %v13438_v43 = vadd.f32 %v13308_v61, %v2930_v36  ;;  %20691 = vst [vmem:[#allocation49_spill] sm:$0xff] %v13441_v51  ;;  %vm2948_vm14 = vweird.f32 %v13319_v40  ;;  %v9480_v36 = vld [vmem:[%s20375_s6 + $0x16c] sm:$0xf0]  ;;  %vm13521_vm0 = vmor %vm2932_vm13, %vm2933_vm9 }
 0x459   : > { %v13402_v21 = vpop.eup %9917  ;;  %v989_v22 = vmul.f32 %v13392_v35, %v13333_v50  ;;  %v983_v23 = vmul.f32 %v13350_v27, %v982_v44  ;;  %v2925_v17 = vsel %vm2922_vm12, %v2924_v58, %v2920_v38  ;;  %9925 = vrsqrt.f32 %v13422_v49  ;;  %v13454_v44 = vpop.f32.mrf.mxu1 }
 0x45a   : > { %v999_v7 = vmul.f32 %v13402_v21, %v13335_v10  ;;  %v13433_v46 = vpop.eup %9919  ;;  %714 = vadd.xlane.f32.xlu1 %v655_v37  ;;  %v13458_v38 = vadd.f32 %v13319_v40, %v2945_v34  ;;  %v592_v58 = vmul.f32 %v11819_v57, %v550_v31  ;;  %vm995_vm15 = vweird.f32 %v13392_v35  ;;  %v9478_v34 = vld [vmem:[%s20375_s6 + $0x154] sm:$0xf] }
 0x45b   : > { %v990_v11 = vmul.f32 %v13392_v35, %v989_v22  ;;  %v987_v60 = vsel %vm986_vm11, %v13350_v27, %v983_v23  ;;  %v9095_v27 = vld [vmem:[%s20375_s6 + $0x150] sm:$0xf]  ;;  %v9479_v22 = vld [vmem:[%s20375_s6 + $0x15c] sm:$0xf]  ;;  %vm1005_vm1 = vweird.f32 %v13402_v21  ;;  %vm994_vm2 = vweird.f32 %v13333_v50 }
 0x45c   : > { %v1000_v24 = vmul.f32 %v13402_v21, %v999_v7  ;;  %v1127_v32 = vmul.f32 %v987_v60, %v12863_v15  ;;  %v13452_v33 = vpop.eup %9921  ;;  %v3765_v15 = vadd.f32 %v3733_v45, %v13311_v29  ;;  %v9105_v23 = vld [vmem:[%s20375_s6 + $0x178] sm:$0xf0]  ;;  %v552_v7 = vpop.xlane.xlu1 %551  ;;  %v9097_v45 = vld [vmem:[%s20375_s6 + $0x170] sm:$0xf0]  ;;  %v13478_v60 = vsub.f32 %v13014_v19, %v592_v58  ;;  %vm13485_vm3 = vmor %vm994_vm2, %vm995_vm15 }
 0x45d   : > { %v991_v59 = vmul.f32 0.5, %v990_v11  ;;  %v1019_v11 = vmul.f32 %v13433_v46, %v13355_v53  ;;  %v9108_v51 = vor.u32 %v9479_v22, %v9105_v23  ;;  %vm1004_vm4 = vweird.f32 %v13335_v10 }
 0x45e   : > { %v1001_v30 = vmul.f32 0.5, %v1000_v24  ;;  %v3734_v37 = vmul.f32 %v2925_v17, %v1127_v32  ;;  %v9096_v24 = vor.u32 %v9480_v36, %v9095_v27  ;;  %v13480_v17 = vpop.eup %9923  ;;  %v9100_v19 = vor.u32 %v9478_v34, %v9097_v45  ;;  %vm1006_vm6 = vmor %vm1004_vm4, %vm1005_vm1  ;;  %v9103_v34 = vld [vmem:[%s20375_s6 + $0x158] sm:$0xf] }
 0x45f   : > { %v992_v29 = vsub.f32 1.5, %v991_v59  ;;  %v656_v27 = vmul.f32 %v13478_v60, %v13478_v60  ;;  %v13493_v36 = vpop.eup %9925  ;;  %vm2947_vm5 = vweird.f32 %v13266_v56  ;;  %v2951_v58 = vand.u32 2147483647, %v13266_v56  ;;  %4804 = vmatpush.bf16.msra.mxu2 %v9108_v51  ;;  %v9481_v45 = vld [vmem:[%s20375_s6 + $0x174] sm:$0xf0] }
 0x460   : > { %v1002_v31 = vsub.f32 1.5, %v1001_v30  ;;  %v3766_v32 = vadd.f32 %v3734_v37, %v13314_v6  ;;  %4537 = vmatpush.bf16.msra.mxu3 %v9096_v24  ;;  %v13495_v6 = vpop.f32.mrf.mxu2  ;;  %v595_v10 = vmul.f32 %v11819_v57, %v556_v14  ;;  %v2938_v22 = vand.u32 2147483648, %v13263_v2  ;;  %vm13511_vm7 = vmor %vm2947_vm5, %vm2948_vm14  ;;  %4626 = vmatpush.bf16.msra.mxu0 %v9100_v19  ;;  %v13550_v24 = vpop.f32.mrf.mxu3 }
 0x461   : > { %v993_v59 = vmul.f32 %v13392_v35, %v992_v29  ;;  %20694 = vst [vmem:[#allocation50_spill] sm:$0xff] %v13495_v6  ;;  %v1009_v29 = vmul.f32 %v13493_v36, %v13422_v49  ;;  %v2950_v51 = vsel %vm13511_vm7, %v13319_v40, %v13458_v38  ;;  %716 = vadd.xlane.f32.xlu2 %v656_v27  ;;  %v20700_v40 = vand.u32 2147483648, %v13266_v56 }
 0x462   : > { %v1003_v30 = vmul.f32 %v13402_v21, %v1002_v31  ;;  %v13498_v50 = vpack.c.bf16 %v3766_v32, %v3765_v15  ;;  %20701 = vst [vmem:[#allocation52_spill] sm:$0xff] %v13550_v24  ;;  %vm2952_vm8 = vcmp.eq.f32.partialorder %v2951_v58, 8.507059e+37  ;;  %v2939_v56 = vor.u32 1.1754944e-38, %v2938_v22 }
 0x463   : > { %v997_v23 = vsel %vm13485_vm3, %v13392_v35, %v993_v59  ;;  %v2958_v35 = vmul.f32 %v13452_v33, %v13379_v16  ;;  %v2954_v38 = vor.u32 1.1754944e-38, %v20700_v40  ;;  %v1010_v31 = vmul.f32 %v13493_v36, %v1009_v29 }
 0x464   : > { %20695 = vst [vmem:[#allocation51_spill] sm:$0xff] %v13498_v50  ;;  %v1007_v37 = vsel %vm1006_vm6, %v13402_v21, %v1003_v30  ;;  %v2936_v21 = vand.u32 2147483647, %v13263_v2  ;;  %4040 = vmatmul.bf16.gmra.mxu3 %v13498_v50  ;;  %v1020_v2 = vmul.f32 %v13433_v46, %v1019_v11  ;;  %4129 = vmatmul.bf16.gmra.mxu0 %v13498_v50  ;;  %v554_v27 = vpop.xlane.xlu1 %553  ;;  %vm1024_vm10 = vweird.f32 %v13355_v53 }
 0x465   : > { %v1129_v1 = vmul.f32 %v1007_v37, %v12898_v9  ;;  %v2935_v9 = vsel %vm13521_vm0, %v13308_v61, %v13438_v43  ;;  %4218 = vmatmul.bf16.gmra.mxu1 %v13498_v50  ;;  %v1128_v32 = vmul.f32 %v997_v23, %v12893_v12  ;;  %4307 = vmatmul.bf16.gmra.mxu2 %v13498_v50  ;;  %v2382_v43 = vpop.f32.mrf.mxu1  ;;  %v1011_v30 = vmul.f32 0.5, %v1010_v31 }
 0x466   : > { %v13555_v11 = vsub.f32 %v12927_v55, %v595_v10  ;;  %v593_v61 = vmul.f32 %v11819_v57, %v552_v7  ;;  %v2955_v59 = vsel %vm2952_vm8, %v2954_v38, %v2950_v51  ;;  %v9104_v19 = vor.u32 %v9481_v45, %v9103_v34 }
 0x467   : > { %v2973_v37 = vmul.f32 %v13480_v17, %v13394_v4  ;;  %vm2937_vm9 = vcmp.eq.f32.partialorder %v2936_v21, 8.507059e+37  ;;  %v3736_v15 = vmul.f32 %v2955_v59, %v1129_v1  ;;  %v2959_v58 = vsub.f32 1.0, %v2958_v35 }
 0x468   : > { %v13561_v12 = vsub.f32 %v13009_v28, %v593_v61  ;;  %v1021_v23 = vmul.f32 0.5, %v1020_v2  ;;  %v2940_v55 = vsel %vm2937_vm9, %v2939_v56, %v2935_v9  ;;  %4715 = vmatpush.bf16.msra.mxu1 %v9104_v19  ;;  %v659_v7 = vmul.f32 %v13555_v11, %v13555_v11  ;;  %v13565_v10 = vpop.f32.mrf.mxu2  ;;  %v13583_v38 = vpop.f32.mrf.mxu3  ;;  %v9475_v61 = vld [vmem:[%s20375_s6 + $0x11c] sm:$0xf] }
 0x469   : > { %20702 = vst [vmem:[#allocation53_spill] sm:$0xff] %v13565_v10  ;;  %v2383_v22 = vadd.f32 %v2382_v43, %v12014_v42  ;;  %v3735_v29 = vmul.f32 %v2940_v55, %v1128_v32  ;;  %v594_v21 = vmul.f32 %v11819_v57, %v554_v27  ;;  %v1012_v1 = vsub.f32 1.5, %v1011_v30  ;;  %v9089_v56 = vld [vmem:[%s20375_s6 + $0x138] sm:$0xf0]  ;;  %v20742_v10 = vld [vmem:[#allocation33_spill] sm:$0xff] }
 0x46a   : > { %v657_v14 = vmul.f32 %v13561_v12, %v13561_v12  ;;  %v2381_v28 = vadd.f32 %v13454_v44, %v12014_v42  ;;  %v2974_v35 = vsub.f32 1.0, %v2973_v37  ;;  %722 = vadd.xlane.f32.xlu2 %v659_v7  ;;  %v2960_v45 = vmul.f32 %v13452_v33, %v2959_v58  ;;  %20703 = vst [vmem:[#allocation54_spill] sm:$0xff] %v13583_v38  ;;  %v473_v38 = vld [vmem:[%s13656_s26 + $0x60] sm:$0xff] }
 0x46b   : > { %v3768_v51 = vadd.f32 %v3736_v15, %v2383_v22  ;;  %v13574_v34 = vsub.f32 %v13064_v8, %v594_v21  ;;  %v1022_v2 = vsub.f32 1.5, %v1021_v23  ;;  %vm1025_vm11 = vweird.f32 %v13433_v46 }
 0x46c   : > { %718 = vadd.xlane.f32.xlu0 %v657_v14  ;;  %v3767_v9 = vadd.f32 %v3735_v29, %v2381_v28  ;;  %v1013_v44 = vmul.f32 %v13493_v36, %v1012_v1  ;;  %vm1015_vm12 = vweird.f32 %v13493_v36  ;;  %v2975_v8 = vmul.f32 %v13480_v17, %v2974_v35  ;;  %vm13589_vm13 = vmor %vm1024_vm10, %vm1025_vm11 }
 0x46d   : > { %v658_v40 = vmul.f32 %v13574_v34, %v13574_v34  ;;  %v2385_v32 = vpop.f32.mrf.mxu1  ;;  %v1023_v53 = vmul.f32 %v13433_v46, %v1022_v2  ;;  %vm1014_vm14 = vweird.f32 %v13422_v49  ;;  %vm2963_vm15 = vweird.f32 %v13452_v33 }
 0x46e   : > { %v13586_v31 = vpack.c.bf16 %v3768_v51, %v3767_v9  ;;  %vm13595_vm1 = vmor %vm1014_vm14, %vm1015_vm12  ;;  %v2961_v43 = vadd.f32 %v13452_v33, %v2960_v45  ;;  %v2968_v59 = vand.u32 2147483648, %v13379_v16  ;;  %vm2962_vm2 = vweird.f32 %v13379_v16  ;;  %v9079_v9 = vld [vmem:[%s20375_s6 + $0x110] sm:$0xf] }
 0x46f   : > { %720 = vadd.xlane.f32.xlu1 %v658_v40  ;;  %v1017_v30 = vsel %vm13595_vm1, %v13493_v36, %v1013_v44  ;;  %v2976_v49 = vadd.f32 %v13480_v17, %v2975_v8  ;;  %vm2978_vm3 = vweird.f32 %v13480_v17  ;;  %v2966_v27 = vand.u32 2147483647, %v13379_v16  ;;  %vm13611_vm4 = vmor %vm2962_vm2, %vm2963_vm15  ;;  %v9476_v40 = vld [vmem:[%s20375_s6 + $0x12c] sm:$0xf0] }
 0x470   : > { %20704 = vst [vmem:[#allocation55_spill] sm:$0xff] %v13586_v31  ;;  %v13604_v19 = vpop.f32.mrf.mxu2  ;;  %v2983_v15 = vand.u32 2147483648, %v13394_v4  ;;  %v1027_v36 = vsel %vm13589_vm13, %v13433_v46, %v1023_v53  ;;  %vm2977_vm5 = vweird.f32 %v13394_v4  ;;  %v2981_v16 = vand.u32 2147483647, %v13394_v4  ;;  %v13630_v14 = vpop.f32.mrf.mxu3  ;;  %v461_v53 = vld [vmem:[%s13656_s26] sm:$0xff] }
 0x471   : > { %20709 = vst [vmem:[#allocation56_spill] sm:$0xff] %v13604_v19  ;;  %v1130_v58 = vmul.f32 %v1017_v30, %v12923_v13  ;;  %v2965_v23 = vsel %vm13611_vm4, %v13452_v33, %v2961_v43  ;;  %v2969_v55 = vor.u32 1.1754944e-38, %v2968_v59  ;;  %vm2979_vm6 = vmor %vm2977_vm5, %vm2978_vm3  ;;  %v1131_v46 = vmul.f32 %v1027_v36, %v12845_v25  ;;  %v9474_v43 = vld [vmem:[%s20375_s6 + $0x114] sm:$0xf] }
 0x472   : > { %v2980_v7 = vsel %vm2979_vm6, %v13480_v17, %v2976_v49  ;;  %vm2967_vm7 = vcmp.eq.f32.partialorder %v2966_v27, 8.507059e+37  ;;  %v2984_v22 = vor.u32 1.1754944e-38, %v2983_v15  ;;  %20712 = vst [vmem:[#allocation57_spill] sm:$0xff] %v13630_v14  ;;  %vm2982_vm0 = vcmp.eq.f32.partialorder %v2981_v16, 8.507059e+37  ;;  %v9081_v59 = vld [vmem:[%s20375_s6 + $0x130] sm:$0xf0] }
 0x473   : > { %v2970_v29 = vsel %vm2967_vm7, %v2969_v55, %v2965_v23  ;;  %v2386_v1 = vadd.f32 %v2385_v32, %v12014_v42  ;;  %v9080_v44 = vor.u32 %v9476_v40, %v9079_v9  ;;  %v10786_v8 = vmov 0   ;;  %v9087_v55 = vld [vmem:[%s20375_s6 + $0x118] sm:$0xf]  ;;  %v9472_v40 = vld [vmem:[%s20375_s6 + $0xec] sm:$0xf0] }
 0x474   : > { %4045 = vmatmul.bf16.gmra.mxu3 %v13586_v31  ;;  %4134 = vmatmul.bf16.gmra.mxu0 %v13586_v31  ;;  %v3737_v4 = vmul.f32 %v2970_v29, %v1130_v58  ;;  %v2985_v21 = vsel %vm2982_vm0, %v2984_v22, %v2980_v7  ;;  %v2304_v32 = vadd.f32 %v12246_v63, %v11915_v26  ;;  %v468_v29 = vld [vmem:[%s13656_s26 + $0x38] sm:$0xff] }
 0x475   : > { %4223 = vmatmul.bf16.gmra.mxu1 %v13586_v31  ;;  %4312 = vmatmul.bf16.gmra.mxu2 %v13586_v31  ;;  %v2387_v13 = vpop.f32.mrf.mxu1  ;;  %v3738_v28 = vmul.f32 %v2985_v21, %v1131_v46  ;;  %v9092_v63 = vor.u32 %v9475_v61, %v9089_v56  ;;  %v9084_v49 = vor.u32 %v9474_v43, %v9081_v59  ;;  %v9477_v46 = vld [vmem:[%s20375_s6 + $0x134] sm:$0xf0]  ;;  %v9073_v56 = vld [vmem:[%s20375_s6 + $0xf8] sm:$0xf0]  ;;  %v9470_v43 = vld [vmem:[%s20375_s6 + $0xd4] sm:$0xf] }
 0x476   : > { %v2388_v35 = vadd.f32 %v2387_v13, %v12014_v42  ;;  %v3769_v51 = vadd.f32 %v3737_v4, %v2386_v1  ;;  %9705 = vset.pattern.permute.xlu0 %v10786_v8  ;;  %9707 = vset.pattern.permute.xlu2 %v10786_v8  ;;  %v8846_v30 = vmul.f32 -1.442695, %v2304_v32  ;;  %v2307_v27 = vadd.f32 %v12414_v62, %v11915_v26  ;;  %v462_v4 = vld [vmem:[%s13656_s26 + $0x8] sm:$0xff]  ;;  %v10615_v13 = vld [vmem:[#allocation8] sm:$0x7]  ;;  %v487_v31 = vld [vmem:[%s13656_s26 + $0xd0] sm:$0xff] }
 0x477   : > { %9706 = vset.pattern.permute.xlu1 %v10786_v8  ;;  %4538 = vmatpush.bf16.msra.mxu3 %v9080_v44  ;;  %v2309_v58 = vadd.f32 %v12436_v47, %v11915_v26  ;;  %v2312_v62 = vadd.f32 %v12499_v20, %v11915_v26  ;;  %v2314_v23 = vadd.f32 %v12527_v5, %v11915_v26  ;;  %v463_v20 = vld [vmem:[%s13656_s26 + $0x10] sm:$0xff]  ;;  %v13697_v21 = vperm.slane %v10615_v13, 2 }
 0x478   : > { %v13633_v33 = vpop.f32.mrf.mxu2  ;;  %v3770_v25 = vadd.f32 %v3738_v28, %v2388_v35  ;;  %v13638_v45 = vpop.f32.mrf.mxu3  ;;  %4805 = vmatpush.bf16.msra.mxu2 %v9092_v63  ;;  %4627 = vmatpush.bf16.msra.mxu0 %v9084_v49  ;;  %9927 = vpow2.f32 %v8846_v30  ;;  %v8847_v37 = vmul.f32 -1.442695, %v2307_v27  ;;  %v2317_v47 = vadd.f32 %v12648_v39, %v11915_v26  ;;  %v20718_v35 = vld [vmem:[#allocation23_spill] sm:$0xff]  ;;  %v9063_v39 = vld [vmem:[%s20375_s6 + $0xd0] sm:$0xf] }
 0x479   : > { %20713 = vst [vmem:[#allocation58_spill] sm:$0xff] %v13633_v33  ;;  %v8848_v5 = vmul.f32 -1.442695, %v2309_v58  ;;  %v8849_v1 = vmul.f32 -1.442695, %v2312_v62  ;;  %v20719_v32 = vld [vmem:[#allocation14_spill] sm:$0xff]  ;;  %v9064_v61 = vor.u32 %v9472_v40, %v9063_v39 }
 0x47a   : > { %v13636_v17 = vpack.c.bf16 %v3770_v25, %v3769_v51  ;;  %20715 = vst [vmem:[#allocation60_spill] sm:$0xff] %v13638_v45  ;;  %9929 = vpow2.f32 %v8847_v37  ;;  %v8850_v28 = vmul.f32 -1.442695, %v2314_v23  ;;  %v2319_v51 = vadd.f32 %v20718_v35, %v11915_v26  ;;  %v9471_v26 = vld [vmem:[%s20375_s6 + $0xdc] sm:$0xf]  ;;  %v471_v49 = vld [vmem:[%s13656_s26 + $0x50] sm:$0xff] }
 0x47b   : > { %20717 = vst [vmem:[#allocation62_spill] sm:$0xff] %v13697_v21  ;;  %v9088_v25 = vor.u32 %v9477_v46, %v9087_v55  ;;  %v8851_v9 = vmul.f32 -1.442695, %v2317_v47  ;;  %v9065_v59 = vld [vmem:[%s20375_s6 + $0xf0] sm:$0xf0]  ;;  %v464_v27 = vld [vmem:[%s13656_s26 + $0x18] sm:$0xff]  ;;  %4539 = vmatpush.bf16.msra.mxu3 %v9064_v61 }
 0x47c   : > { %20714 = vst [vmem:[#allocation59_spill] sm:$0xff] %v13636_v17  ;;  %v20720_v30 = vld [vmem:[#allocation15_spill] sm:$0xff]  ;;  %v8852_v62 = vmul.f32 -1.442695, %v2319_v51  ;;  %v465_v23 = vld [vmem:[%s13656_s26 + $0x20] sm:$0xff] }
 0x47d   : > { %4716 = vmatpush.bf16.msra.mxu1 %v9088_v25  ;;  %v2422_v63 = vadd.f32 %v20720_v30, %v13697_v21  ;;  %v9071_v58 = vld [vmem:[%s20375_s6 + $0xd8] sm:$0xf]  ;;  %v475_v33 = vld [vmem:[%s13656_s26 + $0x70] sm:$0xff] }
 0x47e   : > { %v9928_v15 = vpop.eup %9927  ;;  %v9473_v55 = vld [vmem:[%s20375_s6 + $0xf4] sm:$0xf0] }
 0x47f   : > { %v13675_v36 = vadd.f32 1.0, %v9928_v15  ;;  %v9076_v15 = vor.u32 %v9471_v26, %v9073_v56  ;;  %v8854_v35 = vmul.f32 -1.442695, %v2422_v63  ;;  %v467_v56 = vld [vmem:[%s13656_s26 + $0x30] sm:$0xff] }
 0x480   : > { %v13643_v2 = vpop.f32.mrf.mxu2  ;;  %8289 = vperm.xlu0 %9705, %v461_v53   ;;  %v9930_v16 = vpop.eup %9929  ;;  %v2420_v53 = vadd.f32 %v20719_v32, %v13697_v21 }
 0x481   : > { %20716 = vst [vmem:[#allocation61_spill] sm:$0xff] %v13643_v2  ;;  %9931 = vrcp.f32 %v13675_v36  ;;  %v13690_v22 = vadd.f32 1.0, %v9930_v16  ;;  %v9068_v16 = vor.u32 %v9470_v43, %v9065_v59  ;;  %v13740_v47 = vpop.f32.mrf.mxu3  ;;  %4806 = vmatpush.bf16.msra.mxu2 %v9076_v15  ;;  %vm3007_vm11 = vweird.f32 %v13675_v36 }
 0x482   : > { %8299 = vperm.xlu2 %9707, %v463_v20   ;;  %v20721_v20 = vld [vmem:[#allocation20_spill] sm:$0xff] }
 0x483   : > { %9933 = vrcp.f32 %v13690_v22  ;;  %4628 = vmatpush.bf16.msra.mxu0 %v9068_v16  ;;  %v2425_v13 = vadd.f32 %v20721_v20, %v13697_v21  ;;  %v3013_v16 = vand.u32 2147483648, %v13675_v36  ;;  %vm3022_vm3 = vweird.f32 %v13690_v22 }
 0x484   : > { %4050 = vmatmul.bf16.gmra.mxu3 %v13636_v17  ;;  %4139 = vmatmul.bf16.gmra.mxu0 %v13636_v17  ;;  %9935 = vpow2.f32 %v8848_v5 }
 0x485   : > { %4228 = vmatmul.bf16.gmra.mxu1 %v13636_v17  ;;  %4317 = vmatmul.bf16.gmra.mxu2 %v13636_v17  ;;  %9937 = vpow2.f32 %v8849_v1 }
 0x487   : > { %v13712_v8 = vpop.eup %9931 }
 0x488   : > { %8324 = vperm.xlu0 %9705, %v468_v29   ;;  %8294 = vperm.xlu1 %9706, %v462_v4   ;;  %v9072_v29 = vor.u32 %v9473_v55, %v9071_v58  ;;  %v8853_v4 = vmul.f32 -1.442695, %v2420_v53  ;;  %v466_v53 = vld [vmem:[%s13656_s26 + $0x28] sm:$0xff]  ;;  %vm3008_vm10 = vweird.f32 %v13712_v8 }
 0x489   : > { %v13746_v1 = vpop.eup %9933  ;;  %vm13809_vm13 = vmor %vm3007_vm11, %vm3008_vm10 }
 0x48a   : > { %8309 = vperm.xlu2 %9707, %v465_v23   ;;  %4717 = vmatpush.bf16.msra.mxu1 %v9072_v29  ;;  %v9936_v51 = vpop.eup %9935  ;;  %v3018_v26 = vmul.f32 %v13746_v1, %v13690_v22  ;;  %v13771_v23 = vpop.f32.mrf.mxu3  ;;  %vm3023_vm2 = vweird.f32 %v13746_v1 }
 0x48b   : > { %v9938_v40 = vpop.eup %9937  ;;  %v13754_v32 = vadd.f32 1.0, %v9936_v51  ;;  %vm13862_vm5 = vmor %vm3022_vm3, %vm3023_vm2 }
 0x48c   : > { %v13763_v63 = vadd.f32 1.0, %v9938_v40  ;;  %v3019_v58 = vsub.f32 1.0, %v3018_v26  ;;  %v477_v40 = vld [vmem:[%s13656_s26 + $0x80] sm:$0xff] }
 0x48d   : > { %v469_v26 = vld [vmem:[%s13656_s26 + $0x40] sm:$0xff]  ;;  %vm3037_vm7 = vweird.f32 %v13754_v32 }
 0x48e   : > { %vm3052_vm0 = vweird.f32 %v13763_v63 }
 0x490   : > { %8339 = vperm.xlu0 %9705, %v471_v49   ;;  %8304 = vperm.xlu1 %9706, %v464_v27   ;;  %v9141_v27 = vmul.f32 -1.442695, %v13740_v47 }
 0x492   : > { %8319 = vperm.xlu2 %9707, %v467_v56  }
 0x498   : > { %8314 = vperm.xlu1 %9706, %v466_v53  }
 0x499   : > { %v711_v7 = vpop.xlane.xlu0 %710 }
 0x49a   : > { %v749_v44 = vmul.f32 %v711_v7, %v11819_v57  ;;  %v3003_v7 = vmul.f32 %v13712_v8, %v13675_v36 }
 0x49c   : > { %v13729_v37 = vadd.f32 1e-05, %v749_v44  ;;  %v3004_v25 = vsub.f32 1.0, %v3003_v7 }
 0x49e   : > { %9939 = vrsqrt.f32 %v13729_v37  ;;  %v3005_v30 = vmul.f32 %v13712_v8, %v3004_v25  ;;  %vm1044_vm8 = vweird.f32 %v13729_v37 }
 0x49f   : > { %9941 = vpow2.f32 %v8850_v28  ;;  %v8855_v28 = vmul.f32 -1.442695, %v2425_v13 }
 0x4a0   : > { %9943 = vpow2.f32 %v8851_v9  ;;  %v474_v9 = vld [vmem:[%s13656_s26 + $0x68] sm:$0xff]  ;;  %v3006_v20 = vadd.f32 %v13712_v8, %v3005_v30  ;;  %8329 = vperm.xlu1 %9706, %v469_v26  }
 0x4a1   : > { %v713_v46 = vpop.xlane.xlu0 %712  ;;  %9945 = vpow2.f32 %v8852_v62  ;;  %8354 = vperm.xlu0 %9705, %v474_v9  }
 0x4a2   : > { %v750_v5 = vmul.f32 %v713_v46, %v11819_v57  ;;  %9947 = vpow2.f32 %v8853_v4 }
 0x4a3   : > { %9949 = vpow2.f32 %v8854_v35  ;;  %v3011_v35 = vand.u32 2147483647, %v13675_v36  ;;  %v3020_v36 = vmul.f32 %v13746_v1, %v3019_v58  ;;  %v13826_v58 = vpop.f32.mrf.mxu1 }
 0x4a4   : > { %v13748_v39 = vadd.f32 1e-05, %v750_v5  ;;  %v13750_v44 = vpop.eup %9939  ;;  %v9145_v5 = vmul.f32 -1.442695, %v13771_v23 }
 0x4a5   : > { %v9942_v61 = vpop.eup %9941  ;;  %v1039_v43 = vmul.f32 %v13750_v44, %v13729_v37  ;;  %vm1045_vm9 = vweird.f32 %v13750_v44  ;;  %vm3012_vm14 = vcmp.eq.f32.partialorder %v3011_v35, 8.507059e+37  ;;  %v3021_v35 = vadd.f32 %v13746_v1, %v3020_v36 }
 0x4a6   : > { %9951 = vrsqrt.f32 %v13748_v39  ;;  %v9944_v59 = vpop.eup %9943  ;;  %v13769_v62 = vadd.f32 1.0, %v9942_v61  ;;  %vm13795_vm12 = vmor %vm1044_vm8, %vm1045_vm9  ;;  %v3028_v61 = vand.u32 2147483648, %v13690_v22  ;;  %vm1054_vm15 = vweird.f32 %v13748_v39 }
 0x4a7   : > { %v9946_v49 = vpop.eup %9945  ;;  %9953 = vpow2.f32 %v8855_v28  ;;  %v1040_v15 = vmul.f32 %v13750_v44, %v1039_v43  ;;  %v13773_v46 = vadd.f32 1.0, %v9944_v59  ;;  %v470_v43 = vld [vmem:[%s13656_s26 + $0x48] sm:$0xff]  ;;  %v3026_v36 = vand.u32 2147483647, %v13690_v22 }
 0x4a8   : > { %9955 = vrcp.f32 %v13754_v32  ;;  %v9948_v55 = vpop.eup %9947  ;;  %v13778_v4 = vadd.f32 1.0, %v9946_v49  ;;  %v3010_v49 = vsel %vm13809_vm13, %v13712_v8, %v3006_v20  ;;  %8334 = vperm.xlu2 %9707, %v470_v43   ;;  %v3029_v37 = vor.u32 1.1754944e-38, %v3028_v61 }
 0x4a9   : > { %v1041_v7 = vmul.f32 0.5, %v1040_v15  ;;  %v9950_v29 = vpop.eup %9949  ;;  %9957 = vrcp.f32 %v13763_v63  ;;  %v13787_v25 = vadd.f32 1.0, %v9948_v55  ;;  %v13824_v15 = vpop.f32.mrf.mxu0  ;;  %8369 = vperm.xlu0 %9705, %v477_v40   ;;  %v3014_v55 = vor.u32 1.1754944e-38, %v3013_v16  ;;  %v20728_v40 = vld [vmem:[#allocation28_spill] sm:$0xff] }
 0x4aa   : > { %9959 = vpow2.f32 %v9141_v27  ;;  %v13817_v30 = vadd.f32 1.0, %v9950_v29  ;;  %v3025_v14 = vsel %vm13862_vm5, %v13746_v1, %v3021_v35  ;;  %vm3027_vm6 = vcmp.eq.f32.partialorder %v3026_v36, 8.507059e+37  ;;  %v9468_v36 = vld [vmem:[%s20375_s6 + $0xac] sm:$0xf0] }
 0x4ab   : > { %v1042_v51 = vsub.f32 1.5, %v1041_v7  ;;  %20722 = vst [vmem:[#allocation23_spill] sm:$0xff] %v13787_v25  ;;  %9961 = vrcp.f32 %v13769_v62  ;;  %v3015_v16 = vsel %vm3012_vm14, %v3014_v55, %v3010_v49  ;;  %v480_v55 = vld [vmem:[%s13656_s26 + $0x98] sm:$0xff]  ;;  %v3088_v24 = vand.u32 2147483648, %v13773_v46 }
 0x4ac   : > { %v13782_v13 = vpop.eup %9951  ;;  %9963 = vrcp.f32 %v13773_v46  ;;  %20727 = vst [vmem:[#allocation14_spill] sm:$0xff] %v13817_v30  ;;  %vm3067_vm9 = vweird.f32 %v13769_v62  ;;  %vm3082_vm11 = vweird.f32 %v13773_v46 }
 0x4ad   : > { %v1049_v9 = vmul.f32 %v13782_v13, %v13748_v39  ;;  %v13802_v53 = vpop.eup %9953  ;;  %v1043_v56 = vmul.f32 %v13750_v44, %v1042_v51  ;;  %9965 = vrcp.f32 %v13778_v4  ;;  %v13833_v51 = vpop.f32.mrf.mxu2  ;;  %vm1055_vm1 = vweird.f32 %v13782_v13 }
 0x4ae   : > { %v13815_v59 = vpop.eup %9955  ;;  %9967 = vpow2.f32 %v9145_v5  ;;  %vm13854_vm4 = vmor %vm1054_vm15, %vm1055_vm1 }
 0x4af   : > { %v1050_v27 = vmul.f32 %v13782_v13, %v1049_v9  ;;  %v1047_v7 = vsel %vm13795_vm12, %v13750_v44, %v1043_v56  ;;  %v13831_v29 = vpop.eup %9957  ;;  %9969 = vrcp.f32 %v13787_v25  ;;  %v3033_v61 = vmul.f32 %v13815_v59, %v13754_v32 }
 0x4b0   : > { %v1133_v8 = vmul.f32 %v1047_v7, %v13148_v18  ;;  %v9960_v5 = vpop.eup %9959  ;;  %v2393_v18 = vadd.f32 %v20728_v40, %v12014_v42  ;;  %9971 = vrcp.f32 %v13817_v30  ;;  %v472_v7 = vld [vmem:[%s13656_s26 + $0x58] sm:$0xff]  ;;  %v20733_v40 = vld [vmem:[#allocation17_spill] sm:$0xff]  ;;  %8349 = vperm.xlu2 %9707, %v473_v38   ;;  %v13923_v38 = vpop.f32.mrf.mxu1  ;;  %vm3053_vm8 = vweird.f32 %v13831_v29 }
 0x4b1   : > { %v1051_v20 = vmul.f32 0.5, %v1050_v27  ;;  %v13840_v44 = vpop.eup %9961  ;;  %v13868_v22 = vadd.f32 1.0, %v9960_v5  ;;  %v2427_v45 = vadd.f32 %v20733_v40, %v13697_v21  ;;  %v3048_v5 = vmul.f32 %v13831_v29, %v13763_v63  ;;  %8384 = vperm.xlu0 %9705, %v480_v55   ;;  %8344 = vperm.xlu1 %9706, %v472_v7   ;;  %vm14011_vm15 = vmor %vm3052_vm0, %vm3053_vm8 }
 0x4b2   : > { %v3740_v28 = vmul.f32 %v3015_v16, %v1133_v8  ;;  %v13845_v9 = vpop.eup %9963  ;;  %v3058_v16 = vand.u32 2147483648, %v13763_v63  ;;  %v13915_v55 = vadd.f32 1.0, %v13802_v53  ;;  %v13982_v30 = vadd.f32 %v20742_v10, %v12014_v42 }
 0x4b3   : > { %v1052_v26 = vsub.f32 1.5, %v1051_v20  ;;  %v13858_v43 = vpop.eup %9965  ;;  %v13893_v40 = vmul.f32 %v13845_v9, %v13773_v46  ;;  %9973 = vrcp.f32 %v13868_v22  ;;  %vm3083_vm10 = vweird.f32 %v13845_v9 }
 0x4b4   : > { %v3772_v27 = vadd.f32 %v3740_v28, %v2393_v18  ;;  %v9968_v8 = vpop.eup %9967  ;;  %v3063_v18 = vmul.f32 %v13840_v44, %v13769_v62  ;;  %v13897_v1 = vmul.f32 %v13858_v43, %v13778_v4  ;;  %20737 = vst [vmem:[#allocation17_spill] sm:$0xff] %v13915_v55  ;;  %v3041_v55 = vand.u32 2147483647, %v13754_v32 }
 0x4b5   : > { %v1053_v39 = vmul.f32 %v13782_v13, %v1052_v26  ;;  %v13903_v49 = vpop.eup %9969  ;;  %v13906_v56 = vadd.f32 1.0, %v9968_v8  ;;  %v13921_v8 = vpop.f32.mrf.mxu0  ;;  %vm3097_vm12 = vweird.f32 %v13778_v4  ;;  %vm3038_vm13 = vweird.f32 %v13815_v59 }
 0x4b6   : > { %v13886_v28 = vpack.c.bf16 %v3772_v27, %v13329_v0  ;;  %v9047_v0 = vld [vmem:[%s20375_s6 + $0x90] sm:$0xf]  ;;  %20735 = vst [vmem:[#allocation20_spill] sm:$0xff] %v13903_v49  ;;  %v3030_v27 = vsel %vm3027_vm6, %v3029_v37, %v3025_v14  ;;  %v3049_v37 = vsub.f32 1.0, %v3048_v5  ;;  %v3064_v53 = vsub.f32 1.0, %v3063_v18  ;;  %vm14040_vm2 = vmor %vm3037_vm7, %vm3038_vm13 }
 0x4b7   : > { %v1057_v26 = vsel %vm13854_vm4, %v13782_v13, %v1053_v39  ;;  %v3034_v13 = vsub.f32 1.0, %v3033_v61  ;;  %v13917_v39 = vmul.f32 -1.442695, %v2427_v45  ;;  %v20739_v61 = vld [vmem:[#allocation30_spill] sm:$0xff]  ;;  %v13929_v45 = vpop.f32.mrf.mxu2  ;;  %v9048_v20 = vor.u32 %v9468_v36, %v9047_v0  ;;  %v476_v36 = vld [vmem:[%s13656_s26 + $0x78] sm:$0xff]  ;;  %vm14092_vm6 = vmor %vm3082_vm11, %vm3083_vm10 }
 0x4b8   : > { %20734 = vst [vmem:[#allocation15_spill] sm:$0xff] %v13886_v28  ;;  %v1134_v35 = vmul.f32 %v1057_v26, %v13186_v41  ;;  %4055 = vmatmul.bf16.gmra.mxu3 %v13886_v28  ;;  %v13912_v41 = vpop.eup %9971  ;;  %v2396_v7 = vadd.f32 %v20739_v61, %v12014_v42  ;;  %4144 = vmatmul.bf16.gmra.mxu0 %v13886_v28  ;;  %v13927_v26 = vor.u32 1.1754944e-38, %v3058_v16  ;;  %v3079_v61 = vsub.f32 1.0, %v13893_v40  ;;  %v20740_v5 = vld [vmem:[#allocation18_spill] sm:$0xff]  ;;  %v9467_v40 = vld [vmem:[%s20375_s6 + $0x9c] sm:$0xf] }
 0x4b9   : > { %20736 = vst [vmem:[#allocation28_spill] sm:$0xff] %v13912_v41  ;;  %4233 = vmatmul.bf16.gmra.mxu1 %v13886_v28  ;;  %4322 = vmatmul.bf16.gmra.mxu2 %v13886_v28  ;;  %v3094_v2 = vsub.f32 1.0, %v13897_v1  ;;  %v3035_v16 = vmul.f32 %v13815_v59, %v3034_v13  ;;  %v13944_v18 = vadd.f32 %v20740_v5, %v13697_v21  ;;  %9975 = vrcp.f32 %v13906_v56  ;;  %v9057_v1 = vld [vmem:[%s20375_s6 + $0xb8] sm:$0xf0]  ;;  %v9466_v0 = vld [vmem:[%s20375_s6 + $0x94] sm:$0xf] }
 0x4ba   : > { %20738 = vst [vmem:[#allocation63_spill] sm:$0xff] %v13917_v39  ;;  %v3741_v14 = vmul.f32 %v3030_v27, %v1134_v35  ;;  %v483_v27 = vld [vmem:[%s13656_s26 + $0xb0] sm:$0xff]  ;;  %4540 = vmatpush.bf16.msra.mxu3 %v9048_v20  ;;  %v9142_v13 = vmul.f32 -1.442695, %v13824_v15  ;;  %v9060_v20 = vor.u32 %v9467_v40, %v9057_v1  ;;  %v3050_v5 = vmul.f32 %v13831_v29, %v3049_v37  ;;  %v9055_v21 = vld [vmem:[%s20375_s6 + $0x98] sm:$0xf] }
 0x4bb   : > { %20741 = vst [vmem:[#allocation30_spill] sm:$0xff] %v13944_v18  ;;  %v3065_v19 = vmul.f32 %v13840_v44, %v3064_v53  ;;  %v9469_v40 = vld [vmem:[%s20375_s6 + $0xb4] sm:$0xf0]  ;;  %v13975_v41 = vor.u32 1.1754944e-38, %v3088_v24  ;;  %8399 = vperm.xlu0 %9705, %v483_v27   ;;  %8359 = vperm.xlu1 %9706, %v475_v33   ;;  %v3056_v27 = vand.u32 2147483647, %v13763_v63  ;;  %vm3068_vm14 = vweird.f32 %v13840_v44 }
 0x4bc   : > { %v13935_v35 = vadd.f32 %v3741_v14, %v2396_v7  ;;  %v9049_v7 = vld [vmem:[%s20375_s6 + $0xb0] sm:$0xf0]  ;;  %v13963_v14 = vpop.eup %9973  ;;  %v9056_v53 = vor.u32 %v9469_v40, %v9055_v21  ;;  %8364 = vperm.xlu2 %9707, %v476_v36   ;;  %4807 = vmatpush.bf16.msra.mxu2 %v9060_v20  ;;  %9977 = vpow2.f32 %v9142_v13  ;;  %v3036_v21 = vadd.f32 %v13815_v59, %v3035_v16  ;;  %vm14062_vm4 = vmor %vm3067_vm9, %vm3068_vm14  ;;  %v9031_v16 = vld [vmem:[%s20375_s6 + $0x50] sm:$0xf] }
 0x4bd   : > { %v9052_v6 = vor.u32 %v9466_v0, %v9049_v7  ;;  %v3080_v0 = vmul.f32 %v13845_v9, %v3079_v61  ;;  %v3095_v7 = vmul.f32 %v13858_v43, %v3094_v2  ;;  %v20743_v24 = vld [vmem:[#allocation35_spill] sm:$0xff]  ;;  %v5404_v33 = vmul.f32 %v13963_v14, %v13868_v22  ;;  %v481_v40 = vld [vmem:[%s13656_s26 + $0xa0] sm:$0xff] }
 0x4be   : > { %v13988_v37 = vadd.f32 %v20743_v24, %v12014_v42  ;;  %4718 = vmatpush.bf16.msra.mxu1 %v9056_v53  ;;  %v3051_v61 = vadd.f32 %v13831_v29, %v3050_v5  ;;  %v9143_v13 = vmul.f32 -1.442695, %v13826_v58  ;;  %v3066_v36 = vadd.f32 %v13840_v44, %v3065_v19  ;;  %v486_v5 = vld [vmem:[%s13656_s26 + $0xc8] sm:$0xff] }
 0x4bf   : > { %4629 = vmatpush.bf16.msra.mxu0 %v9052_v6  ;;  %v13993_v2 = vpop.eup %9975  ;;  %v14002_v6 = vadd.f32 %v13016_v48, %v12014_v42  ;;  %v14017_v20 = vadd.f32 %v13071_v54, %v12014_v42  ;;  %v14021_v48 = vadd.f32 %v13079_v52, %v12014_v42  ;;  %v478_v19 = vld [vmem:[%s13656_s26 + $0x88] sm:$0xff]  ;;  %vm14025_vm1 = vcmp.eq.f32.partialorder %v3041_v55, 8.507059e+37  ;;  %v479_v54 = vld [vmem:[%s13656_s26 + $0x90] sm:$0xff] }
 0x4c0   : > { %v14031_v63 = vmul.f32 %v13903_v49, %v13787_v25  ;;  %v5464_v53 = vmul.f32 %v13993_v2, %v13906_v56  ;;  %v20751_v52 = vand.u32 2147483648, %v13754_v32  ;;  %v3055_v25 = vsel %vm14011_vm15, %v13831_v29, %v3051_v61 }
 0x4c1   : > { %vm14054_vm3 = vcmp.eq.f32.partialorder %v3056_v27, 8.507059e+37  ;;  %9979 = vpow2.f32 %v9143_v13  ;;  %v3070_v29 = vsel %vm14062_vm4, %v13840_v44, %v3066_v36  ;;  %v3086_v61 = vand.u32 2147483647, %v13773_v46  ;;  %v14072_v27 = vpop.f32.mrf.mxu3  ;;  %v9464_v13 = vld [vmem:[%s20375_s6 + $0x6c] sm:$0xf0] }
 0x4c2   : > { %20748 = vst [vmem:[#allocation18_spill] sm:$0xff] %v14031_v63  ;;  %v3044_v55 = vor.u32 1.1754944e-38, %v20751_v52  ;;  %vm3098_vm5 = vweird.f32 %v13858_v43  ;;  %v3081_v44 = vadd.f32 %v13845_v9, %v3080_v0  ;;  %v20757_v42 = vand.u32 2147483648, %v13769_v62 }
 0x4c3   : > { %8414 = vperm.xlu0 %9705, %v486_v5   ;;  %8374 = vperm.xlu1 %9706, %v478_v19   ;;  %20756 = vst [vmem:[#allocation33_spill] sm:$0xff] %v14072_v27  ;;  %v3096_v5 = vadd.f32 %v13858_v43, %v3095_v7  ;;  %v3101_v19 = vand.u32 2147483647, %v13778_v4  ;;  %v9032_v63 = vor.u32 %v9464_v13, %v9031_v16  ;;  %vm14112_vm0 = vmor %vm3097_vm12, %vm3098_vm5  ;;  %vm14130_vm9 = vcmp.eq.f32.partialorder %v3086_v61, 8.507059e+37 }
 0x4c4   : > { %8379 = vperm.xlu2 %9707, %v479_v54   ;;  %v5465_v54 = vsub.f32 1.0, %v5464_v53  ;;  %v3074_v52 = vor.u32 1.1754944e-38, %v20757_v42  ;;  %v14106_v46 = vsel %vm14054_vm3, %v13927_v26, %v3055_v25  ;;  %v489_v53 = vld [vmem:[%s13656_s26 + $0xe0] sm:$0xff]  ;;  %v3085_v49 = vsel %vm14092_vm6, %v13845_v9, %v3081_v44 }
 0x4c5   : > { %4541 = vmatpush.bf16.msra.mxu3 %v9032_v63  ;;  %vm14123_vm8 = vcmp.eq.f32.partialorder %v3101_v19, 8.507059e+37  ;;  %vm5409_vm10 = vweird.f32 %v13963_v14  ;;  %v20766_v9 = vand.u32 2147483648, %v13778_v4  ;;  %vm5408_vm11 = vweird.f32 %v13868_v22 }
 0x4c6   : > { %v5466_v63 = vmul.f32 %v13993_v2, %v5465_v54  ;;  %v5472_v13 = vand.u32 2147483647, %v13906_v56  ;;  %vm14157_vm12 = vmor %vm5408_vm11, %vm5409_vm10  ;;  %v5474_v19 = vand.u32 2147483648, %v13906_v56  ;;  %vm5469_vm13 = vweird.f32 %v13993_v2 }
 0x4c7   : > { %v3104_v61 = vor.u32 1.1754944e-38, %v20766_v9  ;;  %v9146_v7 = vmul.f32 -1.442695, %v13921_v8  ;;  %vm5468_vm15 = vweird.f32 %v13906_v56  ;;  %v484_v9 = vld [vmem:[%s13656_s26 + $0xb8] sm:$0xff] }
 0x4cb   : > { %8429 = vperm.xlu0 %9705, %v489_v53   ;;  %8389 = vperm.xlu1 %9706, %v481_v40   ;;  %v9147_v40 = vmul.f32 -1.442695, %v13923_v38 }
 0x4cd   : > { %v715_v1 = vpop.xlane.xlu1 %714 }
 0x4ce   : > { %v751_v10 = vmul.f32 %v715_v1, %v11819_v57  ;;  %v5405_v1 = vsub.f32 1.0, %v5404_v33  ;;  %v3040_v33 = vsel %vm14040_vm2, %v13815_v59, %v3036_v21  ;;  %v9978_v59 = vpop.eup %9977  ;;  %v9144_v21 = vmul.f32 -1.442695, %v13833_v51  ;;  %vm14199_vm2 = vmor %vm5468_vm15, %vm5469_vm13 }
 0x4cf   : > { %v14096_v32 = vadd.f32 1.0, %v9978_v59 }
 0x4d0   : > { %v14046_v24 = vadd.f32 1e-05, %v751_v10  ;;  %v3071_v10 = vand.u32 2147483647, %v13769_v62  ;;  %v5406_v36 = vmul.f32 %v13963_v14, %v5405_v1  ;;  %v14101_v62 = vsel %vm14025_vm1, %v3044_v55, %v3040_v33  ;;  %v9980_v33 = vpop.eup %9979  ;;  %v14178_v1 = vpop.f32.mrf.mxu1 }
 0x4d1   : > { %v3100_v55 = vsel %vm14112_vm0, %v13858_v43, %v3096_v5  ;;  %v482_v43 = vld [vmem:[%s13656_s26 + $0xa8] sm:$0xff]  ;;  %v14153_v5 = vsel %vm14130_vm9, %v13975_v41, %v3085_v49  ;;  %20769 = vst [vmem:[#allocation35_spill] sm:$0xff] %v14178_v1  ;;  %vm14186_vm1 = vcmp.eq.f32.partialorder %v5472_v13, 8.507059e+37  ;;  %v9148_v49 = vmul.f32 -1.442695, %v13929_v45 }
 0x4d2   : > { %9981 = vrsqrt.f32 %v14046_v24  ;;  %vm3072_vm7 = vcmp.eq.f32.partialorder %v3071_v10, 8.507059e+37  ;;  %v5407_v10 = vadd.f32 %v13963_v14, %v5406_v36  ;;  %8394 = vperm.xlu2 %9707, %v482_v43   ;;  %v14168_v36 = vsel %vm14123_vm8, %v3104_v61, %v3100_v55  ;;  %v14182_v55 = vpop.f32.mrf.mxu2 }
 0x4d3   : > { %9983 = vpow2.f32 %v9144_v21  ;;  %v5412_v21 = vand.u32 2147483647, %v13868_v22  ;;  %20770 = vst [vmem:[#allocation64_spill] sm:$0xff] %v14182_v55  ;;  %v5475_v43 = vor.u32 1.1754944e-38, %v5474_v19  ;;  %8404 = vperm.xlu1 %9706, %v484_v9   ;;  %vm1064_vm4 = vweird.f32 %v14046_v24 }
 0x4d4   : > { %v717_v18 = vpop.xlane.xlu2 %716  ;;  %9985 = vrcp.f32 %v14096_v32  ;;  %v5411_v42 = vsel %vm14157_vm12, %v13963_v14, %v5407_v10  ;;  %v14184_v14 = vpop.f32.mrf.mxu3  ;;  %vm5423_vm8 = vweird.f32 %v14096_v32 }
 0x4d5   : > { %v752_v0 = vmul.f32 %v717_v18, %v11819_v57  ;;  %v14116_v18 = vsel %vm3072_vm7, %v3074_v52, %v3070_v29  ;;  %v5414_v29 = vand.u32 2147483648, %v13868_v22  ;;  %v14162_v22 = vadd.f32 1.0, %v9980_v33 }
 0x4d6   : > { %v5467_v52 = vadd.f32 %v13993_v2, %v5466_v63  ;;  %vm5413_vm14 = vcmp.eq.f32.partialorder %v5412_v21, 8.507059e+37  ;;  %v9033_v63 = vld [vmem:[%s20375_s6 + $0x70] sm:$0xf0] }
 0x4d7   : > { %v14138_v59 = vadd.f32 1e-05, %v752_v0  ;;  %v14176_v0 = vpop.f32.mrf.mxu0  ;;  %v5415_v53 = vor.u32 1.1754944e-38, %v5414_v29  ;;  %v492_v29 = vld [vmem:[%s13656_s26 + $0xf8] sm:$0xff]  ;;  %vm5438_vm11 = vweird.f32 %v14162_v22 }
 0x4d8   : > { %v14145_v16 = vpop.eup %9981  ;;  %v5471_v13 = vsel %vm14199_vm2, %v13993_v2, %v5467_v52  ;;  %v9150_v19 = vmul.f32 -1.442695, %v14176_v0  ;;  %8444 = vperm.xlu0 %9705, %v492_v29   ;;  %v9463_v52 = vld [vmem:[%s20375_s6 + $0x5c] sm:$0xf]  ;;  %v9151_v29 = vmul.f32 -1.442695, %v14178_v1  ;;  %v14265_v17 = vpop.f32.mrf.mxu1 }
 0x4d9   : > { %9987 = vrsqrt.f32 %v14138_v59  ;;  %v1059_v44 = vmul.f32 %v14145_v16, %v14046_v24  ;;  %v9984_v54 = vpop.eup %9983  ;;  %v14195_v56 = vsel %vm5413_vm14, %v5415_v53, %v5411_v42  ;;  %vm1065_vm3 = vweird.f32 %v14145_v16  ;;  %v9039_v24 = vld [vmem:[%s20375_s6 + $0x58] sm:$0xf] }
 0x4da   : > { %v14193_v10 = vpop.eup %9985  ;;  %9989 = vrcp.f32 %v14162_v22  ;;  %v14204_v21 = vadd.f32 1.0, %v9984_v54  ;;  %vm14252_vm5 = vmor %vm1064_vm4, %vm1065_vm3  ;;  %vm1074_vm6 = vweird.f32 %v14138_v59 }
 0x4db   : > { %v1060_v26 = vmul.f32 %v14145_v16, %v1059_v44  ;;  %9991 = vpow2.f32 %v9146_v7  ;;  %v485_v44 = vld [vmem:[%s13656_s26 + $0xc0] sm:$0xff]  ;;  %v14222_v39 = vmul.f32 %v14193_v10, %v14096_v32  ;;  %v9041_v7 = vld [vmem:[%s20375_s6 + $0x78] sm:$0xf0]  ;;  %8419 = vperm.xlu1 %9706, %v487_v31   ;;  %vm5424_vm10 = vweird.f32 %v14193_v10 }
 0x4dc   : > { %9993 = vpow2.f32 %v9147_v40  ;;  %v5476_v40 = vsel %vm14186_vm1, %v5475_v43, %v5471_v13  ;;  %8409 = vperm.xlu2 %9707, %v485_v44   ;;  %v14248_v13 = vpop.f32.mrf.mxu3  ;;  %vm14372_vm13 = vmor %vm5423_vm8, %vm5424_vm10 }
 0x4dd   : > { %v723_v41 = vpop.xlane.xlu2 %722  ;;  %9995 = vpow2.f32 %v9148_v49  ;;  %v5420_v4 = vsub.f32 1.0, %v14222_v39 }
 0x4de   : > { %v755_v33 = vmul.f32 %v723_v41, %v11819_v57  ;;  %v1061_v41 = vmul.f32 0.5, %v1060_v26  ;;  %9997 = vrcp.f32 %v14204_v21 }
 0x4df   : > { %v14208_v61 = vpop.eup %9987  ;;  %v719_v53 = vpop.xlane.xlu0 %718  ;;  %9999 = vpow2.f32 %v9150_v19  ;;  %v9465_v19 = vld [vmem:[%s20375_s6 + $0x74] sm:$0xf0] }
 0x4e0   : > { %v1069_v54 = vmul.f32 %v14208_v61, %v14138_v59  ;;  %v14218_v42 = vadd.f32 1e-05, %v755_v33  ;;  %v1062_v2 = vsub.f32 1.5, %v1061_v41  ;;  %v9462_v33 = vld [vmem:[%s20375_s6 + $0x54] sm:$0xf]  ;;  %v753_v43 = vmul.f32 %v719_v53, %v11819_v57  ;;  %v14246_v9 = vpop.eup %9989  ;;  %v14263_v28 = vpop.f32.mrf.mxu0 }
 0x4e1   : > { %v9036_v26 = vor.u32 %v9462_v33, %v9033_v63  ;;  %v14273_v33 = vpop.f32.mrf.mxu2  ;;  %vm1075_vm7 = vweird.f32 %v14208_v61  ;;  %vm5439_vm12 = vweird.f32 %v14246_v9 }
 0x4e2   : > { %v1070_v49 = vmul.f32 %v14208_v61, %v1069_v54  ;;  %v1063_v25 = vmul.f32 %v14145_v16, %v1062_v2  ;;  %v9044_v54 = vor.u32 %v9463_v52, %v9041_v7  ;;  %v721_v53 = vpop.xlane.xlu1 %720  ;;  %v9992_v2 = vpop.eup %9991  ;;  %10001 = vrsqrt.f32 %v14218_v42  ;;  %vm1076_vm0 = vmor %vm1074_vm6, %vm1075_vm7 }
 0x4e3   : > { %v14271_v7 = vadd.f32 1e-05, %v753_v43  ;;  %4630 = vmatpush.bf16.msra.mxu0 %v9036_v26  ;;  %v9040_v43 = vor.u32 %v9465_v19, %v9039_v24  ;;  %v754_v44 = vmul.f32 %v721_v53, %v11819_v57  ;;  %v14292_v26 = vmul.f32 %v14195_v56, %v13740_v47  ;;  %vm14434_vm3 = vmor %vm5438_vm11, %vm5439_vm12 }
 0x4e4   : > { %v1071_v41 = vmul.f32 0.5, %v1070_v49  ;;  %v1067_v52 = vsel %vm14252_vm5, %v14145_v16, %v1063_v25  ;;  %v9994_v49 = vpop.eup %9993  ;;  %4808 = vmatpush.bf16.msra.mxu2 %v9044_v54  ;;  %v5434_v16 = vmul.f32 %v14246_v9, %v14162_v22  ;;  %v488_v25 = vld [vmem:[%s13656_s26 + $0xd8] sm:$0xff]  ;;  %v5444_v24 = vand.u32 2147483648, %v14162_v22 }
 0x4e5   : > { %v1135_v63 = vmul.f32 %v1067_v52, %v13400_v3  ;;  %v9996_v50 = vpop.eup %9995  ;;  %10003 = vrsqrt.f32 %v14271_v7  ;;  %v14286_v3 = vadd.f32 1.0, %v9992_v2  ;;  %20777 = vst [vmem:[#allocation65_spill] sm:$0xff] %v14292_v26  ;;  %v14295_v52 = vmul.f32 %v5476_v40, %v13771_v23  ;;  %4719 = vmatpush.bf16.msra.mxu1 %v9040_v43  ;;  %8424 = vperm.xlu2 %9707, %v488_v25   ;;  %v14334_v25 = vpop.f32.mrf.mxu1 }
 0x4e6   : > { %v1072_v39 = vsub.f32 1.5, %v1071_v41  ;;  %v14284_v1 = vpop.eup %9997  ;;  %10005 = vpow2.f32 %v9151_v29  ;;  %v14302_v57 = vadd.f32 1e-05, %v754_v44  ;;  %v5421_v29 = vmul.f32 %v14193_v10, %v5420_v4 }
 0x4e7   : > { %v3742_v41 = vmul.f32 %v14101_v62, %v1135_v63  ;;  %20778 = vst [vmem:[#allocation66_spill] sm:$0xff] %v14295_v52  ;;  %v10000_v62 = vpop.eup %9999  ;;  %v5435_v31 = vsub.f32 1.0, %v5434_v16  ;;  %v20779_v19 = vand.u32 2147483647, %v14096_v32  ;;  %v5459_v63 = vand.u32 2147483648, %v14204_v21 }
 0x4e8   : > { %v1073_v54 = vmul.f32 %v14208_v61, %v1072_v39  ;;  %v14308_v56 = vpop.eup %10001  ;;  %10007 = vrsqrt.f32 %v14302_v57  ;;  %v14330_v39 = vadd.f32 1.0, %v9994_v49  ;;  %v14332_v16 = vpop.f32.mrf.mxu0  ;;  %v14363_v40 = vadd.f32 1.0, %v10000_v62 }
 0x4e9   : > { %v3774_v47 = vadd.f32 %v3742_v41, %v13982_v30  ;;  %vm14315_vm9 = vcmp.eq.f32.partialorder %v20779_v19, 8.507059e+37  ;;  %v20782_v30 = vand.u32 2147483648, %v14096_v32  ;;  %10009 = vrcp.f32 %v14286_v3 }
 0x4ea   : > { %v1077_v23 = vsel %vm1076_vm0, %v14208_v61, %v1073_v54  ;;  %v5422_v41 = vadd.f32 %v14193_v10, %v5421_v29  ;;  %v14341_v54 = vpop.f32.mrf.mxu3  ;;  %v1099_v49 = vmul.f32 %v14308_v56, %v14218_v42  ;;  %v14353_v29 = vadd.f32 1.0, %v9996_v50 }
 0x4eb   : > { %v1136_v59 = vmul.f32 %v1077_v23, %v13478_v60  ;;  %v5430_v53 = vor.u32 1.1754944e-38, %v20782_v30  ;;  %v14323_v61 = vpack.c.bf16 %v3774_v47, %v13935_v35  ;;  %v14325_v2 = vpop.eup %10003  ;;  %v14327_v60 = vor.u32 1.1754944e-38, %v5444_v24  ;;  %v14339_v35 = vpop.f32.mrf.mxu2  ;;  %20784 = vst [vmem:[#allocation68_spill] sm:$0xff] %v14341_v54  ;;  %v490_v24 = vld [vmem:[%s13656_s26 + $0xe8] sm:$0xff] }
 0x4ec   : > { %v10006_v44 = vpop.eup %10005  ;;  %v1079_v47 = vmul.f32 %v14325_v2, %v14271_v7  ;;  %10011 = vrcp.f32 %v14330_v39  ;;  %8434 = vperm.xlu1 %9706, %v490_v24   ;;  %v5426_v32 = vsel %vm14372_vm13, %v14193_v10, %v5422_v41  ;;  %v1100_v30 = vmul.f32 %v14308_v56, %v1099_v49 }
 0x4ed   : > { %20783 = vst [vmem:[#allocation67_spill] sm:$0xff] %v14323_v61  ;;  %v3743_v43 = vmul.f32 %v14106_v46, %v1136_v59  ;;  %4060 = vmatmul.bf16.gmra.mxu3 %v14323_v61  ;;  %4149 = vmatmul.bf16.gmra.mxu0 %v14323_v61  ;;  %v5436_v46 = vmul.f32 %v14246_v9, %v5435_v31  ;;  %v491_v59 = vld [vmem:[%s13656_s26 + $0xf0] sm:$0xff]  ;;  %v14381_v62 = vadd.f32 1.0, %v10006_v44  ;;  %v5489_v44 = vand.u32 2147483648, %v14286_v3 }
 0x4ee   : > { %4238 = vmatmul.bf16.gmra.mxu1 %v14323_v61  ;;  %4327 = vmatmul.bf16.gmra.mxu2 %v14323_v61  ;;  %v1080_v31 = vmul.f32 %v14325_v2, %v1079_v47  ;;  %v14366_v52 = vpop.eup %10007  ;;  %10013 = vrcp.f32 %v14353_v29  ;;  %vm1085_vm14 = vweird.f32 %v14325_v2  ;;  %v5431_v41 = vsel %vm14315_vm9, %v5430_v53, %v5426_v32 }
 0x4ef   : > { %v14356_v23 = vadd.f32 %v3743_v43, %v13988_v37  ;;  %v5449_v37 = vmul.f32 %v14284_v1, %v14204_v21  ;;  %v14378_v43 = vor.u32 1.1754944e-38, %v5459_v63  ;;  %v14383_v47 = vpop.eup %10009  ;;  %8439 = vperm.xlu2 %9707, %v491_v59   ;;  %v1089_v61 = vmul.f32 %v14366_v52, %v14302_v57 }
 0x4f0   : > { %v1081_v19 = vmul.f32 0.5, %v1080_v31  ;;  %v14392_v63 = vadd.f32 %v14246_v9, %v5436_v46  ;;  %10015 = vrcp.f32 %v14363_v40  ;;  %v14404_v46 = vmul.f32 %v14383_v47, %v14286_v3 }
 0x4f1   : > { %v1090_v10 = vmul.f32 %v14366_v52, %v1089_v61  ;;  %v5450_v49 = vsub.f32 1.0, %v5449_v37  ;;  %10017 = vrcp.f32 %v14381_v62  ;;  %v1101_v31 = vmul.f32 0.5, %v1100_v30 }
 0x4f2   : > { %v1082_v50 = vsub.f32 1.5, %v1081_v19  ;;  %v14407_v59 = vpop.f32.mrf.mxu3  ;;  %vm1084_vm15 = vweird.f32 %v14271_v7  ;;  %v14411_v26 = vpop.eup %10011  ;;  %v20788_v4 = vand.u32 2147483647, %v14162_v22  ;;  %v14419_v61 = vor.u32 1.1754944e-38, %v5489_v44 }
 0x4f3   : > { %20787 = vst [vmem:[#allocation69_spill] sm:$0xff] %v14407_v59  ;;  %v1091_v19 = vmul.f32 0.5, %v1090_v10  ;;  %v9149_v32 = vmul.f32 -1.442695, %v14072_v27  ;;  %v9152_v30 = vmul.f32 -1.442695, %v14182_v55  ;;  %v14426_v7 = vpop.f32.mrf.mxu1  ;;  %vm1086_vm2 = vmor %vm1084_vm15, %vm1085_vm14  ;;  %vm5454_vm4 = vweird.f32 %v14284_v1  ;;  %v14439_v10 = vpop.f32.mrf.mxu2 }
 0x4f4   : > { %v1083_v24 = vmul.f32 %v14325_v2, %v1082_v50  ;;  %vm14415_vm1 = vcmp.eq.f32.partialorder %v20788_v4, 8.507059e+37  ;;  %v14424_v50 = vpop.f32.mrf.mxu0  ;;  %20793 = vst [vmem:[#allocation70_spill] sm:$0xff] %v14439_v10  ;;  %vm1094_vm5 = vweird.f32 %v14302_v57  ;;  %vm1095_vm6 = vweird.f32 %v14366_v52  ;;  %v14444_v59 = vpop.eup %10013 }
 0x4f5   : > { %v1092_v37 = vsub.f32 1.5, %v1091_v19  ;;  %v14447_v55 = vmul.f32 %v5431_v41, %v13824_v15  ;;  %v5441_v22 = vsel %vm14434_vm3, %v14246_v9, %v14392_v63  ;;  %v5451_v27 = vmul.f32 %v14284_v1, %v5450_v49  ;;  %vm1096_vm0 = vmor %vm1094_vm5, %vm1095_vm6 }
 0x4f6   : > { %v1087_v4 = vsel %vm1086_vm2, %v14325_v2, %v1083_v24  ;;  %v14455_v2 = vpop.eup %10015  ;;  %vm5453_vm7 = vweird.f32 %v14204_v21  ;;  %v5480_v24 = vsub.f32 1.0, %v14404_v46  ;;  %v9154_v19 = vmul.f32 -1.442695, %v14263_v28 }
 0x4f7   : > { %20794 = vst [vmem:[#allocation71_spill] sm:$0xff] %v14447_v55  ;;  %v1137_v10 = vmul.f32 %v1087_v4, %v13561_v12  ;;  %v1102_v54 = vsub.f32 1.5, %v1101_v31  ;;  %v1093_v15 = vmul.f32 %v14366_v52, %v1092_v37  ;;  %v14461_v41 = vpop.eup %10017  ;;  %v5494_v9 = vmul.f32 %v14411_v26, %v14330_v39  ;;  %vm14537_vm15 = vmor %vm5453_vm7, %vm5454_vm4 }
 0x4f8   : > { %10019 = vpow2.f32 %v9149_v32  ;;  %v9155_v63 = vmul.f32 -1.442695, %v14265_v17  ;;  %vm1104_vm8 = vweird.f32 %v14218_v42  ;;  %vm1105_vm9 = vweird.f32 %v14308_v56 }
 0x4f9   : > { %v3744_v12 = vmul.f32 %v14116_v18, %v1137_v10  ;;  %10021 = vpow2.f32 %v9152_v30  ;;  %v1097_v49 = vsel %vm1096_vm0, %v14366_v52, %v1093_v15  ;;  %v5509_v46 = vmul.f32 %v14444_v59, %v14353_v29  ;;  %vm14499_vm11 = vmor %vm1104_vm8, %vm1105_vm9 }
 0x4fa   : > { %v9153_v31 = vmul.f32 -1.442695, %v14184_v14  ;;  %v1138_v18 = vmul.f32 %v1097_v49, %v13574_v34  ;;  %v20795_v32 = vand.u32 2147483647, %v14204_v21  ;;  %v5539_v30 = vmul.f32 %v14455_v2, %v14363_v40  ;;  %v14515_v49 = vpop.f32.mrf.mxu3 }
 0x4fb   : > { %v3776_v37 = vadd.f32 %v3744_v12, %v14002_v6  ;;  %10023 = vpow2.f32 %v9154_v19  ;;  %v9156_v52 = vmul.f32 -1.442695, %v14273_v33  ;;  %v1103_v44 = vmul.f32 %v14308_v56, %v1102_v54  ;;  %v14493_v34 = vpop.f32.mrf.mxu1  ;;  %v14513_v42 = vpop.f32.mrf.mxu2 }
 0x4fc   : > { %vm14481_vm10 = vcmp.eq.f32.partialorder %v20795_v32, 8.507059e+37  ;;  %v5554_v10 = vmul.f32 %v14461_v41, %v14381_v62  ;;  %10025 = vpow2.f32 %v9155_v63  ;;  %v14491_v6 = vpop.f32.mrf.mxu0  ;;  %v3745_v54 = vmul.f32 %v14153_v5, %v1138_v18 }
 0x4fd   : > { %v14504_v19 = vpack.c.bf16 %v3776_v37, %v14356_v23  ;;  %v5446_v15 = vsel %vm14415_vm1, %v14327_v60, %v5441_v22  ;;  %v5452_v63 = vadd.f32 %v14284_v1, %v5451_v27  ;;  %vm5484_vm12 = vweird.f32 %v14383_v47 }
 0x4fe   : > { %v5519_v12 = vand.u32 2147483648, %v14353_v29  ;;  %v10020_v32 = vpop.eup %10019  ;;  %v5481_v23 = vmul.f32 %v14383_v47, %v5480_v24  ;;  %vm5483_vm13 = vweird.f32 %v14286_v3  ;;  %v5495_v5 = vsub.f32 1.0, %v5494_v9 }
 0x4ff   : > { %20800 = vst [vmem:[#allocation72_spill] sm:$0xff] %v14504_v19  ;;  %10027 = vpow2.f32 %v9153_v31  ;;  %v14520_v53 = vadd.f32 %v3745_v54, %v14017_v20  ;;  %4065 = vmatmul.bf16.gmra.mxu3 %v14504_v19  ;;  %4154 = vmatmul.bf16.gmra.mxu0 %v14504_v19  ;;  %v10022_v27 = vpop.eup %10021  ;;  %vm5498_vm14 = vweird.f32 %v14330_v39  ;;  %v5510_v60 = vsub.f32 1.0, %v5509_v46  ;;  %vm14605_vm0 = vmor %vm5483_vm13, %vm5484_vm12 }
 0x500   : > { %v5540_v22 = vsub.f32 1.0, %v5539_v30  ;;  %10029 = vpow2.f32 %v9156_v52  ;;  %v1107_v24 = vsel %vm14499_vm11, %v14308_v56, %v1103_v44  ;;  %4243 = vmatmul.bf16.gmra.mxu1 %v14504_v19  ;;  %4332 = vmatmul.bf16.gmra.mxu2 %v14504_v19  ;;  %v14531_v20 = vmul.f32 %v5446_v15, %v13826_v58 }
 0x501   : > { %v20804_v46 = vand.u32 2147483648, %v14330_v39  ;;  %vm5513_vm1 = vweird.f32 %v14353_v29  ;;  %v5555_v56 = vsub.f32 1.0, %v5554_v10  ;;  %v10024_v37 = vpop.eup %10023  ;;  %v5456_v58 = vsel %vm14537_vm15, %v14284_v1, %v5452_v63 }
 0x502   : > { %20801 = vst [vmem:[#allocation73_spill] sm:$0xff] %v14531_v20  ;;  %vm5499_vm2 = vweird.f32 %v14411_v26  ;;  %v5517_v21 = vand.u32 2147483647, %v14353_v29  ;;  %v14551_v18 = vadd.f32 1.0, %v10020_v32  ;;  %v10026_v30 = vpop.eup %10025  ;;  %v5496_v52 = vmul.f32 %v14411_v26, %v5495_v5  ;;  %v14616_v20 = vpop.f32.mrf.mxu3 }
 0x503   : > { %v14543_v31 = vor.u32 1.1754944e-38, %v20804_v46  ;;  %v14554_v44 = vor.u32 1.1754944e-38, %v5519_v12  ;;  %v14556_v4 = vadd.f32 1.0, %v10022_v27  ;;  %v1139_v10 = vmul.f32 %v1107_v24, %v13555_v11  ;;  %v14614_v19 = vpop.f32.mrf.mxu2  ;;  %vm14622_vm9 = vmor %vm5498_vm14, %vm5499_vm2 }
 0x504   : > { %v5482_v54 = vadd.f32 %v14383_v47, %v5481_v23  ;;  %v5511_v15 = vmul.f32 %v14444_v59, %v5510_v60  ;;  %v5541_v1 = vmul.f32 %v14455_v2, %v5540_v22  ;;  %vm5543_vm3 = vweird.f32 %v14363_v40 }
 0x505   : > { %v10028_v63 = vpop.eup %10027  ;;  %v14566_v32 = vsel %vm14481_vm10, %v14378_v43, %v5456_v58  ;;  %v20805_v12 = vand.u32 2147483647, %v14286_v3  ;;  %v20808_v11 = vand.u32 2147483647, %v14330_v39  ;;  %v5547_v27 = vand.u32 2147483647, %v14363_v40  ;;  %v14598_v58 = vpop.f32.mrf.mxu1 }
 0x506   : > { %v5556_v60 = vmul.f32 %v14461_v41, %v5555_v56  ;;  %v14582_v22 = vadd.f32 1.0, %v10024_v37  ;;  %v10030_v43 = vpop.eup %10029  ;;  %vm5514_vm6 = vweird.f32 %v14444_v59  ;;  %vm14585_vm7 = vcmp.eq.f32.partialorder %v5517_v21, 8.507059e+37  ;;  %v14596_v37 = vpop.f32.mrf.mxu0 }
 0x507   : > { %vm14570_vm4 = vcmp.eq.f32.partialorder %v20805_v12, 8.507059e+37  ;;  %vm14576_vm5 = vcmp.eq.f32.partialorder %v20808_v11, 8.507059e+37  ;;  %v5549_v24 = vand.u32 2147483648, %v14363_v40  ;;  %10031 = vrcp.f32 %v14551_v18  ;;  %vm14638_vm11 = vmor %vm5513_vm1, %vm5514_vm6 }
 0x508   : > { %v14591_v9 = vadd.f32 1.0, %v10026_v30  ;;  %v5497_v46 = vadd.f32 %v14411_v26, %v5496_v52  ;;  %10033 = vrcp.f32 %v14556_v4  ;;  %v9158_v56 = vmul.f32 -1.442695, %v14332_v16 }
 0x509   : > { %v3746_v21 = vmul.f32 %v14168_v36, %v1139_v10  ;;  %v5512_v30 = vadd.f32 %v14444_v59, %v5511_v15  ;;  %v5542_v52 = vadd.f32 %v14455_v2, %v5541_v1  ;;  %vm5544_vm8 = vweird.f32 %v14455_v2 }
 0x50a   : > { %v14612_v11 = vadd.f32 1.0, %v10028_v63  ;;  %v5557_v3 = vadd.f32 %v14461_v41, %v5556_v60  ;;  %vm5559_vm10 = vweird.f32 %v14461_v41  ;;  %10035 = vrcp.f32 %v14582_v22  ;;  %vm14652_vm13 = vmor %vm5543_vm3, %vm5544_vm8 }
 0x50b   : > { %v14629_v10 = vadd.f32 1.0, %v10030_v43  ;;  %v5486_v15 = vsel %vm14605_vm0, %v14383_v47, %v5482_v54  ;;  %vm5558_vm12 = vweird.f32 %v14381_v62  ;;  %v5564_v1 = vand.u32 2147483648, %v14381_v62 }
 0x50c   : > { %10037 = vrcp.f32 %v14591_v9  ;;  %v5501_v63 = vsel %vm14622_vm9, %v14411_v26, %v5497_v46  ;;  %v5562_v47 = vand.u32 2147483647, %v14381_v62  ;;  %v3778_v54 = vadd.f32 %v3746_v21, %v14021_v48  ;;  %vm14668_vm15 = vmor %vm5558_vm12, %vm5559_vm10 }
 0x50d   : > { %10039 = vpow2.f32 %v9158_v56  ;;  %v14658_v60 = vpop.eup %10031  ;;  %v5516_v43 = vsel %vm14638_vm11, %v14444_v59, %v5512_v30  ;;  %v5546_v26 = vsel %vm14652_vm13, %v14455_v2, %v5542_v52  ;;  %vm5548_vm14 = vcmp.eq.f32.partialorder %v5547_v27, 8.507059e+37 }
 0x50e   : > { %10041 = vrcp.f32 %v14612_v11  ;;  %v14673_v48 = vpop.eup %10033  ;;  %v5550_v62 = vor.u32 1.1754944e-38, %v5549_v24  ;;  %v5561_v59 = vsel %vm14668_vm15, %v14461_v41, %v5557_v3  ;;  %v14680_v2 = vpack.c.bf16 %v3778_v54, %v14520_v53  ;;  %v14717_v36 = vpop.f32.mrf.mxu0 }
 0x50f   : > { %10043 = vrcp.f32 %v14629_v10  ;;  %v5491_v27 = vsel %vm14570_vm4, %v14419_v61, %v5486_v15  ;;  %v5506_v46 = vsel %vm14576_vm5, %v14543_v31, %v5501_v63  ;;  %v5565_v56 = vor.u32 1.1754944e-38, %v5564_v1  ;;  %v14719_v3 = vpop.f32.mrf.mxu1  ;;  %v14733_v63 = vpop.f32.mrf.mxu3 }
 0x510   : > { %20823 = vst [vmem:[#allocation74_spill] sm:$0xff] %v14680_v2  ;;  %v9159_v24 = vmul.f32 -1.442695, %v14334_v25  ;;  %v14689_v21 = vpop.eup %10035  ;;  %v5521_v41 = vsel %vm14585_vm7, %v14554_v44, %v5516_v43  ;;  %v5551_v12 = vsel %vm5548_vm14, %v5550_v62, %v5546_v26  ;;  %vm5563_vm1 = vcmp.eq.f32.partialorder %v5562_v47, 8.507059e+37  ;;  %4070 = vmatmul.bf16.gmra.mxu3 %v14680_v2  ;;  %4159 = vmatmul.bf16.gmra.mxu0 %v14680_v2  ;;  %v20830_v47 = vld [vmem:[#allocation35_spill] sm:$0xff] }
 0x511   : > { %v5524_v53 = vmul.f32 %v14658_v60, %v14551_v18  ;;  %v14702_v31 = vmul.f32 %v14566_v32, %v13833_v51  ;;  %v5566_v5 = vsel %vm5563_vm1, %v5565_v56, %v5561_v59  ;;  %v5569_v23 = vmul.f32 %v14673_v48, %v14556_v4  ;;  %4248 = vmatmul.bf16.gmra.mxu1 %v14680_v2 }
 0x512   : > { %v14698_v61 = vpop.eup %10037  ;;  %v9157_v44 = vmul.f32 -1.442695, %v14248_v13  ;;  %4337 = vmatmul.bf16.gmra.mxu2 %v14680_v2  ;;  %v14710_v30 = vmul.f32 %v5491_v27, %v13921_v8  ;;  %v14713_v52 = vmul.f32 %v5506_v46, %v13923_v38  ;;  %v5534_v51 = vand.u32 2147483648, %v14551_v18  ;;  %v14731_v38 = vpop.f32.mrf.mxu2  ;;  %20829 = vst [vmem:[#allocation80_spill] sm:$0xff] %v14733_v63 }
 0x513   : > { %20824 = vst [vmem:[#allocation75_spill] sm:$0xff] %v14702_v31  ;;  %v10040_v57 = vpop.eup %10039  ;;  %v5579_v32 = vand.u32 2147483648, %v14556_v4  ;;  %v14724_v39 = vmul.f32 %v5521_v41, %v13929_v45  ;;  %v14727_v1 = vmul.f32 %v5551_v12, %v14176_v0  ;;  %v5599_v8 = vmul.f32 %v14689_v21, %v14582_v22 }
 0x514   : > { %20825 = vst [vmem:[#allocation76_spill] sm:$0xff] %v14710_v30  ;;  %v14721_v15 = vpop.eup %10041  ;;  %10045 = vpow2.f32 %v9159_v24  ;;  %v14738_v54 = vmul.f32 %v5566_v5, %v20830_v47  ;;  %v5525_v43 = vsub.f32 1.0, %v5524_v53  ;;  %v5532_v45 = vand.u32 2147483647, %v14551_v18 }
 0x515   : > { %20826 = vst [vmem:[#allocation77_spill] sm:$0xff] %v14713_v52  ;;  %v14735_v29 = vpop.eup %10043  ;;  %v9160_v26 = vmul.f32 -1.442695, %v14339_v35  ;;  %v5570_v0 = vsub.f32 1.0, %v5569_v23  ;;  %v5614_v40 = vmul.f32 %v14698_v61, %v14591_v9  ;;  %v14744_v62 = vadd.f32 1.0, %v10040_v57 }
 0x516   : > { %20827 = vst [vmem:[#allocation78_spill] sm:$0xff] %v14724_v39  ;;  %10047 = vpow2.f32 %v9157_v44  ;;  %vm5528_vm2 = vweird.f32 %v14551_v18  ;;  %v14747_v59 = vor.u32 1.1754944e-38, %v5534_v51  ;;  %v5577_v27 = vand.u32 2147483647, %v14556_v4  ;;  %v14790_v31 = vpop.f32.mrf.mxu0 }
 0x517   : > { %20828 = vst [vmem:[#allocation79_spill] sm:$0xff] %v14727_v1  ;;  %v14750_v46 = vor.u32 1.1754944e-38, %v5579_v32  ;;  %v5584_v56 = vmul.f32 %v14721_v15, %v14612_v11  ;;  %vm5573_vm3 = vweird.f32 %v14556_v4  ;;  %v5600_v24 = vsub.f32 1.0, %v5599_v8  ;;  %v14782_v52 = vpop.f32.mrf.mxu3  ;;  %v9015_v4 = vld [vmem:[%s20375_s6 + $0x10] sm:$0xf]  ;;  %v20861_v8 = vld [vmem:[#allocation33_spill] sm:$0xff] }
 0x518   : > { %20831 = vst [vmem:[#allocation35_spill] sm:$0xff] %v14738_v54  ;;  %v5607_v41 = vand.u32 2147483647, %v14582_v22  ;;  %v5609_v12 = vand.u32 2147483648, %v14582_v22  ;;  %v5629_v53 = vmul.f32 %v14735_v29, %v14629_v10  ;;  %v5526_v5 = vmul.f32 %v14658_v60, %v5525_v43  ;;  %v20836_v54 = vld [vmem:[#allocation68_spill] sm:$0xff] }
 0x519   : > { %vm5529_vm4 = vweird.f32 %v14658_v60  ;;  %v5624_v23 = vand.u32 2147483648, %v14591_v9  ;;  %10049 = vpow2.f32 %v9160_v26  ;;  %v5571_v57 = vmul.f32 %v14673_v48, %v5570_v0  ;;  %20837 = vst [vmem:[#allocation68_spill] sm:$0xff] %v14782_v52 }
 0x51a   : > { %v10046_v44 = vpop.eup %10045  ;;  %vm5603_vm5 = vweird.f32 %v14582_v22  ;;  %v5615_v51 = vsub.f32 1.0, %v5614_v40  ;;  %10051 = vrcp.f32 %v14744_v62  ;;  %v9162_v32 = vmul.f32 -1.442695, %v14424_v50  ;;  %20838 = vst [vmem:[#allocation81_spill] sm:$0xff] %v14790_v31  ;;  %v14801_v63 = vpop.f32.mrf.mxu2  ;;  %vm14813_vm12 = vmor %vm5528_vm2, %vm5529_vm4 }
 0x51b   : > { %vm14766_vm6 = vcmp.eq.f32.partialorder %v5532_v45, 8.507059e+37  ;;  %vm5574_vm7 = vweird.f32 %v14673_v48  ;;  %v5622_v47 = vand.u32 2147483647, %v14591_v9  ;;  %v5585_v43 = vsub.f32 1.0, %v5584_v56 }
 0x51c   : > { %v9163_v26 = vmul.f32 -1.442695, %v14426_v7  ;;  %v10048_v39 = vpop.eup %10047  ;;  %vm14773_vm0 = vcmp.eq.f32.partialorder %v5577_v27, 8.507059e+37  ;;  %v5601_v40 = vmul.f32 %v14689_v21, %v5600_v24  ;;  %v14778_v2 = vor.u32 1.1754944e-38, %v5609_v12  ;;  %v14792_v24 = vpop.f32.mrf.mxu1  ;;  %vm14831_vm15 = vmor %vm5573_vm3, %vm5574_vm7 }
 0x51d   : > { %vm5618_vm8 = vweird.f32 %v14591_v9  ;;  %v5630_v45 = vsub.f32 1.0, %v5629_v53  ;;  %v9161_v1 = vmul.f32 -1.442695, %v20836_v54  ;;  %v5527_v56 = vadd.f32 %v14658_v60, %v5526_v5  ;;  %v20841_v5 = vld [vmem:[#allocation70_spill] sm:$0xff] }
 0x51e   : > { %vm5604_vm9 = vweird.f32 %v14689_v21  ;;  %v14786_v30 = vor.u32 1.1754944e-38, %v5624_v23  ;;  %v14788_v27 = vadd.f32 1.0, %v10046_v44  ;;  %v5572_v12 = vadd.f32 %v14673_v48, %v5571_v57 }
 0x51f   : > { %vm14795_vm10 = vcmp.eq.f32.partialorder %v5607_v41, 8.507059e+37  ;;  %v5616_v55 = vmul.f32 %v14698_v61, %v5615_v51  ;;  %10053 = vpow2.f32 %v9162_v32  ;;  %v9164_v52 = vmul.f32 -1.442695, %v20841_v5  ;;  %v10050_v23 = vpop.eup %10049  ;;  %vm14854_vm1 = vmor %vm5603_vm5, %vm5604_vm9 }
 0x520   : > { %vm5619_vm11 = vweird.f32 %v14698_v61  ;;  %v5586_v44 = vmul.f32 %v14721_v15, %v5585_v43  ;;  %v14805_v31 = vadd.f32 1.0, %v10048_v39  ;;  %10055 = vpow2.f32 %v9163_v26  ;;  %v14807_v57 = vpop.eup %10051 }
 0x521   : > { %v5602_v51 = vadd.f32 %v14689_v21, %v5601_v40  ;;  %vm14818_vm13 = vcmp.eq.f32.partialorder %v5622_v47, 8.507059e+37  ;;  %vm5588_vm14 = vweird.f32 %v14612_v11  ;;  %v5631_v39 = vmul.f32 %v14735_v29, %v5630_v45  ;;  %v9460_v45 = vld [vmem:[%s20375_s6 + $0x2c] sm:$0xf0]  ;;  %vm14878_vm4 = vmor %vm5618_vm8, %vm5619_vm11 }
 0x522   : > { %10057 = vpow2.f32 %v9161_v1  ;;  %v5531_v43 = vsel %vm14813_vm12, %v14658_v60, %v5527_v56  ;;  %v5592_v47 = vand.u32 2147483647, %v14612_v11  ;;  %v5594_v26 = vand.u32 2147483648, %v14612_v11 }
 0x523   : > { %10059 = vrcp.f32 %v14788_v27  ;;  %v5576_v1 = vsel %vm14831_vm15, %v14673_v48, %v5572_v12  ;;  %v5617_v60 = vadd.f32 %v14698_v61, %v5616_v55  ;;  %v14842_v40 = vadd.f32 1.0, %v10050_v23 }
 0x524   : > { %10061 = vpow2.f32 %v9164_v52  ;;  %v5587_v55 = vadd.f32 %v14721_v15, %v5586_v44  ;;  %vm5589_vm2 = vweird.f32 %v14721_v15  ;;  %v5659_v48 = vmul.f32 %v14807_v57, %v14744_v62 }
 0x525   : > { %10063 = vrcp.f32 %v14805_v31  ;;  %v10054_v52 = vpop.eup %10053  ;;  %v5536_v12 = vsel %vm14766_vm6, %v14747_v59, %v5531_v43  ;;  %v5606_v22 = vsel %vm14854_vm1, %v14689_v21, %v5602_v51  ;;  %v5632_v23 = vadd.f32 %v14735_v29, %v5631_v39  ;;  %v14887_v51 = vpop.f32.mrf.mxu0  ;;  %vm14898_vm6 = vmor %vm5588_vm14, %vm5589_vm2 }
 0x526   : > { %vm5634_vm3 = vweird.f32 %v14735_v29  ;;  %v10056_v44 = vpop.eup %10055  ;;  %v5581_v41 = vsel %vm14773_vm0, %v14750_v46, %v5576_v1  ;;  %vm14882_vm5 = vcmp.eq.f32.partialorder %v5592_v47, 8.507059e+37  ;;  %v5639_v21 = vand.u32 2147483648, %v14629_v10  ;;  %v14889_v39 = vpop.f32.mrf.mxu1 }
 0x527   : > { %20854 = vst [vmem:[#allocation70_spill] sm:$0xff] %v14889_v39  ;;  %v9016_v0 = vor.u32 %v9460_v45, %v9015_v4  ;;  %v5621_v9 = vsel %vm14878_vm4, %v14698_v61, %v5617_v60  ;;  %vm5633_vm7 = vweird.f32 %v14629_v10  ;;  %v5637_v18 = vand.u32 2147483647, %v14629_v10  ;;  %v14905_v47 = vpop.f32.mrf.mxu2  ;;  %v14907_v1 = vpop.f32.mrf.mxu3 }
 0x528   : > { %v10058_v46 = vpop.eup %10057  ;;  %10065 = vrcp.f32 %v14842_v40  ;;  %20857 = vst [vmem:[#allocation82_spill] sm:$0xff] %v14905_v47  ;;  %v5611_v11 = vsel %vm14795_vm10, %v14778_v2, %v5606_v22  ;;  %v5591_v61 = vsel %vm14898_vm6, %v14721_v15, %v5587_v55  ;;  %vm14919_vm0 = vmor %vm5633_vm7, %vm5634_vm3  ;;  %v5660_v60 = vsub.f32 1.0, %v5659_v48  ;;  %v20863_v22 = vld [vmem:[#allocation64_spill] sm:$0xff] }
 0x529   : > { %20858 = vst [vmem:[#allocation83_spill] sm:$0xff] %v14907_v1  ;;  %v14909_v4 = vpop.eup %10059  ;;  %v14923_v45 = vadd.f32 1.0, %v10054_v52  ;;  %4542 = vmatpush.bf16.msra.mxu3 %v9016_v0  ;;  %v14926_v1 = vmul.f32 %v5536_v12, %v20861_v8  ;;  %v5595_v53 = vor.u32 1.1754944e-38, %v5594_v26  ;;  %v5636_v2 = vsel %vm14919_vm0, %v14735_v29, %v5632_v23  ;;  %v20866_v23 = vld [vmem:[#allocation13_spill] sm:$0xff] }
 0x52a   : > { %v10062_v56 = vpop.eup %10061  ;;  %v14931_v15 = vadd.f32 1.0, %v10056_v44  ;;  %v14936_v43 = vmul.f32 %v5581_v41, %v20863_v22  ;;  %v5626_v48 = vsel %vm14818_vm13, %v14786_v30, %v5621_v9  ;;  %v5640_v52 = vor.u32 1.1754944e-38, %v5639_v21 }
 0x52b   : > { %20862 = vst [vmem:[#allocation33_spill] sm:$0xff] %v14926_v1  ;;  %v14933_v55 = vpop.eup %10063  ;;  %v14941_v0 = vadd.f32 1.0, %v10058_v46  ;;  %v14944_v26 = vmul.f32 %v5611_v11, %v14263_v28  ;;  %v5596_v29 = vsel %vm14882_vm5, %v5595_v53, %v5591_v61  ;;  %vm5638_vm8 = vcmp.eq.f32.partialorder %v5637_v18, 8.507059e+37 }
 0x52c   : > { %20864 = vst [vmem:[#allocation64_spill] sm:$0xff] %v14936_v43  ;;  %v5674_v12 = vmul.f32 %v14909_v4, %v14788_v27  ;;  %4543 = vmatmul.bf16.vlgmr.msra.gmra.mxu3 %v20866_v23  ;;  %v5641_v44 = vsel %vm5638_vm8, %v5640_v52, %v5636_v2  ;;  %v5661_v41 = vmul.f32 %v14807_v57, %v5660_v60  ;;  %10067 = vrcp.f32 %v14923_v45  ;;  %v9025_v60 = vld [vmem:[%s20375_s6 + $0x38] sm:$0xf0]  ;;  %v9023_v52 = vld [vmem:[%s20375_s6 + $0x18] sm:$0xf] }
 0x52d   : > { %20865 = vst [vmem:[#allocation84_spill] sm:$0xff] %v14944_v26  ;;  %v14953_v30 = vadd.f32 1.0, %v10062_v56  ;;  %v14958_v28 = vmul.f32 %v5626_v48, %v14265_v17  ;;  %v5644_v59 = vmul.f32 %v14933_v55, %v14805_v31  ;;  %10069 = vrcp.f32 %v14931_v15  ;;  %v9459_v17 = vld [vmem:[%s20375_s6 + $0x1c] sm:$0xf]  ;;  %v9458_v56 = vld [vmem:[%s20375_s6 + $0x14] sm:$0xf]  ;;  %v14990_v53 = vpop.f32.mrf.mxu0 }
 0x52e   : > { %v14955_v32 = vpop.eup %10065  ;;  %v9166_v21 = vmul.f32 -1.442695, %v14491_v6  ;;  %v14965_v46 = vmul.f32 %v5596_v29, %v14184_v14  ;;  %v5667_v9 = vand.u32 2147483647, %v14744_v62  ;;  %v5669_v18 = vand.u32 2147483648, %v14744_v62  ;;  %20871 = vst [vmem:[#allocation88_spill] sm:$0xff] %v14990_v53  ;;  %v14992_v2 = vpop.f32.mrf.mxu1 }
 0x52f   : > { %20867 = vst [vmem:[#allocation13_spill] sm:$0xff] %v14958_v28  ;;  %10071 = vrcp.f32 %v14941_v0  ;;  %v14974_v11 = vmul.f32 %v5641_v44, %v14273_v33  ;;  %vm5664_vm9 = vweird.f32 %v14807_v57  ;;  %v5675_v61 = vsub.f32 1.0, %v5674_v12  ;;  %v14978_v14 = vpop.f32.mrf.mxu3  ;;  %v9017_v48 = vld [vmem:[%s20375_s6 + $0x30] sm:$0xf0]  ;;  %v15002_v44 = vpop.f32.mrf.mxu2 }
 0x530   : > { %20868 = vst [vmem:[#allocation85_spill] sm:$0xff] %v14965_v46  ;;  %v5684_v10 = vand.u32 2147483648, %v14788_v27  ;;  %v5662_v8 = vadd.f32 %v14807_v57, %v5661_v41  ;;  %v5689_v33 = vmul.f32 %v14955_v32, %v14842_v40  ;;  %10073 = vrcp.f32 %v14953_v30  ;;  %v9461_v41 = vld [vmem:[%s20375_s6 + $0x34] sm:$0xf0] }
 0x531   : > { %20869 = vst [vmem:[#allocation86_spill] sm:$0xff] %v14974_v11  ;;  %v9028_v22 = vor.u32 %v9459_v17, %v9025_v60  ;;  %vm5663_vm10 = vweird.f32 %v14744_v62  ;;  %v5645_v29 = vsub.f32 1.0, %v5644_v59  ;;  %10075 = vpow2.f32 %v9166_v21 }
 0x532   : > { %20870 = vst [vmem:[#allocation87_spill] sm:$0xff] %v14978_v14  ;;  %v9167_v12 = vmul.f32 -1.442695, %v14493_v34  ;;  %v15007_v17 = vpop.eup %10067  ;;  %vm5678_vm11 = vweird.f32 %v14788_v27  ;;  %v5682_v60 = vand.u32 2147483647, %v14788_v27  ;;  %v5654_v11 = vand.u32 2147483648, %v14805_v31  ;;  %vm15016_vm12 = vmor %vm5663_vm10, %vm5664_vm9 }
 0x533   : > { %20872 = vst [vmem:[#allocation89_spill] sm:$0xff] %v14992_v2  ;;  %4809 = vmatpush.bf16.msra.mxu2 %v9028_v22  ;;  %v9020_v62 = vor.u32 %v9458_v56, %v9017_v48  ;;  %v9024_v59 = vor.u32 %v9461_v41, %v9023_v52  ;;  %v15012_v21 = vpop.eup %10069  ;;  %vm15020_vm13 = vcmp.eq.f32.partialorder %v5667_v9, 8.507059e+37  ;;  %v5670_v26 = vor.u32 1.1754944e-38, %v5669_v18 }
 0x534   : > { %20873 = vst [vmem:[#allocation90_spill] sm:$0xff] %v15002_v44  ;;  %v15024_v43 = vor.u32 1.1754944e-38, %v5684_v10  ;;  %v5652_v1 = vand.u32 2147483647, %v14805_v31  ;;  %v5666_v56 = vsel %vm15016_vm12, %v14807_v57, %v5662_v8  ;;  %v5676_v48 = vmul.f32 %v14909_v4, %v5675_v61  ;;  %v20878_v10 = vld [vmem:[#allocation69_spill] sm:$0xff] }
 0x535   : > { %v15027_v22 = vpop.eup %10071  ;;  %vm5648_vm14 = vweird.f32 %v14805_v31  ;;  %v5690_v52 = vsub.f32 1.0, %v5689_v33  ;;  %4631 = vmatpush.bf16.msra.mxu0 %v9020_v62  ;;  %4720 = vmatpush.bf16.msra.mxu1 %v9024_v59  ;;  %v5646_v9 = vmul.f32 %v14933_v55, %v5645_v29  ;;  %v5719_v18 = vmul.f32 %v15007_v17, %v14923_v45  ;;  %v15065_v44 = vpop.f32.mrf.mxu0 }
 0x536   : > { %10077 = vpow2.f32 %v9167_v12  ;;  %v9165_v41 = vmul.f32 -1.442695, %v20878_v10  ;;  %4810 = vmatmul.bf16.vlgmr.msra.gmra.mxu2 %v20866_v23  ;;  %v15039_v14 = vpop.eup %10073  ;;  %vm5679_vm15 = vweird.f32 %v14909_v4  ;;  %vm15042_vm1 = vcmp.eq.f32.partialorder %v5682_v60, 8.507059e+37  ;;  %v15067_v2 = vpop.f32.mrf.mxu1 }
 0x537   : > { %v5655_v46 = vor.u32 1.1754944e-38, %v5654_v11  ;;  %v5734_v61 = vmul.f32 %v15012_v21, %v14931_v15  ;;  %v9168_v8 = vmul.f32 -1.442695, %v14513_v42  ;;  %v10076_v33 = vpop.eup %10075  ;;  %vm15049_vm2 = vcmp.eq.f32.partialorder %v5652_v1, 8.507059e+37  ;;  %v15073_v28 = vpop.f32.mrf.mxu3  ;;  %vm15083_vm5 = vmor %vm5678_vm11, %vm5679_vm15 }
 0x538   : > { %vm5693_vm3 = vweird.f32 %v14842_v40  ;;  %v5697_v12 = vand.u32 2147483647, %v14842_v40  ;;  %v5699_v60 = vand.u32 2147483648, %v14842_v40  ;;  %v5704_v62 = vmul.f32 %v15027_v22, %v14941_v0  ;;  %4632 = vmatmul.bf16.vlgmr.msra.gmra.mxu0 %v20866_v23  ;;  %4721 = vmatmul.bf16.vlgmr.msra.gmra.mxu1 %v20866_v23  ;;  %v15071_v23 = vpop.f32.mrf.mxu2  ;;  %20884 = vst [vmem:[#allocation91_spill] sm:$0xff] %v15073_v28  ;;  %v20889_v28 = vld [vmem:[#allocation16_spill] sm:$0xff] }
 0x539   : > { %v5671_v11 = vsel %vm15020_vm13, %v5670_v26, %v5666_v56  ;;  %v5677_v1 = vadd.f32 %v14909_v4, %v5676_v48  ;;  %vm5649_vm4 = vweird.f32 %v14933_v55  ;;  %v5691_v59 = vmul.f32 %v14955_v32, %v5690_v52  ;;  %20883 = vst [vmem:[#allocation69_spill] sm:$0xff] %v15071_v23 }
 0x53a   : > { %v5647_v53 = vadd.f32 %v14933_v55, %v5646_v9  ;;  %v5720_v47 = vsub.f32 1.0, %v5719_v18  ;;  %10079 = vpow2.f32 %v9165_v41  ;;  %v9170_v39 = vmul.f32 -1.442695, %v14596_v37  ;;  %vm15105_vm0 = vmor %vm5648_vm14, %vm5649_vm4 }
 0x53b   : > { %v5735_v26 = vsub.f32 1.0, %v5734_v61  ;;  %v5749_v56 = vmul.f32 %v15039_v14, %v14953_v30  ;;  %v15077_v48 = vadd.f32 1.0, %v10076_v33  ;;  %10081 = vpow2.f32 %v9168_v8 }
 0x53c   : > { %v10078_v52 = vpop.eup %10077  ;;  %vm15087_vm6 = vcmp.eq.f32.partialorder %v5697_v12, 8.507059e+37  ;;  %v5700_v41 = vor.u32 1.1754944e-38, %v5699_v60  ;;  %vm5723_vm7 = vweird.f32 %v14923_v45  ;;  %v5727_v61 = vand.u32 2147483647, %v14923_v45  ;;  %4548 = vmatmul.bf16.gmra.mxu3 %v20889_v28 }
 0x53d   : > { %v5729_v8 = vand.u32 2147483648, %v14923_v45  ;;  %v5705_v33 = vsub.f32 1.0, %v5704_v62  ;;  %v15096_v27 = vmul.f32 %v5671_v11, %v14332_v16  ;;  %v5681_v12 = vsel %vm15083_vm5, %v14909_v4, %v5677_v1 }
 0x53e   : > { %v5692_v23 = vadd.f32 %v14955_v32, %v5691_v59  ;;  %vm5694_vm8 = vweird.f32 %v14955_v32  ;;  %v5651_v16 = vsel %vm15105_vm0, %v14933_v55, %v5647_v53  ;;  %v5721_v62 = vmul.f32 %v15007_v17, %v5720_v47 }
 0x53f   : > { %20890 = vst [vmem:[#allocation16_spill] sm:$0xff] %v15096_v27  ;;  %10083 = vpow2.f32 %v9170_v39  ;;  %v9171_v4 = vmul.f32 -1.442695, %v14598_v58  ;;  %v5736_v11 = vmul.f32 %v15012_v21, %v5735_v26  ;;  %v5750_v31 = vsub.f32 1.0, %v5749_v56  ;;  %vm15127_vm9 = vmor %vm5693_vm3, %vm5694_vm8 }
 0x540   : > { %10085 = vrcp.f32 %v15077_v48  ;;  %v15118_v1 = vadd.f32 1.0, %v10078_v52  ;;  %v10080_v9 = vpop.eup %10079  ;;  %v15123_v59 = vsel %vm15042_vm1, %v15024_v43, %v5681_v12  ;;  %vm5724_vm10 = vweird.f32 %v15007_v17 }
 0x541   : > { %v5730_v39 = vor.u32 1.1754944e-38, %v5729_v8  ;;  %v5706_v55 = vmul.f32 %v15027_v22, %v5705_v33  ;;  %v10082_v53 = vpop.eup %10081  ;;  %v15135_v26 = vsel %vm15049_vm2, %v5655_v46, %v5651_v16  ;;  %v5696_v43 = vsel %vm15127_vm9, %v14955_v32, %v5692_v23  ;;  %v15154_v23 = vpop.f32.mrf.mxu0  ;;  %vm15175_vm15 = vmor %vm5723_vm7, %vm5724_vm10 }
 0x542   : > { %vm15140_vm11 = vcmp.eq.f32.partialorder %v5727_v61, 8.507059e+37  ;;  %vm5738_vm12 = vweird.f32 %v14931_v15  ;;  %v5742_v57 = vand.u32 2147483647, %v14931_v15  ;;  %v5722_v56 = vadd.f32 %v15007_v17, %v5721_v62  ;;  %v15156_v61 = vpop.f32.mrf.mxu1  ;;  %v15163_v16 = vpop.f32.mrf.mxu2 }
 0x543   : > { %vm5739_vm13 = vweird.f32 %v15012_v21  ;;  %10087 = vpow2.f32 %v9171_v4  ;;  %v9169_v46 = vmul.f32 -1.442695, %v14515_v49  ;;  %v5737_v29 = vadd.f32 %v15012_v21, %v5736_v11  ;;  %v15165_v62 = vpop.f32.mrf.mxu3 }
 0x544   : > { %v5751_v52 = vmul.f32 %v15039_v14, %v5750_v31  ;;  %10089 = vrcp.f32 %v15118_v1  ;;  %v15152_v32 = vadd.f32 1.0, %v10080_v9  ;;  %v5744_v33 = vand.u32 2147483648, %v14931_v15  ;;  %20897 = vst [vmem:[#allocation92_spill] sm:$0xff] %v15165_v62  ;;  %vm15189_vm2 = vmor %vm5738_vm12, %vm5739_vm13 }
 0x545   : > { %v10084_v8 = vpop.eup %10083  ;;  %v5707_v12 = vadd.f32 %v15027_v22, %v5706_v55  ;;  %vm5709_vm14 = vweird.f32 %v15027_v22  ;;  %v15161_v60 = vadd.f32 1.0, %v10082_v53  ;;  %v5701_v11 = vsel %vm15087_vm6, %v5700_v41, %v5696_v43 }
 0x546   : > { %v15167_v4 = vpop.eup %10085  ;;  %vm5708_vm1 = vweird.f32 %v14941_v0  ;;  %v5712_v9 = vand.u32 2147483647, %v14941_v0  ;;  %v5714_v47 = vand.u32 2147483648, %v14941_v0  ;;  %v5726_v55 = vsel %vm15175_vm15, %v15007_v17, %v5722_v56  ;;  %4815 = vmatmul.bf16.gmra.mxu2 %v20889_v28 }
 0x547   : > { %vm5754_vm3 = vweird.f32 %v15039_v14  ;;  %v5759_v18 = vand.u32 2147483648, %v14953_v30  ;;  %10091 = vpow2.f32 %v9169_v46  ;;  %v5741_v0 = vsel %vm15189_vm2, %v15012_v21, %v5737_v29  ;;  %vm15201_vm4 = vmor %vm5708_vm1, %vm5709_vm14 }
 0x548   : > { %v5752_v15 = vadd.f32 %v15039_v14, %v5751_v52  ;;  %10093 = vrcp.f32 %v15152_v32  ;;  %v9172_v41 = vmul.f32 -1.442695, %v14614_v19  ;;  %v5711_v43 = vsel %vm15201_vm4, %v15027_v22, %v5707_v12  ;;  %4637 = vmatmul.bf16.gmra.mxu0 %v20889_v28  ;;  %4726 = vmatmul.bf16.gmra.mxu1 %v20889_v28 }
 0x549   : > { %v10088_v53 = vpop.eup %10087  ;;  %v5779_v21 = vmul.f32 %v15167_v4, %v15077_v48  ;;  %10095 = vrcp.f32 %v15161_v60  ;;  %v15214_v56 = vadd.f32 1.0, %v10084_v8  ;;  %v5745_v29 = vor.u32 1.1754944e-38, %v5744_v33 }
 0x54a   : > { %v15218_v46 = vpop.eup %10089  ;;  %v5715_v52 = vor.u32 1.1754944e-38, %v5714_v47  ;;  %vm5753_vm5 = vweird.f32 %v14953_v30  ;;  %v5757_v31 = vand.u32 2147483647, %v14953_v30  ;;  %v5731_v22 = vsel %vm15140_vm11, %v5730_v39, %v5726_v55  ;;  %v15252_v17 = vpop.f32.mrf.mxu1 }
 0x54b   : > { %vm5743_vm6 = vcmp.eq.f32.partialorder %v5742_v57, 8.507059e+37  ;;  %vm5713_vm7 = vcmp.eq.f32.partialorder %v5712_v9, 8.507059e+37  ;;  %vm15226_vm0 = vmor %vm5753_vm5, %vm5754_vm3  ;;  %v5760_v28 = vor.u32 1.1754944e-38, %v5759_v18  ;;  %10097 = vpow2.f32 %v9172_v41  ;;  %v20906_v57 = vld [vmem:[#allocation19_spill] sm:$0xff] }
 0x54c   : > { %v5746_v12 = vsel %vm5743_vm6, %v5745_v29, %v5741_v0  ;;  %v5716_v45 = vsel %vm5713_vm7, %v5715_v52, %v5711_v43  ;;  %v5756_v33 = vsel %vm15226_vm0, %v15039_v14, %v5752_v15  ;;  %v5780_v47 = vsub.f32 1.0, %v5779_v21  ;;  %4553 = vmatmul.bf16.gmra.mxu3 %v20906_v57  ;;  %v15250_v0 = vpop.f32.mrf.mxu0 }
 0x54d   : > { %v10092_v30 = vpop.eup %10091  ;;  %v5794_v39 = vmul.f32 %v15218_v46, %v15118_v1  ;;  %10099 = vrcp.f32 %v15214_v56  ;;  %v15236_v40 = vadd.f32 1.0, %v10088_v53  ;;  %v15243_v55 = vmul.f32 %v15123_v59, %v14334_v25 }
 0x54e   : > { %v15239_v9 = vpop.eup %10093  ;;  %v15247_v14 = vmul.f32 %v15135_v26, %v14248_v13  ;;  %vm5758_vm8 = vcmp.eq.f32.partialorder %v5757_v31, 8.507059e+37  ;;  %v9174_v18 = vmul.f32 -1.442695, %v14717_v36  ;;  %v15257_v41 = vmul.f32 %v5701_v11, %v14339_v35  ;;  %v15263_v13 = vpop.f32.mrf.mxu2 }
 0x54f   : > { %20907 = vst [vmem:[#allocation19_spill] sm:$0xff] %v15243_v55  ;;  %v15254_v15 = vpop.eup %10095  ;;  %v15260_v53 = vmul.f32 %v5731_v22, %v14424_v50  ;;  %v5761_v25 = vsel %vm5758_vm8, %v5760_v28, %v5756_v33  ;;  %v9175_v59 = vmul.f32 -1.442695, %v14719_v3  ;;  %v15265_v26 = vpop.f32.mrf.mxu3  ;;  %v15268_v43 = vmul.f32 %v5746_v12, %v14426_v7 }
 0x550   : > { %20908 = vst [vmem:[#allocation93_spill] sm:$0xff] %v15247_v14  ;;  %v15271_v21 = vmul.f32 %v5716_v45, %v20836_v54  ;;  %v5787_v29 = vand.u32 2147483647, %v15077_v48  ;;  %v5789_v35 = vand.u32 2147483648, %v15077_v48  ;;  %v5781_v50 = vmul.f32 %v15167_v4, %v5780_v47 }
 0x551   : > { %20909 = vst [vmem:[#allocation94_spill] sm:$0xff] %v15257_v41  ;;  %v5795_v11 = vsub.f32 1.0, %v5794_v39  ;;  %v5764_v52 = vmul.f32 %v15239_v9, %v15152_v32  ;;  %10101 = vrcp.f32 %v15236_v40  ;;  %v10098_v31 = vpop.eup %10097  ;;  %v15280_v22 = vmul.f32 %v5761_v25, %v20841_v5 }
 0x552   : > { %20910 = vst [vmem:[#allocation95_spill] sm:$0xff] %v15260_v53  ;;  %v5809_v7 = vmul.f32 %v15254_v15, %v15161_v60  ;;  %v15284_v54 = vadd.f32 1.0, %v10092_v30  ;;  %10103 = vpow2.f32 %v9174_v18  ;;  %vm5783_vm9 = vweird.f32 %v15077_v48  ;;  %v9497_v18 = vld [vmem:[%s20376_s7 + $0x38] sm:$0xff] }
 0x553   : > { %20911 = vst [vmem:[#allocation96_spill] sm:$0xff] %v15263_v13  ;;  %v15286_v8 = vpop.eup %10099  ;;  %v5802_v28 = vand.u32 2147483647, %v15118_v1  ;;  %v5804_v12 = vand.u32 2147483648, %v15118_v1  ;;  %10105 = vpow2.f32 %v9175_v59  ;;  %vm15291_vm10 = vcmp.eq.f32.partialorder %v5787_v29, 8.507059e+37  ;;  %7899 = vmatpush.bf16.msrb.mxu3 %v9497_v18 }
 0x554   : > { %20912 = vst [vmem:[#allocation97_spill] sm:$0xff] %v15265_v26  ;;  %v5790_v5 = vor.u32 1.1754944e-38, %v5789_v35  ;;  %vm5798_vm11 = vweird.f32 %v15118_v1  ;;  %v5774_v33 = vand.u32 2147483648, %v15152_v32  ;;  %v5782_v30 = vadd.f32 %v15167_v4, %v5781_v50  ;;  %v15333_v18 = vpop.f32.mrf.mxu0  ;;  %v20939_v50 = vld [vmem:[#allocation80_spill] sm:$0xff] }
 0x555   : > { %20913 = vst [vmem:[#allocation98_spill] sm:$0xff] %v15268_v43  ;;  %vm5784_vm12 = vweird.f32 %v15167_v4  ;;  %v5796_v47 = vmul.f32 %v15218_v46, %v5795_v11  ;;  %v5765_v39 = vsub.f32 1.0, %v5764_v52  ;;  %v5810_v25 = vsub.f32 1.0, %v5809_v7  ;;  %v15335_v43 = vpop.f32.mrf.mxu1 }
 0x556   : > { %20914 = vst [vmem:[#allocation99_spill] sm:$0xff] %v15271_v21  ;;  %v5839_v59 = vmul.f32 %v15286_v8, %v15214_v56  ;;  %10107 = vrcp.f32 %v15284_v54  ;;  %v15306_v29 = vadd.f32 1.0, %v10098_v31  ;;  %vm15310_vm13 = vcmp.eq.f32.partialorder %v5802_v28, 8.507059e+37  ;;  %4820 = vmatmul.bf16.gmra.mxu2 %v20906_v57  ;;  %vm15324_vm15 = vmor %vm5783_vm9, %vm5784_vm12  ;;  %v15343_v55 = vpop.f32.mrf.mxu2 }
 0x557   : > { %20915 = vst [vmem:[#allocation100_spill] sm:$0xff] %v15280_v22  ;;  %v15308_v35 = vpop.eup %10101  ;;  %v5805_v11 = vor.u32 1.1754944e-38, %v5804_v12  ;;  %vm5768_vm14 = vweird.f32 %v15152_v32  ;;  %v5772_v52 = vand.u32 2147483647, %v15152_v32  ;;  %v5819_v7 = vand.u32 2147483648, %v15161_v60  ;;  %v15317_v22 = vpop.f32.mrf.mxu3 }
 0x558   : > { %20920 = vst [vmem:[#allocation101_spill] sm:$0xff] %v15317_v22  ;;  %v10104_v31 = vpop.eup %10103  ;;  %vm5799_vm1 = vweird.f32 %v15218_v46  ;;  %v15329_v12 = vor.u32 1.1754944e-38, %v5774_v33  ;;  %vm5813_vm2 = vweird.f32 %v15161_v60  ;;  %v5817_v21 = vand.u32 2147483647, %v15161_v60  ;;  %4642 = vmatmul.bf16.gmra.mxu0 %v20906_v57  ;;  %4731 = vmatmul.bf16.gmra.mxu1 %v20906_v57 }
 0x559   : > { %20923 = vst [vmem:[#allocation102_spill] sm:$0xff] %v15333_v18  ;;  %v10106_v53 = vpop.eup %10105  ;;  %v5786_v48 = vsel %vm15324_vm15, %v15167_v4, %v5782_v30  ;;  %v5797_v41 = vadd.f32 %v15218_v46, %v5796_v47  ;;  %v5766_v14 = vmul.f32 %v15239_v9, %v5765_v39  ;;  %v9173_v33 = vmul.f32 -1.442695, %v14616_v20  ;;  %vm15365_vm5 = vmor %vm5798_vm11, %vm5799_vm1 }
 0x55a   : > { %20924 = vst [vmem:[#allocation103_spill] sm:$0xff] %v15335_v43  ;;  %v5811_v27 = vmul.f32 %v15254_v15, %v5810_v25  ;;  %v5840_v22 = vsub.f32 1.0, %v5839_v59  ;;  %v5854_v26 = vmul.f32 %v15308_v35, %v15236_v40  ;;  %10109 = vrcp.f32 %v15306_v29  ;;  %v20933_v43 = vld [vmem:[#allocation81_spill] sm:$0xff] }
 0x55b   : > { %20925 = vst [vmem:[#allocation104_spill] sm:$0xff] %v15343_v55  ;;  %vm5769_vm3 = vweird.f32 %v15239_v9  ;;  %vm5814_vm4 = vweird.f32 %v15254_v15  ;;  %v15353_v4 = vor.u32 1.1754944e-38, %v5819_v7  ;;  %v15355_v30 = vadd.f32 1.0, %v10104_v31  ;;  %v20932_v31 = vld [vmem:[#allocation24_spill] sm:$0xff] }
 0x55c   : > { %v15357_v47 = vpop.eup %10107  ;;  %v5791_v57 = vsel %vm15291_vm10, %v5790_v5, %v5786_v48  ;;  %vm15369_vm6 = vcmp.eq.f32.partialorder %v5772_v52, 8.507059e+37  ;;  %vm15373_vm7 = vcmp.eq.f32.partialorder %v5817_v21, 8.507059e+37  ;;  %vm5843_vm0 = vweird.f32 %v15214_v56  ;;  %4558 = vmatmul.bf16.gmra.mxu3 %v20932_v31  ;;  %vm15415_vm8 = vmor %vm5768_vm14, %vm5769_vm3 }
 0x55d   : > { %v5847_v45 = vand.u32 2147483647, %v15214_v56  ;;  %v5849_v5 = vand.u32 2147483648, %v15214_v56  ;;  %v15380_v7 = vadd.f32 1.0, %v10106_v53  ;;  %v5801_v1 = vsel %vm15365_vm5, %v15218_v46, %v5797_v41  ;;  %v9521_v41 = vld [vmem:[%s20376_s7 + $0xf8] sm:$0xff]  ;;  %vm15438_vm11 = vmor %vm5813_vm2, %vm5814_vm4 }
 0x55e   : > { %v5767_v52 = vadd.f32 %v15239_v9, %v5766_v14  ;;  %10111 = vpow2.f32 %v9173_v33  ;;  %v9176_v21 = vmul.f32 -1.442695, %v14731_v38  ;;  %v5812_v28 = vadd.f32 %v15254_v15, %v5811_v27  ;;  %v9505_v27 = vld [vmem:[%s20376_s7 + $0x78] sm:$0xff]  ;;  %8166 = vmatpush.bf16.msrb.mxu2 %v9521_v41 }
 0x55f   : > { %v5841_v48 = vmul.f32 %v15286_v8, %v5840_v22  ;;  %v5855_v55 = vsub.f32 1.0, %v5854_v26  ;;  %v9178_v18 = vmul.f32 -1.442695, %v20933_v43  ;;  %v15392_v53 = vmul.f32 %v5791_v57, %v14491_v6  ;;  %v9513_v6 = vld [vmem:[%s20376_s7 + $0xb8] sm:$0xff]  ;;  %7988 = vmatpush.bf16.msrb.mxu0 %v9505_v27 }
 0x560   : > { %v5824_v46 = vmul.f32 %v15357_v47, %v15284_v54  ;;  %10113 = vrcp.f32 %v15355_v30  ;;  %v9179_v14 = vmul.f32 -1.442695, %v14792_v24  ;;  %v15407_v26 = vpop.eup %10109  ;;  %v5806_v22 = vsel %vm15310_vm13, %v5805_v11, %v5801_v1  ;;  %v15427_v1 = vpop.f32.mrf.mxu0  ;;  %8077 = vmatpush.bf16.msrb.mxu1 %v9513_v6 }
 0x561   : > { %20934 = vst [vmem:[#allocation24_spill] sm:$0xff] %v15392_v53  ;;  %vm15419_vm9 = vcmp.eq.f32.partialorder %v5847_v45, 8.507059e+37  ;;  %vm5858_vm10 = vweird.f32 %v15236_v40  ;;  %v5862_v39 = vand.u32 2147483647, %v15236_v40  ;;  %10115 = vrcp.f32 %v15380_v7  ;;  %v15429_v53 = vpop.f32.mrf.mxu1 }
 0x562   : > { %v9177_v11 = vmul.f32 -1.442695, %v20939_v50  ;;  %20940 = vst [vmem:[#allocation81_spill] sm:$0xff] %v15427_v1  ;;  %v5771_v32 = vsel %vm15415_vm8, %v15239_v9, %v5767_v52  ;;  %vm5844_vm12 = vweird.f32 %v15286_v8  ;;  %v5864_v13 = vand.u32 2147483648, %v15236_v40  ;;  %v15444_v1 = vpop.f32.mrf.mxu2 }
 0x563   : > { %20941 = vst [vmem:[#allocation80_spill] sm:$0xff] %v15429_v53  ;;  %10117 = vpow2.f32 %v9176_v21  ;;  %v15446_v53 = vpop.f32.mrf.mxu3  ;;  %v5816_v9 = vsel %vm15438_vm11, %v15254_v15, %v5812_v28  ;;  %v5842_v60 = vadd.f32 %v15286_v8, %v5841_v48  ;;  %v5856_v52 = vmul.f32 %v15308_v35, %v5855_v55  ;;  %vm15475_vm14 = vmor %vm5843_vm0, %vm5844_vm12 }
 0x564   : > { %20944 = vst [vmem:[#allocation105_spill] sm:$0xff] %v15446_v53  ;;  %10119 = vpow2.f32 %v9178_v18  ;;  %v10112_v33 = vpop.eup %10111  ;;  %v5825_v62 = vsub.f32 1.0, %v5824_v46  ;;  %v5869_v21 = vmul.f32 %v15407_v26, %v15306_v29  ;;  %v9180_v53 = vmul.f32 -1.442695, %v14801_v63 }
 0x565   : > { %10121 = vpow2.f32 %v9179_v14  ;;  %v15457_v41 = vmul.f32 %v5806_v22, %v14493_v34  ;;  %v5850_v27 = vor.u32 1.1754944e-38, %v5849_v5  ;;  %vm15459_vm13 = vcmp.eq.f32.partialorder %v5862_v39, 8.507059e+37 }
 0x566   : > { %10123 = vpow2.f32 %v9177_v11  ;;  %v15463_v55 = vpop.eup %10113  ;;  %v5776_v18 = vsel %vm15369_vm6, %v15329_v12, %v5771_v32  ;;  %v5821_v28 = vsel %vm15373_vm7, %v15353_v4, %v5816_v9  ;;  %v5832_v5 = vand.u32 2147483647, %v15284_v54  ;;  %4825 = vmatmul.bf16.gmra.mxu2 %v20932_v31 }
 0x567   : > { %20945 = vst [vmem:[#allocation106_spill] sm:$0xff] %v15457_v41  ;;  %v5834_v48 = vand.u32 2147483648, %v15284_v54  ;;  %v15481_v46 = vpop.eup %10115  ;;  %v5846_v12 = vsel %vm15475_vm14, %v15286_v8, %v5842_v60  ;;  %v5857_v4 = vadd.f32 %v15308_v35, %v5856_v52  ;;  %vm5859_vm15 = vweird.f32 %v15308_v35 }
 0x568   : > { %v15488_v25 = vadd.f32 1.0, %v10112_v33  ;;  %v5865_v59 = vor.u32 1.1754944e-38, %v5864_v13  ;;  %v5826_v14 = vmul.f32 %v15357_v47, %v5825_v62  ;;  %v5870_v6 = vsub.f32 1.0, %v5869_v21  ;;  %vm15507_vm2 = vmor %vm5858_vm10, %vm5859_vm15  ;;  %4647 = vmatmul.bf16.gmra.mxu0 %v20932_v31  ;;  %4736 = vmatmul.bf16.gmra.mxu1 %v20932_v31  ;;  %v15529_v33 = vpop.f32.mrf.mxu0 }
 0x569   : > { %v10118_v56 = vpop.eup %10117  ;;  %10125 = vpow2.f32 %v9180_v53  ;;  %v15493_v39 = vmul.f32 %v5776_v18, %v20878_v10  ;;  %v15496_v8 = vmul.f32 %v5821_v28, %v14513_v42  ;;  %vm5828_vm1 = vweird.f32 %v15284_v54  ;;  %v15531_v21 = vpop.f32.mrf.mxu1  ;;  %v20963_v54 = vld [vmem:[#allocation70_spill] sm:$0xff] }
 0x56a   : > { %v10120_v22 = vpop.eup %10119  ;;  %v5899_v11 = vmul.f32 %v15463_v55, %v15355_v30  ;;  %v5851_v62 = vsel %vm15419_vm9, %v5850_v27, %v5846_v12  ;;  %vm15511_vm3 = vcmp.eq.f32.partialorder %v5832_v5, 8.507059e+37  ;;  %v5835_v10 = vor.u32 1.1754944e-38, %v5834_v48  ;;  %v15538_v28 = vpop.f32.mrf.mxu2 }
 0x56b   : > { %20950 = vst [vmem:[#allocation107_spill] sm:$0xff] %v15493_v39  ;;  %v10122_v32 = vpop.eup %10121  ;;  %v5877_v53 = vand.u32 2147483647, %v15306_v29  ;;  %v5914_v45 = vmul.f32 %v15481_v46, %v15380_v7  ;;  %v15518_v57 = vpop.f32.mrf.mxu3  ;;  %v5861_v9 = vsel %vm15507_vm2, %v15308_v35, %v5857_v4  ;;  %v5879_v60 = vand.u32 2147483648, %v15306_v29 }
 0x56c   : > { %20951 = vst [vmem:[#allocation108_spill] sm:$0xff] %v15496_v8  ;;  %v10124_v40 = vpop.eup %10123  ;;  %10127 = vrcp.f32 %v15488_v25  ;;  %v15527_v52 = vadd.f32 1.0, %v10118_v56  ;;  %v5827_v27 = vadd.f32 %v15357_v47, %v5826_v14  ;;  %vm5829_vm4 = vweird.f32 %v15357_v47 }
 0x56d   : > { %20956 = vst [vmem:[#allocation109_spill] sm:$0xff] %v15518_v57  ;;  %v5871_v31 = vmul.f32 %v15407_v26, %v5870_v6  ;;  %v15536_v18 = vadd.f32 1.0, %v10120_v22  ;;  %v15541_v35 = vmul.f32 %v5851_v62, %v14596_v37  ;;  %vm5873_vm5 = vweird.f32 %v15306_v29  ;;  %v20960_v6 = vld [vmem:[#allocation27_spill] sm:$0xff]  ;;  %vm15557_vm7 = vmor %vm5828_vm1, %vm5829_vm4 }
 0x56e   : > { %v5900_v34 = vsub.f32 1.0, %v5899_v11  ;;  %v15544_v5 = vadd.f32 1.0, %v10122_v32  ;;  %v5866_v12 = vsel %vm15459_vm13, %v5865_v59, %v5861_v9  ;;  %vm15548_vm6 = vcmp.eq.f32.partialorder %v5877_v53, 8.507059e+37  ;;  %4563 = vmatmul.bf16.gmra.mxu3 %v20960_v6 }
 0x56f   : > { %20957 = vst [vmem:[#allocation110_spill] sm:$0xff] %v15541_v35  ;;  %v10126_v48 = vpop.eup %10125  ;;  %v5915_v56 = vsub.f32 1.0, %v5914_v45  ;;  %v15552_v14 = vadd.f32 1.0, %v10124_v40  ;;  %vm5874_vm0 = vweird.f32 %v15407_v26  ;;  %v5880_v22 = vor.u32 1.1754944e-38, %v5879_v60 }
 0x570   : > { %10129 = vrcp.f32 %v15527_v52  ;;  %v9182_v15 = vmul.f32 -1.442695, %v14887_v51  ;;  %v5831_v59 = vsel %vm15557_vm7, %v15357_v47, %v5827_v27  ;;  %v5872_v11 = vadd.f32 %v15407_v26, %v5871_v31  ;;  %vm15589_vm9 = vmor %vm5873_vm5, %vm5874_vm0  ;;  %v15595_v31 = vpop.f32.mrf.mxu0 }
 0x571   : > { %10131 = vrcp.f32 %v15536_v18  ;;  %v9183_v32 = vmul.f32 -1.442695, %v20963_v54  ;;  %v15573_v13 = vmul.f32 %v5866_v12, %v14598_v58  ;;  %v5901_v53 = vmul.f32 %v15463_v55, %v5900_v34  ;;  %20967 = vst [vmem:[#allocation70_spill] sm:$0xff] %v15595_v31  ;;  %v15597_v34 = vpop.f32.mrf.mxu1 }
 0x572   : > { %v15570_v62 = vpop.eup %10127  ;;  %10133 = vrcp.f32 %v15544_v5  ;;  %v15577_v45 = vadd.f32 1.0, %v10126_v48  ;;  %vm5903_vm8 = vweird.f32 %v15355_v30  ;;  %v5907_v47 = vand.u32 2147483647, %v15355_v30  ;;  %20968 = vst [vmem:[#allocation111_spill] sm:$0xff] %v15597_v34  ;;  %v15605_v12 = vpop.f32.mrf.mxu2 }
 0x573   : > { %20964 = vst [vmem:[#allocation27_spill] sm:$0xff] %v15573_v13  ;;  %v5916_v40 = vmul.f32 %v15481_v46, %v5915_v56  ;;  %10135 = vrcp.f32 %v15552_v14  ;;  %v5836_v9 = vsel %vm15511_vm3, %v5835_v10, %v5831_v59  ;;  %v5909_v60 = vand.u32 2147483648, %v15355_v30  ;;  %v20969_v10 = vld [vmem:[#allocation68_spill] sm:$0xff]  ;;  %v15607_v56 = vpop.f32.mrf.mxu3 }
 0x574   : > { %v5922_v27 = vand.u32 2147483647, %v15380_v7  ;;  %10137 = vpow2.f32 %v9182_v15  ;;  %v5876_v42 = vsel %vm15589_vm9, %v15407_v26, %v5872_v11  ;;  %v5884_v29 = vmul.f32 %v15570_v62, %v15488_v25  ;;  %20970 = vst [vmem:[#allocation68_spill] sm:$0xff] %v15605_v12 }
 0x575   : > { %10139 = vpow2.f32 %v9183_v32  ;;  %v9181_v48 = vmul.f32 -1.442695, %v20969_v10  ;;  %20971 = vst [vmem:[#allocation112_spill] sm:$0xff] %v15607_v56  ;;  %v5902_v15 = vadd.f32 %v15463_v55, %v5901_v53  ;;  %vm5904_vm10 = vweird.f32 %v15463_v55 }
 0x576   : > { %v15609_v37 = vpop.eup %10129  ;;  %v5924_v59 = vand.u32 2147483648, %v15380_v7  ;;  %10141 = vrcp.f32 %v15577_v45  ;;  %v5917_v11 = vadd.f32 %v15481_v46, %v5916_v40  ;;  %vm5918_vm11 = vweird.f32 %v15380_v7  ;;  %vm15637_vm14 = vmor %vm5903_vm8, %vm5904_vm10  ;;  %4830 = vmatmul.bf16.gmra.mxu2 %v20960_v6 }
 0x577   : > { %v15615_v26 = vpop.eup %10131  ;;  %vm5919_vm12 = vweird.f32 %v15481_v46  ;;  %v5894_v32 = vand.u32 2147483648, %v15488_v25  ;;  %v15624_v53 = vmul.f32 %v5836_v9, %v14515_v49  ;;  %v5881_v13 = vsel %vm15548_vm6, %v5880_v22, %v5876_v42 }
 0x578   : > { %v15621_v58 = vpop.eup %10133  ;;  %vm15628_vm13 = vcmp.eq.f32.partialorder %v5907_v47, 8.507059e+37  ;;  %v5939_v40 = vand.u32 2147483648, %v15527_v52  ;;  %v5910_v41 = vor.u32 1.1754944e-38, %v5909_v60  ;;  %v5885_v49 = vsub.f32 1.0, %v5884_v29  ;;  %vm15651_vm15 = vmor %vm5918_vm11, %vm5919_vm12  ;;  %4652 = vmatmul.bf16.gmra.mxu0 %v20960_v6  ;;  %4741 = vmatmul.bf16.gmra.mxu1 %v20960_v6 }
 0x579   : > { %20972 = vst [vmem:[#allocation113_spill] sm:$0xff] %v15624_v53  ;;  %v15633_v8 = vpop.eup %10135  ;;  %v5929_v4 = vmul.f32 %v15609_v37, %v15527_v52  ;;  %10143 = vpow2.f32 %v9181_v48  ;;  %v5906_v47 = vsel %vm15637_vm14, %v15463_v55, %v5902_v15  ;;  %vm15655_vm1 = vcmp.eq.f32.partialorder %v5922_v27, 8.507059e+37  ;;  %v15695_v53 = vpop.f32.mrf.mxu1 }
 0x57a   : > { %v10138_v22 = vpop.eup %10137  ;;  %v5925_v60 = vor.u32 1.1754944e-38, %v5924_v59  ;;  %v5892_v42 = vand.u32 2147483647, %v15488_v25  ;;  %v15661_v48 = vmul.f32 %v5881_v13, %v14614_v19  ;;  %v5921_v55 = vsel %vm15651_vm15, %v15481_v46, %v5917_v11  ;;  %20983 = vst [vmem:[#allocation116_spill] sm:$0xff] %v15695_v53 }
 0x57b   : > { %v10140_v29 = vpop.eup %10139  ;;  %vm5888_vm2 = vweird.f32 %v15488_v25  ;;  %v15667_v7 = vor.u32 1.1754944e-38, %v5894_v32  ;;  %v5937_v39 = vand.u32 2147483647, %v15527_v52  ;;  %vm5889_vm3 = vweird.f32 %v15570_v62 }
 0x57c   : > { %20981 = vst [vmem:[#allocation114_spill] sm:$0xff] %v15661_v48  ;;  %v15672_v27 = vpop.eup %10141  ;;  %v15675_v19 = vor.u32 1.1754944e-38, %v5939_v40  ;;  %v5959_v13 = vmul.f32 %v15615_v26, %v15536_v18  ;;  %v5974_v46 = vmul.f32 %v15621_v58, %v15544_v5  ;;  %v5911_v15 = vsel %vm15628_vm13, %v5910_v41, %v5906_v47  ;;  %v15693_v48 = vpop.f32.mrf.mxu0  ;;  %v20986_v47 = vld [vmem:[#allocation82_spill] sm:$0xff]  ;;  %vm15733_vm0 = vmor %vm5888_vm2, %vm5889_vm3 }
 0x57d   : > { %v5886_v59 = vmul.f32 %v15570_v62, %v5885_v49  ;;  %v5930_v11 = vsub.f32 1.0, %v5929_v4  ;;  %v15684_v32 = vadd.f32 1.0, %v10138_v22  ;;  %v5926_v6 = vsel %vm15655_vm1, %v5925_v60, %v5921_v55  ;;  %20982 = vst [vmem:[#allocation115_spill] sm:$0xff] %v15693_v48  ;;  %v15707_v60 = vpop.f32.mrf.mxu2  ;;  %v20989_v55 = vld [vmem:[#allocation32_spill] sm:$0xff] }
 0x57e   : > { %vm5934_vm4 = vweird.f32 %v15609_v37  ;;  %v5944_v40 = vmul.f32 %v15633_v8, %v15552_v14  ;;  %v15691_v30 = vadd.f32 1.0, %v10140_v29  ;;  %vm15697_vm5 = vcmp.eq.f32.partialorder %v5892_v42, 8.507059e+37  ;;  %20987 = vst [vmem:[#allocation82_spill] sm:$0xff] %v15707_v60  ;;  %v15709_v29 = vpop.f32.mrf.mxu3  ;;  %4568 = vmatmul.bf16.gmra.mxu3 %v20989_v55  ;;  %v20991_v48 = vld [vmem:[#allocation88_spill] sm:$0xff] }
 0x57f   : > { %v10144_v41 = vpop.eup %10143  ;;  %vm5933_vm6 = vweird.f32 %v15527_v52  ;;  %v5967_v49 = vand.u32 2147483647, %v15536_v18  ;;  %v5969_v4 = vand.u32 2147483648, %v15536_v18  ;;  %v5989_v22 = vmul.f32 %v15672_v27, %v15577_v45  ;;  %20988 = vst [vmem:[#allocation117_spill] sm:$0xff] %v15709_v29 }
 0x580   : > { %v9184_v9 = vmul.f32 -1.442695, %v20986_v47  ;;  %v15713_v42 = vmul.f32 %v5911_v15, %v14717_v36  ;;  %v5960_v56 = vsub.f32 1.0, %v5959_v13  ;;  %v5975_v53 = vsub.f32 1.0, %v5974_v46  ;;  %vm15775_vm13 = vmor %vm5933_vm6, %vm5934_vm4 }
 0x581   : > { %v9186_v12 = vmul.f32 -1.442695, %v20991_v48  ;;  %v15717_v57 = vmul.f32 %v5926_v6, %v14719_v3  ;;  %v5887_v34 = vadd.f32 %v15570_v62, %v5886_v59  ;;  %v5931_v31 = vmul.f32 %v15609_v37, %v5930_v11  ;;  %v20993_v3 = vld [vmem:[#allocation89_spill] sm:$0xff] }
 0x582   : > { %20990 = vst [vmem:[#allocation32_spill] sm:$0xff] %v15713_v42  ;;  %vm5963_vm7 = vweird.f32 %v15536_v18  ;;  %10145 = vrcp.f32 %v15684_v32  ;;  %v5982_v29 = vand.u32 2147483647, %v15544_v5  ;;  %v5945_v60 = vsub.f32 1.0, %v5944_v40 }
 0x583   : > { %20992 = vst [vmem:[#allocation88_spill] sm:$0xff] %v15717_v57  ;;  %10147 = vrcp.f32 %v15691_v30  ;;  %v15725_v36 = vadd.f32 1.0, %v10144_v41  ;;  %v5984_v13 = vand.u32 2147483648, %v15544_v5  ;;  %v5990_v46 = vsub.f32 1.0, %v5989_v22 }
 0x584   : > { %10149 = vpow2.f32 %v9184_v9  ;;  %v9187_v15 = vmul.f32 -1.442695, %v20993_v3  ;;  %vm15737_vm8 = vcmp.eq.f32.partialorder %v5937_v39, 8.507059e+37  ;;  %v5961_v6 = vmul.f32 %v15615_v26, %v5960_v56  ;;  %v20998_v9 = vld [vmem:[#allocation83_spill] sm:$0xff] }
 0x585   : > { %v15742_v40 = vor.u32 1.1754944e-38, %v5969_v4  ;;  %v5976_v41 = vmul.f32 %v15621_v58, %v5975_v53  ;;  %10151 = vpow2.f32 %v9186_v12  ;;  %v5891_v22 = vsel %vm15733_vm0, %v15570_v62, %v5887_v34  ;;  %v21001_v12 = vld [vmem:[#allocation90_spill] sm:$0xff]  ;;  %v15791_v42 = vpop.f32.mrf.mxu2 }
 0x586   : > { %v5932_v25 = vadd.f32 %v15609_v37, %v5931_v31  ;;  %vm5978_vm9 = vweird.f32 %v15544_v5  ;;  %v9185_v39 = vmul.f32 -1.442695, %v20998_v9  ;;  %vm5964_vm10 = vweird.f32 %v15615_v26  ;;  %21007 = vst [vmem:[#allocation83_spill] sm:$0xff] %v15791_v42  ;;  %4835 = vmatmul.bf16.gmra.mxu2 %v20989_v55 }
 0x587   : > { %vm15752_vm11 = vcmp.eq.f32.partialorder %v5967_v49, 8.507059e+37  ;;  %v5946_v56 = vmul.f32 %v15633_v8, %v5945_v60  ;;  %10153 = vrcp.f32 %v15725_v36  ;;  %v9188_v53 = vmul.f32 -1.442695, %v21001_v12  ;;  %vm15800_vm15 = vmor %vm5963_vm7, %vm5964_vm10 }
 0x588   : > { %v15759_v4 = vpop.eup %10145  ;;  %vm15761_vm12 = vcmp.eq.f32.partialorder %v5982_v29, 8.507059e+37  ;;  %v5985_v31 = vor.u32 1.1754944e-38, %v5984_v13  ;;  %v5991_v34 = vmul.f32 %v15672_v27, %v5990_v46  ;;  %10155 = vpow2.f32 %v9187_v15  ;;  %v15782_v46 = vpop.f32.mrf.mxu0  ;;  %4657 = vmatmul.bf16.gmra.mxu0 %v20989_v55  ;;  %4746 = vmatmul.bf16.gmra.mxu1 %v20989_v55 }
 0x589   : > { %v15766_v49 = vpop.eup %10147  ;;  %v5896_v60 = vsel %vm15697_vm5, %v15667_v7, %v5891_v22  ;;  %v5962_v29 = vadd.f32 %v15615_v26, %v5961_v6  ;;  %v5977_v13 = vadd.f32 %v15621_v58, %v5976_v41  ;;  %vm5979_vm14 = vweird.f32 %v15621_v58  ;;  %v15784_v15 = vpop.f32.mrf.mxu1 }
 0x58a   : > { %21006 = vst [vmem:[#allocation89_spill] sm:$0xff] %v15784_v15  ;;  %v10150_v35 = vpop.eup %10149  ;;  %v5936_v7 = vsel %vm15775_vm13, %v15609_v37, %v5932_v25  ;;  %v5952_v52 = vand.u32 2147483647, %v15552_v14  ;;  %v5954_v22 = vand.u32 2147483648, %v15552_v14  ;;  %10157 = vpow2.f32 %v9185_v39  ;;  %v15793_v6 = vpop.f32.mrf.mxu3  ;;  %vm15812_vm2 = vmor %vm5978_vm9, %vm5979_vm14 }
 0x58b   : > { %21008 = vst [vmem:[#allocation90_spill] sm:$0xff] %v15793_v6  ;;  %v10152_v41 = vpop.eup %10151  ;;  %v5947_v37 = vadd.f32 %v15633_v8, %v5946_v56  ;;  %vm5949_vm1 = vweird.f32 %v15633_v8  ;;  %v6019_v25 = vmul.f32 %v15759_v4, %v15684_v32  ;;  %10159 = vpow2.f32 %v9188_v53 }
 0x58c   : > { %vm5948_vm3 = vweird.f32 %v15552_v14  ;;  %v5992_v18 = vadd.f32 %v15672_v27, %v5991_v34  ;;  %vm5994_vm4 = vweird.f32 %v15672_v27  ;;  %v6034_v56 = vmul.f32 %v15766_v49, %v15691_v30 }
 0x58d   : > { %v15823_v53 = vpop.eup %10153  ;;  %v5966_v5 = vsel %vm15800_vm15, %v15615_v26, %v5962_v29  ;;  %v5981_v14 = vsel %vm15812_vm2, %v15621_v58, %v5977_v13  ;;  %v5999_v34 = vand.u32 2147483648, %v15577_v45  ;;  %v15832_v59 = vadd.f32 1.0, %v10150_v35  ;;  %vm15839_vm5 = vmor %vm5948_vm3, %vm5949_vm1 }
 0x58e   : > { %v10156_v6 = vpop.eup %10155  ;;  %v5941_v42 = vsel %vm15737_vm8, %v15675_v19, %v5936_v7  ;;  %vm5993_vm6 = vweird.f32 %v15577_v45  ;;  %v5997_v26 = vand.u32 2147483647, %v15577_v45  ;;  %v15845_v58 = vadd.f32 1.0, %v10152_v41 }
 0x58f   : > { %v5951_v29 = vsel %vm15839_vm5, %v15633_v8, %v5947_v37  ;;  %vm15850_vm7 = vcmp.eq.f32.partialorder %v5952_v52, 8.507059e+37  ;;  %v5955_v19 = vor.u32 1.1754944e-38, %v5954_v22  ;;  %vm15856_vm0 = vmor %vm5993_vm6, %vm5994_vm4  ;;  %v6020_v15 = vsub.f32 1.0, %v6019_v25  ;;  %v21019_v22 = vld [vmem:[#allocation37_spill] sm:$0xff] }
 0x590   : > { %v10158_v35 = vpop.eup %10157  ;;  %v5971_v45 = vsel %vm15752_vm11, %v15742_v40, %v5966_v5  ;;  %v5986_v8 = vsel %vm15761_vm12, %v5985_v31, %v5981_v14  ;;  %v5996_v7 = vsel %vm15856_vm0, %v15672_v27, %v5992_v18  ;;  %v6035_v52 = vsub.f32 1.0, %v6034_v56  ;;  %4573 = vmatmul.bf16.gmra.mxu3 %v21019_v22  ;;  %v15886_v56 = vpop.f32.mrf.mxu0 }
 0x591   : > { %v10160_v41 = vpop.eup %10159  ;;  %v6000_v37 = vor.u32 1.1754944e-38, %v5999_v34  ;;  %v6004_v25 = vmul.f32 %v15823_v53, %v15725_v36  ;;  %10161 = vrcp.f32 %v15832_v59  ;;  %v15872_v39 = vadd.f32 1.0, %v10156_v6  ;;  %21022 = vst [vmem:[#allocation119_spill] sm:$0xff] %v15886_v56  ;;  %v15888_v6 = vpop.f32.mrf.mxu1  ;;  %v9496_v34 = vld [vmem:[%s20376_s7 + $0x30] sm:$0xff] }
 0x592   : > { %v15875_v57 = vmul.f32 %v5896_v60, %v14616_v20  ;;  %v5956_v40 = vsel %vm15850_vm7, %v5955_v19, %v5951_v29  ;;  %vm5998_vm8 = vcmp.eq.f32.partialorder %v5997_v26, 8.507059e+37  ;;  %10163 = vrcp.f32 %v15845_v58  ;;  %21023 = vst [vmem:[#allocation120_spill] sm:$0xff] %v15888_v6  ;;  %7900 = vmatpush.bf16.msrb.mxu3 %v9496_v34 }
 0x593   : > { %v15881_v27 = vmul.f32 %v5941_v42, %v14731_v38  ;;  %v6001_v62 = vsel %vm5998_vm8, %v6000_v37, %v5996_v7  ;;  %v6021_v31 = vmul.f32 %v15759_v4, %v6020_v15  ;;  %v15884_v18 = vadd.f32 1.0, %v10158_v35  ;;  %v15899_v38 = vpop.f32.mrf.mxu2  ;;  %v15901_v42 = vpop.f32.mrf.mxu3  ;;  %v21042_v37 = vld [vmem:[#allocation87_spill] sm:$0xff] }
 0x594   : > { %21020 = vst [vmem:[#allocation37_spill] sm:$0xff] %v15875_v57  ;;  %v15891_v20 = vmul.f32 %v5971_v45, %v20933_v43  ;;  %v15894_v60 = vmul.f32 %v5986_v8, %v14792_v24  ;;  %v6036_v5 = vmul.f32 %v15766_v49, %v6035_v52  ;;  %v15897_v14 = vadd.f32 1.0, %v10160_v41  ;;  %v9520_v43 = vld [vmem:[%s20376_s7 + $0xf0] sm:$0xff] }
 0x595   : > { %21021 = vst [vmem:[#allocation118_spill] sm:$0xff] %v15881_v27  ;;  %v15910_v55 = vmul.f32 %v5956_v40, %v20939_v50  ;;  %v6005_v24 = vsub.f32 1.0, %v6004_v25  ;;  %10165 = vrcp.f32 %v15872_v39  ;;  %v9190_v26 = vmul.f32 -1.442695, %v15065_v44  ;;  %8167 = vmatpush.bf16.msrb.mxu2 %v9520_v43  ;;  %v9504_v41 = vld [vmem:[%s20376_s7 + $0x70] sm:$0xff]  ;;  %v21045_v27 = vld [vmem:[#allocation69_spill] sm:$0xff] }
 0x596   : > { %21024 = vst [vmem:[#allocation121_spill] sm:$0xff] %v15891_v20  ;;  %v15915_v29 = vmul.f32 %v6001_v62, %v14801_v63  ;;  %v6027_v13 = vand.u32 2147483647, %v15684_v32  ;;  %v6029_v19 = vand.u32 2147483648, %v15684_v32  ;;  %v6042_v11 = vand.u32 2147483647, %v15691_v30  ;;  %4840 = vmatmul.bf16.gmra.mxu2 %v21019_v22  ;;  %7989 = vmatpush.bf16.msrb.mxu0 %v9504_v41 }
 0x597   : > { %21025 = vst [vmem:[#allocation122_spill] sm:$0xff] %v15894_v60  ;;  %v15920_v15 = vpop.eup %10161  ;;  %v6022_v50 = vadd.f32 %v15759_v4, %v6021_v31  ;;  %vm6024_vm9 = vweird.f32 %v15759_v4  ;;  %v6044_v35 = vand.u32 2147483648, %v15691_v30  ;;  %10167 = vrcp.f32 %v15884_v18 }
 0x598   : > { %21026 = vst [vmem:[#allocation123_spill] sm:$0xff] %v15899_v38  ;;  %v15926_v63 = vpop.eup %10163  ;;  %vm6023_vm10 = vweird.f32 %v15684_v32  ;;  %v6037_v45 = vadd.f32 %v15766_v49, %v6036_v5  ;;  %vm6039_vm11 = vweird.f32 %v15766_v49  ;;  %10169 = vrcp.f32 %v15897_v14  ;;  %4662 = vmatmul.bf16.gmra.mxu0 %v21019_v22  ;;  %4751 = vmatmul.bf16.gmra.mxu1 %v21019_v22 }
 0x599   : > { %21027 = vst [vmem:[#allocation124_spill] sm:$0xff] %v15901_v42  ;;  %v6006_v8 = vmul.f32 %v15823_v53, %v6005_v24  ;;  %v6012_v7 = vand.u32 2147483647, %v15725_v36  ;;  %v6014_v52 = vand.u32 2147483648, %v15725_v36  ;;  %10171 = vpow2.f32 %v9190_v26  ;;  %vm15938_vm12 = vmor %vm6023_vm10, %vm6024_vm9 }
 0x59a   : > { %21028 = vst [vmem:[#allocation125_spill] sm:$0xff] %v15910_v55  ;;  %vm15942_vm13 = vcmp.eq.f32.partialorder %v6027_v13, 8.507059e+37  ;;  %v6030_v25 = vor.u32 1.1754944e-38, %v6029_v19  ;;  %vm6038_vm14 = vweird.f32 %v15691_v30  ;;  %vm15947_vm15 = vcmp.eq.f32.partialorder %v6042_v11, 8.507059e+37 }
 0x59b   : > { %21029 = vst [vmem:[#allocation126_spill] sm:$0xff] %v15915_v29  ;;  %v15952_v62 = vpop.eup %10165  ;;  %v6026_v31 = vsel %vm15938_vm12, %v15759_v4, %v6022_v50  ;;  %vm15959_vm1 = vmor %vm6038_vm14, %vm6039_vm11  ;;  %v6045_v34 = vor.u32 1.1754944e-38, %v6044_v35  ;;  %v6049_v30 = vmul.f32 %v15920_v15, %v15832_v59  ;;  %v6079_v43 = vmul.f32 %v15926_v63, %v15845_v58  ;;  %v15983_v50 = vpop.f32.mrf.mxu0 }
 0x59c   : > { %v6041_v24 = vsel %vm15959_vm1, %v15766_v49, %v6037_v45  ;;  %vm6008_vm2 = vweird.f32 %v15725_v36  ;;  %v6059_v4 = vand.u32 2147483648, %v15832_v59  ;;  %v9191_v26 = vmul.f32 -1.442695, %v15067_v2  ;;  %21040 = vst [vmem:[#allocation127_spill] sm:$0xff] %v15983_v50  ;;  %v15985_v35 = vpop.f32.mrf.mxu1  ;;  %v15995_v5 = vpop.f32.mrf.mxu2 }
 0x59d   : > { %v15975_v13 = vpop.eup %10167  ;;  %v6007_v19 = vadd.f32 %v15823_v53, %v6006_v8  ;;  %vm6009_vm3 = vweird.f32 %v15823_v53  ;;  %vm15979_vm4 = vcmp.eq.f32.partialorder %v6012_v7, 8.507059e+37  ;;  %v6015_v49 = vor.u32 1.1754944e-38, %v6014_v52  ;;  %21041 = vst [vmem:[#allocation128_spill] sm:$0xff] %v15985_v35  ;;  %v15997_v60 = vpop.f32.mrf.mxu3 }
 0x59e   : > { %v15987_v45 = vpop.eup %10169  ;;  %v6031_v22 = vsel %vm15942_vm13, %v6030_v25, %v6026_v31  ;;  %v6057_v41 = vand.u32 2147483647, %v15832_v59  ;;  %v6094_v8 = vmul.f32 %v15952_v62, %v15872_v39  ;;  %v9189_v7 = vmul.f32 -1.442695, %v21042_v37  ;;  %21043 = vst [vmem:[#allocation87_spill] sm:$0xff] %v15995_v5  ;;  %vm16006_vm5 = vmor %vm6008_vm2, %vm6009_vm3 }
 0x59f   : > { %21044 = vst [vmem:[#allocation129_spill] sm:$0xff] %v15997_v60  ;;  %v10172_v52 = vpop.eup %10171  ;;  %v6046_v29 = vsel %vm15947_vm15, %v6045_v34, %v6041_v24  ;;  %v6050_v55 = vsub.f32 1.0, %v6049_v30  ;;  %v6080_v20 = vsub.f32 1.0, %v6079_v43  ;;  %v9192_v32 = vmul.f32 -1.442695, %v21045_v27  ;;  %v21048_v30 = vld [vmem:[#allocation40_spill] sm:$0xff] }
 0x5a0   : > { %vm6053_vm6 = vweird.f32 %v15832_v59  ;;  %v16011_v31 = vor.u32 1.1754944e-38, %v6059_v4  ;;  %v6064_v40 = vmul.f32 %v15975_v13, %v15884_v18  ;;  %10173 = vpow2.f32 %v9191_v26  ;;  %4578 = vmatmul.bf16.gmra.mxu3 %v21048_v30  ;;  %v9512_v26 = vld [vmem:[%s20376_s7 + $0xb0] sm:$0xff] }
 0x5a1   : > { %v9194_v34 = vmul.f32 -1.442695, %v15154_v23  ;;  %v16018_v43 = vmul.f32 %v6031_v22, %v14887_v51  ;;  %v6011_v36 = vsel %vm16006_vm5, %v15823_v53, %v6007_v19  ;;  %v6109_v24 = vmul.f32 %v15987_v45, %v15897_v14  ;;  %v21051_v19 = vld [vmem:[#allocation91_spill] sm:$0xff]  ;;  %8078 = vmatpush.bf16.msrb.mxu1 %v9512_v26 }
 0x5a2   : > { %v9195_v4 = vmul.f32 -1.442695, %v15156_v61  ;;  %v16030_v57 = vmul.f32 %v6046_v29, %v20963_v54  ;;  %v6095_v60 = vsub.f32 1.0, %v6094_v8  ;;  %v16032_v5 = vadd.f32 1.0, %v10172_v52 }
 0x5a3   : > { %21049 = vst [vmem:[#allocation69_spill] sm:$0xff] %v16018_v43  ;;  %10175 = vpow2.f32 %v9189_v7  ;;  %v6051_v51 = vmul.f32 %v15920_v15, %v6050_v55  ;;  %v6081_v53 = vmul.f32 %v15926_v63, %v6080_v20  ;;  %v9193_v22 = vmul.f32 -1.442695, %v21051_v19 }
 0x5a4   : > { %21050 = vst [vmem:[#allocation40_spill] sm:$0xff] %v16030_v57  ;;  %10177 = vpow2.f32 %v9192_v32  ;;  %v6016_v25 = vsel %vm15979_vm4, %v6015_v49, %v6011_v36  ;;  %vm6054_vm7 = vweird.f32 %v15920_v15  ;;  %v6065_v43 = vsub.f32 1.0, %v6064_v40 }
 0x5a5   : > { %10179 = vpow2.f32 %v9194_v34  ;;  %v6087_v54 = vand.u32 2147483647, %v15845_v58  ;;  %v6089_v29 = vand.u32 2147483648, %v15845_v58  ;;  %v6110_v8 = vsub.f32 1.0, %v6109_v24  ;;  %v16046_v11 = vpop.f32.mrf.mxu3  ;;  %v16057_v34 = vpop.f32.mrf.mxu1  ;;  %vm16071_vm11 = vmor %vm6053_vm6, %vm6054_vm7 }
 0x5a6   : > { %10181 = vpow2.f32 %v9195_v4  ;;  %v10174_v55 = vpop.eup %10173  ;;  %v6096_v20 = vmul.f32 %v15952_v62, %v6095_v60  ;;  %v6102_v7 = vand.u32 2147483647, %v15872_v39  ;;  %v6104_v52 = vand.u32 2147483648, %v15872_v39  ;;  %21052 = vst [vmem:[#allocation91_spill] sm:$0xff] %v16046_v11  ;;  %v16055_v60 = vpop.f32.mrf.mxu0 }
 0x5a7   : > { %10183 = vrcp.f32 %v16032_v5  ;;  %v6052_v49 = vadd.f32 %v15920_v15, %v6051_v51  ;;  %vm16049_vm0 = vcmp.eq.f32.partialorder %v6057_v41, 8.507059e+37  ;;  %v6082_v40 = vadd.f32 %v15926_v63, %v6081_v53  ;;  %21055 = vst [vmem:[#allocation130_spill] sm:$0xff] %v16055_v60  ;;  %v16065_v4 = vpop.f32.mrf.mxu2  ;;  %4845 = vmatmul.bf16.gmra.mxu2 %v21048_v30 }
 0x5a8   : > { %vm6084_vm8 = vweird.f32 %v15926_v63  ;;  %10185 = vpow2.f32 %v9193_v22  ;;  %21056 = vst [vmem:[#allocation131_spill] sm:$0xff] %v16057_v34  ;;  %v16060_v24 = vmul.f32 %v6016_v25, %v20969_v10  ;;  %vm6083_vm9 = vweird.f32 %v15845_v58  ;;  %4667 = vmatmul.bf16.gmra.mxu0 %v21048_v30  ;;  %4756 = vmatmul.bf16.gmra.mxu1 %v21048_v30 }
 0x5a9   : > { %v10176_v36 = vpop.eup %10175  ;;  %vm6098_vm10 = vweird.f32 %v15872_v39  ;;  %v6066_v41 = vmul.f32 %v15975_v13, %v6065_v43  ;;  %21058 = vst [vmem:[#allocation133_spill] sm:$0xff] %v16065_v4  ;;  %vm16075_vm12 = vcmp.eq.f32.partialorder %v6087_v54, 8.507059e+37  ;;  %v6090_v58 = vor.u32 1.1754944e-38, %v6089_v29  ;;  %vm16084_vm13 = vmor %vm6083_vm9, %vm6084_vm8 }
 0x5aa   : > { %21057 = vst [vmem:[#allocation132_spill] sm:$0xff] %v16060_v24  ;;  %v10178_v26 = vpop.eup %10177  ;;  %v6111_v53 = vmul.f32 %v15987_v45, %v6110_v8  ;;  %v16080_v22 = vadd.f32 1.0, %v10174_v55  ;;  %v6097_v59 = vadd.f32 %v15952_v62, %v6096_v20  ;;  %vm6099_vm14 = vweird.f32 %v15952_v62 }
 0x5ab   : > { %v10180_v43 = vpop.eup %10179  ;;  %vm16090_vm15 = vcmp.eq.f32.partialorder %v6102_v7, 8.507059e+37  ;;  %v6105_v29 = vor.u32 1.1754944e-38, %v6104_v52  ;;  %v6056_v55 = vsel %vm16071_vm11, %v15920_v15, %v6052_v49  ;;  %v6086_v24 = vsel %vm16084_vm13, %v15926_v63, %v6082_v40  ;;  %vm16116_vm3 = vmor %vm6098_vm10, %vm6099_vm14 }
 0x5ac   : > { %v10182_v8 = vpop.eup %10181  ;;  %vm6068_vm1 = vweird.f32 %v15884_v18  ;;  %v16102_v20 = vadd.f32 1.0, %v10176_v36  ;;  %v6067_v57 = vadd.f32 %v15975_v13, %v6066_v41  ;;  %vm6069_vm2 = vweird.f32 %v15975_v13 }
 0x5ad   : > { %v16104_v7 = vpop.eup %10183  ;;  %v6072_v52 = vand.u32 2147483647, %v15884_v18  ;;  %v6074_v11 = vand.u32 2147483648, %v15884_v18  ;;  %v6112_v49 = vadd.f32 %v15987_v45, %v6111_v53  ;;  %vm6114_vm4 = vweird.f32 %v15987_v45  ;;  %vm16136_vm6 = vmor %vm6068_vm1, %vm6069_vm2 }
 0x5ae   : > { %v10186_v15 = vpop.eup %10185  ;;  %10187 = vrcp.f32 %v16080_v22  ;;  %v16123_v40 = vadd.f32 1.0, %v10178_v26  ;;  %v6101_v30 = vsel %vm16116_vm3, %v15952_v62, %v6097_v59  ;;  %vm6113_vm5 = vweird.f32 %v15897_v14  ;;  %v16146_v53 = vpop.f32.mrf.mxu0 }
 0x5af   : > { %v6119_v39 = vand.u32 2147483648, %v15897_v14  ;;  %v16130_v36 = vadd.f32 1.0, %v10180_v43  ;;  %v6117_v26 = vand.u32 2147483647, %v15897_v14  ;;  %v6139_v51 = vmul.f32 %v16104_v7, %v16032_v5  ;;  %21071 = vst [vmem:[#allocation134_spill] sm:$0xff] %v16146_v53  ;;  %v16148_v43 = vpop.f32.mrf.mxu1  ;;  %vm16160_vm7 = vmor %vm6113_vm5, %vm6114_vm4  ;;  %v16166_v63 = vpop.f32.mrf.mxu2 }
 0x5b0   : > { %10189 = vrcp.f32 %v16102_v20  ;;  %v16144_v62 = vadd.f32 1.0, %v10182_v8  ;;  %21072 = vst [vmem:[#allocation135_spill] sm:$0xff] %v16148_v43  ;;  %v6061_v18 = vsel %vm16049_vm0, %v16011_v31, %v6056_v55  ;;  %v6091_v25 = vsel %vm16075_vm12, %v6090_v58, %v6086_v24  ;;  %v16168_v43 = vpop.f32.mrf.mxu3  ;;  %v9495_v31 = vld [vmem:[%s20376_s7 + $0x28] sm:$0xff] }
 0x5b1   : > { %v6071_v14 = vsel %vm16136_vm6, %v15975_v13, %v6067_v57  ;;  %v16164_v8 = vadd.f32 1.0, %v10186_v15  ;;  %21075 = vst [vmem:[#allocation136_spill] sm:$0xff] %v16166_v63  ;;  %v9519_v57 = vld [vmem:[%s20376_s7 + $0xe8] sm:$0xff]  ;;  %v21077_v13 = vld [vmem:[#allocation44_spill] sm:$0xff]  ;;  %v6106_v32 = vsel %vm16090_vm15, %v6105_v29, %v6101_v30  ;;  %v6075_v24 = vor.u32 1.1754944e-38, %v6074_v11  ;;  %7901 = vmatpush.bf16.msrb.mxu3 %v9495_v31 }
 0x5b2   : > { %21076 = vst [vmem:[#allocation137_spill] sm:$0xff] %v16168_v43  ;;  %4583 = vmatmul.bf16.gmra.mxu3 %v21077_v13  ;;  %v6116_v10 = vsel %vm16160_vm7, %v15987_v45, %v6112_v49  ;;  %10191 = vrcp.f32 %v16123_v40  ;;  %v9503_v58 = vld [vmem:[%s20376_s7 + $0x68] sm:$0xff]  ;;  %vm6073_vm0 = vcmp.eq.f32.partialorder %v6072_v52, 8.507059e+37  ;;  %v6120_v15 = vor.u32 1.1754944e-38, %v6119_v39  ;;  %8168 = vmatpush.bf16.msrb.mxu2 %v9519_v57 }
 0x5b3   : > { %v9511_v55 = vld [vmem:[%s20376_s7 + $0xa8] sm:$0xff]  ;;  %10193 = vrcp.f32 %v16130_v36  ;;  %v9196_v11 = vmul.f32 -1.442695, %v15163_v16  ;;  %v6076_v45 = vsel %vm6073_vm0, %v6075_v24, %v6071_v14  ;;  %vm6118_vm8 = vcmp.eq.f32.partialorder %v6117_v26, 8.507059e+37  ;;  %7990 = vmatpush.bf16.msrb.mxu0 %v9503_v58 }
 0x5b4   : > { %v16191_v54 = vpop.eup %10187  ;;  %v6140_v29 = vsub.f32 1.0, %v6139_v51  ;;  %10195 = vrcp.f32 %v16144_v62  ;;  %8079 = vmatpush.bf16.msrb.mxu1 %v9511_v55  ;;  %v16195_v49 = vmul.f32 %v6061_v18, %v20986_v47  ;;  %v6121_v52 = vsel %vm6118_vm8, %v6120_v15, %v6116_v10 }
 0x5b5   : > { %v6149_v30 = vand.u32 2147483648, %v16032_v5  ;;  %10197 = vrcp.f32 %v16164_v8  ;;  %v16202_v41 = vmul.f32 %v6091_v25, %v20991_v48  ;;  %v16205_v26 = vmul.f32 %v6106_v32, %v20993_v3 }
 0x5b6   : > { %21078 = vst [vmem:[#allocation44_spill] sm:$0xff] %v16195_v49  ;;  %v16199_v39 = vpop.eup %10189  ;;  %v6147_v51 = vand.u32 2147483647, %v16032_v5  ;;  %v6164_v14 = vand.u32 2147483648, %v16080_v22  ;;  %v16210_v47 = vmul.f32 %v6076_v45, %v20998_v9  ;;  %v6154_v18 = vmul.f32 %v16191_v54, %v16080_v22 }
 0x5b7   : > { %21079 = vst [vmem:[#allocation138_spill] sm:$0xff] %v16202_v41  ;;  %10199 = vpow2.f32 %v9196_v11  ;;  %v9198_v59 = vmul.f32 -1.442695, %v15250_v0  ;;  %v16218_v48 = vmul.f32 %v6121_v52, %v21001_v12  ;;  %v6141_v3 = vmul.f32 %v16104_v7, %v6140_v29  ;;  %v21085_v11 = vld [vmem:[#allocation92_spill] sm:$0xff]  ;;  %v16240_v29 = vpop.f32.mrf.mxu0 }
 0x5b8   : > { %21080 = vst [vmem:[#allocation139_spill] sm:$0xff] %v16205_v26  ;;  %v16215_v31 = vpop.eup %10191  ;;  %vm6143_vm9 = vweird.f32 %v16032_v5  ;;  %v6134_v25 = vand.u32 2147483648, %v16102_v20  ;;  %v6150_v9 = vor.u32 1.1754944e-38, %v6149_v30  ;;  %v6124_v24 = vmul.f32 %v16199_v39, %v16102_v20  ;;  %v21087_v26 = vld [vmem:[#allocation96_spill] sm:$0xff]  ;;  %4672 = vmatmul.bf16.gmra.mxu0 %v21077_v13  ;;  %v16284_v5 = vpop.f32.mrf.mxu3 }
 0x5b9   : > { %21081 = vst [vmem:[#allocation140_spill] sm:$0xff] %v16210_v47  ;;  %v16223_v57 = vpop.eup %10193  ;;  %v9199_v10 = vmul.f32 -1.442695, %v15252_v17  ;;  %vm6144_vm10 = vweird.f32 %v16104_v7  ;;  %vm16232_vm11 = vcmp.eq.f32.partialorder %v6147_v51, 8.507059e+37  ;;  %v16236_v55 = vor.u32 1.1754944e-38, %v6164_v14  ;;  %v16249_v47 = vpop.f32.mrf.mxu2  ;;  %4850 = vmatmul.bf16.gmra.mxu2 %v21077_v13 }
 0x5ba   : > { %21082 = vst [vmem:[#allocation141_spill] sm:$0xff] %v16218_v48  ;;  %v16229_v58 = vpop.eup %10195  ;;  %v9197_v45 = vmul.f32 -1.442695, %v21085_v11  ;;  %v6155_v30 = vsub.f32 1.0, %v6154_v18  ;;  %v6169_v32 = vmul.f32 %v16215_v31, %v16123_v40  ;;  %10201 = vpow2.f32 %v9198_v59  ;;  %v16247_v48 = vpop.f32.mrf.mxu1  ;;  %v21090_v18 = vld [vmem:[#allocation102_spill] sm:$0xff]  ;;  %4761 = vmatmul.bf16.gmra.mxu1 %v21077_v13  ;;  %vm16272_vm13 = vmor %vm6143_vm9, %vm6144_vm10 }
 0x5bb   : > { %21086 = vst [vmem:[#allocation92_spill] sm:$0xff] %v16240_v29  ;;  %v16242_v52 = vpop.eup %10197  ;;  %v9200_v51 = vmul.f32 -1.442695, %v21087_v26  ;;  %v6142_v14 = vadd.f32 %v16104_v7, %v6141_v3  ;;  %v16253_v15 = vor.u32 1.1754944e-38, %v6134_v25  ;;  %v6199_v41 = vmul.f32 %v16223_v57, %v16130_v36 }
 0x5bc   : > { %21088 = vst [vmem:[#allocation96_spill] sm:$0xff] %v16247_v48  ;;  %v9202_v43 = vmul.f32 -1.442695, %v21090_v18  ;;  %v6125_v29 = vsub.f32 1.0, %v6124_v24  ;;  %v6214_v59 = vmul.f32 %v16229_v58, %v16144_v62  ;;  %10203 = vpow2.f32 %v9199_v10  ;;  %v21091_v48 = vld [vmem:[#allocation103_spill] sm:$0xff] }
 0x5bd   : > { %21089 = vst [vmem:[#allocation142_spill] sm:$0xff] %v16249_v47  ;;  %v10200_v49 = vpop.eup %10199  ;;  %v9203_v63 = vmul.f32 -1.442695, %v21091_v48  ;;  %vm6158_vm12 = vweird.f32 %v16080_v22  ;;  %v6177_v3 = vand.u32 2147483647, %v16123_v40  ;;  %v6179_v25 = vand.u32 2147483648, %v16123_v40 }
 0x5be   : > { %v6184_v47 = vmul.f32 %v16242_v52, %v16164_v8  ;;  %10205 = vpow2.f32 %v9197_v45  ;;  %v6156_v13 = vmul.f32 %v16191_v54, %v6155_v30  ;;  %vm6128_vm14 = vweird.f32 %v16102_v20  ;;  %21094 = vst [vmem:[#allocation102_spill] sm:$0xff] %v16284_v5 }
 0x5bf   : > { %v6170_v10 = vsub.f32 1.0, %v6169_v32  ;;  %v6207_v53 = vand.u32 2147483647, %v16130_v36  ;;  %10207 = vpow2.f32 %v9200_v51  ;;  %v6146_v45 = vsel %vm16272_vm13, %v16104_v7, %v6142_v14 }
 0x5c0   : > { %v6200_v4 = vsub.f32 1.0, %v6199_v41  ;;  %v16282_v34 = vadd.f32 1.0, %v10200_v49  ;;  %10209 = vpow2.f32 %v9202_v43  ;;  %v10202_v60 = vpop.eup %10201  ;;  %v6126_v42 = vmul.f32 %v16199_v39, %v6125_v29 }
 0x5c1   : > { %vm6173_vm15 = vweird.f32 %v16123_v40  ;;  %v6209_v32 = vand.u32 2147483648, %v16130_v36  ;;  %v6215_v30 = vsub.f32 1.0, %v6214_v59  ;;  %10211 = vpow2.f32 %v9203_v63  ;;  %v16299_v63 = vpop.f32.mrf.mxu0 }
 0x5c2   : > { %vm6159_vm1 = vweird.f32 %v16191_v54  ;;  %vm6129_vm2 = vweird.f32 %v16199_v39  ;;  %v16291_v7 = vor.u32 1.1754944e-38, %v6179_v25  ;;  %vm6203_vm3 = vweird.f32 %v16130_v36  ;;  %v10204_v49 = vpop.eup %10203  ;;  %21095 = vst [vmem:[#allocation103_spill] sm:$0xff] %v16299_v63  ;;  %v16301_v59 = vpop.f32.mrf.mxu1  ;;  %v21129_v63 = vld [vmem:[#allocation81_spill] sm:$0xff] }
 0x5c3   : > { %v6185_v43 = vsub.f32 1.0, %v6184_v47  ;;  %v6151_v41 = vsel %vm16232_vm11, %v6150_v9, %v6146_v45  ;;  %v6171_v29 = vmul.f32 %v16215_v31, %v6170_v10  ;;  %v6222_v51 = vand.u32 2147483647, %v16144_v62  ;;  %21096 = vst [vmem:[#allocation143_spill] sm:$0xff] %v16301_v59  ;;  %vm16343_vm10 = vmor %vm6158_vm12, %vm6159_vm1 }
 0x5c4   : > { %v6224_v14 = vand.u32 2147483648, %v16144_v62  ;;  %v10206_v24 = vpop.eup %10205  ;;  %v6157_v25 = vadd.f32 %v16191_v54, %v6156_v13  ;;  %v21097_v5 = vand.u32 2147483647, %v16080_v22  ;;  %v6201_v9 = vmul.f32 %v16223_v57, %v6200_v4  ;;  %vm16361_vm12 = vmor %vm6128_vm14, %vm6129_vm2 }
 0x5c5   : > { %10213 = vrcp.f32 %v16282_v34  ;;  %v16312_v12 = vadd.f32 1.0, %v10202_v60  ;;  %v10208_v10 = vpop.eup %10207  ;;  %v6127_v45 = vadd.f32 %v16199_v39, %v6126_v42  ;;  %v21100_v59 = vand.u32 2147483647, %v16102_v20 }
 0x5c6   : > { %vm16306_vm4 = vcmp.eq.f32.partialorder %v21097_v5, 8.507059e+37  ;;  %vm16321_vm6 = vcmp.eq.f32.partialorder %v6177_v3, 8.507059e+37  ;;  %v6210_v5 = vor.u32 1.1754944e-38, %v6209_v32  ;;  %v6216_v4 = vmul.f32 %v16229_v58, %v6215_v30  ;;  %v10210_v60 = vpop.eup %10209 }
 0x5c7   : > { %vm16317_vm5 = vcmp.eq.f32.partialorder %v21100_v59, 8.507059e+37  ;;  %vm6218_vm7 = vweird.f32 %v16144_v62  ;;  %vm6174_vm0 = vweird.f32 %v16215_v31  ;;  %vm6204_vm8 = vweird.f32 %v16223_v57  ;;  %v10212_v35 = vpop.eup %10211 }
 0x5c8   : > { %vm16329_vm9 = vcmp.eq.f32.partialorder %v6207_v53, 8.507059e+37  ;;  %v6186_v59 = vmul.f32 %v16242_v52, %v6185_v43  ;;  %v16334_v3 = vadd.f32 1.0, %v10204_v49  ;;  %v16337_v32 = vmul.f32 %v6151_v41, %v15065_v44  ;;  %vm16382_vm14 = vmor %vm6173_vm15, %vm6174_vm0 }
 0x5c9   : > { %v6172_v53 = vadd.f32 %v16215_v31, %v6171_v29  ;;  %vm16348_vm11 = vcmp.eq.f32.partialorder %v6222_v51, 8.507059e+37  ;;  %v6225_v43 = vor.u32 1.1754944e-38, %v6224_v14  ;;  %v16352_v49 = vadd.f32 1.0, %v10206_v24  ;;  %vm16403_vm15 = vmor %vm6203_vm3, %vm6204_vm8 }
 0x5ca   : > { %21107 = vst [vmem:[#allocation144_spill] sm:$0xff] %v16337_v32  ;;  %v6161_v44 = vsel %vm16343_vm10, %v16191_v54, %v6157_v25  ;;  %v6202_v41 = vadd.f32 %v16223_v57, %v6201_v9  ;;  %10215 = vrcp.f32 %v16312_v12  ;;  %v16367_v29 = vadd.f32 1.0, %v10208_v10  ;;  %v16391_v9 = vpop.f32.mrf.mxu2  ;;  %v16393_v10 = vpop.f32.mrf.mxu3 }
 0x5cb   : > { %v6131_v51 = vsel %vm16361_vm12, %v16199_v39, %v6127_v45  ;;  %v6217_v54 = vadd.f32 %v16229_v58, %v6216_v4  ;;  %vm6219_vm13 = vweird.f32 %v16229_v58  ;;  %v16374_v14 = vadd.f32 1.0, %v10210_v60  ;;  %v16376_v20 = vpop.eup %10213  ;;  %21116 = vst [vmem:[#allocation145_spill] sm:$0xff] %v16391_v9  ;;  %v21118_v45 = vld [vmem:[#allocation51_spill] sm:$0xff]  ;;  %v21121_v60 = vld [vmem:[#allocation97_spill] sm:$0xff]  ;;  %v21128_v4 = vld [vmem:[#allocation104_spill] sm:$0xff] }
 0x5cc   : > { %v6187_v25 = vadd.f32 %v16242_v52, %v6186_v59  ;;  %vm6189_vm1 = vweird.f32 %v16242_v52  ;;  %10217 = vrcp.f32 %v16334_v3  ;;  %v16389_v39 = vadd.f32 1.0, %v10212_v35  ;;  %21117 = vst [vmem:[#allocation146_spill] sm:$0xff] %v16393_v10  ;;  %4588 = vmatmul.bf16.gmra.mxu3 %v21118_v45  ;;  %vm16417_vm2 = vmor %vm6218_vm7, %vm6219_vm13 }
 0x5cd   : > { %v6176_v40 = vsel %vm16382_vm14, %v16215_v31, %v6172_v53  ;;  %v6194_v35 = vand.u32 2147483648, %v16164_v8  ;;  %10219 = vrcp.f32 %v16352_v49  ;;  %v9201_v59 = vmul.f32 -1.442695, %v21121_v60 }
 0x5ce   : > { %v6206_v30 = vsel %vm16403_vm15, %v16223_v57, %v6202_v41  ;;  %vm6188_vm3 = vweird.f32 %v16164_v8  ;;  %v6192_v31 = vand.u32 2147483647, %v16164_v8  ;;  %10221 = vrcp.f32 %v16367_v29  ;;  %v16439_v8 = vpop.f32.mrf.mxu0  ;;  %v16441_v41 = vpop.f32.mrf.mxu1  ;;  %4677 = vmatmul.bf16.gmra.mxu0 %v21118_v45  ;;  %4766 = vmatmul.bf16.gmra.mxu1 %v21118_v45 }
 0x5cf   : > { %v6166_v53 = vsel %vm16306_vm4, %v16236_v55, %v6161_v44  ;;  %v6221_v57 = vsel %vm16417_vm2, %v16229_v58, %v6217_v54  ;;  %vm16432_vm7 = vmor %vm6188_vm3, %vm6189_vm1  ;;  %v6229_v22 = vmul.f32 %v16376_v20, %v16282_v34  ;;  %10223 = vrcp.f32 %v16374_v14  ;;  %21126 = vst [vmem:[#allocation51_spill] sm:$0xff] %v16439_v8 }
 0x5d0   : > { %21127 = vst [vmem:[#allocation97_spill] sm:$0xff] %v16441_v41  ;;  %v16445_v58 = vpop.eup %10215  ;;  %v6136_v55 = vsel %vm16317_vm5, %v16253_v15, %v6131_v51  ;;  %v6181_v47 = vsel %vm16321_vm6, %v16291_v7, %v6176_v40  ;;  %v6191_v44 = vsel %vm16432_vm7, %v16242_v52, %v6187_v25  ;;  %10225 = vrcp.f32 %v16389_v39 }
 0x5d1   : > { %v6211_v54 = vsel %vm16329_vm9, %v6210_v5, %v6206_v30  ;;  %v6195_v24 = vor.u32 1.1754944e-38, %v6194_v35  ;;  %10227 = vpow2.f32 %v9201_v59  ;;  %v9204_v36 = vmul.f32 -1.442695, %v21128_v4  ;;  %v21134_v59 = vld [vmem:[#allocation80_spill] sm:$0xff] }
 0x5d2   : > { %v16460_v10 = vpop.eup %10217  ;;  %v6226_v15 = vsel %vm16348_vm11, %v6225_v43, %v6221_v57  ;;  %vm6193_vm4 = vcmp.eq.f32.partialorder %v6192_v31, 8.507059e+37  ;;  %v6239_v7 = vand.u32 2147483648, %v16282_v34  ;;  %v9206_v13 = vmul.f32 -1.442695, %v21129_v63  ;;  %v16498_v62 = vpop.f32.mrf.mxu2  ;;  %4855 = vmatmul.bf16.gmra.mxu2 %v21118_v45 }
 0x5d3   : > { %v16466_v52 = vpop.eup %10219  ;;  %v16469_v51 = vmul.f32 %v6166_v53, %v15067_v2  ;;  %v6196_v5 = vsel %vm6193_vm4, %v6195_v24, %v6191_v44  ;;  %v6230_v42 = vsub.f32 1.0, %v6229_v22  ;;  %v6259_v25 = vmul.f32 %v16445_v58, %v16312_v12  ;;  %21137 = vst [vmem:[#allocation150_spill] sm:$0xff] %v16498_v62  ;;  %v21138_v44 = vld [vmem:[#allocation101_spill] sm:$0xff] }
 0x5d4   : > { %v16473_v40 = vpop.eup %10221  ;;  %v16476_v50 = vmul.f32 %v6136_v55, %v21042_v37  ;;  %v16479_v43 = vmul.f32 %v6181_v47, %v21045_v27  ;;  %v16482_v35 = vmul.f32 %v6211_v54, %v15154_v23  ;;  %v9207_v30 = vmul.f32 -1.442695, %v21134_v59 }
 0x5d5   : > { %21130 = vst [vmem:[#allocation104_spill] sm:$0xff] %v16469_v51  ;;  %v16485_v2 = vpop.eup %10223  ;;  %v16488_v31 = vmul.f32 %v6226_v15, %v15156_v61  ;;  %v6237_v53 = vand.u32 2147483647, %v16282_v34  ;;  %v6269_v57 = vand.u32 2147483648, %v16312_v12  ;;  %10229 = vpow2.f32 %v9204_v36 }
 0x5d6   : > { %21131 = vst [vmem:[#allocation81_spill] sm:$0xff] %v16476_v50  ;;  %v16492_v37 = vpop.eup %10225  ;;  %v16495_v27 = vmul.f32 %v6196_v5, %v21051_v19  ;;  %vm6233_vm5 = vweird.f32 %v16282_v34  ;;  %v6240_v23 = vor.u32 1.1754944e-38, %v6239_v7  ;;  %10231 = vpow2.f32 %v9206_v13 }
 0x5d7   : > { %21132 = vst [vmem:[#allocation147_spill] sm:$0xff] %v16479_v43  ;;  %v10228_v61 = vpop.eup %10227  ;;  %v6231_v22 = vmul.f32 %v16376_v20, %v6230_v42  ;;  %v6260_v55 = vsub.f32 1.0, %v6259_v25  ;;  %v6267_v47 = vand.u32 2147483647, %v16312_v12  ;;  %v9205_v54 = vmul.f32 -1.442695, %v21138_v44 }
 0x5d8   : > { %21133 = vst [vmem:[#allocation148_spill] sm:$0xff] %v16482_v35  ;;  %v6274_v19 = vmul.f32 %v16460_v10, %v16334_v3  ;;  %v6284_v24 = vand.u32 2147483648, %v16334_v3  ;;  %v6244_v36 = vmul.f32 %v16466_v52, %v16352_v49  ;;  %10233 = vpow2.f32 %v9207_v30 }
 0x5d9   : > { %21135 = vst [vmem:[#allocation80_spill] sm:$0xff] %v16488_v31  ;;  %vm6234_vm6 = vweird.f32 %v16376_v20  ;;  %vm16510_vm0 = vcmp.eq.f32.partialorder %v6237_v53, 8.507059e+37  ;;  %vm6263_vm8 = vweird.f32 %v16312_v12  ;;  %v16515_v15 = vor.u32 1.1754944e-38, %v6269_v57 }
 0x5da   : > { %21136 = vst [vmem:[#allocation149_spill] sm:$0xff] %v16495_v27  ;;  %v6254_v7 = vand.u32 2147483648, %v16352_v49  ;;  %v6289_v13 = vmul.f32 %v16473_v40, %v16367_v29  ;;  %v6282_v5 = vand.u32 2147483647, %v16334_v3  ;;  %v6319_v42 = vmul.f32 %v16485_v2, %v16374_v14  ;;  %vm16543_vm12 = vmor %vm6233_vm5, %vm6234_vm6 }
 0x5db   : > { %v6334_v25 = vmul.f32 %v16492_v37, %v16389_v39  ;;  %v16525_v30 = vadd.f32 1.0, %v10228_v61  ;;  %v10230_v53 = vpop.eup %10229  ;;  %v6232_v31 = vadd.f32 %v16376_v20, %v6231_v22  ;;  %v6261_v57 = vmul.f32 %v16445_v58, %v6260_v55 }
 0x5dc   : > { %v6252_v27 = vand.u32 2147483647, %v16352_v49  ;;  %10235 = vpow2.f32 %v9205_v54  ;;  %v10232_v62 = vpop.eup %10231  ;;  %v6275_v41 = vsub.f32 1.0, %v6274_v19  ;;  %vm6278_vm9 = vweird.f32 %v16334_v3  ;;  %v21165_v19 = vld [vmem:[#allocation105_spill] sm:$0xff] }
 0x5dd   : > { %v16531_v8 = vor.u32 1.1754944e-38, %v6284_v24  ;;  %v6245_v9 = vsub.f32 1.0, %v6244_v36  ;;  %v6299_v35 = vand.u32 2147483648, %v16367_v29  ;;  %vm6264_vm10 = vweird.f32 %v16445_v58 }
 0x5de   : > { %vm6248_vm11 = vweird.f32 %v16352_v49  ;;  %v16536_v61 = vor.u32 1.1754944e-38, %v6254_v7  ;;  %v6290_v22 = vsub.f32 1.0, %v6289_v13  ;;  %v6297_v55 = vand.u32 2147483647, %v16367_v29  ;;  %v10234_v43 = vpop.eup %10233  ;;  %v16555_v13 = vpop.f32.mrf.mxu0  ;;  %vm16582_vm3 = vmor %vm6263_vm8, %vm6264_vm10 }
 0x5df   : > { %vm16547_vm13 = vcmp.eq.f32.partialorder %v6267_v47, 8.507059e+37  ;;  %vm6293_vm14 = vweird.f32 %v16367_v29  ;;  %v6320_v24 = vsub.f32 1.0, %v6319_v42  ;;  %v6335_v36 = vsub.f32 1.0, %v6334_v25  ;;  %21145 = vst [vmem:[#allocation101_spill] sm:$0xff] %v16555_v13 }
 0x5e0   : > { %10237 = vrcp.f32 %v16525_v30  ;;  %v16553_v7 = vadd.f32 1.0, %v10230_v53  ;;  %v6236_v34 = vsel %vm16543_vm12, %v16376_v20, %v6232_v31  ;;  %v6262_v50 = vadd.f32 %v16445_v58, %v6261_v57 }
 0x5e1   : > { %vm6279_vm1 = vweird.f32 %v16460_v10  ;;  %v16562_v47 = vadd.f32 1.0, %v10232_v62  ;;  %v6276_v51 = vmul.f32 %v16460_v10, %v6275_v41  ;;  %v6246_v42 = vmul.f32 %v16466_v52, %v6245_v9 }
 0x5e2   : > { %v16566_v25 = vor.u32 1.1754944e-38, %v6299_v35  ;;  %v6327_v53 = vand.u32 2147483647, %v16374_v14  ;;  %v10236_v32 = vpop.eup %10235  ;;  %vm6249_vm15 = vweird.f32 %v16466_v52  ;;  %v6291_v54 = vmul.f32 %v16473_v40, %v6290_v22  ;;  %vm16626_vm8 = vmor %vm6278_vm9, %vm6279_vm1 }
 0x5e3   : > { %vm6323_vm2 = vweird.f32 %v16374_v14  ;;  %v16572_v20 = vadd.f32 1.0, %v10234_v43  ;;  %v16576_v31 = vsel %vm16510_vm0, %v6240_v23, %v6236_v34  ;;  %v6321_v41 = vmul.f32 %v16485_v2, %v6320_v24  ;;  %v9494_v43 = vld [vmem:[%s20376_s7 + $0x20] sm:$0xff]  ;;  %vm16638_vm12 = vmor %vm6248_vm11, %vm6249_vm15 }
 0x5e4   : > { %v6336_v35 = vmul.f32 %v16492_v37, %v6335_v36  ;;  %10239 = vrcp.f32 %v16553_v7  ;;  %v6266_v23 = vsel %vm16582_vm3, %v16445_v58, %v6262_v50  ;;  %vm16595_vm7 = vcmp.eq.f32.partialorder %v6282_v5, 8.507059e+37  ;;  %v16620_v36 = vpop.f32.mrf.mxu1  ;;  %7902 = vmatpush.bf16.msrb.mxu3 %v9494_v43 }
 0x5e5   : > { %vm6294_vm4 = vweird.f32 %v16473_v40  ;;  %v6329_v62 = vand.u32 2147483648, %v16374_v14  ;;  %10241 = vrcp.f32 %v16562_v47  ;;  %v6277_v57 = vadd.f32 %v16460_v10, %v6276_v51  ;;  %21156 = vst [vmem:[#allocation151_spill] sm:$0xff] %v16620_v36  ;;  %v21167_v36 = vld [vmem:[#allocation55_spill] sm:$0xff] }
 0x5e6   : > { %v16602_v45 = vpop.eup %10237  ;;  %v6247_v22 = vadd.f32 %v16466_v52, %v6246_v42  ;;  %vm16606_vm5 = vcmp.eq.f32.partialorder %v6252_v27, 8.507059e+37  ;;  %vm16610_vm6 = vcmp.eq.f32.partialorder %v6297_v55, 8.507059e+37  ;;  %vm16614_vm0 = vcmp.eq.f32.partialorder %v6327_v53, 8.507059e+37  ;;  %vm16653_vm11 = vmor %vm6293_vm14, %vm6294_vm4 }
 0x5e7   : > { %v16618_v5 = vadd.f32 1.0, %v10236_v32  ;;  %v6292_v27 = vadd.f32 %v16473_v40, %v6291_v54  ;;  %vm6324_vm10 = vweird.f32 %v16485_v2  ;;  %10243 = vrcp.f32 %v16572_v20 }
 0x5e8   : > { %v9208_v32 = vmul.f32 -1.442695, %v15444_v1  ;;  %v6322_v3 = vadd.f32 %v16485_v2, %v6321_v41  ;;  %v6337_v34 = vadd.f32 %v16492_v37, %v6336_v35  ;;  %vm6339_vm9 = vweird.f32 %v16492_v37  ;;  %vm16664_vm1 = vmor %vm6323_vm2, %vm6324_vm10 }
 0x5e9   : > { %v9210_v42 = vmul.f32 -1.442695, %v15529_v33  ;;  %v6271_v53 = vsel %vm16547_vm13, %v16515_v15, %v6266_v23  ;;  %v6330_v54 = vor.u32 1.1754944e-38, %v6329_v62  ;;  %v6304_v9 = vmul.f32 %v16602_v45, %v16525_v30  ;;  %v9518_v23 = vld [vmem:[%s20376_s7 + $0xe0] sm:$0xff]  ;;  %v16675_v62 = vpop.f32.mrf.mxu0  ;;  %4682 = vmatmul.bf16.gmra.mxu0 %v21167_v36 }
 0x5ea   : > { %v9211_v41 = vmul.f32 -1.442695, %v15531_v21  ;;  %v16660_v35 = vpop.eup %10239  ;;  %vm6338_vm13 = vweird.f32 %v16389_v39  ;;  %v6344_v29 = vand.u32 2147483648, %v16389_v39  ;;  %10245 = vrcp.f32 %v16618_v5  ;;  %21166 = vst [vmem:[#allocation105_spill] sm:$0xff] %v16675_v62  ;;  %8169 = vmatpush.bf16.msrb.mxu2 %v9518_v23 }
 0x5eb   : > { %v9209_v43 = vmul.f32 -1.442695, %v21165_v19  ;;  %v16678_v14 = vpop.eup %10241  ;;  %v6281_v13 = vsel %vm16626_vm8, %v16460_v10, %v6277_v57  ;;  %v6251_v38 = vsel %vm16638_vm12, %v16466_v52, %v6247_v22  ;;  %vm16688_vm14 = vmor %vm6338_vm13, %vm6339_vm9  ;;  %v6342_v62 = vand.u32 2147483647, %v16389_v39 }
 0x5ec   : > { %10247 = vpow2.f32 %v9208_v32  ;;  %v6296_v56 = vsel %vm16653_vm11, %v16473_v40, %v6292_v27  ;;  %v6326_v10 = vsel %vm16664_vm1, %v16485_v2, %v6322_v3  ;;  %v6341_v52 = vsel %vm16688_vm14, %v16492_v37, %v6337_v34  ;;  %v16712_v37 = vpop.f32.mrf.mxu3  ;;  %v16728_v24 = vpop.f32.mrf.mxu1  ;;  %4771 = vmatmul.bf16.gmra.mxu1 %v21167_v36 }
 0x5ed   : > { %10249 = vpow2.f32 %v9210_v42  ;;  %v16702_v57 = vpop.eup %10243  ;;  %v6305_v22 = vsub.f32 1.0, %v6304_v9  ;;  %v6349_v39 = vmul.f32 %v16660_v35, %v16553_v7  ;;  %v9212_v51 = vmul.f32 -1.442695, %v15538_v28  ;;  %21170 = vst [vmem:[#allocation55_spill] sm:$0xff] %v16712_v37  ;;  %v16745_v9 = vpop.f32.mrf.mxu2 }
 0x5ee   : > { %10251 = vpow2.f32 %v9211_v41  ;;  %v6286_v40 = vsel %vm16595_vm7, %v16531_v8, %v6281_v13  ;;  %v6345_v2 = vor.u32 1.1754944e-38, %v6344_v29  ;;  %v6379_v6 = vmul.f32 %v16678_v14, %v16562_v47  ;;  %21171 = vst [vmem:[#allocation152_spill] sm:$0xff] %v16728_v24 }
 0x5ef   : > { %10253 = vpow2.f32 %v9209_v43  ;;  %v6256_v27 = vsel %vm16606_vm5, %v16536_v61, %v6251_v38  ;;  %v6301_v32 = vsel %vm16610_vm6, %v16566_v25, %v6296_v56  ;;  %v6331_v55 = vsel %vm16614_vm0, %v6330_v54, %v6326_v10  ;;  %21176 = vst [vmem:[#allocation157_spill] sm:$0xff] %v16745_v9 }
 0x5f0   : > { %vm6343_vm15 = vcmp.eq.f32.partialorder %v6342_v62, 8.507059e+37  ;;  %v16722_v8 = vpop.eup %10245  ;;  %v6312_v12 = vand.u32 2147483647, %v16525_v30  ;;  %v6314_v3 = vand.u32 2147483648, %v16525_v30  ;;  %v6394_v34 = vmul.f32 %v16702_v57, %v16572_v20 }
 0x5f1   : > { %v6346_v13 = vsel %vm6343_vm15, %v6345_v2, %v6341_v52  ;;  %v16733_v56 = vmul.f32 %v16576_v31, %v15163_v16  ;;  %v6306_v61 = vmul.f32 %v16602_v45, %v6305_v22  ;;  %v6350_v25 = vsub.f32 1.0, %v6349_v39 }
 0x5f2   : > { %v10248_v38 = vpop.eup %10247  ;;  %10255 = vpow2.f32 %v9212_v51  ;;  %v16737_v50 = vmul.f32 %v6271_v53, %v15250_v0  ;;  %v16740_v42 = vmul.f32 %v6286_v40, %v15252_v17  ;;  %v16743_v49 = vmul.f32 %v6256_v27, %v21085_v11  ;;  %v21186_v27 = vld [vmem:[#allocation70_spill] sm:$0xff] }
 0x5f3   : > { %21172 = vst [vmem:[#allocation153_spill] sm:$0xff] %v16733_v56  ;;  %v10250_v58 = vpop.eup %10249  ;;  %v6380_v54 = vsub.f32 1.0, %v6379_v6  ;;  %v16748_v16 = vmul.f32 %v6301_v32, %v21087_v26  ;;  %v16751_v31 = vmul.f32 %v6331_v55, %v21090_v18  ;;  %v16754_v15 = vmul.f32 %v6346_v13, %v21091_v48  ;;  %v9510_v55 = vld [vmem:[%s20376_s7 + $0xa0] sm:$0xff] }
 0x5f4   : > { %21173 = vst [vmem:[#allocation154_spill] sm:$0xff] %v16737_v50  ;;  %v10252_v41 = vpop.eup %10251  ;;  %vm6308_vm2 = vweird.f32 %v16525_v30  ;;  %vm16757_vm3 = vcmp.eq.f32.partialorder %v6312_v12, 8.507059e+37  ;;  %v6315_v11 = vor.u32 1.1754944e-38, %v6314_v3  ;;  %v6357_v53 = vand.u32 2147483647, %v16553_v7  ;;  %v9502_v30 = vld [vmem:[%s20376_s7 + $0x60] sm:$0xff]  ;;  %v16800_v13 = vpop.f32.mrf.mxu3  ;;  %4593 = vmatmul.bf16.gmra.mxu3 %v21167_v36  ;;  %8080 = vmatpush.bf16.msrb.mxu1 %v9510_v55 }
 0x5f5   : > { %21174 = vst [vmem:[#allocation155_spill] sm:$0xff] %v16740_v42  ;;  %v10254_v0 = vpop.eup %10253  ;;  %v6395_v29 = vsub.f32 1.0, %v6394_v34  ;;  %v16762_v43 = vadd.f32 1.0, %v10248_v38  ;;  %v6307_v26 = vadd.f32 %v16602_v45, %v6306_v61  ;;  %vm6309_vm7 = vweird.f32 %v16602_v45  ;;  %v21188_v34 = vld [vmem:[#allocation111_spill] sm:$0xff]  ;;  %7991 = vmatpush.bf16.msrb.mxu0 %v9502_v30 }
 0x5f6   : > { %21175 = vst [vmem:[#allocation156_spill] sm:$0xff] %v16743_v49  ;;  %v6351_v48 = vmul.f32 %v16660_v35, %v6350_v25  ;;  %v16767_v18 = vadd.f32 1.0, %v10250_v58  ;;  %vm6353_vm4 = vweird.f32 %v16553_v7  ;;  %v6359_v23 = vand.u32 2147483648, %v16553_v7  ;;  %vm16782_vm0 = vmor %vm6308_vm2, %vm6309_vm7  ;;  %v21300_v42 = vld [vmem:[#allocation67_spill] sm:$0xff] }
 0x5f7   : > { %21177 = vst [vmem:[#allocation158_spill] sm:$0xff] %v16748_v16  ;;  %v6381_v62 = vmul.f32 %v16678_v14, %v6380_v54  ;;  %v16772_v10 = vadd.f32 1.0, %v10252_v41  ;;  %vm6354_vm5 = vweird.f32 %v16660_v35  ;;  %vm6383_vm6 = vweird.f32 %v16562_v47  ;;  %v16884_v41 = vpop.f32.mrf.mxu0 }
 0x5f8   : > { %21178 = vst [vmem:[#allocation159_spill] sm:$0xff] %v16751_v31  ;;  %v10256_v52 = vpop.eup %10255  ;;  %v6364_v22 = vmul.f32 %v16722_v8, %v16618_v5  ;;  %v16778_v39 = vadd.f32 1.0, %v10254_v0  ;;  %vm16786_vm8 = vcmp.eq.f32.partialorder %v6357_v53, 8.507059e+37  ;;  %v6387_v2 = vand.u32 2147483647, %v16562_v47  ;;  %vm16821_vm12 = vmor %vm6353_vm4, %vm6354_vm5 }
 0x5f9   : > { %21179 = vst [vmem:[#allocation160_spill] sm:$0xff] %v16754_v15  ;;  %v6396_v6 = vmul.f32 %v16702_v57, %v6395_v29  ;;  %10257 = vrcp.f32 %v16762_v43  ;;  %v9214_v32 = vmul.f32 -1.442695, %v21186_v27  ;;  %v6311_v12 = vsel %vm16782_vm0, %v16602_v45, %v6307_v26  ;;  %v16828_v29 = vpop.f32.mrf.mxu2  ;;  %4860 = vmatmul.bf16.gmra.mxu2 %v21167_v36 }
 0x5fa   : > { %21187 = vst [vmem:[#allocation70_spill] sm:$0xff] %v16800_v13  ;;  %v6352_v3 = vadd.f32 %v16660_v35, %v6351_v48  ;;  %10259 = vrcp.f32 %v16767_v18  ;;  %v9215_v38 = vmul.f32 -1.442695, %v21188_v34  ;;  %v6382_v61 = vadd.f32 %v16678_v14, %v6381_v62 }
 0x5fb   : > { %vm6384_vm10 = vweird.f32 %v16678_v14  ;;  %10261 = vrcp.f32 %v16772_v10  ;;  %v16812_v25 = vadd.f32 1.0, %v10256_v52  ;;  %v6389_v58 = vand.u32 2147483648, %v16562_v47  ;;  %21191 = vst [vmem:[#allocation111_spill] sm:$0xff] %v16828_v29  ;;  %v21194_v47 = vld [vmem:[#allocation109_spill] sm:$0xff] }
 0x5fc   : > { %v6402_v45 = vand.u32 2147483647, %v16572_v20  ;;  %v6365_v54 = vsub.f32 1.0, %v6364_v22  ;;  %10263 = vrcp.f32 %v16778_v39  ;;  %v6397_v0 = vadd.f32 %v16702_v57, %v6396_v6  ;;  %vm16837_vm11 = vmor %vm6383_vm6, %vm6384_vm10  ;;  %v21197_v22 = vld [vmem:[#allocation68_spill] sm:$0xff] }
 0x5fd   : > { %vm6399_vm9 = vweird.f32 %v16702_v57  ;;  %v6404_v53 = vand.u32 2147483648, %v16572_v20  ;;  %10265 = vpow2.f32 %v9214_v32  ;;  %v6316_v26 = vsel %vm16757_vm3, %v6315_v11, %v6311_v12  ;;  %21199 = vst [vmem:[#allocation68_spill] sm:$0xff] %v16884_v41 }
 0x5fe   : > { %v6360_v48 = vor.u32 1.1754944e-38, %v6359_v23  ;;  %vm6398_vm1 = vweird.f32 %v16572_v20  ;;  %10267 = vpow2.f32 %v9215_v38  ;;  %v6356_v36 = vsel %vm16821_vm12, %v16660_v35, %v6352_v3 }
 0x5ff   : > { %v16842_v62 = vpop.eup %10257  ;;  %v6386_v17 = vsel %vm16837_vm11, %v16678_v14, %v6382_v61  ;;  %10269 = vrcp.f32 %v16812_v25  ;;  %v9213_v11 = vmul.f32 -1.442695, %v21194_v47  ;;  %vm6388_vm13 = vcmp.eq.f32.partialorder %v6387_v2, 8.507059e+37  ;;  %vm16856_vm14 = vmor %vm6398_vm1, %vm6399_vm9 }
 0x600   : > { %v16852_v23 = vpop.eup %10259  ;;  %v6390_v52 = vor.u32 1.1754944e-38, %v6389_v58  ;;  %v6366_v35 = vmul.f32 %v16722_v8, %v6365_v54  ;;  %v9216_v51 = vmul.f32 -1.442695, %v21197_v22  ;;  %v16865_v14 = vmul.f32 %v6316_v26, %v21121_v60 }
 0x601   : > { %v16862_v6 = vpop.eup %10261  ;;  %v6401_v2 = vsel %vm16856_vm14, %v16702_v57, %v6397_v0  ;;  %vm6403_vm15 = vcmp.eq.f32.partialorder %v6402_v45, 8.507059e+37  ;;  %v6405_v32 = vor.u32 1.1754944e-38, %v6404_v53  ;;  %v6361_v55 = vsel %vm16786_vm8, %v6360_v48, %v6356_v36 }
 0x602   : > { %21198 = vst [vmem:[#allocation109_spill] sm:$0xff] %v16865_v14  ;;  %v16870_v30 = vpop.eup %10263  ;;  %v6391_v12 = vsel %vm6388_vm13, %v6390_v52, %v6386_v17  ;;  %v6372_v3 = vand.u32 2147483647, %v16618_v5  ;;  %v6374_v38 = vand.u32 2147483648, %v16618_v5  ;;  %vm6369_vm2 = vweird.f32 %v16722_v8 }
 0x603   : > { %v10266_v61 = vpop.eup %10265  ;;  %v6409_v60 = vmul.f32 %v16842_v62, %v16762_v43  ;;  %v6439_v57 = vmul.f32 %v16852_v23, %v16767_v18  ;;  %10271 = vpow2.f32 %v9213_v11  ;;  %v6406_v45 = vsel %vm6403_vm15, %v6405_v32, %v6401_v2 }
 0x604   : > { %v10268_v58 = vpop.eup %10267  ;;  %v6367_v40 = vadd.f32 %v16722_v8, %v6366_v35  ;;  %v6454_v54 = vmul.f32 %v16862_v6, %v16772_v10  ;;  %10273 = vpow2.f32 %v9216_v51  ;;  %v16889_v53 = vmul.f32 %v6361_v55, %v21128_v4 }
 0x605   : > { %v16886_v0 = vpop.eup %10269  ;;  %vm6368_vm3 = vweird.f32 %v16618_v5  ;;  %v6419_v26 = vand.u32 2147483648, %v16762_v43  ;;  %v6424_v48 = vmul.f32 %v16870_v30, %v16778_v39  ;;  %v16896_v7 = vmul.f32 %v6391_v12, %v21129_v63 }
 0x606   : > { %21200 = vst [vmem:[#allocation161_spill] sm:$0xff] %v16889_v53  ;;  %vm16898_vm7 = vcmp.eq.f32.partialorder %v6372_v3, 8.507059e+37  ;;  %v6375_v17 = vor.u32 1.1754944e-38, %v6374_v38  ;;  %v16902_v11 = vadd.f32 1.0, %v10266_v61  ;;  %v16905_v4 = vmul.f32 %v6406_v45, %v21134_v59  ;;  %vm16909_vm4 = vmor %vm6368_vm3, %vm6369_vm2  ;;  %v21207_v59 = vld [vmem:[#allocation115_spill] sm:$0xff]  ;;  %v16925_v61 = vpop.f32.mrf.mxu1  ;;  %v21223_v53 = vld [vmem:[#allocation116_spill] sm:$0xff] }
 0x607   : > { %21201 = vst [vmem:[#allocation162_spill] sm:$0xff] %v16896_v7  ;;  %v6410_v52 = vsub.f32 1.0, %v6409_v60  ;;  %v6440_v20 = vsub.f32 1.0, %v6439_v57  ;;  %v16913_v63 = vadd.f32 1.0, %v10268_v58  ;;  %v6371_v35 = vsel %vm16909_vm4, %v16722_v8, %v6367_v40 }
 0x608   : > { %21204 = vst [vmem:[#allocation163_spill] sm:$0xff] %v16905_v4  ;;  %v6455_v51 = vsub.f32 1.0, %v6454_v54  ;;  %v6469_v2 = vmul.f32 %v16886_v0, %v16812_v25  ;;  %v9218_v32 = vmul.f32 -1.442695, %v21207_v59  ;;  %vm6413_vm5 = vweird.f32 %v16762_v43  ;;  %v21294_v4 = vld [vmem:[#allocation64_spill] sm:$0xff] }
 0x609   : > { %v10272_v55 = vpop.eup %10271  ;;  %v6417_v12 = vand.u32 2147483647, %v16762_v43  ;;  %v16923_v3 = vor.u32 1.1754944e-38, %v6419_v26  ;;  %v6425_v38 = vsub.f32 1.0, %v6424_v48  ;;  %21208 = vst [vmem:[#allocation115_spill] sm:$0xff] %v16925_v61  ;;  %vm6443_vm6 = vweird.f32 %v16767_v18  ;;  %v17071_v43 = vpop.f32.mrf.mxu2 }
 0x60a   : > { %v10274_v60 = vpop.eup %10273  ;;  %v6447_v8 = vand.u32 2147483647, %v16767_v18  ;;  %v6449_v57 = vand.u32 2147483648, %v16767_v18  ;;  %10275 = vrcp.f32 %v16902_v11  ;;  %v16933_v58 = vsel %vm16898_vm7, %v6375_v17, %v6371_v35 }
 0x60b   : > { %v6411_v45 = vmul.f32 %v16842_v62, %v6410_v52  ;;  %v6441_v40 = vmul.f32 %v16852_v23, %v6440_v20  ;;  %10277 = vrcp.f32 %v16913_v63  ;;  %v6456_v54 = vmul.f32 %v16862_v6, %v6455_v51  ;;  %v17065_v52 = vpop.f32.mrf.mxu3 }
 0x60c   : > { %v6470_v26 = vsub.f32 1.0, %v6469_v2  ;;  %v16939_v48 = vadd.f32 1.0, %v10272_v55  ;;  %10279 = vpow2.f32 %v9218_v32  ;;  %vm6458_vm0 = vweird.f32 %v16772_v10  ;;  %v16957_v32 = vpop.f32.mrf.mxu0  ;;  %v21214_v55 = vld [vmem:[#allocation59_spill] sm:$0xff]  ;;  %21233 = vst [vmem:[#allocation116_spill] sm:$0xff] %v17065_v52 }
 0x60d   : > { %v6462_v5 = vand.u32 2147483647, %v16772_v10  ;;  %v6426_v36 = vmul.f32 %v16870_v30, %v6425_v38  ;;  %v16944_v17 = vadd.f32 1.0, %v10274_v60  ;;  %vm6414_vm8 = vweird.f32 %v16842_v62  ;;  %21213 = vst [vmem:[#allocation164_spill] sm:$0xff] %v16957_v32  ;;  %4687 = vmatmul.bf16.gmra.mxu0 %v21214_v55 }
 0x60e   : > { %vm16947_vm10 = vcmp.eq.f32.partialorder %v6417_v12, 8.507059e+37  ;;  %vm16951_vm12 = vcmp.eq.f32.partialorder %v6447_v8, 8.507059e+37  ;;  %v6450_v35 = vor.u32 1.1754944e-38, %v6449_v57  ;;  %v6464_v51 = vand.u32 2147483648, %v16772_v10  ;;  %vm16976_vm13 = vmor %vm6413_vm5, %vm6414_vm8 }
 0x60f   : > { %v6432_v2 = vand.u32 2147483647, %v16778_v39  ;;  %v6412_v38 = vadd.f32 %v16842_v62, %v6411_v45  ;;  %v6442_v12 = vadd.f32 %v16852_v23, %v6441_v40  ;;  %vm6444_vm9 = vweird.f32 %v16852_v23 }
 0x610   : > { %vm6428_vm11 = vweird.f32 %v16778_v39  ;;  %v16964_v60 = vpop.eup %10275  ;;  %v6457_v8 = vadd.f32 %v16862_v6, %v6456_v54  ;;  %vm6459_vm1 = vweird.f32 %v16862_v6  ;;  %v6471_v57 = vmul.f32 %v16886_v0, %v6470_v26  ;;  %vm16986_vm15 = vmor %vm6443_vm6, %vm6444_vm9 }
 0x611   : > { %10281 = vrcp.f32 %v16939_v48  ;;  %v16970_v32 = vpop.eup %10277  ;;  %v6427_v40 = vadd.f32 %v16870_v30, %v6426_v36  ;;  %vm6429_vm14 = vweird.f32 %v16870_v30  ;;  %v6434_v54 = vand.u32 2147483648, %v16778_v39  ;;  %vm17009_vm7 = vmor %vm6458_vm0, %vm6459_vm1 }
 0x612   : > { %10283 = vrcp.f32 %v16944_v17  ;;  %v10280_v26 = vpop.eup %10279  ;;  %vm16990_vm2 = vcmp.eq.f32.partialorder %v6462_v5, 8.507059e+37  ;;  %v6465_v61 = vor.u32 1.1754944e-38, %v6464_v51  ;;  %vm16994_vm3 = vcmp.eq.f32.partialorder %v6432_v2, 8.507059e+37  ;;  %v17015_v2 = vpop.f32.mrf.mxu1  ;;  %4776 = vmatmul.bf16.gmra.mxu1 %v21214_v55  ;;  %vm17025_vm5 = vmor %vm6428_vm11, %vm6429_vm14 }
 0x613   : > { %v9219_v41 = vmul.f32 -1.442695, %v21223_v53  ;;  %v6416_v14 = vsel %vm16976_vm13, %v16842_v62, %v6412_v38  ;;  %v6446_v18 = vsel %vm16986_vm15, %v16852_v23, %v6442_v12  ;;  %vm6474_vm4 = vweird.f32 %v16886_v0  ;;  %21226 = vst [vmem:[#allocation59_spill] sm:$0xff] %v17015_v2  ;;  %v21229_v38 = vld [vmem:[#allocation112_spill] sm:$0xff]  ;;  %v21230_v2 = vld [vmem:[#allocation82_spill] sm:$0xff] }
 0x614   : > { %v6479_v51 = vand.u32 2147483648, %v16812_v25  ;;  %v6461_v15 = vsel %vm17009_vm7, %v16862_v6, %v6457_v8  ;;  %v6472_v62 = vadd.f32 %v16886_v0, %v6471_v57  ;;  %v6499_v23 = vmul.f32 %v16964_v60, %v16902_v11  ;;  %21234 = vst [vmem:[#allocation112_spill] sm:$0xff] %v17071_v43 }
 0x615   : > { %v9217_v12 = vmul.f32 -1.442695, %v21229_v38  ;;  %v6431_v45 = vsel %vm17025_vm5, %v16870_v30, %v6427_v40  ;;  %v6435_v6 = vor.u32 1.1754944e-38, %v6434_v54  ;;  %v6514_v8 = vmul.f32 %v16970_v32, %v16913_v63 }
 0x616   : > { %v17038_v39 = vadd.f32 1.0, %v10280_v26  ;;  %vm6473_vm6 = vweird.f32 %v16812_v25  ;;  %v6477_v57 = vand.u32 2147483647, %v16812_v25  ;;  %10285 = vpow2.f32 %v9219_v41 }
 0x617   : > { %v17040_v5 = vpop.eup %10281  ;;  %v9220_v29 = vmul.f32 -1.442695, %v21230_v2  ;;  %v6421_v30 = vsel %vm16947_vm10, %v16923_v3, %v6416_v14  ;;  %v6451_v40 = vsel %vm16951_vm12, %v6450_v35, %v6446_v18  ;;  %v6466_v54 = vsel %vm16990_vm2, %v6465_v61, %v6461_v15  ;;  %vm17056_vm0 = vmor %vm6473_vm6, %vm6474_vm4 }
 0x618   : > { %v17045_v13 = vpop.eup %10283  ;;  %v6480_v25 = vor.u32 1.1754944e-38, %v6479_v51  ;;  %v6436_v41 = vsel %vm16994_vm3, %v6435_v6, %v6431_v45  ;;  %v6476_v14 = vsel %vm17056_vm0, %v16886_v0, %v6472_v62  ;;  %v6500_v3 = vsub.f32 1.0, %v6499_v23 }
 0x619   : > { %10287 = vpow2.f32 %v9217_v12  ;;  %v6515_v20 = vsub.f32 1.0, %v6514_v8  ;;  %v6484_v61 = vmul.f32 %v17040_v5, %v16939_v48  ;;  %v9222_v35 = vmul.f32 -1.442695, %v15782_v46 }
 0x61a   : > { %10289 = vrcp.f32 %v17038_v39  ;;  %v17075_v36 = vmul.f32 %v16933_v58, %v21138_v44  ;;  %vm6478_vm8 = vcmp.eq.f32.partialorder %v6477_v57, 8.507059e+37  ;;  %v6529_v0 = vmul.f32 %v17045_v13, %v16944_v17 }
 0x61b   : > { %10291 = vpow2.f32 %v9220_v29  ;;  %v17080_v18 = vmul.f32 %v6421_v30, %v15444_v1  ;;  %v17083_v51 = vmul.f32 %v6451_v40, %v15529_v33  ;;  %v6481_v15 = vsel %vm6478_vm8, %v6480_v25, %v6476_v14  ;;  %v21245_v25 = vld [vmem:[#allocation89_spill] sm:$0xff] }
 0x61c   : > { %21235 = vst [vmem:[#allocation82_spill] sm:$0xff] %v17075_v36  ;;  %v6509_v10 = vand.u32 2147483648, %v16902_v11  ;;  %v10286_v62 = vpop.eup %10285  ;;  %v17087_v23 = vmul.f32 %v6466_v54, %v15531_v21  ;;  %v17090_v44 = vmul.f32 %v6436_v41, %v21165_v19  ;;  %v6507_v58 = vand.u32 2147483647, %v16902_v11  ;;  %v21293_v36 = vld [vmem:[#allocation123_spill] sm:$0xff] }
 0x61d   : > { %21236 = vst [vmem:[#allocation165_spill] sm:$0xff] %v17080_v18  ;;  %v6522_v29 = vand.u32 2147483647, %v16913_v63  ;;  %v6501_v1 = vmul.f32 %v16964_v60, %v6500_v3  ;;  %v6516_v12 = vmul.f32 %v16970_v32, %v6515_v20  ;;  %v6485_v33 = vsub.f32 1.0, %v6484_v61 }
 0x61e   : > { %21237 = vst [vmem:[#allocation166_spill] sm:$0xff] %v17083_v51  ;;  %10293 = vpow2.f32 %v9222_v35  ;;  %v17097_v6 = vmul.f32 %v6481_v15, %v15538_v28  ;;  %vm6503_vm10 = vweird.f32 %v16902_v11  ;;  %v6524_v21 = vand.u32 2147483648, %v16913_v63  ;;  %v21260_v11 = vld [vmem:[#allocation73_spill] sm:$0xff] }
 0x61f   : > { %21238 = vst [vmem:[#allocation167_spill] sm:$0xff] %v17087_v23  ;;  %v10288_v45 = vpop.eup %10287  ;;  %v6530_v19 = vsub.f32 1.0, %v6529_v0  ;;  %v6510_v57 = vor.u32 1.1754944e-38, %v6509_v10  ;;  %vm6518_vm12 = vweird.f32 %v16913_v63  ;;  %v6492_v30 = vand.u32 2147483647, %v16939_v48  ;;  %v17127_v10 = vpop.f32.mrf.mxu3  ;;  %4598 = vmatmul.bf16.gmra.mxu3 %v21214_v55 }
 0x620   : > { %21239 = vst [vmem:[#allocation168_spill] sm:$0xff] %v17090_v44  ;;  %v17101_v8 = vpop.eup %10289  ;;  %v17105_v40 = vadd.f32 1.0, %v10286_v62  ;;  %vm6504_vm9 = vweird.f32 %v16964_v60  ;;  %vm17108_vm11 = vcmp.eq.f32.partialorder %v6507_v58, 8.507059e+37  ;;  %vm6519_vm1 = vweird.f32 %v16970_v32  ;;  %v21259_v58 = vld [vmem:[#allocation71_spill] sm:$0xff] }
 0x621   : > { %21240 = vst [vmem:[#allocation169_spill] sm:$0xff] %v17097_v6  ;;  %v10292_v54 = vpop.eup %10291  ;;  %vm17113_vm13 = vcmp.eq.f32.partialorder %v6522_v29, 8.507059e+37  ;;  %v9223_v41 = vmul.f32 -1.442695, %v21245_v25  ;;  %v6502_v14 = vadd.f32 %v16964_v60, %v6501_v1  ;;  %v6517_v3 = vadd.f32 %v16970_v32, %v6516_v12  ;;  %vm17134_vm15 = vmor %vm6503_vm10, %vm6504_vm9  ;;  %v9509_v6 = vld [vmem:[%s20376_s7 + $0x98] sm:$0xff] }
 0x622   : > { %v6486_v20 = vmul.f32 %v17040_v5, %v6485_v33  ;;  %v17121_v61 = vadd.f32 1.0, %v10288_v45  ;;  %v6525_v35 = vor.u32 1.1754944e-38, %v6524_v21  ;;  %vm6488_vm14 = vweird.f32 %v16939_v48  ;;  %21246 = vst [vmem:[#allocation89_spill] sm:$0xff] %v17127_v10  ;;  %v17146_v33 = vpop.f32.mrf.mxu2  ;;  %4865 = vmatmul.bf16.gmra.mxu2 %v21214_v55  ;;  %vm17153_vm3 = vmor %vm6518_vm12, %vm6519_vm1  ;;  %v21254_v21 = vld [vmem:[#allocation117_spill] sm:$0xff]  ;;  %8081 = vmatpush.bf16.msrb.mxu1 %v9509_v6 }
 0x623   : > { %v6531_v0 = vmul.f32 %v17045_v13, %v6530_v19  ;;  %v6559_v15 = vmul.f32 %v17101_v8, %v17038_v39  ;;  %vm17138_vm2 = vcmp.eq.f32.partialorder %v6492_v30, 8.507059e+37  ;;  %v6494_v1 = vand.u32 2147483648, %v16939_v48  ;;  %21251 = vst [vmem:[#allocation170_spill] sm:$0xff] %v17146_v33 }
 0x624   : > { %v10294_v62 = vpop.eup %10293  ;;  %10295 = vrcp.f32 %v17105_v40  ;;  %v17144_v12 = vadd.f32 1.0, %v10292_v54  ;;  %vm6489_vm7 = vweird.f32 %v17040_v5  ;;  %v6537_v45 = vand.u32 2147483647, %v16944_v17 }
 0x625   : > { %10297 = vpow2.f32 %v9223_v41  ;;  %v9221_v19 = vmul.f32 -1.442695, %v21254_v21  ;;  %v6506_v30 = vsel %vm17134_vm15, %v16964_v60, %v6502_v14  ;;  %v6521_v55 = vsel %vm17153_vm3, %v16970_v32, %v6517_v3  ;;  %v4633_v14 = vpop.f32.mrf.mxu0  ;;  %v4722_v32 = vpop.f32.mrf.mxu1  ;;  %v9493_v3 = vld [vmem:[%s20376_s7 + $0x18] sm:$0xff]  ;;  %vm17188_vm6 = vmor %vm6488_vm14, %vm6489_vm7 }
 0x626   : > { %v6487_v63 = vadd.f32 %v17040_v5, %v6486_v20  ;;  %10299 = vrcp.f32 %v17121_v61  ;;  %v6532_v54 = vadd.f32 %v17045_v13, %v6531_v0  ;;  %vm6534_vm4 = vweird.f32 %v17045_v13  ;;  %v9517_v20 = vld [vmem:[%s20376_s7 + $0xd8] sm:$0xff]  ;;  %7903 = vmatpush.bf16.msrb.mxu3 %v9493_v3 }
 0x627   : > { %v6560_v33 = vsub.f32 1.0, %v6559_v15  ;;  %v17170_v41 = vadd.f32 1.0, %v10294_v62  ;;  %v6495_v23 = vor.u32 1.1754944e-38, %v6494_v1  ;;  %vm6533_vm5 = vweird.f32 %v16944_v17  ;;  %v9501_v0 = vld [vmem:[%s20376_s7 + $0x58] sm:$0xff]  ;;  %8170 = vmatpush.bf16.msrb.mxu2 %v9517_v20  ;;  %v21265_v15 = vld [vmem:[#allocation65_spill] sm:$0xff] }
 0x628   : > { %v6539_v60 = vand.u32 2147483648, %v16944_v17  ;;  %10301 = vrcp.f32 %v17144_v12  ;;  %vm17192_vm0 = vcmp.eq.f32.partialorder %v6537_v45, 8.507059e+37  ;;  %v17197_v1 = vmul.f32 %v21259_v58, %v4633_v14  ;;  %vm17218_vm8 = vmor %vm6533_vm5, %vm6534_vm4  ;;  %v21264_v17 = vld [vmem:[#allocation119_spill] sm:$0xff]  ;;  %7992 = vmatpush.bf16.msrb.mxu0 %v9501_v0 }
 0x629   : > { %10303 = vpow2.f32 %v9221_v19  ;;  %v17200_v10 = vmul.f32 %v21260_v11, %v4722_v32  ;;  %v6511_v44 = vsel %vm17108_vm11, %v6510_v57, %v6506_v30  ;;  %v6526_v45 = vsel %vm17113_vm13, %v6525_v35, %v6521_v55  ;;  %v21263_v32 = vld [vmem:[#allocation83_spill] sm:$0xff]  ;;  %v4544_v30 = vpop.f32.mrf.mxu3 }
 0x62a   : > { %v17205_v48 = vpop.eup %10295  ;;  %v6491_v19 = vsel %vm17188_vm6, %v17040_v5, %v6487_v63  ;;  %v9224_v58 = vmul.f32 -1.442695, %v21263_v32  ;;  %v9492_v57 = vld [vmem:[%s20376_s7 + $0x10] sm:$0xff]  ;;  %v6536_v5 = vsel %vm17218_vm8, %v17045_v13, %v6532_v54  ;;  %v6561_v26 = vmul.f32 %v17101_v8, %v6560_v33  ;;  %v4811_v13 = vpop.f32.mrf.mxu2 }
 0x62b   : > { %v10298_v28 = vpop.eup %10297  ;;  %10305 = vrcp.f32 %v17170_v41  ;;  %v9226_v35 = vmul.f32 -1.442695, %v21264_v17  ;;  %v6540_v63 = vor.u32 1.1754944e-38, %v6539_v60  ;;  %v6567_v3 = vand.u32 2147483647, %v17038_v39  ;;  %v21267_v0 = vld [vmem:[#allocation75_spill] sm:$0xff]  ;;  %7904 = vmatpush.bf16.msrb.mxu3 %v9492_v57 }
 0x62c   : > { %v17232_v55 = vpop.eup %10299  ;;  %v6569_v20 = vand.u32 2147483648, %v17038_v39  ;;  %v17237_v11 = vmul.f32 %v21265_v15, %v4544_v30  ;;  %v17240_v33 = vmul.f32 %v6511_v44, %v21186_v27  ;;  %v6496_v54 = vsel %vm17138_vm2, %v6495_v23, %v6491_v19  ;;  %v9516_v60 = vld [vmem:[%s20376_s7 + $0xd0] sm:$0xff] }
 0x62d   : > { %v6574_v6 = vmul.f32 %v17205_v48, %v17105_v40  ;;  %v17247_v14 = vmul.f32 %v21267_v0, %v4811_v13  ;;  %v17255_v30 = vmul.f32 %v6526_v45, %v21188_v34  ;;  %v6541_v27 = vsel %vm17192_vm0, %v6540_v63, %v6536_v5  ;;  %8171 = vmatpush.bf16.msrb.mxu2 %v9516_v60  ;;  %v4724_v57 = vpop.f32.mrf.mxu1 }
 0x62e   : > { %21266 = vst [vmem:[#allocation117_spill] sm:$0xff] %v17240_v33  ;;  %v17252_v43 = vpop.eup %10301  ;;  %v17259_v44 = vadd.f32 1.0, %v10298_v28  ;;  %10307 = vpow2.f32 %v9224_v58  ;;  %v6562_v29 = vadd.f32 %v17101_v8, %v6561_v26  ;;  %vm6564_vm10 = vweird.f32 %v17101_v8  ;;  %v4635_v58 = vpop.f32.mrf.mxu0  ;;  %v21272_v28 = vld [vmem:[#allocation15_spill] sm:$0xff] }
 0x62f   : > { %21268 = vst [vmem:[#allocation71_spill] sm:$0xff] %v17255_v30  ;;  %v10304_v23 = vpop.eup %10303  ;;  %v6544_v19 = vmul.f32 %v17232_v55, %v17121_v61  ;;  %10309 = vpow2.f32 %v9226_v35  ;;  %v17266_v34 = vmul.f32 %v6496_v54, %v21194_v47  ;;  %vm6563_vm12 = vweird.f32 %v17038_v39  ;;  %4692 = vmatmul.bf16.gmra.mxu0 %v21272_v28  ;;  %4781 = vmatmul.bf16.gmra.mxu1 %v21272_v28  ;;  %v21273_v47 = vld [vmem:[#allocation76_spill] sm:$0xff]  ;;  %v21274_v39 = vld [vmem:[#allocation77_spill] sm:$0xff] }
 0x630   : > { %vm17269_vm9 = vcmp.eq.f32.partialorder %v6567_v3, 8.507059e+37  ;;  %v6570_v45 = vor.u32 1.1754944e-38, %v6569_v20  ;;  %v6575_v26 = vsub.f32 1.0, %v6574_v6  ;;  %v6584_v35 = vand.u32 2147483648, %v17105_v40  ;;  %vm17289_vm11 = vmor %vm6563_vm12, %vm6564_vm10 }
 0x631   : > { %21269 = vst [vmem:[#allocation73_spill] sm:$0xff] %v17266_v34  ;;  %v17275_v5 = vpop.eup %10305  ;;  %v17279_v63 = vmul.f32 %v21273_v47, %v4635_v58  ;;  %v17282_v3 = vmul.f32 %v21274_v39, %v4724_v57  ;;  %v17285_v15 = vmul.f32 %v6541_v27, %v21197_v22  ;;  %v6589_v13 = vmul.f32 %v17252_v43, %v17144_v12  ;;  %v17303_v27 = vpop.f32.mrf.mxu3  ;;  %v9500_v58 = vld [vmem:[%s20376_s7 + $0x50] sm:$0xff] }
 0x632   : > { %10311 = vrcp.f32 %v17259_v44  ;;  %v17296_v54 = vadd.f32 1.0, %v10304_v23  ;;  %v6566_v6 = vsel %vm17289_vm11, %v17101_v8, %v6562_v29  ;;  %v6582_v22 = vand.u32 2147483647, %v17105_v40  ;;  %v9508_v23 = vld [vmem:[%s20376_s7 + $0x90] sm:$0xff]  ;;  %4603 = vmatmul.bf16.gmra.mxu3 %v21272_v28  ;;  %v17317_v39 = vpop.f32.mrf.mxu2  ;;  %4870 = vmatmul.bf16.gmra.mxu2 %v21272_v28 }
 0x633   : > { %21275 = vst [vmem:[#allocation83_spill] sm:$0xff] %v17285_v15  ;;  %v6545_v0 = vsub.f32 1.0, %v6544_v19  ;;  %v6554_v60 = vand.u32 2147483648, %v17121_v61  ;;  %vm6578_vm1 = vweird.f32 %v17105_v40  ;;  %v6552_v8 = vand.u32 2147483647, %v17121_v61  ;;  %v21278_v19 = vld [vmem:[#allocation120_spill] sm:$0xff]  ;;  %7993 = vmatpush.bf16.msrb.mxu0 %v9500_v58  ;;  %8082 = vmatpush.bf16.msrb.mxu1 %v9508_v23 }
 0x634   : > { %v10308_v57 = vpop.eup %10307  ;;  %v6619_v29 = vmul.f32 %v17275_v5, %v17170_v41  ;;  %v9227_v47 = vmul.f32 -1.442695, %v21278_v19  ;;  %v6576_v52 = vmul.f32 %v17205_v48, %v6575_v26  ;;  %v6585_v56 = vor.u32 1.1754944e-38, %v6584_v35 }
 0x635   : > { %v10310_v20 = vpop.eup %10309  ;;  %vm6548_vm13 = vweird.f32 %v17121_v61  ;;  %v6571_v34 = vsel %vm17269_vm9, %v6570_v45, %v6566_v6  ;;  %v6590_v9 = vsub.f32 1.0, %v6589_v13  ;;  %v6599_v28 = vand.u32 2147483648, %v17144_v12 }
 0x636   : > { %10313 = vrcp.f32 %v17296_v54  ;;  %vm17330_vm14 = vcmp.eq.f32.partialorder %v6582_v22, 8.507059e+37  ;;  %v6546_v35 = vmul.f32 %v17232_v55, %v6545_v0  ;;  %v17335_v24 = vor.u32 1.1754944e-38, %v6554_v60  ;;  %v4638_v6 = vpop.f32.mrf.mxu0  ;;  %v4727_v22 = vpop.f32.mrf.mxu1 }
 0x637   : > { %v6597_v15 = vand.u32 2147483647, %v17144_v12  ;;  %v17338_v58 = vadd.f32 1.0, %v10308_v57  ;;  %vm6593_vm15 = vweird.f32 %v17144_v12  ;;  %v6620_v62 = vsub.f32 1.0, %v6619_v29 }
 0x638   : > { %v17340_v23 = vpop.eup %10311  ;;  %v6627_v45 = vand.u32 2147483647, %v17170_v41  ;;  %v17344_v13 = vadd.f32 1.0, %v10310_v20  ;;  %10315 = vpow2.f32 %v9227_v47  ;;  %v17347_v0 = vmul.f32 %v6571_v34, %v21207_v59  ;;  %v21284_v47 = vld [vmem:[#allocation79_spill] sm:$0xff] }
 0x639   : > { %v6577_v60 = vadd.f32 %v17205_v48, %v6576_v52  ;;  %vm6579_vm2 = vweird.f32 %v17205_v48  ;;  %vm17351_vm3 = vcmp.eq.f32.partialorder %v6552_v8, 8.507059e+37  ;;  %v6629_v29 = vand.u32 2147483648, %v17170_v41  ;;  %v21285_v59 = vld [vmem:[#allocation35_spill] sm:$0xff] }
 0x63a   : > { %21281 = vst [vmem:[#allocation119_spill] sm:$0xff] %v17347_v0  ;;  %v6591_v37 = vmul.f32 %v17252_v43, %v6590_v9  ;;  %v17357_v20 = vor.u32 1.1754944e-38, %v6599_v28  ;;  %vm6623_vm7 = vweird.f32 %v17170_v41  ;;  %v17361_v30 = vmul.f32 %v21284_v47, %v4638_v6  ;;  %v4549_v9 = vpop.f32.mrf.mxu3  ;;  %vm17375_vm5 = vmor %vm6578_vm1, %vm6579_vm2  ;;  %v21291_v47 = vld [vmem:[#allocation90_spill] sm:$0xff]  ;;  %v21292_v0 = vld [vmem:[#allocation33_spill] sm:$0xff]  ;;  %v4816_v51 = vpop.f32.mrf.mxu2 }
 0x63b   : > { %v17364_v34 = vmul.f32 %v21285_v59, %v4727_v22  ;;  %v6547_v52 = vadd.f32 %v17232_v55, %v6546_v35  ;;  %vm6549_vm4 = vweird.f32 %v17232_v55  ;;  %v6634_v8 = vmul.f32 %v17340_v23, %v17259_v44 }
 0x63c   : > { %10317 = vrcp.f32 %v17338_v58  ;;  %v17371_v28 = vpop.eup %10313  ;;  %vm17379_vm6 = vcmp.eq.f32.partialorder %v6597_v15, 8.507059e+37  ;;  %v6621_v35 = vmul.f32 %v17275_v5, %v6620_v62  ;;  %v9225_v59 = vmul.f32 -1.442695, %v21291_v47  ;;  %vm17400_vm0 = vmor %vm6548_vm13, %vm6549_vm4 }
 0x63d   : > { %21286 = vst [vmem:[#allocation65_spill] sm:$0xff] %v17364_v34  ;;  %10319 = vrcp.f32 %v17344_v13  ;;  %v17387_v33 = vmul.f32 %v21292_v0, %v4549_v9  ;;  %v6581_v40 = vsel %vm17375_vm5, %v17205_v48, %v6577_v60  ;;  %v6630_v18 = vor.u32 1.1754944e-38, %v6629_v29 }
 0x63e   : > { %v9228_v15 = vmul.f32 -1.442695, %v21293_v36  ;;  %v17394_v7 = vmul.f32 %v21294_v4, %v4816_v51  ;;  %v10316_v31 = vpop.eup %10315  ;;  %v6592_v0 = vadd.f32 %v17252_v43, %v6591_v37  ;;  %vm6594_vm8 = vweird.f32 %v17252_v43  ;;  %v21299_v4 = vld [vmem:[#allocation127_spill] sm:$0xff]  ;;  %v4640_v16 = vpop.f32.mrf.mxu0 }
 0x63f   : > { %vm6624_vm10 = vweird.f32 %v17275_v5  ;;  %vm17407_vm12 = vcmp.eq.f32.partialorder %v6627_v45, 8.507059e+37  ;;  %v9230_v51 = vmul.f32 -1.442695, %v21299_v4  ;;  %v6551_v61 = vsel %vm17400_vm0, %v17232_v55, %v6547_v52  ;;  %v4729_v49 = vpop.f32.mrf.mxu1  ;;  %4697 = vmatmul.bf16.gmra.mxu0 %v21300_v42  ;;  %4786 = vmatmul.bf16.gmra.mxu1 %v21300_v42  ;;  %vm17430_vm9 = vmor %vm6593_vm15, %vm6594_vm8  ;;  %v21303_v52 = vld [vmem:[#allocation84_spill] sm:$0xff] }
 0x640   : > { %v6635_v60 = vsub.f32 1.0, %v6634_v8  ;;  %v6642_v29 = vand.u32 2147483647, %v17259_v44  ;;  %v6604_v37 = vmul.f32 %v17371_v28, %v17296_v54  ;;  %v6586_v9 = vsel %vm17330_vm14, %v6585_v56, %v6581_v40  ;;  %vm17456_vm1 = vmor %vm6623_vm7, %vm6624_vm10 }
 0x641   : > { %v6622_v45 = vadd.f32 %v17275_v5, %v6621_v35  ;;  %v6644_v6 = vand.u32 2147483648, %v17259_v44  ;;  %10321 = vpow2.f32 %v9225_v59  ;;  %vm6638_vm11 = vweird.f32 %v17259_v44  ;;  %v21304_v35 = vld [vmem:[#allocation13_spill] sm:$0xff] }
 0x642   : > { %v17424_v55 = vpop.eup %10317  ;;  %v17435_v56 = vadd.f32 1.0, %v10316_v31  ;;  %10323 = vpow2.f32 %v9228_v15  ;;  %v17438_v8 = vmul.f32 %v21303_v52, %v4640_v16  ;;  %v17441_v59 = vmul.f32 %v21304_v35, %v4729_v49  ;;  %v21306_v31 = vld [vmem:[#allocation128_spill] sm:$0xff]  ;;  %v17465_v57 = vpop.f32.mrf.mxu3  ;;  %4608 = vmatmul.bf16.gmra.mxu3 %v21300_v42 }
 0x643   : > { %v17443_v40 = vpop.eup %10319  ;;  %v6556_v12 = vsel %vm17351_vm3, %v17335_v24, %v6551_v61  ;;  %v6596_v62 = vsel %vm17430_vm9, %v17252_v43, %v6592_v0  ;;  %10325 = vpow2.f32 %v9230_v51  ;;  %v9231_v50 = vmul.f32 -1.442695, %v21306_v31  ;;  %v21319_v24 = vld [vmem:[#allocation19_spill] sm:$0xff] }
 0x644   : > { %21305 = vst [vmem:[#allocation75_spill] sm:$0xff] %v17441_v59  ;;  %v6636_v16 = vmul.f32 %v17340_v23, %v6635_v60  ;;  %v6605_v15 = vsub.f32 1.0, %v6604_v37  ;;  %v17469_v0 = vmul.f32 %v6586_v9, %v21223_v53  ;;  %v6626_v41 = vsel %vm17456_vm1, %v17275_v5, %v6622_v45  ;;  %v17476_v60 = vpop.f32.mrf.mxu2  ;;  %4875 = vmatmul.bf16.gmra.mxu2 %v21300_v42  ;;  %v21313_v42 = vld [vmem:[#allocation124_spill] sm:$0xff] }
 0x645   : > { %v6645_v51 = vor.u32 1.1754944e-38, %v6644_v6  ;;  %v6649_v61 = vmul.f32 %v17424_v55, %v17338_v58  ;;  %v6601_v37 = vsel %vm17379_vm6, %v17357_v20, %v6596_v62  ;;  %vm17482_vm13 = vcmp.eq.f32.partialorder %v6642_v29, 8.507059e+37 }
 0x646   : > { %21309 = vst [vmem:[#allocation15_spill] sm:$0xff] %v17469_v0  ;;  %v6612_v53 = vand.u32 2147483647, %v17296_v54  ;;  %v6679_v5 = vmul.f32 %v17443_v40, %v17344_v13  ;;  %10327 = vrcp.f32 %v17435_v56  ;;  %v17491_v45 = vmul.f32 %v6556_v12, %v21229_v38  ;;  %v4643_v49 = vpop.f32.mrf.mxu0 }
 0x647   : > { %v10322_v9 = vpop.eup %10321  ;;  %vm6639_vm14 = vweird.f32 %v17340_v23  ;;  %10329 = vpow2.f32 %v9231_v50  ;;  %v9229_v20 = vmul.f32 -1.442695, %v21313_v42  ;;  %v6631_v29 = vsel %vm17407_vm12, %v6630_v18, %v6626_v41  ;;  %v4732_v43 = vpop.f32.mrf.mxu1 }
 0x648   : > { %21312 = vst [vmem:[#allocation76_spill] sm:$0xff] %v17491_v45  ;;  %v10324_v22 = vpop.eup %10323  ;;  %v6637_v6 = vadd.f32 %v17340_v23, %v6636_v16  ;;  %v6606_v52 = vmul.f32 %v17371_v28, %v6605_v15  ;;  %vm6608_vm15 = vweird.f32 %v17296_v54  ;;  %v17501_v62 = vmul.f32 %v6601_v37, %v21230_v2  ;;  %v21317_v15 = vld [vmem:[#allocation16_spill] sm:$0xff]  ;;  %vm17527_vm3 = vmor %vm6638_vm11, %vm6639_vm14 }
 0x649   : > { %v10326_v35 = vpop.eup %10325  ;;  %v6614_v38 = vand.u32 2147483648, %v17296_v54  ;;  %v6650_v12 = vsub.f32 1.0, %v6649_v61  ;;  %v6659_v50 = vand.u32 2147483648, %v17338_v58  ;;  %vm17505_vm2 = vcmp.eq.f32.partialorder %v6612_v53, 8.507059e+37  ;;  %v9491_v61 = vld [vmem:[%s20376_s7 + $0x8] sm:$0xff] }
 0x64a   : > { %21314 = vst [vmem:[#allocation77_spill] sm:$0xff] %v17501_v62  ;;  %v6680_v18 = vsub.f32 1.0, %v6679_v5  ;;  %v17509_v16 = vadd.f32 1.0, %v10322_v9  ;;  %v17512_v41 = vmul.f32 %v21317_v15, %v4643_v49  ;;  %v17515_v2 = vmul.f32 %v21319_v24, %v4732_v43  ;;  %7905 = vmatpush.bf16.msrb.mxu3 %v9491_v61 }
 0x64b   : > { %v17521_v37 = vmul.f32 %v6631_v29, %v15782_v46  ;;  %v6657_v5 = vand.u32 2147483647, %v17338_v58  ;;  %v17532_v9 = vadd.f32 1.0, %v10324_v22  ;;  %10331 = vpow2.f32 %v9229_v20  ;;  %v4554_v29 = vpop.f32.mrf.mxu3  ;;  %v21324_v20 = vld [vmem:[#allocation93_spill] sm:$0xff] }
 0x64c   : > { %21318 = vst [vmem:[#allocation120_spill] sm:$0xff] %v17512_v41  ;;  %v17534_v24 = vpop.eup %10327  ;;  %v6641_v46 = vsel %vm17527_vm3, %v17340_v23, %v6637_v6  ;;  %v6607_v43 = vadd.f32 %v17371_v28, %v6606_v52  ;;  %vm6609_vm7 = vweird.f32 %v17371_v28  ;;  %v17541_v44 = vadd.f32 1.0, %v10326_v35  ;;  %v4821_v62 = vpop.f32.mrf.mxu2  ;;  %v21326_v6 = vld [vmem:[#allocation94_spill] sm:$0xff] }
 0x64d   : > { %21320 = vst [vmem:[#allocation79_spill] sm:$0xff] %v17515_v2  ;;  %v10330_v49 = vpop.eup %10329  ;;  %v6615_v15 = vor.u32 1.1754944e-38, %v6614_v38  ;;  %v6651_v22 = vmul.f32 %v17424_v55, %v6650_v12  ;;  %vm6653_vm4 = vweird.f32 %v17338_v58  ;;  %v17546_v0 = vmul.f32 %v21324_v20, %v4554_v29  ;;  %v9515_v35 = vld [vmem:[%s20376_s7 + $0xc8] sm:$0xff]  ;;  %vm17564_vm5 = vmor %vm6608_vm15, %vm6609_vm7  ;;  %v21332_v20 = vld [vmem:[#allocation72_spill] sm:$0xff] }
 0x64e   : > { %21321 = vst [vmem:[#allocation35_spill] sm:$0xff] %v17521_v37  ;;  %v17548_v53 = vor.u32 1.1754944e-38, %v6659_v50  ;;  %v6681_v23 = vmul.f32 %v17443_v40, %v6680_v18  ;;  %10333 = vrcp.f32 %v17509_v16  ;;  %v17553_v52 = vmul.f32 %v21326_v6, %v4821_v62  ;;  %8172 = vmatpush.bf16.msrb.mxu2 %v9515_v35  ;;  %v21334_v6 = vld [vmem:[#allocation95_spill] sm:$0xff]  ;;  %v9499_v58 = vld [vmem:[%s20376_s7 + $0x48] sm:$0xff] }
 0x64f   : > { %21325 = vst [vmem:[#allocation90_spill] sm:$0xff] %v17546_v0  ;;  %v6646_v38 = vsel %vm17482_vm13, %v6645_v51, %v6641_v46  ;;  %vm17568_vm6 = vcmp.eq.f32.partialorder %v6657_v5, 8.507059e+37  ;;  %vm6683_vm0 = vweird.f32 %v17344_v13  ;;  %v6694_v62 = vmul.f32 %v17534_v24, %v17435_v56  ;;  %v4645_v46 = vpop.f32.mrf.mxu0  ;;  %v4734_v29 = vpop.f32.mrf.mxu1  ;;  %4702 = vmatmul.bf16.gmra.mxu0 %v21332_v20  ;;  %4791 = vmatmul.bf16.gmra.mxu1 %v21332_v20 }
 0x650   : > { %21327 = vst [vmem:[#allocation33_spill] sm:$0xff] %v17553_v52  ;;  %10335 = vrcp.f32 %v17532_v9  ;;  %v6611_v51 = vsel %vm17564_vm5, %v17371_v28, %v6607_v43  ;;  %v6687_v54 = vand.u32 2147483647, %v17344_v13  ;;  %v17581_v26 = vadd.f32 1.0, %v10330_v49  ;;  %v21333_v43 = vld [vmem:[#allocation87_spill] sm:$0xff]  ;;  %7994 = vmatpush.bf16.msrb.mxu0 %v9499_v58 }
 0x651   : > { %10337 = vrcp.f32 %v17541_v44  ;;  %v10332_v18 = vpop.eup %10331  ;;  %v6652_v61 = vadd.f32 %v17424_v55, %v6651_v22  ;;  %vm6654_vm8 = vweird.f32 %v17424_v55  ;;  %vm6684_vm10 = vweird.f32 %v17443_v40  ;;  %v21336_v22 = vld [vmem:[#allocation98_spill] sm:$0xff] }
 0x652   : > { %v6689_v5 = vand.u32 2147483648, %v17344_v13  ;;  %v6682_v28 = vadd.f32 %v17443_v40, %v6681_v23  ;;  %v9232_v49 = vmul.f32 -1.442695, %v21333_v43  ;;  %v17592_v35 = vmul.f32 %v21334_v6, %v4645_v46  ;;  %vm17609_vm12 = vmor %vm6653_vm4, %vm6654_vm8  ;;  %v21353_v46 = vld [vmem:[#allocation24_spill] sm:$0xff] }
 0x653   : > { %v17595_v12 = vmul.f32 %v21336_v22, %v4734_v29  ;;  %v17598_v45 = vmul.f32 %v6646_v38, %v21245_v25  ;;  %v6616_v37 = vsel %vm17505_vm2, %v6615_v15, %v6611_v51  ;;  %v6695_v52 = vsub.f32 1.0, %v6694_v62  ;;  %v17620_v38 = vpop.f32.mrf.mxu3  ;;  %v9507_v62 = vld [vmem:[%s20376_s7 + $0x88] sm:$0xff]  ;;  %4613 = vmatmul.bf16.gmra.mxu3 %v21332_v20  ;;  %vm17638_vm9 = vmor %vm6683_vm0, %vm6684_vm10 }
 0x654   : > { %21335 = vst [vmem:[#allocation123_spill] sm:$0xff] %v17592_v35  ;;  %v6704_v0 = vand.u32 2147483648, %v17435_v56  ;;  %v17603_v34 = vpop.eup %10333  ;;  %10339 = vrcp.f32 %v17581_v26  ;;  %v17614_v25 = vadd.f32 1.0, %v10332_v18  ;;  %v6656_v18 = vsel %vm17609_vm12, %v17424_v55, %v6652_v61  ;;  %v21346_v22 = vld [vmem:[#allocation130_spill] sm:$0xff]  ;;  %v17647_v48 = vpop.f32.mrf.mxu2  ;;  %4880 = vmatmul.bf16.gmra.mxu2 %v21332_v20  ;;  %v21348_v61 = vld [vmem:[#allocation131_spill] sm:$0xff]  ;;  %8083 = vmatpush.bf16.msrb.mxu1 %v9507_v62  ;;  %v21352_v62 = vld [vmem:[#allocation129_spill] sm:$0xff] }
 0x655   : > { %21337 = vst [vmem:[#allocation64_spill] sm:$0xff] %v17595_v12  ;;  %vm17642_vm11 = vcmp.eq.f32.partialorder %v6687_v54, 8.507059e+37  ;;  %v6690_v6 = vor.u32 1.1754944e-38, %v6689_v5  ;;  %v9234_v15 = vmul.f32 -1.442695, %v21346_v22  ;;  %v6686_v13 = vsel %vm17638_vm9, %v17443_v40, %v6682_v28 }
 0x656   : > { %21338 = vst [vmem:[#allocation127_spill] sm:$0xff] %v17598_v45  ;;  %v17629_v51 = vpop.eup %10335  ;;  %vm6698_vm1 = vweird.f32 %v17435_v56  ;;  %v6702_v54 = vand.u32 2147483647, %v17435_v56  ;;  %10341 = vpow2.f32 %v9232_v49  ;;  %v9235_v23 = vmul.f32 -1.442695, %v21348_v61 }
 0x657   : > { %21341 = vst [vmem:[#allocation67_spill] sm:$0xff] %v17620_v38  ;;  %v17650_v55 = vpop.eup %10337  ;;  %v17659_v5 = vmul.f32 %v6616_v37, %v21254_v21  ;;  %vm6699_vm13 = vweird.f32 %v17534_v24  ;;  %v17662_v20 = vor.u32 1.1754944e-38, %v6704_v0  ;;  %v6674_v45 = vand.u32 2147483648, %v17509_v16  ;;  %v4648_v58 = vpop.f32.mrf.mxu0  ;;  %v21365_v38 = vld [vmem:[#allocation74_spill] sm:$0xff] }
 0x658   : > { %21347 = vst [vmem:[#allocation84_spill] sm:$0xff] %v17647_v48  ;;  %v6661_v40 = vsel %vm17568_vm6, %v17548_v53, %v6656_v18  ;;  %v6696_v28 = vmul.f32 %v17534_v24, %v6695_v52  ;;  %v6664_v49 = vmul.f32 %v17603_v34, %v17509_v16  ;;  %10343 = vrcp.f32 %v17614_v25  ;;  %v4737_v50 = vpop.f32.mrf.mxu1  ;;  %vm17720_vm3 = vmor %vm6698_vm1, %vm6699_vm13 }
 0x659   : > { %21349 = vst [vmem:[#allocation13_spill] sm:$0xff] %v17659_v5  ;;  %v6691_v21 = vsel %vm17642_vm11, %v6690_v6, %v6686_v13  ;;  %v6709_v0 = vmul.f32 %v17629_v51, %v17532_v9  ;;  %v6739_v37 = vmul.f32 %v17650_v55, %v17541_v44  ;;  %10345 = vpow2.f32 %v9234_v15  ;;  %v21354_v6 = vld [vmem:[#allocation106_spill] sm:$0xff] }
 0x65a   : > { %v17678_v53 = vpop.eup %10339  ;;  %vm17680_vm14 = vcmp.eq.f32.partialorder %v6702_v54, 8.507059e+37  ;;  %10347 = vpow2.f32 %v9235_v23  ;;  %v9233_v18 = vmul.f32 -1.442695, %v21352_v62  ;;  %v17686_v29 = vmul.f32 %v21353_v46, %v4648_v58  ;;  %v21357_v54 = vld [vmem:[#allocation133_spill] sm:$0xff] }
 0x65b   : > { %v17689_v13 = vmul.f32 %v21354_v6, %v4737_v50  ;;  %v17692_v61 = vmul.f32 %v6661_v40, %v21263_v32  ;;  %v6672_v15 = vand.u32 2147483647, %v17509_v16  ;;  %v17695_v5 = vor.u32 1.1754944e-38, %v6674_v45  ;;  %v4559_v50 = vpop.f32.mrf.mxu3  ;;  %v21359_v6 = vld [vmem:[#allocation107_spill] sm:$0xff] }
 0x65c   : > { %v9236_v2 = vmul.f32 -1.442695, %v21357_v54  ;;  %v10342_v12 = vpop.eup %10341  ;;  %v17699_v23 = vmul.f32 %v6691_v21, %v21264_v17  ;;  %v6697_v41 = vadd.f32 %v17534_v24, %v6696_v28  ;;  %v6665_v58 = vsub.f32 1.0, %v6664_v49  ;;  %v4826_v35 = vpop.f32.mrf.mxu2  ;;  %v21361_v28 = vld [vmem:[#allocation108_spill] sm:$0xff] }
 0x65d   : > { %21355 = vst [vmem:[#allocation128_spill] sm:$0xff] %v17689_v13  ;;  %v6719_v46 = vand.u32 2147483648, %v17532_v9  ;;  %vm6668_vm15 = vweird.f32 %v17509_v16  ;;  %v6710_v32 = vsub.f32 1.0, %v6709_v0  ;;  %v6740_v40 = vsub.f32 1.0, %v6739_v37 }
 0x65e   : > { %21356 = vst [vmem:[#allocation124_spill] sm:$0xff] %v17692_v61  ;;  %v6754_v45 = vmul.f32 %v17678_v53, %v17581_v26  ;;  %v17707_v61 = vmul.f32 %v21359_v6, %v4559_v50  ;;  %v17709_v48 = vpop.eup %10343  ;;  %vm6713_vm2 = vweird.f32 %v17532_v9  ;;  %v6717_v17 = vand.u32 2147483647, %v17532_v9  ;;  %v21390_v9 = vld [vmem:[#allocation134_spill] sm:$0xff] }
 0x65f   : > { %21358 = vst [vmem:[#allocation16_spill] sm:$0xff] %v17699_v23  ;;  %10349 = vpow2.f32 %v9233_v18  ;;  %v17714_v49 = vmul.f32 %v21361_v28, %v4826_v35  ;;  %v10346_v21 = vpop.eup %10345  ;;  %vm6743_vm7 = vweird.f32 %v17541_v44  ;;  %v6749_v37 = vand.u32 2147483648, %v17541_v44 }
 0x660   : > { %21360 = vst [vmem:[#allocation19_spill] sm:$0xff] %v17707_v61  ;;  %v17726_v50 = vadd.f32 1.0, %v10342_v12  ;;  %10351 = vpow2.f32 %v9236_v2  ;;  %v10348_v18 = vpop.eup %10347  ;;  %v6701_v35 = vsel %vm17720_vm3, %v17534_v24, %v6697_v41  ;;  %v6666_v6 = vmul.f32 %v17603_v34, %v6665_v58  ;;  %v4650_v61 = vpop.f32.mrf.mxu0  ;;  %4707 = vmatmul.bf16.gmra.mxu0 %v21365_v38 }
 0x661   : > { %21362 = vst [vmem:[#allocation93_spill] sm:$0xff] %v17714_v49  ;;  %vm6669_vm4 = vweird.f32 %v17603_v34  ;;  %v6747_v56 = vand.u32 2147483647, %v17541_v44  ;;  %v6711_v28 = vmul.f32 %v17629_v51, %v6710_v32  ;;  %v17735_v23 = vor.u32 1.1754944e-38, %v6719_v46  ;;  %v4739_v2 = vpop.f32.mrf.mxu1  ;;  %4796 = vmatmul.bf16.gmra.mxu1 %v21365_v38  ;;  %v21368_v46 = vld [vmem:[#allocation110_spill] sm:$0xff] }
 0x662   : > { %v6741_v49 = vmul.f32 %v17650_v55, %v6740_v40  ;;  %v6755_v12 = vsub.f32 1.0, %v6754_v45  ;;  %vm17740_vm5 = vcmp.eq.f32.partialorder %v6672_v15, 8.507059e+37  ;;  %v6724_v24 = vmul.f32 %v17709_v48, %v17614_v25  ;;  %v21369_v40 = vld [vmem:[#allocation27_spill] sm:$0xff]  ;;  %vm17791_vm12 = vmor %vm6668_vm15, %vm6669_vm4 }
 0x663   : > { %v17746_v58 = vadd.f32 1.0, %v10346_v21  ;;  %v17749_v32 = vmul.f32 %v21368_v46, %v4650_v61  ;;  %v17752_v45 = vmul.f32 %v21369_v40, %v4739_v2  ;;  %v6706_v0 = vsel %vm17680_vm14, %v17662_v20, %v6701_v35  ;;  %v21392_v61 = vld [vmem:[#allocation66_spill] sm:$0xff] }
 0x664   : > { %v6750_v54 = vor.u32 1.1754944e-38, %v6749_v37  ;;  %10353 = vrcp.f32 %v17726_v50  ;;  %v17758_v15 = vadd.f32 1.0, %v10348_v18  ;;  %v6667_v59 = vadd.f32 %v17603_v34, %v6666_v6  ;;  %v17774_v37 = vpop.f32.mrf.mxu3  ;;  %4618 = vmatmul.bf16.gmra.mxu3 %v21365_v38 }
 0x665   : > { %v10350_v62 = vpop.eup %10349  ;;  %vm6714_vm6 = vweird.f32 %v17629_v51  ;;  %vm17762_vm0 = vcmp.eq.f32.partialorder %v6717_v17, 8.507059e+37  ;;  %vm17766_vm8 = vcmp.eq.f32.partialorder %v6747_v56, 8.507059e+37  ;;  %v6712_v17 = vadd.f32 %v17629_v51, %v6711_v28  ;;  %v17781_v56 = vpop.f32.mrf.mxu2  ;;  %4885 = vmatmul.bf16.gmra.mxu2 %v21365_v38 }
 0x666   : > { %v10352_v18 = vpop.eup %10351  ;;  %v6742_v35 = vadd.f32 %v17650_v55, %v6741_v49  ;;  %vm6744_vm10 = vweird.f32 %v17650_v55  ;;  %v6762_v6 = vand.u32 2147483647, %v17581_v26  ;;  %v17785_v2 = vmul.f32 %v6706_v0, %v21278_v19  ;;  %vm17801_vm9 = vmor %vm6713_vm2, %vm6714_vm6 }
 0x667   : > { %v6756_v49 = vmul.f32 %v17678_v53, %v6755_v12  ;;  %v6725_v28 = vsub.f32 1.0, %v6724_v24  ;;  %10355 = vrcp.f32 %v17746_v58  ;;  %vm6758_vm11 = vweird.f32 %v17581_v26  ;;  %vm17817_vm1 = vmor %vm6743_vm7, %vm6744_vm10 }
 0x668   : > { %21374 = vst [vmem:[#allocation94_spill] sm:$0xff] %v17785_v2  ;;  %v6764_v16 = vand.u32 2147483648, %v17581_v26  ;;  %10357 = vrcp.f32 %v17758_v15  ;;  %v17808_v38 = vadd.f32 1.0, %v10350_v62  ;;  %v6671_v12 = vsel %vm17791_vm12, %v17603_v34, %v6667_v59  ;;  %v4653_v46 = vpop.f32.mrf.mxu0  ;;  %v21383_v2 = vld [vmem:[#allocation32_spill] sm:$0xff]  ;;  %v21393_v26 = vld [vmem:[#allocation118_spill] sm:$0xff] }
 0x669   : > { %v6732_v24 = vand.u32 2147483647, %v17614_v25  ;;  %v6734_v40 = vand.u32 2147483648, %v17614_v25  ;;  %v17823_v0 = vadd.f32 1.0, %v10352_v18  ;;  %v6716_v34 = vsel %vm17801_vm9, %v17629_v51, %v6712_v17  ;;  %v4742_v52 = vpop.f32.mrf.mxu1  ;;  %v21385_v51 = vld [vmem:[#allocation88_spill] sm:$0xff] }
 0x66a   : > { %v17825_v62 = vpop.eup %10353  ;;  %v6746_v59 = vsel %vm17817_vm1, %v17650_v55, %v6742_v35  ;;  %vm6759_vm13 = vweird.f32 %v17678_v53  ;;  %vm17834_vm14 = vcmp.eq.f32.partialorder %v6762_v6, 8.507059e+37  ;;  %v6757_v18 = vadd.f32 %v17678_v53, %v6756_v49  ;;  %v9490_v55 = vld [vmem:[%s20376_s7] sm:$0xff] }
 0x66b   : > { %v6726_v20 = vmul.f32 %v17709_v48, %v6725_v28  ;;  %v17841_v13 = vmul.f32 %v21383_v2, %v4653_v46  ;;  %v17844_v17 = vmul.f32 %v21385_v51, %v4742_v52  ;;  %v6676_v35 = vsel %vm17740_vm5, %v17695_v5, %v6671_v12  ;;  %7906 = vmatpush.bf16.msrb.mxu3 %v9490_v55  ;;  %vm17875_vm7 = vmor %vm6758_vm11, %vm6759_vm13  ;;  %v21395_v12 = vld [vmem:[#allocation135_spill] sm:$0xff] }
 0x66c   : > { %v6765_v6 = vor.u32 1.1754944e-38, %v6764_v16  ;;  %vm6728_vm15 = vweird.f32 %v17614_v25  ;;  %10359 = vrcp.f32 %v17808_v38  ;;  %vm6729_vm2 = vweird.f32 %v17709_v48  ;;  %v4564_v5 = vpop.f32.mrf.mxu3 }
 0x66d   : > { %21384 = vst [vmem:[#allocation72_spill] sm:$0xff] %v17841_v13  ;;  %v17854_v49 = vpop.eup %10355  ;;  %vm17857_vm3 = vcmp.eq.f32.partialorder %v6732_v24, 8.507059e+37  ;;  %v6735_v2 = vor.u32 1.1754944e-38, %v6734_v40  ;;  %v6769_v28 = vmul.f32 %v17825_v62, %v17726_v50  ;;  %10361 = vrcp.f32 %v17823_v0  ;;  %v21391_v40 = vld [vmem:[#allocation37_spill] sm:$0xff]  ;;  %v4831_v51 = vpop.f32.mrf.mxu2  ;;  %vm17920_vm4 = vmor %vm6728_vm15, %vm6729_vm2 }
 0x66e   : > { %v17864_v41 = vpop.eup %10357  ;;  %v6721_v19 = vsel %vm17762_vm0, %v17735_v23, %v6716_v34  ;;  %v6751_v16 = vsel %vm17766_vm8, %v6750_v54, %v6746_v59  ;;  %v9238_v24 = vmul.f32 -1.442695, %v21390_v9  ;;  %v17881_v46 = vmul.f32 %v21391_v40, %v4564_v5  ;;  %v9514_v59 = vld [vmem:[%s20376_s7 + $0xc0] sm:$0xff] }
 0x66f   : > { %v6761_v23 = vsel %vm17875_vm7, %v17678_v53, %v6757_v18  ;;  %v6727_v54 = vadd.f32 %v17709_v48, %v6726_v20  ;;  %v7455_v21 = vmul.f32 %v21392_v61, %v17303_v27  ;;  %v17890_v34 = vmul.f32 %v21393_v26, %v4831_v51  ;;  %v21396_v20 = vld [vmem:[#allocation78_spill] sm:$0xff]  ;;  %v21398_v61 = vld [vmem:[#allocation91_spill] sm:$0xff]  ;;  %8173 = vmatpush.bf16.msrb.mxu2 %v9514_v59 }
 0x670   : > { %v17896_v55 = vmul.f32 %v6676_v35, %v21291_v47  ;;  %v6799_v5 = vmul.f32 %v17854_v49, %v17746_v58  ;;  %v9239_v53 = vmul.f32 -1.442695, %v21395_v12  ;;  %v7458_v18 = vmul.f32 %v21396_v20, %v17317_v39  ;;  %v21402_v39 = vld [vmem:[#allocation136_spill] sm:$0xff] }
 0x671   : > { %v17904_v27 = vmul.f32 %v6721_v19, %v21293_v36  ;;  %v6770_v40 = vsub.f32 1.0, %v6769_v28  ;;  %v6814_v51 = vmul.f32 %v17864_v41, %v17758_v15  ;;  %v9237_v26 = vmul.f32 -1.442695, %v21398_v61  ;;  %v4655_v19 = vpop.f32.mrf.mxu0  ;;  %v17925_v59 = vpop.f32.mrf.mxu1 }
 0x672   : > { %21394 = vst [vmem:[#allocation87_spill] sm:$0xff] %v17896_v55  ;;  %v17909_v47 = vpop.eup %10359  ;;  %v17912_v35 = vmul.f32 %v6751_v16, %v21299_v4  ;;  %v6766_v55 = vsel %vm17834_vm14, %v6765_v6, %v6761_v23  ;;  %10363 = vpow2.f32 %v9238_v24  ;;  %v9240_v28 = vmul.f32 -1.442695, %v21402_v39  ;;  %v21403_v6 = vld [vmem:[#allocation121_spill] sm:$0xff] }
 0x673   : > { %21397 = vst [vmem:[#allocation95_spill] sm:$0xff] %v17904_v27  ;;  %v17927_v20 = vpop.eup %10361  ;;  %v6731_v4 = vsel %vm17920_vm4, %v17709_v48, %v6727_v54  ;;  %v6779_v44 = vand.u32 2147483648, %v17726_v50  ;;  %v7579_v25 = vpack.c.bf16 %v7455_v21, %v17237_v11  ;;  %v17935_v16 = vmul.f32 %v21403_v6, %v4655_v19  ;;  %v9498_v11 = vld [vmem:[%s20376_s7 + $0x40] sm:$0xff] }
 0x674   : > { %21399 = vst [vmem:[#allocation98_spill] sm:$0xff] %v17912_v35  ;;  %vm6773_vm5 = vweird.f32 %v17726_v50  ;;  %v6800_v24 = vsub.f32 1.0, %v6799_v5  ;;  %10365 = vpow2.f32 %v9239_v53  ;;  %v7582_v23 = vpack.c.bf16 %v7458_v18, %v17247_v14  ;;  %v17942_v54 = vpop.f32.mrf.mxu3  ;;  %v9506_v21 = vld [vmem:[%s20376_s7 + $0x80] sm:$0xff]  ;;  %7995 = vmatpush.bf16.msrb.mxu0 %v9498_v11 }
 0x675   : > { %v6771_v27 = vmul.f32 %v17825_v62, %v6770_v40  ;;  %v6815_v35 = vsub.f32 1.0, %v6814_v51  ;;  %10367 = vpow2.f32 %v9237_v26  ;;  %7907 = vmatmul.bf16.vlgmr.msrb.gmra.mxu3 %v7579_v25  ;;  %v6736_v14 = vsel %vm17857_vm3, %v6735_v2, %v6731_v4  ;;  %v17956_v18 = vpop.f32.mrf.mxu2  ;;  %8084 = vmatpush.bf16.msrb.mxu1 %v9506_v21  ;;  %v21405_v19 = vld [vmem:[#allocation92_spill] sm:$0xff]  ;;  %v21409_v6 = vld [vmem:[#allocation69_spill] sm:$0xff] }
 0x676   : > { %v6784_v5 = vmul.f32 %v17909_v47, %v17808_v38  ;;  %v6829_v53 = vmul.f32 %v17927_v20, %v17823_v0  ;;  %10369 = vpow2.f32 %v9240_v28  ;;  %8174 = vmatmul.bf16.vlgmr.msrb.gmra.mxu2 %v7582_v23  ;;  %v17959_v40 = vmul.f32 %v6766_v55, %v21306_v31 }
 0x677   : > { %v6777_v51 = vand.u32 2147483647, %v17726_v50  ;;  %v17962_v26 = vor.u32 1.1754944e-38, %v6779_v44  ;;  %v6809_v52 = vand.u32 2147483648, %v17746_v58  ;;  %v6801_v36 = vmul.f32 %v17854_v49, %v6800_v24 }
 0x678   : > { %21404 = vst [vmem:[#allocation130_spill] sm:$0xff] %v17959_v40  ;;  %v10364_v2 = vpop.eup %10363  ;;  %vm6803_vm6 = vweird.f32 %v17746_v58  ;;  %v9242_v4 = vmul.f32 -1.442695, %v21405_v19  ;;  %v17970_v31 = vmul.f32 %v6736_v14, %v21313_v42  ;;  %v17973_v55 = vadd.f32 %v17825_v62, %v6771_v27 }
 0x679   : > { %vm6774_vm0 = vweird.f32 %v17825_v62  ;;  %v6816_v44 = vmul.f32 %v17864_v41, %v6815_v35  ;;  %v6785_v23 = vsub.f32 1.0, %v6784_v5  ;;  %v6830_v11 = vsub.f32 1.0, %v6829_v53  ;;  %v4658_v21 = vpop.f32.mrf.mxu0  ;;  %v4747_v48 = vpop.f32.mrf.mxu1  ;;  %v21411_v5 = vld [vmem:[#allocation40_spill] sm:$0xff] }
 0x67a   : > { %21406 = vst [vmem:[#allocation24_spill] sm:$0xff] %v17970_v31  ;;  %v10366_v25 = vpop.eup %10365  ;;  %v21407_v42 = vpack.c.bf16 %v17279_v63, %v17197_v1  ;;  %v21408_v27 = vpack.c.bf16 %v17282_v3, %v17200_v10  ;;  %v17985_v28 = vor.u32 1.1754944e-38, %v6809_v52  ;;  %v17987_v35 = vadd.f32 1.0, %v10364_v2  ;;  %vm17999_vm8 = vmor %vm6773_vm5, %vm6774_vm0  ;;  %v21415_v63 = vld [vmem:[#allocation96_spill] sm:$0xff] }
 0x67b   : > { %v10368_v14 = vpop.eup %10367  ;;  %v17990_v31 = vmul.f32 %v21409_v6, %v4658_v21  ;;  %v17993_v53 = vmul.f32 %v21411_v5, %v4747_v48  ;;  %v18004_v10 = vadd.f32 %v17854_v49, %v6801_v36  ;;  %vm6804_vm10 = vweird.f32 %v17854_v49  ;;  %v21425_v5 = vld [vmem:[#allocation137_spill] sm:$0xff] }
 0x67c   : > { %7996 = vmatmul.bf16.vlgmr.msrb.gmra.mxu0 %v21407_v42  ;;  %8085 = vmatmul.bf16.vlgmr.msrb.gmra.mxu1 %v21408_v27  ;;  %v10370_v24 = vpop.eup %10369  ;;  %10371 = vpow2.f32 %v9242_v4  ;;  %v9243_v3 = vmul.f32 -1.442695, %v21415_v63  ;;  %v6776_v48 = vsel %vm17999_vm8, %v17825_v62, %v17973_v55  ;;  %v18013_v52 = vadd.f32 %v17864_v41, %v6816_v44  ;;  %v4569_v2 = vpop.f32.mrf.mxu3  ;;  %v21418_v42 = vld [vmem:[#allocation132_spill] sm:$0xff]  ;;  %vm18031_vm11 = vmor %vm6803_vm6, %vm6804_vm10  ;;  %v21428_v44 = vld [vmem:[#allocation138_spill] sm:$0xff] }
 0x67d   : > { %21410 = vst [vmem:[#allocation106_spill] sm:$0xff] %v17990_v31  ;;  %vm6819_vm12 = vweird.f32 %v17864_v41  ;;  %v18016_v50 = vadd.f32 1.0, %v10366_v25  ;;  %vm18018_vm9 = vcmp.eq.f32.partialorder %v6777_v51, 8.507059e+37  ;;  %v6786_v4 = vmul.f32 %v17909_v47, %v6785_v23  ;;  %v4836_v55 = vpop.f32.mrf.mxu2  ;;  %v21422_v25 = vld [vmem:[#allocation85_spill] sm:$0xff] }
 0x67e   : > { %21412 = vst [vmem:[#allocation107_spill] sm:$0xff] %v17993_v53  ;;  %v6831_v6 = vmul.f32 %v17927_v20, %v6830_v11  ;;  %v18024_v21 = vadd.f32 1.0, %v10368_v14  ;;  %v18027_v62 = vmul.f32 %v21418_v42, %v4569_v2  ;;  %vm6818_vm1 = vweird.f32 %v17758_v15  ;;  %v21423_v11 = vld [vmem:[#allocation44_spill] sm:$0xff]  ;;  %v21426_v2 = vld [vmem:[#allocation86_spill] sm:$0xff] }
 0x67f   : > { %10373 = vrcp.f32 %v17987_v35  ;;  %v18037_v51 = vadd.f32 1.0, %v10370_v24  ;;  %v7463_v23 = vmul.f32 %v21422_v25, %v17465_v57  ;;  %v18042_v27 = vmul.f32 %v21423_v11, %v4836_v55  ;;  %vm18122_vm6 = vmor %vm6818_vm1, %vm6819_vm12 }
 0x680   : > { %21419 = vst [vmem:[#allocation108_spill] sm:$0xff] %v18027_v62  ;;  %v6806_v14 = vsel %vm18031_vm11, %v17854_v49, %v18004_v10  ;;  %10375 = vpow2.f32 %v9243_v3  ;;  %v9241_v1 = vmul.f32 -1.442695, %v21425_v5  ;;  %v7466_v42 = vmul.f32 %v21426_v2, %v17476_v60  ;;  %v21430_v2 = vld [vmem:[#allocation142_spill] sm:$0xff] }
 0x681   : > { %21424 = vst [vmem:[#allocation74_spill] sm:$0xff] %v18042_v27  ;;  %vm6788_vm13 = vweird.f32 %v17808_v38  ;;  %v6792_v24 = vand.u32 2147483647, %v17808_v38  ;;  %v6794_v57 = vand.u32 2147483648, %v17808_v38  ;;  %10377 = vrcp.f32 %v18016_v50  ;;  %v4660_v49 = vpop.f32.mrf.mxu0  ;;  %v18059_v10 = vpop.f32.mrf.mxu1 }
 0x682   : > { %v10372_v55 = vpop.eup %10371  ;;  %v6787_v25 = vadd.f32 %v17909_v47, %v6786_v4  ;;  %vm6789_vm14 = vweird.f32 %v17909_v47  ;;  %vm6834_vm15 = vweird.f32 %v17927_v20  ;;  %10379 = vrcp.f32 %v18024_v21  ;;  %21427 = vst [vmem:[#allocation110_spill] sm:$0xff] %v18059_v10 }
 0x683   : > { %v6832_v60 = vadd.f32 %v17927_v20, %v6831_v6  ;;  %10381 = vrcp.f32 %v18037_v51  ;;  %v7583_v3 = vpack.c.bf16 %v7463_v23, %v17387_v33  ;;  %v18065_v11 = vmul.f32 %v21428_v44, %v4660_v49  ;;  %vm18074_vm2 = vmor %vm6788_vm13, %vm6789_vm14 }
 0x684   : > { %v6839_v4 = vand.u32 2147483648, %v17823_v0  ;;  %10383 = vpow2.f32 %v9241_v1  ;;  %v9244_v40 = vmul.f32 -1.442695, %v21430_v2  ;;  %v7586_v53 = vpack.c.bf16 %v7466_v42, %v17394_v7  ;;  %v18084_v49 = vpop.f32.mrf.mxu3 }
 0x685   : > { %21429 = vst [vmem:[#allocation27_spill] sm:$0xff] %v18065_v11  ;;  %v18070_v27 = vpop.eup %10373  ;;  %vm6833_vm3 = vweird.f32 %v17823_v0  ;;  %v6837_v33 = vand.u32 2147483647, %v17823_v0  ;;  %v18080_v23 = vadd.f32 1.0, %v10372_v55  ;;  %7912 = vmatmul.bf16.gmra.mxu3 %v7583_v3  ;;  %v21434_v42 = vand.u32 2147483647, %v17746_v58  ;;  %v18105_v58 = vpop.f32.mrf.mxu2 }
 0x686   : > { %21433 = vst [vmem:[#allocation32_spill] sm:$0xff] %v18084_v49  ;;  %v10376_v7 = vpop.eup %10375  ;;  %v21435_v38 = vand.u32 2147483647, %v17758_v15  ;;  %v21438_v0 = vand.u32 2147483648, %v17758_v15  ;;  %v6791_v1 = vsel %vm18074_vm2, %v17909_v47, %v6787_v25  ;;  %vm18101_vm5 = vmor %vm6833_vm3, %vm6834_vm15  ;;  %8179 = vmatmul.bf16.gmra.mxu2 %v7586_v53  ;;  %v6795_v31 = vor.u32 1.1754944e-38, %v6794_v57  ;;  %v21452_v3 = vld [vmem:[#allocation104_spill] sm:$0xff] }
 0x687   : > { %vm6808_vm7 = vcmp.eq.f32.partialorder %v21434_v42, 8.507059e+37  ;;  %21441 = vst [vmem:[#allocation88_spill] sm:$0xff] %v18105_v58  ;;  %v18107_v42 = vpop.eup %10377  ;;  %v6836_v47 = vsel %vm18101_vm5, %v17927_v20, %v6832_v60  ;;  %vm6793_vm0 = vcmp.eq.f32.partialorder %v6792_v24, 8.507059e+37  ;;  %v6840_v36 = vor.u32 1.1754944e-38, %v6839_v4  ;;  %v21457_v53 = vld [vmem:[#allocation133_spill] sm:$0xff]  ;;  %v21473_v11 = vld [vmem:[#allocation148_spill] sm:$0xff] }
 0x688   : > { %vm18090_vm4 = vcmp.eq.f32.partialorder %v21435_v38, 8.507059e+37  ;;  %v6825_v55 = vor.u32 1.1754944e-38, %v21438_v0  ;;  %v6781_v38 = vsel %vm18018_vm9, %v17962_v26, %v6776_v48  ;;  %v6811_v0 = vsel %vm6808_vm7, %v17985_v28, %v6806_v14  ;;  %v18116_v25 = vpop.eup %10379 }
 0x689   : > { %v6859_v26 = vmul.f32 %v18070_v27, %v17987_v35  ;;  %10385 = vpow2.f32 %v9244_v40  ;;  %v18128_v28 = vpop.eup %10381  ;;  %v6821_v20 = vsel %vm18122_vm6, %v17864_v41, %v18013_v52  ;;  %v6796_v48 = vsel %vm6793_vm0, %v6795_v31, %v6791_v1  ;;  %v4663_v60 = vpop.f32.mrf.mxu0  ;;  %v21447_v41 = vld [vmem:[#allocation75_spill] sm:$0xff]  ;;  %v21448_v31 = vld [vmem:[#allocation65_spill] sm:$0xff]  ;;  %v21450_v1 = vld [vmem:[#allocation144_spill] sm:$0xff] }
 0x68a   : > { %vm6838_vm8 = vcmp.eq.f32.partialorder %v6837_v33, 8.507059e+37  ;;  %10387 = vrcp.f32 %v18080_v23  ;;  %v10384_v15 = vpop.eup %10383  ;;  %v18136_v14 = vmul.f32 %v6781_v38, %v21333_v43  ;;  %v18139_v24 = vmul.f32 %v6811_v0, %v21346_v22  ;;  %v4752_v4 = vpop.f32.mrf.mxu1 }
 0x68b   : > { %v6841_v57 = vsel %vm6838_vm8, %v6840_v36, %v6836_v47  ;;  %v18141_v40 = vadd.f32 1.0, %v10376_v7  ;;  %v21446_v6 = vpack.c.bf16 %v17438_v8, %v17361_v30  ;;  %v21449_v52 = vpack.c.bf16 %v21447_v41, %v21448_v31  ;;  %v21455_v30 = vld [vmem:[#allocation129_spill] sm:$0xff] }
 0x68c   : > { %21444 = vst [vmem:[#allocation134_spill] sm:$0xff] %v18136_v14  ;;  %v6869_v33 = vand.u32 2147483648, %v17987_v35  ;;  %v6884_v43 = vand.u32 2147483648, %v18016_v50  ;;  %v18152_v22 = vmul.f32 %v21450_v1, %v4663_v60  ;;  %v18155_v7 = vmul.f32 %v21452_v3, %v4752_v4  ;;  %v4574_v44 = vpop.f32.mrf.mxu3  ;;  %v21461_v1 = vld [vmem:[#allocation67_spill] sm:$0xff] }
 0x68d   : > { %21445 = vst [vmem:[#allocation37_spill] sm:$0xff] %v18139_v24  ;;  %8001 = vmatmul.bf16.gmra.mxu0 %v21446_v6  ;;  %8090 = vmatmul.bf16.gmra.mxu1 %v21449_v52  ;;  %v18159_v38 = vsel %vm18090_vm4, %v6825_v55, %v6821_v20  ;;  %v18162_v8 = vmul.f32 %v6796_v48, %v21455_v30  ;;  %v6860_v0 = vsub.f32 1.0, %v6859_v26  ;;  %v18173_v6 = vadd.f32 1.0, %v10384_v15  ;;  %v21459_v48 = vld [vmem:[#allocation81_spill] sm:$0xff]  ;;  %v21462_v3 = vld [vmem:[#allocation99_spill] sm:$0xff]  ;;  %v21466_v24 = vld [vmem:[#allocation100_spill] sm:$0xff] }
 0x68e   : > { %21451 = vst [vmem:[#allocation66_spill] sm:$0xff] %v18152_v22  ;;  %v6874_v47 = vmul.f32 %v18107_v42, %v18016_v50  ;;  %v18167_v36 = vmul.f32 %v6841_v57, %v21457_v53  ;;  %v6844_v60 = vmul.f32 %v18116_v25, %v18024_v21  ;;  %v6889_v4 = vmul.f32 %v18128_v28, %v18037_v51  ;;  %v4841_v57 = vpop.f32.mrf.mxu2  ;;  %v21463_v53 = vld [vmem:[#allocation147_spill] sm:$0xff] }
 0x68f   : > { %21453 = vst [vmem:[#allocation118_spill] sm:$0xff] %v18155_v7  ;;  %v10386_v55 = vpop.eup %10385  ;;  %v6867_v20 = vand.u32 2147483647, %v17987_v35  ;;  %v6882_v26 = vand.u32 2147483647, %v18016_v50  ;;  %10389 = vrcp.f32 %v18141_v40  ;;  %v18179_v41 = vmul.f32 %v21459_v48, %v4574_v44  ;;  %v21465_v48 = vld [vmem:[#allocation84_spill] sm:$0xff] }
 0x690   : > { %21454 = vst [vmem:[#allocation135_spill] sm:$0xff] %v18159_v38  ;;  %v18181_v31 = vpop.eup %10387  ;;  %vm6863_vm10 = vweird.f32 %v17987_v35  ;;  %v18184_v52 = vor.u32 1.1754944e-38, %v6869_v33  ;;  %v18186_v15 = vor.u32 1.1754944e-38, %v6884_v43  ;;  %v7471_v30 = vmul.f32 %v21462_v3, %v21461_v1  ;;  %v21467_v1 = vld [vmem:[#allocation103_spill] sm:$0xff] }
 0x691   : > { %21456 = vst [vmem:[#allocation78_spill] sm:$0xff] %v18162_v8  ;;  %v18191_v38 = vmul.f32 %v21463_v53, %v4841_v57  ;;  %v6875_v8 = vsub.f32 1.0, %v6874_v47  ;;  %v6852_v44 = vand.u32 2147483647, %v18024_v21  ;;  %v7474_v14 = vmul.f32 %v21466_v24, %v21465_v48  ;;  %v4665_v24 = vpop.f32.mrf.mxu0 }
 0x692   : > { %21458 = vst [vmem:[#allocation91_spill] sm:$0xff] %v18167_v36  ;;  %v6861_v36 = vmul.f32 %v18070_v27, %v6860_v0  ;;  %vm6878_vm12 = vweird.f32 %v18016_v50  ;;  %v6845_v33 = vsub.f32 1.0, %v6844_v60  ;;  %v6890_v7 = vsub.f32 1.0, %v6889_v4  ;;  %v18207_v53 = vpop.f32.mrf.mxu1  ;;  %v21492_v50 = vld [vmem:[#allocation64_spill] sm:$0xff] }
 0x693   : > { %21460 = vst [vmem:[#allocation136_spill] sm:$0xff] %v18179_v41  ;;  %10391 = vrcp.f32 %v18173_v6  ;;  %v18199_v43 = vadd.f32 1.0, %v10386_v55  ;;  %vm6848_vm9 = vweird.f32 %v18024_v21  ;;  %v6854_v57 = vand.u32 2147483648, %v18024_v21  ;;  %v21471_v55 = vld [vmem:[#allocation143_spill] sm:$0xff] }
 0x694   : > { %21464 = vst [vmem:[#allocation121_spill] sm:$0xff] %v18191_v38  ;;  %v6897_v0 = vand.u32 2147483647, %v18037_v51  ;;  %v6919_v47 = vmul.f32 %v18181_v31, %v18080_v23  ;;  %v9246_v3 = vmul.f32 -1.442695, %v21467_v1  ;;  %vm18209_vm11 = vcmp.eq.f32.partialorder %v6867_v20, 8.507059e+37 }
 0x695   : > { %21468 = vst [vmem:[#allocation92_spill] sm:$0xff] %v18207_v53  ;;  %vm6893_vm1 = vweird.f32 %v18037_v51  ;;  %v6899_v4 = vand.u32 2147483648, %v18037_v51  ;;  %v9247_v48 = vmul.f32 -1.442695, %v21471_v55  ;;  %v21472_v38 = vld [vmem:[#allocation90_spill] sm:$0xff]  ;;  %v18218_v10 = vmul.f32 %v21473_v11, %v4665_v24  ;;  %v18220_v62 = vpop.eup %10389  ;;  %v21475_v53 = vld [vmem:[#allocation33_spill] sm:$0xff] }
 0x696   : > { %v7587_v41 = vpack.c.bf16 %v7471_v30, %v21472_v38  ;;  %v6862_v1 = vadd.f32 %v18070_v27, %v6861_v36  ;;  %vm6864_vm13 = vweird.f32 %v18070_v27  ;;  %v6876_v20 = vmul.f32 %v18107_v42, %v6875_v8  ;;  %v18231_v38 = vpop.f32.mrf.mxu3  ;;  %v18236_v8 = vpop.f32.mrf.mxu2  ;;  %v21490_v11 = vld [vmem:[#allocation120_spill] sm:$0xff] }
 0x697   : > { %21474 = vst [vmem:[#allocation69_spill] sm:$0xff] %v18218_v10  ;;  %v7590_v58 = vpack.c.bf16 %v7474_v14, %v21475_v53  ;;  %v6846_v49 = vmul.f32 %v18116_v25, %v6845_v33  ;;  %v6891_v13 = vmul.f32 %v18128_v28, %v6890_v7  ;;  %10393 = vrcp.f32 %v18199_v43  ;;  %v21478_v33 = vld [vmem:[#allocation102_spill] sm:$0xff]  ;;  %vm18248_vm15 = vmor %vm6863_vm10, %vm6864_vm13  ;;  %v21493_v10 = vld [vmem:[#allocation79_spill] sm:$0xff] }
 0x698   : > { %21476 = vst [vmem:[#allocation40_spill] sm:$0xff] %v18231_v38  ;;  %7917 = vmatmul.bf16.gmra.mxu3 %v7587_v41  ;;  %v18233_v30 = vor.u32 1.1754944e-38, %v6854_v57  ;;  %v6920_v36 = vsub.f32 1.0, %v6919_v47  ;;  %v6929_v24 = vand.u32 2147483648, %v18080_v23  ;;  %10395 = vpow2.f32 %v9246_v3  ;;  %v21489_v41 = vld [vmem:[#allocation123_spill] sm:$0xff] }
 0x699   : > { %21477 = vst [vmem:[#allocation96_spill] sm:$0xff] %v18236_v8  ;;  %8184 = vmatmul.bf16.gmra.mxu2 %v7590_v58  ;;  %v18238_v14 = vpop.eup %10391  ;;  %vm6879_vm14 = vweird.f32 %v18107_v42  ;;  %v6934_v7 = vmul.f32 %v18220_v62, %v18141_v40  ;;  %10397 = vpow2.f32 %v9247_v48  ;;  %v9245_v53 = vmul.f32 -1.442695, %v21478_v33  ;;  %v21497_v33 = vld [vmem:[#allocation154_spill] sm:$0xff]  ;;  %v21513_v47 = vld [vmem:[#allocation19_spill] sm:$0xff] }
 0x69a   : > { %v6877_v58 = vadd.f32 %v18107_v42, %v6876_v20  ;;  %vm18253_vm2 = vcmp.eq.f32.partialorder %v6882_v26, 8.507059e+37  ;;  %vm6849_vm3 = vweird.f32 %v18116_v25  ;;  %vm18258_vm7 = vcmp.eq.f32.partialorder %v6852_v44, 8.507059e+37  ;;  %vm18277_vm0 = vmor %vm6878_vm12, %vm6879_vm14 }
 0x69b   : > { %v6900_v3 = vor.u32 1.1754944e-38, %v6899_v4  ;;  %vm6923_vm4 = vweird.f32 %v18080_v23  ;;  %v6866_v35 = vsel %vm18248_vm15, %v18070_v27, %v6862_v1  ;;  %v6847_v48 = vadd.f32 %v18116_v25, %v6846_v49  ;;  %v4757_v4 = vpop.f32.mrf.mxu1  ;;  %vm18299_vm8 = vmor %vm6848_vm9, %vm6849_vm3 }
 0x69c   : > { %v6892_v26 = vadd.f32 %v18128_v28, %v6891_v13  ;;  %vm6894_vm5 = vweird.f32 %v18128_v28  ;;  %vm18269_vm6 = vcmp.eq.f32.partialorder %v6897_v0, 8.507059e+37  ;;  %v6921_v27 = vmul.f32 %v18181_v31, %v6920_v36  ;;  %v4668_v0 = vpop.f32.mrf.mxu0 }
 0x69d   : > { %v6927_v49 = vand.u32 2147483647, %v18080_v23  ;;  %v18283_v1 = vor.u32 1.1754944e-38, %v6929_v24  ;;  %v6904_v13 = vmul.f32 %v18238_v14, %v18173_v6  ;;  %v21491_v22 = vpack.c.bf16 %v21489_v41, %v21490_v11  ;;  %v18293_v38 = vpop.eup %10393  ;;  %vm18319_vm10 = vmor %vm6893_vm1, %vm6894_vm5  ;;  %v21505_v41 = vld [vmem:[#allocation51_spill] sm:$0xff] }
 0x69e   : > { %v21494_v8 = vpack.c.bf16 %v21492_v50, %v21493_v10  ;;  %v6935_v24 = vsub.f32 1.0, %v6934_v7  ;;  %10399 = vpow2.f32 %v9245_v53  ;;  %v18304_v55 = vmul.f32 %v21497_v33, %v4668_v0  ;;  %v10396_v10 = vpop.eup %10395  ;;  %v21502_v53 = vld [vmem:[#allocation145_spill] sm:$0xff]  ;;  %v4579_v60 = vpop.f32.mrf.mxu3 }
 0x69f   : > { %8006 = vmatmul.bf16.gmra.mxu0 %v21491_v22  ;;  %v21498_v22 = vld [vmem:[#allocation155_spill] sm:$0xff]  ;;  %v6881_v21 = vsel %vm18277_vm0, %v18107_v42, %v6877_v58  ;;  %v6942_v33 = vand.u32 2147483647, %v18141_v40  ;;  %v9248_v0 = vmul.f32 -1.442695, %v21502_v53  ;;  %v6896_v42 = vsel %vm18319_vm10, %v18128_v28, %v6892_v26  ;;  %v4846_v28 = vpop.f32.mrf.mxu2 }
 0x6a0   : > { %8095 = vmatmul.bf16.gmra.mxu1 %v21494_v8  ;;  %v18307_v11 = vmul.f32 %v21498_v22, %v4757_v4  ;;  %v6871_v8 = vsel %vm18209_vm11, %v18184_v52, %v6866_v35  ;;  %v10398_v4 = vpop.eup %10397  ;;  %v6851_v52 = vsel %vm18299_vm8, %v18116_v25, %v6847_v48  ;;  %vm6924_vm12 = vweird.f32 %v18181_v31  ;;  %v21506_v48 = vld [vmem:[#allocation156_spill] sm:$0xff]  ;;  %v21508_v22 = vld [vmem:[#allocation113_spill] sm:$0xff] }
 0x6a1   : > { %vm6938_vm9 = vweird.f32 %v18141_v40  ;;  %v6944_v51 = vand.u32 2147483648, %v18141_v40  ;;  %v6922_v58 = vadd.f32 %v18181_v31, %v6921_v27  ;;  %vm18335_vm11 = vcmp.eq.f32.partialorder %v6927_v49, 8.507059e+37  ;;  %vm18370_vm1 = vmor %vm6923_vm4, %vm6924_vm12 }
 0x6a2   : > { %21499 = vst [vmem:[#allocation132_spill] sm:$0xff] %v18307_v11  ;;  %v6905_v44 = vsub.f32 1.0, %v6904_v13  ;;  %v9250_v25 = vmul.f32 -1.442695, %v21505_v41  ;;  %v18341_v50 = vmul.f32 %v21506_v48, %v4579_v60  ;;  %v6936_v26 = vmul.f32 %v18220_v62, %v6935_v24  ;;  %v21509_v11 = vld [vmem:[#allocation158_spill] sm:$0xff] }
 0x6a3   : > { %v18344_v36 = vadd.f32 1.0, %v10396_v10  ;;  %v7479_v7 = vmul.f32 %v21508_v22, %v17774_v37  ;;  %v18349_v27 = vmul.f32 %v21509_v11, %v4846_v28  ;;  %v6949_v49 = vmul.f32 %v18293_v38, %v18199_v43  ;;  %v21510_v60 = vld [vmem:[#allocation114_spill] sm:$0xff]  ;;  %v18381_v57 = vpop.f32.mrf.mxu1 }
 0x6a4   : > { %21507 = vst [vmem:[#allocation85_spill] sm:$0xff] %v18341_v50  ;;  %v18353_v13 = vadd.f32 1.0, %v10398_v4  ;;  %10401 = vpow2.f32 %v9248_v0  ;;  %v7482_v48 = vmul.f32 %v21510_v60, %v17781_v56  ;;  %v10400_v50 = vpop.eup %10399  ;;  %v18358_v24 = vmul.f32 %v6871_v8, %v21390_v9 }
 0x6a5   : > { %v6886_v37 = vsel %vm18253_vm2, %v18186_v15, %v6881_v21  ;;  %v6856_v11 = vsel %vm18258_vm7, %v18233_v30, %v6851_v52  ;;  %vm6939_vm13 = vweird.f32 %v18220_v62  ;;  %v6901_v56 = vsel %vm18269_vm6, %v6900_v3, %v6896_v42  ;;  %v4670_v30 = vpop.f32.mrf.mxu0  ;;  %v21514_v21 = vld [vmem:[#allocation159_spill] sm:$0xff] }
 0x6a6   : > { %v6926_v9 = vsel %vm18370_vm1, %v18181_v31, %v6922_v58  ;;  %v6906_v15 = vmul.f32 %v18238_v14, %v6905_v44  ;;  %10403 = vpow2.f32 %v9250_v25  ;;  %v6937_v23 = vadd.f32 %v18220_v62, %v6936_v26  ;;  %v21515_v31 = vld [vmem:[#allocation93_spill] sm:$0xff]  ;;  %v18398_v28 = vpop.f32.mrf.mxu3  ;;  %vm18407_vm14 = vmor %vm6938_vm9, %vm6939_vm13 }
 0x6a7   : > { %10405 = vrcp.f32 %v18344_v36  ;;  %v7591_v8 = vpack.c.bf16 %v7479_v7, %v21513_v47  ;;  %v18387_v0 = vmul.f32 %v21514_v21, %v4670_v30  ;;  %v6950_v3 = vsub.f32 1.0, %v6949_v49  ;;  %v21516_v58 = vld [vmem:[#allocation97_spill] sm:$0xff]  ;;  %v18417_v60 = vpop.f32.mrf.mxu2  ;;  %v21528_v21 = vld [vmem:[#allocation128_spill] sm:$0xff] }
 0x6a8   : > { %10407 = vrcp.f32 %v18353_v13  ;;  %v18390_v20 = vadd.f32 1.0, %v10400_v50  ;;  %v7594_v4 = vpack.c.bf16 %v7482_v48, %v21515_v31  ;;  %v6912_v52 = vand.u32 2147483647, %v18173_v6  ;;  %v21530_v31 = vld [vmem:[#allocation162_spill] sm:$0xff] }
 0x6a9   : > { %v6914_v42 = vand.u32 2147483648, %v18173_v6  ;;  %v9251_v44 = vmul.f32 -1.442695, %v21516_v58  ;;  %7922 = vmatmul.bf16.gmra.mxu3 %v7591_v8  ;;  %v18401_v22 = vmul.f32 %v6886_v37, %v21395_v12  ;;  %vm18411_vm15 = vcmp.eq.f32.partialorder %v6942_v33, 8.507059e+37 }
 0x6aa   : > { %v10402_v26 = vpop.eup %10401  ;;  %v6907_v49 = vadd.f32 %v18238_v14, %v6906_v15  ;;  %vm6909_vm2 = vweird.f32 %v18238_v14  ;;  %8189 = vmatmul.bf16.gmra.mxu2 %v7594_v4  ;;  %v18420_v12 = vmul.f32 %v6856_v11, %v21398_v61  ;;  %v6931_v40 = vsel %vm18335_vm11, %v18283_v1, %v6926_v9  ;;  %v21526_v9 = vld [vmem:[#allocation146_spill] sm:$0xff] }
 0x6ab   : > { %v6941_v33 = vsel %vm18407_vm14, %v18220_v62, %v6937_v23  ;;  %v6945_v48 = vor.u32 1.1754944e-38, %v6944_v51  ;;  %v18429_v10 = vmul.f32 %v6901_v56, %v21402_v39  ;;  %vm6908_vm3 = vweird.f32 %v18173_v6  ;;  %v4762_v47 = vpop.f32.mrf.mxu1 }
 0x6ac   : > { %v10404_v37 = vpop.eup %10403  ;;  %v6951_v15 = vmul.f32 %v18293_v38, %v6950_v3  ;;  %10409 = vrcp.f32 %v18390_v20  ;;  %vm18436_vm7 = vmor %vm6908_vm3, %vm6909_vm2  ;;  %vm18440_vm4 = vcmp.eq.f32.partialorder %v6912_v52, 8.507059e+37  ;;  %v6915_v62 = vor.u32 1.1754944e-38, %v6914_v42 }
 0x6ad   : > { %v18434_v61 = vpop.eup %10405  ;;  %v18444_v51 = vadd.f32 1.0, %v10402_v26  ;;  %10411 = vpow2.f32 %v9251_v44  ;;  %v18449_v6 = vmul.f32 %v6931_v40, %v21405_v19  ;;  %v6946_v11 = vsel %vm18411_vm15, %v6945_v48, %v6941_v33  ;;  %v4673_v23 = vpop.f32.mrf.mxu0  ;;  %v21534_v40 = vld [vmem:[#allocation150_spill] sm:$0xff] }
 0x6ae   : > { %v18446_v39 = vpop.eup %10407  ;;  %v6911_v56 = vsel %vm18436_vm7, %v18238_v14, %v6907_v49  ;;  %v9249_v30 = vmul.f32 -1.442695, %v21526_v9  ;;  %v21527_v8 = vpack.c.bf16 %v17749_v32, %v17686_v29  ;;  %v21529_v3 = vpack.c.bf16 %v17752_v45, %v21528_v21  ;;  %v21532_v14 = vld [vmem:[#allocation163_spill] sm:$0xff]  ;;  %v4584_v50 = vpop.f32.mrf.mxu3  ;;  %v21535_v48 = vld [vmem:[#allocation82_spill] sm:$0xff] }
 0x6af   : > { %21525 = vst [vmem:[#allocation44_spill] sm:$0xff] %v18449_v6  ;;  %vm6953_vm5 = vweird.f32 %v18199_v43  ;;  %v6957_v19 = vand.u32 2147483647, %v18199_v43  ;;  %v18466_v4 = vmul.f32 %v21530_v31, %v4673_v23  ;;  %v18469_v52 = vmul.f32 %v21532_v14, %v4762_v47  ;;  %v4851_v35 = vpop.f32.mrf.mxu2  ;;  %v21542_v47 = vld [vmem:[#allocation165_spill] sm:$0xff]  ;;  %v21544_v21 = vld [vmem:[#allocation126_spill] sm:$0xff] }
 0x6b0   : > { %8011 = vmatmul.bf16.gmra.mxu0 %v21527_v8  ;;  %8100 = vmatmul.bf16.gmra.mxu1 %v21529_v3  ;;  %v6952_v42 = vadd.f32 %v18293_v38, %v6951_v15  ;;  %vm6954_vm6 = vweird.f32 %v18293_v38  ;;  %v6959_v29 = vand.u32 2147483648, %v18199_v43  ;;  %v6979_v32 = vmul.f32 %v18434_v61, %v18344_v36 }
 0x6b1   : > { %21531 = vst [vmem:[#allocation137_spill] sm:$0xff] %v18466_v4  ;;  %v6916_v45 = vsel %vm18440_vm4, %v6915_v62, %v6911_v56  ;;  %v6994_v44 = vmul.f32 %v18446_v39, %v18353_v13  ;;  %10413 = vrcp.f32 %v18444_v51  ;;  %v18481_v26 = vadd.f32 1.0, %v10404_v37  ;;  %vm18497_vm0 = vmor %vm6953_vm5, %vm6954_vm6  ;;  %v21557_v4 = vld [vmem:[#allocation72_spill] sm:$0xff] }
 0x6b2   : > { %21533 = vst [vmem:[#allocation86_spill] sm:$0xff] %v18469_v52  ;;  %v18483_v7 = vpop.eup %10409  ;;  %v6989_v49 = vand.u32 2147483648, %v18344_v36  ;;  %10415 = vpow2.f32 %v9249_v30  ;;  %v9252_v33 = vmul.f32 -1.442695, %v21534_v40  ;;  %v18488_v15 = vmul.f32 %v21535_v48, %v4584_v50  ;;  %v21541_v30 = vld [vmem:[#allocation125_spill] sm:$0xff] }
 0x6b3   : > { %v10412_v1 = vpop.eup %10411  ;;  %v18491_v62 = vmul.f32 %v6946_v11, %v21415_v63  ;;  %vm18501_vm8 = vcmp.eq.f32.partialorder %v6957_v19, 8.507059e+37  ;;  %v7487_v23 = vmul.f32 %v21541_v30, %v17942_v54  ;;  %v18508_v8 = vmul.f32 %v21542_v47, %v4851_v35 }
 0x6b4   : > { %v6956_v63 = vsel %vm18497_vm0, %v18293_v38, %v6952_v42  ;;  %v6960_v11 = vor.u32 1.1754944e-38, %v6959_v29  ;;  %v6980_v43 = vsub.f32 1.0, %v6979_v32  ;;  %v7490_v3 = vmul.f32 %v21544_v21, %v17956_v18  ;;  %v18527_v18 = vpop.f32.mrf.mxu1 }
 0x6b5   : > { %21536 = vst [vmem:[#allocation138_spill] sm:$0xff] %v18491_v62  ;;  %v18516_v19 = vmul.f32 %v6916_v45, %v21425_v5  ;;  %v6995_v31 = vsub.f32 1.0, %v6994_v44  ;;  %v6964_v14 = vmul.f32 %v18483_v7, %v18390_v20  ;;  %10417 = vrcp.f32 %v18481_v26  ;;  %v4675_v42 = vpop.f32.mrf.mxu0  ;;  %v21547_v44 = vld [vmem:[#allocation166_spill] sm:$0xff] }
 0x6b6   : > { %21543 = vst [vmem:[#allocation142_spill] sm:$0xff] %v18508_v8  ;;  %vm6983_vm10 = vweird.f32 %v18344_v36  ;;  %v6987_v54 = vand.u32 2147483647, %v18344_v36  ;;  %v18523_v50 = vor.u32 1.1754944e-38, %v6989_v49  ;;  %v18525_v38 = vadd.f32 1.0, %v10412_v1  ;;  %v21549_v1 = vld [vmem:[#allocation122_spill] sm:$0xff] }
 0x6b7   : > { %21545 = vst [vmem:[#allocation75_spill] sm:$0xff] %v18516_v19  ;;  %10419 = vpow2.f32 %v9252_v33  ;;  %v18529_v5 = vpop.eup %10413  ;;  %v6961_v29 = vsel %vm18501_vm8, %v6960_v11, %v6956_v63  ;;  %v7004_v32 = vand.u32 2147483648, %v18353_v13  ;;  %v7595_v45 = vpack.c.bf16 %v7487_v23, %v17881_v46  ;;  %v18547_v23 = vpop.f32.mrf.mxu3 }
 0x6b8   : > { %21546 = vst [vmem:[#allocation65_spill] sm:$0xff] %v18527_v18  ;;  %v18536_v48 = vmul.f32 %v21547_v44, %v4675_v42  ;;  %v10416_v49 = vpop.eup %10415  ;;  %v6981_v35 = vmul.f32 %v18434_v61, %v6980_v43  ;;  %v6974_v33 = vand.u32 2147483648, %v18390_v20  ;;  %v7489_v37 = vmul.f32 %v21549_v1, %v17925_v59 }
 0x6b9   : > { %v7598_v30 = vpack.c.bf16 %v7490_v3, %v17890_v34  ;;  %v6996_v56 = vmul.f32 %v18446_v39, %v6995_v31  ;;  %v7002_v47 = vand.u32 2147483647, %v18353_v13  ;;  %v6965_v63 = vsub.f32 1.0, %v6964_v14  ;;  %7927 = vmatmul.bf16.gmra.mxu3 %v7595_v45  ;;  %v18554_v34 = vpop.f32.mrf.mxu2 }
 0x6ba   : > { %21548 = vst [vmem:[#allocation144_spill] sm:$0xff] %v18536_v48  ;;  %vm6998_vm12 = vweird.f32 %v18353_v13  ;;  %v6972_v11 = vand.u32 2147483647, %v18390_v20  ;;  %v7009_v59 = vmul.f32 %v18529_v5, %v18444_v51  ;;  %10421 = vrcp.f32 %v18525_v38  ;;  %v21561_v48 = vld [vmem:[#allocation117_spill] sm:$0xff] }
 0x6bb   : > { %8194 = vmatmul.bf16.gmra.mxu2 %v7598_v30  ;;  %v18556_v43 = vpop.eup %10417  ;;  %v18559_v21 = vmul.f32 %v6961_v29, %v21430_v2  ;;  %vm6984_vm9 = vweird.f32 %v18434_v61  ;;  %v7005_v3 = vor.u32 1.1754944e-38, %v7004_v32  ;;  %v18562_v31 = vadd.f32 1.0, %v10416_v49  ;;  %v21555_v49 = vld [vmem:[#allocation101_spill] sm:$0xff]  ;;  %v21585_v30 = vld [vmem:[#allocation119_spill] sm:$0xff] }
 0x6bc   : > { %v6982_v42 = vadd.f32 %v18434_v61, %v6981_v35  ;;  %vm6968_vm11 = vweird.f32 %v18390_v20  ;;  %v18566_v45 = vor.u32 1.1754944e-38, %v6974_v33  ;;  %v7017_v44 = vand.u32 2147483647, %v18444_v51  ;;  %vm18593_vm15 = vmor %vm6983_vm10, %vm6984_vm9  ;;  %v21570_v13 = vld [vmem:[#allocation157_spill] sm:$0xff] }
 0x6bd   : > { %21550 = vst [vmem:[#allocation104_spill] sm:$0xff] %v18559_v21  ;;  %v10420_v14 = vpop.eup %10419  ;;  %v7597_v1 = vpack.c.bf16 %v7489_v37, %v17844_v17  ;;  %vm18570_vm1 = vcmp.eq.f32.partialorder %v6987_v54, 8.507059e+37  ;;  %v6997_v2 = vadd.f32 %v18446_v39, %v6996_v56  ;;  %vm6999_vm13 = vweird.f32 %v18446_v39  ;;  %v21556_v54 = vld [vmem:[#allocation151_spill] sm:$0xff]  ;;  %v4678_v25 = vpop.f32.mrf.mxu0 }
 0x6be   : > { %vm18576_vm14 = vcmp.eq.f32.partialorder %v7002_v47, 8.507059e+37  ;;  %v6966_v32 = vmul.f32 %v18483_v7, %v6965_v63  ;;  %v9254_v35 = vmul.f32 -1.442695, %v21555_v49  ;;  %v7010_v33 = vsub.f32 1.0, %v7009_v59  ;;  %v4767_v56 = vpop.f32.mrf.mxu1  ;;  %v21563_v21 = vld [vmem:[#allocation71_spill] sm:$0xff]  ;;  %vm18615_vm2 = vmor %vm6998_vm12, %vm6999_vm13 }
 0x6bf   : > { %v7019_v46 = vand.u32 2147483648, %v18444_v51  ;;  %v7039_v17 = vmul.f32 %v18556_v43, %v18481_v26  ;;  %v9255_v37 = vmul.f32 -1.442695, %v21556_v54  ;;  %v21558_v47 = vpack.c.bf16 %v17935_v16, %v21557_v4 }
 0x6c0   : > { %8105 = vmatmul.bf16.gmra.mxu1 %v7597_v1  ;;  %10423 = vrcp.f32 %v18562_v31  ;;  %v18598_v59 = vadd.f32 1.0, %v10420_v14  ;;  %v18601_v52 = vmul.f32 %v21561_v48, %v4678_v25  ;;  %v18604_v19 = vmul.f32 %v21563_v21, %v4767_v56  ;;  %v18606_v16 = vpop.eup %10421  ;;  %v21567_v48 = vld [vmem:[#allocation55_spill] sm:$0xff]  ;;  %v4589_v56 = vpop.f32.mrf.mxu3 }
 0x6c1   : > { %8016 = vmatmul.bf16.gmra.mxu0 %v21558_v47  ;;  %v6986_v36 = vsel %vm18593_vm15, %v18434_v61, %v6982_v42  ;;  %vm6969_vm3 = vweird.f32 %v18483_v7  ;;  %v7049_v25 = vand.u32 2147483648, %v18481_v26  ;;  %v9253_v21 = vmul.f32 -1.442695, %v21567_v48 }
 0x6c2   : > { %21562 = vst [vmem:[#allocation129_spill] sm:$0xff] %v18601_v52  ;;  %v7001_v14 = vsel %vm18615_vm2, %v18446_v39, %v6997_v2  ;;  %v6967_v61 = vadd.f32 %v18483_v7, %v6966_v32  ;;  %vm18626_vm7 = vcmp.eq.f32.partialorder %v6972_v11, 8.507059e+37  ;;  %vm7013_vm4 = vweird.f32 %v18444_v51  ;;  %v4856_v39 = vpop.f32.mrf.mxu2  ;;  %v21573_v2 = vld [vmem:[#allocation32_spill] sm:$0xff]  ;;  %vm18654_vm6 = vmor %vm6968_vm11, %vm6969_vm3 }
 0x6c3   : > { %21564 = vst [vmem:[#allocation133_spill] sm:$0xff] %v18604_v19  ;;  %10425 = vpow2.f32 %v9254_v35  ;;  %v9256_v1 = vmul.f32 -1.442695, %v21570_v13  ;;  %v7011_v47 = vmul.f32 %v18529_v5, %v7010_v33  ;;  %v7040_v63 = vsub.f32 1.0, %v7039_v17  ;;  %v21571_v19 = vld [vmem:[#allocation73_spill] sm:$0xff]  ;;  %v21574_v32 = vld [vmem:[#allocation140_spill] sm:$0xff] }
 0x6c4   : > { %10427 = vpow2.f32 %v9255_v37  ;;  %v18634_v8 = vmul.f32 %v21571_v19, %v4589_v56  ;;  %v7054_v11 = vmul.f32 %v18606_v16, %v18525_v38  ;;  %v7495_v4 = vmul.f32 %v21574_v32, %v21573_v2  ;;  %v21575_v35 = vld [vmem:[#allocation83_spill] sm:$0xff]  ;;  %v21577_v17 = vld [vmem:[#allocation88_spill] sm:$0xff]  ;;  %v21578_v19 = vld [vmem:[#allocation141_spill] sm:$0xff] }
 0x6c5   : > { %10429 = vrcp.f32 %v18598_v59  ;;  %v18642_v18 = vmul.f32 %v21575_v35, %v4856_v39  ;;  %vm7043_vm5 = vweird.f32 %v18481_v26  ;;  %v7047_v33 = vand.u32 2147483647, %v18481_v26  ;;  %v21607_v39 = vld [vmem:[#allocation35_spill] sm:$0xff] }
 0x6c6   : > { %21572 = vst [vmem:[#allocation81_spill] sm:$0xff] %v18634_v8  ;;  %10431 = vpow2.f32 %v9253_v21  ;;  %v7498_v37 = vmul.f32 %v21578_v19, %v21577_v17  ;;  %v18648_v56 = vpop.eup %10423  ;;  %vm7014_vm0 = vweird.f32 %v18529_v5  ;;  %vm18659_vm8 = vcmp.eq.f32.partialorder %v7017_v44, 8.507059e+37  ;;  %v4680_v17 = vpop.f32.mrf.mxu0  ;;  %v21587_v8 = vld [vmem:[#allocation105_spill] sm:$0xff] }
 0x6c7   : > { %21576 = vst [vmem:[#allocation67_spill] sm:$0xff] %v18642_v18  ;;  %v7020_v21 = vor.u32 1.1754944e-38, %v7019_v46  ;;  %v18663_v2 = vor.u32 1.1754944e-38, %v7049_v25  ;;  %10433 = vpow2.f32 %v9256_v1  ;;  %v6991_v32 = vsel %vm18570_vm1, %v18523_v50, %v6986_v36  ;;  %v18674_v19 = vpop.f32.mrf.mxu1  ;;  %v21584_v18 = vld [vmem:[#allocation108_spill] sm:$0xff]  ;;  %v21588_v36 = vld [vmem:[#allocation110_spill] sm:$0xff]  ;;  %vm18710_vm9 = vmor %vm7013_vm4, %vm7014_vm0 }
 0x6c8   : > { %v7006_v20 = vsel %vm18576_vm14, %v7005_v3, %v7001_v14  ;;  %v6971_v35 = vsel %vm18654_vm6, %v18483_v7, %v6967_v61  ;;  %v7041_v44 = vmul.f32 %v18556_v43, %v7040_v63  ;;  %21583 = vst [vmem:[#allocation99_spill] sm:$0xff] %v18674_v19  ;;  %v7012_v25 = vadd.f32 %v18529_v5, %v7011_v47  ;;  %v21589_v14 = vld [vmem:[#allocation139_spill] sm:$0xff]  ;;  %v21590_v63 = vld [vmem:[#allocation74_spill] sm:$0xff] }
 0x6c9   : > { %v10426_v46 = vpop.eup %10425  ;;  %v7055_v1 = vsub.f32 1.0, %v7054_v11  ;;  %v7599_v62 = vpack.c.bf16 %v7495_v4, %v21584_v18  ;;  %v18679_v50 = vmul.f32 %v21585_v30, %v4680_v17  ;;  %v7024_v3 = vmul.f32 %v18648_v56, %v18562_v31  ;;  %v18698_v17 = vpop.f32.mrf.mxu3 }
 0x6ca   : > { %v10428_v29 = vpop.eup %10427  ;;  %v9258_v7 = vmul.f32 -1.442695, %v21587_v8  ;;  %v7497_v61 = vmul.f32 %v21589_v14, %v21588_v36  ;;  %v7602_v19 = vpack.c.bf16 %v7498_v37, %v21590_v63  ;;  %vm18689_vm10 = vcmp.eq.f32.partialorder %v7047_v33, 8.507059e+37  ;;  %v21593_v37 = vld [vmem:[#allocation103_spill] sm:$0xff] }
 0x6cb   : > { %21586 = vst [vmem:[#allocation147_spill] sm:$0xff] %v18679_v50  ;;  %v18687_v6 = vpop.eup %10429  ;;  %vm7058_vm12 = vweird.f32 %v18525_v38  ;;  %v7062_v18 = vand.u32 2147483647, %v18525_v38  ;;  %v7064_v11 = vand.u32 2147483648, %v18525_v38  ;;  %7932 = vmatmul.bf16.gmra.mxu3 %v7599_v62  ;;  %v18701_v36 = vmul.f32 %v6991_v32, %v21593_v37  ;;  %v18716_v62 = vpop.f32.mrf.mxu2  ;;  %v21597_v37 = vld [vmem:[#allocation143_spill] sm:$0xff]  ;;  %v21618_v38 = vld [vmem:[#allocation149_spill] sm:$0xff] }
 0x6cc   : > { %v10432_v30 = vpop.eup %10431  ;;  %v6976_v33 = vsel %vm18626_vm7, %v18566_v45, %v6971_v35  ;;  %v7042_v63 = vadd.f32 %v18556_v43, %v7041_v44  ;;  %vm7044_vm11 = vweird.f32 %v18556_v43  ;;  %21596 = vst [vmem:[#allocation84_spill] sm:$0xff] %v18716_v62  ;;  %8199 = vmatmul.bf16.gmra.mxu2 %v7602_v19  ;;  %v18719_v4 = vmul.f32 %v7006_v20, %v21597_v37  ;;  %v21598_v44 = vld [vmem:[#allocation107_spill] sm:$0xff]  ;;  %v21599_v62 = vld [vmem:[#allocation102_spill] sm:$0xff] }
 0x6cd   : > { %v10434_v32 = vpop.eup %10433  ;;  %v7016_v45 = vsel %vm18710_vm9, %v18529_v5, %v7012_v25  ;;  %v7056_v51 = vmul.f32 %v18606_v16, %v7055_v1  ;;  %v18725_v42 = vadd.f32 1.0, %v10426_v46  ;;  %v7025_v35 = vsub.f32 1.0, %v7024_v3  ;;  %vm18735_vm1 = vmor %vm7043_vm5, %vm7044_vm11  ;;  %v21609_v14 = vld [vmem:[#allocation127_spill] sm:$0xff] }
 0x6ce   : > { %v18727_v52 = vadd.f32 1.0, %v10428_v29  ;;  %10435 = vpow2.f32 %v9258_v7  ;;  %v7601_v50 = vpack.c.bf16 %v7497_v61, %v21598_v44  ;;  %v18731_v19 = vmul.f32 %v6976_v33, %v21599_v62  ;;  %v4683_v7 = vpop.f32.mrf.mxu0  ;;  %v21611_v62 = vld [vmem:[#allocation152_spill] sm:$0xff] }
 0x6cf   : > { %vm18739_vm13 = vcmp.eq.f32.partialorder %v7062_v18, 8.507059e+37  ;;  %v7065_v46 = vor.u32 1.1754944e-38, %v7064_v11  ;;  %v7069_v25 = vmul.f32 %v18687_v6, %v18598_v59  ;;  %v18745_v1 = vadd.f32 1.0, %v10432_v30  ;;  %v4772_v61 = vpop.f32.mrf.mxu1  ;;  %v21604_v18 = vld [vmem:[#allocation27_spill] sm:$0xff]  ;;  %v21605_v11 = vld [vmem:[#allocation106_spill] sm:$0xff] }
 0x6d0   : > { %v7021_v29 = vsel %vm18659_vm8, %v7020_v21, %v7016_v45  ;;  %v7046_v26 = vsel %vm18735_vm1, %v18556_v43, %v7042_v63  ;;  %vm7059_vm14 = vweird.f32 %v18606_v16  ;;  %v18753_v3 = vadd.f32 1.0, %v10434_v32  ;;  %8110 = vmatmul.bf16.gmra.mxu1 %v7601_v50 }
 0x6d1   : > { %v21606_v33 = vpack.c.bf16 %v21604_v18, %v21605_v11  ;;  %v7057_v30 = vadd.f32 %v18606_v16, %v7056_v51  ;;  %10437 = vrcp.f32 %v18725_v42  ;;  %v18761_v21 = vmul.f32 %v21607_v39, %v4683_v7  ;;  %v4594_v51 = vpop.f32.mrf.mxu3  ;;  %vm18782_vm2 = vmor %vm7058_vm12, %vm7059_vm14  ;;  %v21619_v18 = vld [vmem:[#allocation124_spill] sm:$0xff] }
 0x6d2   : > { %v18764_v43 = vmul.f32 %v21609_v14, %v4772_v61  ;;  %v7026_v63 = vmul.f32 %v18648_v56, %v7025_v35  ;;  %vm7028_vm15 = vweird.f32 %v18562_v31  ;;  %10439 = vrcp.f32 %v18727_v52  ;;  %v21621_v39 = vld [vmem:[#allocation96_spill] sm:$0xff]  ;;  %v21622_v14 = vld [vmem:[#allocation153_spill] sm:$0xff] }
 0x6d3   : > { %8021 = vmatmul.bf16.gmra.mxu0 %v21606_v33  ;;  %21608 = vst [vmem:[#allocation100_spill] sm:$0xff] %v18761_v21  ;;  %v9259_v32 = vmul.f32 -1.442695, %v21611_v62  ;;  %v18771_v50 = vmul.f32 %v7021_v29, %v21502_v53  ;;  %v7032_v37 = vand.u32 2147483647, %v18562_v31  ;;  %v7070_v45 = vsub.f32 1.0, %v7069_v25  ;;  %v4861_v7 = vpop.f32.mrf.mxu2 }
 0x6d4   : > { %21610 = vst [vmem:[#allocation90_spill] sm:$0xff] %v18764_v43  ;;  %10441 = vrcp.f32 %v18745_v1  ;;  %v10436_v44 = vpop.eup %10435  ;;  %v7051_v35 = vsel %vm18689_vm10, %v18663_v2, %v7046_v26  ;;  %v7034_v53 = vand.u32 2147483648, %v18562_v31  ;;  %v21615_v25 = vld [vmem:[#allocation13_spill] sm:$0xff]  ;;  %v7061_v2 = vsel %vm18782_vm2, %v18606_v16, %v7057_v30  ;;  %v21617_v26 = vld [vmem:[#allocation40_spill] sm:$0xff]  ;;  %v21643_v30 = vld [vmem:[#allocation111_spill] sm:$0xff] }
 0x6d5   : > { %21612 = vst [vmem:[#allocation148_spill] sm:$0xff] %v18771_v50  ;;  %10443 = vrcp.f32 %v18753_v3  ;;  %v18789_v29 = vmul.f32 %v21615_v25, %v4594_v51  ;;  %v7077_v47 = vand.u32 2147483647, %v18598_v59  ;;  %v7503_v61 = vmul.f32 %v21618_v38, %v21617_v26  ;;  %v21634_v43 = vld [vmem:[#allocation92_spill] sm:$0xff] }
 0x6d6   : > { %v18798_v11 = vmul.f32 %v21619_v18, %v4861_v7  ;;  %v7027_v33 = vadd.f32 %v18648_v56, %v7026_v63  ;;  %vm7029_vm3 = vweird.f32 %v18648_v56  ;;  %10445 = vpow2.f32 %v9259_v32 }
 0x6d7   : > { %21616 = vst [vmem:[#allocation33_spill] sm:$0xff] %v18789_v29  ;;  %v7506_v51 = vmul.f32 %v21622_v14, %v21621_v39  ;;  %v18804_v25 = vpop.eup %10437  ;;  %v18807_v16 = vmul.f32 %v7051_v35, %v21505_v41  ;;  %vm18809_vm7 = vcmp.eq.f32.partialorder %v7032_v37, 8.507059e+37  ;;  %v7071_v20 = vmul.f32 %v18687_v6, %v7070_v45  ;;  %v4685_v41 = vpop.f32.mrf.mxu0  ;;  %vm18830_vm5 = vmor %vm7028_vm15, %vm7029_vm3 }
 0x6d8   : > { %21620 = vst [vmem:[#allocation123_spill] sm:$0xff] %v18798_v11  ;;  %v18814_v7 = vadd.f32 1.0, %v10436_v44  ;;  %v18816_v63 = vpop.eup %10439  ;;  %v7066_v32 = vsel %vm18739_vm13, %v7065_v46, %v7061_v2  ;;  %v7035_v26 = vor.u32 1.1754944e-38, %v7034_v53  ;;  %vm7073_vm4 = vweird.f32 %v18598_v59  ;;  %v18822_v35 = vpop.f32.mrf.mxu1  ;;  %v21631_v44 = vld [vmem:[#allocation136_spill] sm:$0xff] }
 0x6d9   : > { %21623 = vst [vmem:[#allocation120_spill] sm:$0xff] %v18807_v16  ;;  %v7079_v38 = vand.u32 2147483648, %v18598_v59  ;;  %vm7074_vm6 = vweird.f32 %v18687_v6  ;;  %vm18835_vm0 = vcmp.eq.f32.partialorder %v7077_v47, 8.507059e+37  ;;  %v7109_v46 = vand.u32 2147483648, %v18725_v42  ;;  %v21632_v2 = vld [vmem:[#allocation16_spill] sm:$0xff] }
 0x6da   : > { %21626 = vst [vmem:[#allocation64_spill] sm:$0xff] %v18822_v35  ;;  %v18824_v37 = vpop.eup %10441  ;;  %v7603_v53 = vpack.c.bf16 %v7503_v61, %v21631_v44  ;;  %v18842_v18 = vmul.f32 %v21632_v2, %v4685_v41  ;;  %v7031_v31 = vsel %vm18830_vm5, %v18648_v56, %v7027_v33  ;;  %v7124_v14 = vand.u32 2147483648, %v18727_v52  ;;  %v21635_v47 = vld [vmem:[#allocation80_spill] sm:$0xff]  ;;  %v21636_v35 = vld [vmem:[#allocation121_spill] sm:$0xff]  ;;  %v18859_v44 = vpop.f32.mrf.mxu3  ;;  %vm18880_vm8 = vmor %vm7073_vm4, %vm7074_vm6 }
 0x6db   : > { %v18844_v39 = vpop.eup %10443  ;;  %v7505_v11 = vmul.f32 %v21635_v47, %v21634_v43  ;;  %v7606_v29 = vpack.c.bf16 %v7506_v51, %v21636_v35  ;;  %v7072_v16 = vadd.f32 %v18687_v6, %v7071_v20  ;;  %v7099_v61 = vmul.f32 %v18804_v25, %v18725_v42  ;;  %21637 = vst [vmem:[#allocation154_spill] sm:$0xff] %v18859_v44  ;;  %v21639_v20 = vld [vmem:[#allocation70_spill] sm:$0xff]  ;;  %v18869_v45 = vpop.f32.mrf.mxu2 }
 0x6dc   : > { %21633 = vst [vmem:[#allocation79_spill] sm:$0xff] %v18842_v18  ;;  %10447 = vrcp.f32 %v18814_v7  ;;  %7937 = vmatmul.bf16.gmra.mxu3 %v7603_v53  ;;  %v10446_v56 = vpop.eup %10445  ;;  %v18862_v33 = vmul.f32 %v7066_v32, %v21516_v58  ;;  %v7114_v43 = vmul.f32 %v18816_v63, %v18727_v52  ;;  %v7084_v51 = vmul.f32 %v18824_v37, %v18745_v1  ;;  %v21652_v32 = vld [vmem:[#allocation24_spill] sm:$0xff] }
 0x6dd   : > { %v9257_v35 = vmul.f32 -1.442695, %v21639_v20  ;;  %21640 = vst [vmem:[#allocation145_spill] sm:$0xff] %v18869_v45  ;;  %8204 = vmatmul.bf16.gmra.mxu2 %v7606_v29  ;;  %v7036_v2 = vsel %vm18809_vm7, %v7035_v26, %v7031_v31  ;;  %v7080_v47 = vor.u32 1.1754944e-38, %v7079_v38  ;;  %v7107_v53 = vand.u32 2147483647, %v18725_v42 }
 0x6de   : > { %21638 = vst [vmem:[#allocation155_spill] sm:$0xff] %v18862_v33  ;;  %v7129_v58 = vmul.f32 %v18844_v39, %v18753_v3  ;;  %v18884_v41 = vor.u32 1.1754944e-38, %v7109_v46  ;;  %v7122_v29 = vand.u32 2147483647, %v18727_v52  ;;  %v9260_v26 = vmul.f32 -1.442695, %v21643_v30 }
 0x6df   : > { %v21644_v38 = vld [vmem:[#allocation118_spill] sm:$0xff]  ;;  %v7076_v21 = vsel %vm18880_vm8, %v18687_v6, %v7072_v16  ;;  %v7100_v18 = vsub.f32 1.0, %v7099_v61  ;;  %v18892_v45 = vor.u32 1.1754944e-38, %v7124_v14  ;;  %v18894_v59 = vadd.f32 1.0, %v10446_v56  ;;  %v4688_v30 = vpop.f32.mrf.mxu0 }
 0x6e0   : > { %v7605_v31 = vpack.c.bf16 %v7505_v11, %v21644_v38  ;;  %v18897_v44 = vmul.f32 %v7036_v2, %v21526_v9  ;;  %vm7103_vm10 = vweird.f32 %v18725_v42  ;;  %v7115_v46 = vsub.f32 1.0, %v7114_v43  ;;  %v4777_v33 = vpop.f32.mrf.mxu1  ;;  %v21646_v11 = vld [vmem:[#allocation69_spill] sm:$0xff]  ;;  %v21647_v38 = vld [vmem:[#allocation66_spill] sm:$0xff]  ;;  %v21676_v42 = vld [vmem:[#allocation116_spill] sm:$0xff] }
 0x6e1   : > { %v7085_v20 = vsub.f32 1.0, %v7084_v51  ;;  %10449 = vpow2.f32 %v9257_v35  ;;  %v21648_v50 = vpack.c.bf16 %v21646_v11, %v21647_v38  ;;  %vm7118_vm12 = vweird.f32 %v18727_v52  ;;  %v21649_v14 = vld [vmem:[#allocation98_spill] sm:$0xff]  ;;  %v21656_v11 = vld [vmem:[#allocation109_spill] sm:$0xff] }
 0x6e2   : > { %21645 = vst [vmem:[#allocation51_spill] sm:$0xff] %v18897_v44  ;;  %8115 = vmatmul.bf16.gmra.mxu1 %v7605_v31  ;;  %v18903_v6 = vpop.eup %10447  ;;  %v7092_v16 = vand.u32 2147483647, %v18745_v1  ;;  %v7130_v9 = vsub.f32 1.0, %v7129_v58  ;;  %v18908_v61 = vmul.f32 %v21649_v14, %v4688_v30  ;;  %v21650_v56 = vld [vmem:[#allocation130_spill] sm:$0xff]  ;;  %v7081_v51 = vsel %vm18835_vm0, %v7080_v47, %v7076_v21 }
 0x6e3   : > { %8026 = vmatmul.bf16.gmra.mxu0 %v21648_v50  ;;  %v18911_v43 = vmul.f32 %v21650_v56, %v4777_v33  ;;  %vm7104_vm9 = vweird.f32 %v18804_v25  ;;  %vm7088_vm11 = vweird.f32 %v18745_v1  ;;  %v7094_v50 = vand.u32 2147483648, %v18745_v1  ;;  %v4599_v33 = vpop.f32.mrf.mxu3  ;;  %v21657_v38 = vld [vmem:[#allocation134_spill] sm:$0xff] }
 0x6e4   : > { %10451 = vpow2.f32 %v9260_v26  ;;  %v7101_v35 = vmul.f32 %v18804_v25, %v7100_v18  ;;  %vm7133_vm1 = vweird.f32 %v18753_v3  ;;  %v7137_v2 = vand.u32 2147483647, %v18753_v3  ;;  %v4866_v18 = vpop.f32.mrf.mxu2  ;;  %vm18973_vm5 = vmor %vm7103_vm10, %vm7104_vm9 }
 0x6e5   : > { %21651 = vst [vmem:[#allocation156_spill] sm:$0xff] %v18911_v43  ;;  %v7139_v58 = vand.u32 2147483648, %v18753_v3  ;;  %10453 = vrcp.f32 %v18894_v59  ;;  %v7116_v21 = vmul.f32 %v18816_v63, %v7115_v46  ;;  %v7086_v5 = vmul.f32 %v18824_v37, %v7085_v20 }
 0x6e6   : > { %v7159_v47 = vmul.f32 %v18903_v6, %v18814_v7  ;;  %v18928_v30 = vmul.f32 %v21652_v32, %v4599_v33  ;;  %vm18930_vm13 = vcmp.eq.f32.partialorder %v7107_v53, 8.507059e+37  ;;  %vm7119_vm14 = vweird.f32 %v18816_v63  ;;  %v21662_v32 = vld [vmem:[#allocation68_spill] sm:$0xff] }
 0x6e7   : > { %v7131_v31 = vmul.f32 %v18844_v39, %v7130_v9  ;;  %v7511_v46 = vmul.f32 %v21656_v11, %v18398_v28  ;;  %v18939_v20 = vmul.f32 %v21657_v38, %v4866_v18  ;;  %v10450_v14 = vpop.eup %10449  ;;  %v18942_v56 = vmul.f32 %v7081_v51, %v21534_v40  ;;  %v21668_v51 = vld [vmem:[#allocation115_spill] sm:$0xff]  ;;  %vm18988_vm6 = vmor %vm7118_vm12, %vm7119_vm14  ;;  %v21686_v28 = vld [vmem:[#allocation112_spill] sm:$0xff] }
 0x6e8   : > { %21653 = vst [vmem:[#allocation113_spill] sm:$0xff] %v18928_v30  ;;  %vm18944_vm15 = vcmp.eq.f32.partialorder %v7122_v29, 8.507059e+37  ;;  %v7095_v53 = vor.u32 1.1754944e-38, %v7094_v50  ;;  %v9262_v43 = vmul.f32 -1.442695, %v21662_v32  ;;  %v21663_v30 = vld [vmem:[#allocation161_spill] sm:$0xff]  ;;  %v7102_v44 = vadd.f32 %v18804_v25, %v7101_v35 }
 0x6e9   : > { %21658 = vst [vmem:[#allocation158_spill] sm:$0xff] %v18939_v20  ;;  %v7514_v9 = vmul.f32 %v21663_v30, %v18417_v60  ;;  %vm7089_vm2 = vweird.f32 %v18824_v37  ;;  %vm18953_vm3 = vcmp.eq.f32.partialorder %v7092_v16, 8.507059e+37  ;;  %vm18957_vm7 = vcmp.eq.f32.partialorder %v7137_v2, 8.507059e+37  ;;  %v4690_v30 = vpop.f32.mrf.mxu0  ;;  %v18965_v16 = vpop.f32.mrf.mxu1 }
 0x6ea   : > { %21659 = vst [vmem:[#allocation114_spill] sm:$0xff] %v18942_v56  ;;  %v7140_v29 = vor.u32 1.1754944e-38, %v7139_v58  ;;  %v9263_v50 = vmul.f32 -1.442695, %v21668_v51  ;;  %v10452_v18 = vpop.eup %10451  ;;  %v7117_v11 = vadd.f32 %v18816_v63, %v7116_v21  ;;  %v7087_v60 = vadd.f32 %v18824_v37, %v7086_v5  ;;  %v21672_v5 = vld [vmem:[#allocation85_spill] sm:$0xff]  ;;  %vm19003_vm0 = vmor %vm7088_vm11, %vm7089_vm2 }
 0x6eb   : > { %vm7134_vm4 = vweird.f32 %v18844_v39  ;;  %v7160_v35 = vsub.f32 1.0, %v7159_v47  ;;  %21669 = vst [vmem:[#allocation19_spill] sm:$0xff] %v18965_v16  ;;  %v18967_v38 = vpop.eup %10453  ;;  %v7132_v58 = vadd.f32 %v18844_v39, %v7131_v31  ;;  %v18978_v21 = vadd.f32 1.0, %v10450_v14  ;;  %v21673_v47 = vld [vmem:[#allocation37_spill] sm:$0xff]  ;;  %v21677_v31 = vld [vmem:[#allocation160_spill] sm:$0xff] }
 0x6ec   : > { %v7607_v20 = vpack.c.bf16 %v7511_v46, %v21672_v5  ;;  %v18982_v51 = vmul.f32 %v21673_v47, %v4690_v30  ;;  %10455 = vpow2.f32 %v9262_v43  ;;  %v9261_v32 = vmul.f32 -1.442695, %v21676_v42  ;;  %v19011_v30 = vpop.f32.mrf.mxu3  ;;  %vm19020_vm8 = vmor %vm7133_vm1, %vm7134_vm4 }
 0x6ed   : > { %v7513_v14 = vmul.f32 %v21677_v31, %v18381_v57  ;;  %v7610_v56 = vpack.c.bf16 %v7514_v9, %v18349_v27  ;;  %v7106_v46 = vsel %vm18973_vm5, %v18804_v25, %v7102_v44  ;;  %v19007_v43 = vadd.f32 1.0, %v10452_v18 }
 0x6ee   : > { %10457 = vpow2.f32 %v9263_v50  ;;  %7942 = vmatmul.bf16.gmra.mxu3 %v7607_v20  ;;  %v7121_v27 = vsel %vm18988_vm6, %v18816_v63, %v7117_v11  ;;  %v7161_v25 = vmul.f32 %v18903_v6, %v7160_v35  ;;  %vm7163_vm10 = vweird.f32 %v18814_v7  ;;  %v19028_v20 = vpop.f32.mrf.mxu2 }
 0x6ef   : > { %v7174_v44 = vmul.f32 %v18967_v38, %v18894_v59  ;;  %8209 = vmatmul.bf16.gmra.mxu2 %v7610_v56  ;;  %v7091_v63 = vsel %vm19003_vm0, %v18824_v37, %v7087_v60  ;;  %v7136_v3 = vsel %vm19020_vm8, %v18844_v39, %v7132_v58  ;;  %v7167_v9 = vand.u32 2147483647, %v18814_v7  ;;  %v21682_v56 = vld [vmem:[#allocation132_spill] sm:$0xff]  ;;  %v21701_v58 = vld [vmem:[#allocation89_spill] sm:$0xff] }
 0x6f0   : > { %10459 = vrcp.f32 %v18978_v21  ;;  %v7111_v50 = vsel %vm18930_vm13, %v18884_v41, %v7106_v46  ;;  %v7169_v18 = vand.u32 2147483648, %v18814_v7  ;;  %v7609_v11 = vpack.c.bf16 %v7513_v14, %v21682_v56 }
 0x6f1   : > { %10461 = vpow2.f32 %v9261_v32  ;;  %v7126_v37 = vsel %vm18944_vm15, %v18892_v45, %v7121_v27  ;;  %vm7164_vm12 = vweird.f32 %v18903_v6  ;;  %v7184_v39 = vand.u32 2147483648, %v18894_v59  ;;  %v4693_v16 = vpop.f32.mrf.mxu0  ;;  %v4782_v2 = vpop.f32.mrf.mxu1 }
 0x6f2   : > { %10463 = vrcp.f32 %v19007_v43  ;;  %v10456_v60 = vpop.eup %10455  ;;  %v7096_v26 = vsel %vm18953_vm3, %v7095_v53, %v7091_v63  ;;  %v7141_v41 = vsel %vm18957_vm7, %v7140_v29, %v7136_v3  ;;  %v7162_v32 = vadd.f32 %v18903_v6, %v7161_v25  ;;  %8120 = vmatmul.bf16.gmra.mxu1 %v7609_v11  ;;  %vm19087_vm11 = vmor %vm7163_vm10, %vm7164_vm12  ;;  %v21692_v3 = vld [vmem:[#allocation168_spill] sm:$0xff]  ;;  %v21694_v11 = vld [vmem:[#allocation169_spill] sm:$0xff] }
 0x6f3   : > { %v7175_v35 = vsub.f32 1.0, %v7174_v44  ;;  %v21683_v45 = vpack.c.bf16 %v18387_v0, %v18304_v55  ;;  %vm19057_vm9 = vcmp.eq.f32.partialorder %v7167_v9, 8.507059e+37  ;;  %v9264_v53 = vmul.f32 -1.442695, %v21686_v28  ;;  %v21691_v44 = vld [vmem:[#allocation164_spill] sm:$0xff] }
 0x6f4   : > { %v10458_v33 = vpop.eup %10457  ;;  %v19063_v40 = vmul.f32 %v18358_v24, %v4693_v16  ;;  %v19066_v29 = vmul.f32 %v18401_v22, %v4782_v2  ;;  %v19069_v5 = vmul.f32 %v7111_v50, %v21555_v49  ;;  %v19072_v55 = vmul.f32 %v7126_v37, %v21556_v54  ;;  %v4604_v46 = vpop.f32.mrf.mxu3  ;;  %v21697_v16 = vld [vmem:[#allocation44_spill] sm:$0xff]  ;;  %v21703_v22 = vld [vmem:[#allocation167_spill] sm:$0xff] }
 0x6f5   : > { %8031 = vmatmul.bf16.gmra.mxu0 %v21683_v45  ;;  %v7170_v0 = vor.u32 1.1754944e-38, %v7169_v18  ;;  %v7182_v47 = vand.u32 2147483647, %v18894_v59  ;;  %v19078_v14 = vmul.f32 %v7096_v26, %v21567_v48  ;;  %v19081_v24 = vmul.f32 %v7141_v41, %v21570_v13  ;;  %v21699_v45 = vld [vmem:[#allocation138_spill] sm:$0xff] }
 0x6f6   : > { %21687 = vst [vmem:[#allocation159_spill] sm:$0xff] %v19063_v40  ;;  %v19075_v31 = vpop.eup %10459  ;;  %v19091_v49 = vor.u32 1.1754944e-38, %v7184_v39  ;;  %v19093_v54 = vadd.f32 1.0, %v10456_v60  ;;  %v7166_v48 = vsel %vm19087_vm11, %v18903_v6, %v7162_v32  ;;  %v7176_v13 = vmul.f32 %v18967_v38, %v7175_v35  ;;  %v4871_v1 = vpop.f32.mrf.mxu2 }
 0x6f7   : > { %21688 = vst [vmem:[#allocation93_spill] sm:$0xff] %v19066_v29  ;;  %v10462_v52 = vpop.eup %10461  ;;  %v19099_v27 = vadd.f32 1.0, %v10458_v33  ;;  %v19102_v7 = vmul.f32 %v18420_v12, %v4604_v46  ;;  %vm7178_vm1 = vweird.f32 %v18894_v59  ;;  %10465 = vpow2.f32 %v9264_v53  ;;  %v21693_v12 = vld [vmem:[#allocation59_spill] sm:$0xff] }
 0x6f8   : > { %v19104_v25 = vpop.eup %10463  ;;  %v9266_v63 = vmul.f32 -1.442695, %v21691_v44  ;;  %v7519_v9 = vmul.f32 %v21692_v3, %v18547_v23  ;;  %v19111_v6 = vmul.f32 %v18429_v10, %v4871_v1  ;;  %v7152_v50 = vand.u32 2147483647, %v18978_v21  ;;  %v21705_v1 = vld [vmem:[#allocation170_spill] sm:$0xff] }
 0x6f9   : > { %v7154_v18 = vand.u32 2147483648, %v18978_v21  ;;  %v9267_v56 = vmul.f32 -1.442695, %v21693_v12  ;;  %v7522_v37 = vmul.f32 %v21694_v11, %v18554_v34  ;;  %v7171_v39 = vsel %vm19057_vm9, %v7170_v0, %v7166_v48  ;;  %v4695_v34 = vpop.f32.mrf.mxu0  ;;  %v4784_v41 = vpop.f32.mrf.mxu1  ;;  %v21702_v0 = vld [vmem:[#allocation65_spill] sm:$0xff] }
 0x6fa   : > { %vm7179_vm13 = vweird.f32 %v18967_v38  ;;  %v7144_v23 = vmul.f32 %v19075_v31, %v18978_v21  ;;  %10467 = vrcp.f32 %v19093_v54  ;;  %v19125_v10 = vadd.f32 %v18967_v38, %v7176_v13 }
 0x6fb   : > { %v7189_v60 = vmul.f32 %v19104_v25, %v19007_v43  ;;  %10469 = vrcp.f32 %v19099_v27  ;;  %v19130_v26 = vadd.f32 1.0, %v10462_v52  ;;  %vm19132_vm14 = vcmp.eq.f32.partialorder %v7182_v47, 8.507059e+37  ;;  %v21704_v52 = vld [vmem:[#allocation142_spill] sm:$0xff]  ;;  %vm19175_vm2 = vmor %vm7178_vm1, %vm7179_vm13 }
 0x6fc   : > { %10471 = vpow2.f32 %v9266_v63  ;;  %v7611_v35 = vpack.c.bf16 %v7519_v9, %v18488_v15  ;;  %v19138_v2 = vmul.f32 %v21697_v16, %v4695_v34  ;;  %v19141_v33 = vmul.f32 %v21699_v45, %v4784_v41  ;;  %v4606_v9 = vpop.f32.mrf.mxu3  ;;  %v21706_v34 = vld [vmem:[#allocation75_spill] sm:$0xff] }
 0x6fd   : > { %10473 = vpow2.f32 %v9267_v56  ;;  %v9265_v53 = vmul.f32 -1.442695, %v21701_v58  ;;  %v7521_v46 = vmul.f32 %v21703_v22, %v21702_v0  ;;  %v7614_v47 = vpack.c.bf16 %v7522_v37, %v21704_v52  ;;  %v10466_v48 = vpop.eup %10465 }
 0x6fe   : > { %21698 = vst [vmem:[#allocation97_spill] sm:$0xff] %v19138_v2  ;;  %v7145_v13 = vsub.f32 1.0, %v7144_v23  ;;  %v9268_v63 = vmul.f32 -1.442695, %v21705_v1  ;;  %7947 = vmatmul.bf16.gmra.mxu3 %v7611_v35  ;;  %v19152_v56 = vor.u32 1.1754944e-38, %v7154_v18  ;;  %v7199_v11 = vand.u32 2147483648, %v19007_v43  ;;  %v4873_v23 = vpop.f32.mrf.mxu2 }
 0x6ff   : > { %21700 = vst [vmem:[#allocation146_spill] sm:$0xff] %v19141_v33  ;;  %10475 = vrcp.f32 %v19130_v26  ;;  %v19157_v37 = vmul.f32 %v21706_v34, %v4606_v9  ;;  %8214 = vmatmul.bf16.gmra.mxu2 %v7614_v47  ;;  %v19162_v16 = vmul.f32 %v7171_v39, %v21587_v8  ;;  %vm7148_vm15 = vweird.f32 %v18978_v21  ;;  %v21707_v35 = vld [vmem:[#allocation104_spill] sm:$0xff]  ;;  %v21710_v39 = vld [vmem:[#allocation86_spill] sm:$0xff] }
 0x700   : > { %v19159_v41 = vpop.eup %10467  ;;  %v7190_v45 = vsub.f32 1.0, %v7189_v60  ;;  %v7197_v18 = vand.u32 2147483647, %v19007_v43  ;;  %v19167_v0 = vmul.f32 %v21707_v35, %v4873_v23  ;;  %v19179_v8 = vadd.f32 1.0, %v10466_v48  ;;  %v21730_v33 = vld [vmem:[#allocation120_spill] sm:$0xff] }
 0x701   : > { %v19169_v22 = vpop.eup %10469  ;;  %10477 = vpow2.f32 %v9265_v53  ;;  %v7613_v60 = vpack.c.bf16 %v7521_v46, %v21710_v39  ;;  %v7181_v34 = vsel %vm19175_vm2, %v18967_v38, %v19125_v10  ;;  %v7146_v59 = vmul.f32 %v19075_v31, %v7145_v13  ;;  %v4698_v52 = vpop.f32.mrf.mxu0  ;;  %v21711_v10 = vld [vmem:[#allocation144_spill] sm:$0xff]  ;;  %v21712_v13 = vld [vmem:[#allocation137_spill] sm:$0xff] }
 0x702   : > { %v10472_v9 = vpop.eup %10471  ;;  %10479 = vpow2.f32 %v9268_v63  ;;  %vm7149_vm3 = vweird.f32 %v19075_v31  ;;  %vm7193_vm7 = vweird.f32 %v19007_v43  ;;  %v19193_v53 = vor.u32 1.1754944e-38, %v7199_v11  ;;  %v4787_v38 = vpop.f32.mrf.mxu1 }
 0x703   : > { %v10474_v48 = vpop.eup %10473  ;;  %v7219_v46 = vmul.f32 %v19159_v41, %v19093_v54  ;;  %v7229_v35 = vand.u32 2147483648, %v19093_v54  ;;  %v21713_v63 = vpack.c.bf16 %v21711_v10, %v21712_v13  ;;  %8125 = vmatmul.bf16.gmra.mxu1 %v7613_v60  ;;  %vm19201_vm4 = vcmp.eq.f32.partialorder %v7152_v50, 8.507059e+37  ;;  %vm19252_vm0 = vmor %vm7148_vm15, %vm7149_vm3 }
 0x704   : > { %v7227_v3 = vand.u32 2147483647, %v19093_v54  ;;  %v7244_v11 = vand.u32 2147483648, %v19099_v27  ;;  %v19208_v15 = vmul.f32 %v18701_v36, %v4698_v52  ;;  %v19211_v23 = vmul.f32 %v18719_v4, %v4787_v38  ;;  %v4609_v52 = vpop.f32.mrf.mxu3  ;;  %v21721_v36 = vld [vmem:[#allocation148_spill] sm:$0xff] }
 0x705   : > { %8036 = vmatmul.bf16.gmra.mxu0 %v21713_v63  ;;  %v19213_v47 = vpop.eup %10475  ;;  %v7186_v60 = vsel %vm19132_vm14, %v19091_v49, %v7181_v34  ;;  %v7191_v50 = vmul.f32 %v19104_v25, %v7190_v45  ;;  %10481 = vrcp.f32 %v19179_v8  ;;  %v19220_v10 = vadd.f32 1.0, %v10472_v9 }
 0x706   : > { %21716 = vst [vmem:[#allocation128_spill] sm:$0xff] %v19208_v15  ;;  %v7147_v13 = vadd.f32 %v19075_v31, %v7146_v59  ;;  %vm7194_vm5 = vweird.f32 %v19104_v25  ;;  %v19225_v4 = vadd.f32 1.0, %v10474_v48  ;;  %v7220_v63 = vsub.f32 1.0, %v7219_v46  ;;  %v4876_v45 = vpop.f32.mrf.mxu2  ;;  %v21720_v46 = vld [vmem:[#allocation76_spill] sm:$0xff]  ;;  %v21751_v59 = vld [vmem:[#allocation111_spill] sm:$0xff] }
 0x707   : > { %21717 = vst [vmem:[#allocation162_spill] sm:$0xff] %v19211_v23  ;;  %v10478_v38 = vpop.eup %10477  ;;  %v19227_v57 = vor.u32 1.1754944e-38, %v7229_v35  ;;  %v7234_v49 = vmul.f32 %v19169_v22, %v19099_v27  ;;  %v19232_v32 = vmul.f32 %v18731_v19, %v4609_v52  ;;  %v19235_v34 = vmul.f32 %v7186_v60, %v21611_v62  ;;  %v21726_v60 = vld [vmem:[#allocation77_spill] sm:$0xff]  ;;  %vm19280_vm9 = vmor %vm7193_vm7, %vm7194_vm5  ;;  %v21748_v23 = vld [vmem:[#allocation147_spill] sm:$0xff] }
 0x708   : > { %v10480_v9 = vpop.eup %10479  ;;  %vm19237_vm6 = vcmp.eq.f32.partialorder %v7197_v18, 8.507059e+37  ;;  %v7204_v48 = vmul.f32 %v19213_v47, %v19130_v26  ;;  %v7527_v35 = vmul.f32 %v21720_v46, %v18698_v17  ;;  %v19246_v29 = vmul.f32 %v21721_v36, %v4876_v45  ;;  %v21725_v17 = vld [vmem:[#allocation84_spill] sm:$0xff] }
 0x709   : > { %v7192_v62 = vadd.f32 %v19104_v25, %v7191_v50  ;;  %vm7223_vm8 = vweird.f32 %v19093_v54  ;;  %v19258_v18 = vor.u32 1.1754944e-38, %v7244_v11  ;;  %10483 = vrcp.f32 %v19220_v10 }
 0x70a   : > { %21722 = vst [vmem:[#allocation163_spill] sm:$0xff] %v19246_v29  ;;  %v7530_v36 = vmul.f32 %v21726_v60, %v21725_v17  ;;  %v7151_v52 = vsel %vm19252_vm0, %v19075_v31, %v7147_v13  ;;  %vm7224_vm10 = vweird.f32 %v19159_v41  ;;  %10485 = vrcp.f32 %v19225_v4  ;;  %v4700_v17 = vpop.f32.mrf.mxu0  ;;  %v4789_v60 = vpop.f32.mrf.mxu1  ;;  %v21739_v31 = vld [vmem:[#allocation51_spill] sm:$0xff] }
 0x70b   : > { %v19268_v21 = vadd.f32 1.0, %v10478_v38  ;;  %v19270_v50 = vpop.eup %10481  ;;  %v7221_v11 = vmul.f32 %v19159_v41, %v7220_v63  ;;  %v7235_v45 = vsub.f32 1.0, %v7234_v49  ;;  %vm7239_vm12 = vweird.f32 %v19169_v22  ;;  %v21729_v38 = vld [vmem:[#allocation81_spill] sm:$0xff]  ;;  %v21732_v49 = vld [vmem:[#allocation155_spill] sm:$0xff]  ;;  %vm19348_vm15 = vmor %vm7223_vm8, %vm7224_vm10 }
 0x70c   : > { %v19274_v46 = vadd.f32 1.0, %v10480_v9  ;;  %v7205_v13 = vsub.f32 1.0, %v7204_v48  ;;  %v7615_v19 = vpack.c.bf16 %v7527_v35, %v21729_v38  ;;  %v19286_v63 = vmul.f32 %v21730_v33, %v4700_v17  ;;  %v21736_v48 = vld [vmem:[#allocation99_spill] sm:$0xff]  ;;  %v4611_v39 = vpop.f32.mrf.mxu3 }
 0x70d   : > { %v19289_v40 = vmul.f32 %v21732_v49, %v4789_v60  ;;  %v7156_v9 = vsel %vm19201_vm4, %v19152_v56, %v7151_v52  ;;  %v7196_v43 = vsel %vm19280_vm9, %v19104_v25, %v7192_v62  ;;  %vm19297_vm11 = vcmp.eq.f32.partialorder %v7227_v3, 8.507059e+37  ;;  %v21737_v33 = vld [vmem:[#allocation15_spill] sm:$0xff]  ;;  %v21741_v25 = vld [vmem:[#allocation114_spill] sm:$0xff] }
 0x70e   : > { %21731 = vst [vmem:[#allocation150_spill] sm:$0xff] %v19286_v63  ;;  %vm7238_vm1 = vweird.f32 %v19099_v27  ;;  %v7529_v35 = vmul.f32 %v21737_v33, %v21736_v48  ;;  %v21738_v17 = vld [vmem:[#allocation67_spill] sm:$0xff]  ;;  %vm7208_vm13 = vweird.f32 %v19130_v26  ;;  %v7249_v56 = vmul.f32 %v19270_v50, %v19179_v8  ;;  %7952 = vmatmul.bf16.gmra.mxu3 %v7615_v19  ;;  %v4878_v49 = vpop.f32.mrf.mxu2  ;;  %v21740_v33 = vld [vmem:[#allocation70_spill] sm:$0xff] }
 0x70f   : > { %21733 = vst [vmem:[#allocation82_spill] sm:$0xff] %v19289_v40  ;;  %v7618_v60 = vpack.c.bf16 %v7530_v36, %v21738_v17  ;;  %10487 = vrcp.f32 %v19268_v21  ;;  %v19313_v62 = vpop.eup %10483  ;;  %v7222_v52 = vadd.f32 %v19159_v41, %v7221_v11  ;;  %v7236_v36 = vmul.f32 %v19169_v22, %v7235_v45  ;;  %v21749_v40 = vld [vmem:[#allocation129_spill] sm:$0xff]  ;;  %vm19392_vm4 = vmor %vm7238_vm1, %vm7239_vm12 }
 0x710   : > { %10489 = vrcp.f32 %v19274_v46  ;;  %v19319_v38 = vmul.f32 %v21739_v31, %v4611_v39  ;;  %v19321_v48 = vpop.eup %10485  ;;  %v19324_v17 = vmul.f32 %v7156_v9, %v21740_v33  ;;  %v7206_v19 = vmul.f32 %v19213_v47, %v7205_v13  ;;  %v21745_v31 = vld [vmem:[#allocation133_spill] sm:$0xff] }
 0x711   : > { %8219 = vmatmul.bf16.gmra.mxu2 %v7618_v60  ;;  %v7212_v3 = vand.u32 2147483647, %v19130_v26  ;;  %v19329_v11 = vmul.f32 %v21741_v25, %v4878_v49  ;;  %v7201_v45 = vsel %vm19237_vm6, %v19193_v53, %v7196_v43  ;;  %v21742_v39 = vand.u32 2147483647, %v19099_v27 }
 0x712   : > { %v7214_v9 = vand.u32 2147483648, %v19130_v26  ;;  %v7617_v33 = vpack.c.bf16 %v7529_v35, %v21745_v31  ;;  %v7250_v53 = vsub.f32 1.0, %v7249_v56  ;;  %v7259_v43 = vand.u32 2147483648, %v19179_v8  ;;  %v4703_v56 = vpop.f32.mrf.mxu0  ;;  %v4792_v13 = vpop.f32.mrf.mxu1 }
 0x713   : > { %vm19336_vm14 = vcmp.eq.f32.partialorder %v21742_v39, 8.507059e+37  ;;  %v7279_v25 = vmul.f32 %v19313_v62, %v19220_v10  ;;  %v7226_v49 = vsel %vm19348_vm15, %v19159_v41, %v7222_v52  ;;  %v7237_v39 = vadd.f32 %v19169_v22, %v7236_v36 }
 0x714   : > { %v7257_v54 = vand.u32 2147483647, %v19179_v8  ;;  %v7294_v31 = vmul.f32 %v19321_v48, %v19225_v4  ;;  %v21750_v15 = vpack.c.bf16 %v21748_v23, %v21749_v40  ;;  %8130 = vmatmul.bf16.gmra.mxu1 %v7617_v33  ;;  %v7207_v35 = vadd.f32 %v19213_v47, %v7206_v19  ;;  %v21779_v40 = vld [vmem:[#allocation79_spill] sm:$0xff] }
 0x715   : > { %v19367_v63 = vpop.eup %10487  ;;  %vm7209_vm2 = vweird.f32 %v19213_v47  ;;  %v19372_v41 = vmul.f32 %v19069_v5, %v4703_v56  ;;  %v19375_v52 = vmul.f32 %v19072_v55, %v4792_v13  ;;  %v7442_v29 = vmul.f32 %v7201_v45, %v21751_v59  ;;  %v4614_v45 = vpop.f32.mrf.mxu3 }
 0x716   : > { %8041 = vmatmul.bf16.gmra.mxu0 %v21750_v15  ;;  %v19377_v36 = vpop.eup %10489  ;;  %vm19380_vm3 = vcmp.eq.f32.partialorder %v7212_v3, 8.507059e+37  ;;  %v7215_v15 = vor.u32 1.1754944e-38, %v7214_v9  ;;  %vm7253_vm7 = vweird.f32 %v19179_v8  ;;  %v7231_v23 = vsel %vm19297_vm11, %v19227_v57, %v7226_v49  ;;  %vm19404_vm5 = vmor %vm7208_vm13, %vm7209_vm2  ;;  %v4881_v13 = vpop.f32.mrf.mxu2 }
 0x717   : > { %v7251_v55 = vmul.f32 %v19270_v50, %v7250_v53  ;;  %v7260_v3 = vor.u32 1.1754944e-38, %v7259_v43  ;;  %v7280_v19 = vsub.f32 1.0, %v7279_v25  ;;  %v7241_v9 = vsel %vm19392_vm4, %v19169_v22, %v7237_v39  ;;  %v21760_v43 = vld [vmem:[#allocation154_spill] sm:$0xff]  ;;  %v21761_v25 = vld [vmem:[#allocation87_spill] sm:$0xff] }
 0x718   : > { %v7295_v27 = vsub.f32 1.0, %v7294_v31  ;;  %v7264_v2 = vmul.f32 %v19367_v63, %v19268_v21  ;;  %v19411_v33 = vmul.f32 %v19078_v14, %v4614_v45  ;;  %v7211_v22 = vsel %vm19404_vm5, %v19213_v47, %v7207_v35  ;;  %v21762_v14 = vld [vmem:[#allocation68_spill] sm:$0xff]  ;;  %v21763_v47 = vld [vmem:[#allocation145_spill] sm:$0xff]  ;;  %v21764_v35 = vld [vmem:[#allocation95_spill] sm:$0xff] }
 0x719   : > { %vm19416_vm6 = vcmp.eq.f32.partialorder %v7257_v54, 8.507059e+37  ;;  %v7309_v26 = vmul.f32 %v19377_v36, %v19274_v46  ;;  %v7535_v49 = vmul.f32 %v21761_v25, %v21760_v43  ;;  %v19425_v39 = vmul.f32 %v19081_v24, %v4881_v13 }
 0x71a   : > { %v7444_v31 = vmul.f32 %v7231_v23, %v21762_v14  ;;  %vm7283_vm0 = vweird.f32 %v19220_v10  ;;  %v7287_v56 = vand.u32 2147483647, %v19220_v10  ;;  %v7538_v54 = vmul.f32 %v21764_v35, %v21763_v47  ;;  %v4705_v43 = vpop.f32.mrf.mxu0  ;;  %v4794_v25 = vpop.f32.mrf.mxu1  ;;  %v21765_v47 = vld [vmem:[#allocation33_spill] sm:$0xff] }
 0x71b   : > { %v7246_v59 = vsel %vm19336_vm14, %v19258_v18, %v7241_v9  ;;  %v7252_v5 = vadd.f32 %v19270_v50, %v7251_v55  ;;  %vm7254_vm8 = vweird.f32 %v19270_v50  ;;  %v7281_v24 = vmul.f32 %v19313_v62, %v7280_v19  ;;  %v21766_v19 = vld [vmem:[#allocation115_spill] sm:$0xff] }
 0x71c   : > { %v7216_v23 = vsel %vm19380_vm3, %v7215_v15, %v7211_v22  ;;  %v7289_v45 = vand.u32 2147483648, %v19220_v10  ;;  %v7296_v57 = vmul.f32 %v19321_v48, %v7295_v27  ;;  %v7265_v13 = vsub.f32 1.0, %v7264_v2  ;;  %vm19452_vm10 = vmor %vm7253_vm7, %vm7254_vm8  ;;  %v21769_v15 = vld [vmem:[#allocation64_spill] sm:$0xff]  ;;  %v21770_v27 = vld [vmem:[#allocation94_spill] sm:$0xff] }
 0x71d   : > { %v7310_v14 = vsub.f32 1.0, %v7309_v26  ;;  %v7619_v60 = vpack.c.bf16 %v7535_v49, %v21765_v47  ;;  %v19444_v18 = vmul.f32 %v19162_v16, %v4705_v43  ;;  %v19447_v55 = vmul.f32 %v19235_v34, %v4794_v25  ;;  %v21771_v22 = vld [vmem:[#allocation123_spill] sm:$0xff]  ;;  %v21786_v49 = vld [vmem:[#allocation78_spill] sm:$0xff] }
 0x71e   : > { %v7445_v9 = vmul.f32 %v7246_v59, %v21766_v19  ;;  %vm7284_vm12 = vweird.f32 %v19313_v62  ;;  %v7537_v2 = vmul.f32 %v21770_v27, %v21769_v15  ;;  %v7622_v26 = vpack.c.bf16 %v7538_v54, %v21771_v22  ;;  %v4616_v59 = vpop.f32.mrf.mxu3  ;;  %v21780_v15 = vld [vmem:[#allocation100_spill] sm:$0xff] }
 0x71f   : > { %v7256_v16 = vsel %vm19452_vm10, %v19270_v50, %v7252_v5  ;;  %v7282_v34 = vadd.f32 %v19313_v62, %v7281_v24  ;;  %vm19464_vm9 = vcmp.eq.f32.partialorder %v7287_v56, 8.507059e+37  ;;  %v7636_v8 = vpack.c.bf16 %v19444_v18, %v19372_v41  ;;  %7957 = vmatmul.bf16.gmra.mxu3 %v7619_v60  ;;  %v4883_v56 = vpop.f32.mrf.mxu2  ;;  %vm19488_vm1 = vmor %vm7283_vm0, %vm7284_vm12  ;;  %v21840_v41 = vld [vmem:[#allocation36_spill] sm:$0xff] }
 0x720   : > { %v7637_v35 = vpack.c.bf16 %v19447_v55, %v19375_v52  ;;  %v7443_v54 = vmul.f32 %v7216_v23, %v21676_v42  ;;  %v7290_v43 = vor.u32 1.1754944e-38, %v7289_v45  ;;  %v7266_v25 = vmul.f32 %v19367_v63, %v7265_v13  ;;  %v21776_v23 = vld [vmem:[#allocation90_spill] sm:$0xff] }
 0x721   : > { %v19475_v50 = vmul.f32 %v19324_v17, %v4616_v59  ;;  %8224 = vmatmul.bf16.gmra.mxu2 %v7622_v26  ;;  %v7297_v5 = vadd.f32 %v19321_v48, %v7296_v57  ;;  %vm7299_vm11 = vweird.f32 %v19321_v48  ;;  %v7311_v24 = vmul.f32 %v19377_v36, %v7310_v14 }
 0x722   : > { %v19480_v47 = vmul.f32 %v7442_v29, %v4883_v56  ;;  %v7261_v60 = vsel %vm19416_vm6, %v7260_v3, %v7256_v16  ;;  %v7304_v17 = vand.u32 2147483648, %v19225_v4  ;;  %v7621_v45 = vpack.c.bf16 %v7537_v2, %v21776_v23  ;;  %v4797_v19 = vpop.f32.mrf.mxu1 }
 0x723   : > { %v7635_v57 = vpack.c.bf16 %v19475_v50, %v19411_v33  ;;  %v7286_v29 = vsel %vm19488_vm1, %v19313_v62, %v7282_v34  ;;  %vm7298_vm13 = vweird.f32 %v19225_v4  ;;  %v7302_v3 = vand.u32 2147483647, %v19225_v4  ;;  %v4708_v62 = vpop.f32.mrf.mxu0  ;;  %v21839_v50 = vld [vmem:[#allocation34_spill] sm:$0xff] }
 0x724   : > { %v7638_v10 = vpack.c.bf16 %v19480_v47, %v19425_v39  ;;  %vm19503_vm14 = vmor %vm7298_vm13, %vm7299_vm11  ;;  %v7267_v13 = vadd.f32 %v19367_v63, %v7266_v25  ;;  %vm7269_vm15 = vweird.f32 %v19367_v63  ;;  %v7274_v14 = vand.u32 2147483648, %v19268_v21  ;;  %8135 = vmatmul.bf16.gmra.mxu1 %v7621_v45  ;;  %v21788_v45 = vld [vmem:[#allocation91_spill] sm:$0xff] }
 0x725   : > { %vm7314_vm2 = vweird.f32 %v19377_v36  ;;  %v21781_v4 = vpack.c.bf16 %v21779_v40, %v21780_v15  ;;  %v7301_v27 = vsel %vm19503_vm14, %v19321_v48, %v7297_v5  ;;  %v7312_v2 = vadd.f32 %v19377_v36, %v7311_v24  ;;  %v21796_v48 = vld [vmem:[#allocation158_spill] sm:$0xff] }
 0x726   : > { %v19518_v22 = vmul.f32 %v7444_v31, %v4708_v62  ;;  %v19520_v26 = vmul.f32 %v7445_v9, %v4797_v19  ;;  %v7305_v16 = vor.u32 1.1754944e-38, %v7304_v17  ;;  %vm7268_vm3 = vweird.f32 %v19268_v21  ;;  %v4619_v9 = vpop.f32.mrf.mxu3  ;;  %v21791_v62 = vld [vmem:[#allocation135_spill] sm:$0xff] }
 0x727   : > { %8046 = vmatmul.bf16.gmra.mxu0 %v21781_v4  ;;  %v7272_v34 = vand.u32 2147483647, %v19268_v21  ;;  %v7319_v59 = vand.u32 2147483648, %v19274_v46  ;;  %v7446_v25 = vmul.f32 %v7261_v60, %v21686_v28  ;;  %vm7303_vm7 = vcmp.eq.f32.partialorder %v7302_v3, 8.507059e+37  ;;  %vm19528_vm4 = vmor %vm7268_vm3, %vm7269_vm15  ;;  %v4886_v60 = vpop.f32.mrf.mxu2  ;;  %v21792_v4 = vld [vmem:[#allocation30_spill] sm:$0xff] }
 0x728   : > { %vm7313_vm5 = vweird.f32 %v19274_v46  ;;  %v7317_v31 = vand.u32 2147483647, %v19274_v46  ;;  %v7291_v56 = vsel %vm19464_vm9, %v7290_v43, %v7286_v29  ;;  %v7306_v21 = vsel %vm7303_vm7, %v7305_v16, %v7301_v27 }
 0x729   : > { %v7271_v28 = vsel %vm19528_vm4, %v19367_v63, %v7267_v13  ;;  %vm19541_vm6 = vmor %vm7313_vm5, %vm7314_vm2  ;;  %v19545_v24 = vmul.f32 %v7443_v54, %v4619_v9  ;;  %v7275_v42 = vor.u32 1.1754944e-38, %v7274_v14  ;;  %v7543_v43 = vmul.f32 %v21786_v49, %v19011_v30  ;;  %v21787_v63 = vld [vmem:[#allocation63_spill] sm:$0xff]  ;;  %v21789_v13 = vld [vmem:[#allocation18_spill] sm:$0xff] }
 0x72a   : > { %v7316_v46 = vsel %vm19541_vm6, %v19377_v36, %v7312_v2  ;;  %v19552_v17 = vmul.f32 %v7446_v25, %v4886_v60  ;;  %10491 = vpow2.f32 %v21787_v63  ;;  %vm7273_vm0 = vcmp.eq.f32.partialorder %v7272_v34, 8.507059e+37  ;;  %v21790_v14 = vld [vmem:[#allocation131_spill] sm:$0xff]  ;;  %v4799_v15 = vpop.f32.mrf.mxu1  ;;  %v21793_v2 = vld [vmem:[#allocation113_spill] sm:$0xff]  ;;  %v21797_v9 = vld [vmem:[#allocation14_spill] sm:$0xff] }
 0x72b   : > { %v7320_v23 = vor.u32 1.1754944e-38, %v7319_v59  ;;  %v7546_v29 = vmul.f32 %v21788_v45, %v19028_v20  ;;  %v7448_v54 = vmul.f32 %v7291_v56, %v21691_v44  ;;  %v7449_v3 = vmul.f32 %v7306_v21, %v21693_v12  ;;  %v4710_v40 = vpop.f32.mrf.mxu0  ;;  %v21794_v44 = vld [vmem:[#allocation17_spill] sm:$0xff]  ;;  %v21795_v59 = vld [vmem:[#allocation19_spill] sm:$0xff]  ;;  %v21798_v56 = vld [vmem:[#allocation28_spill] sm:$0xff] }
 0x72c   : > { %v7276_v53 = vsel %vm7273_vm0, %v7275_v42, %v7271_v28  ;;  %vm7318_vm8 = vcmp.eq.f32.partialorder %v7317_v31, 8.507059e+37  ;;  %v3237_v36 = vsub.f32 1.0, %v21789_v13  ;;  %v7417_v30 = vmul.f32 %v21791_v62, %v21790_v14  ;;  %v21799_v49 = vld [vmem:[#allocation20_spill] sm:$0xff]  ;;  %v21800_v45 = vld [vmem:[#allocation62_spill] sm:$0xff] }
 0x72d   : > { %v7321_v19 = vsel %vm7318_vm8, %v7320_v23, %v7316_v46  ;;  %v8857_v27 = vmul.f32 -1.442695, %v21792_v4  ;;  %v7623_v16 = vpack.c.bf16 %v7543_v43, %v21793_v2  ;;  %v19564_v34 = vmul.f32 %v7448_v54, %v4710_v40  ;;  %v21802_v54 = vld [vmem:[#allocation156_spill] sm:$0xff]  ;;  %v21804_v4 = vld [vmem:[#allocation23_spill] sm:$0xff] }
 0x72e   : > { %v19566_v20 = vmul.f32 %v7449_v3, %v4799_v15  ;;  %10493 = vrcp.f32 %v21794_v44  ;;  %v7447_v12 = vmul.f32 %v7276_v53, %v21701_v58  ;;  %v7545_v25 = vmul.f32 %v7417_v30, %v21795_v59  ;;  %v4621_v42 = vpop.f32.mrf.mxu3 }
 0x72f   : > { %v7626_v31 = vpack.c.bf16 %v7546_v29, %v21796_v48  ;;  %v3251_v21 = vmul.f32 %v21798_v56, %v21797_v9  ;;  %v7450_v28 = vmul.f32 %v7321_v19, %v21705_v1  ;;  %v7640_v5 = vpack.c.bf16 %v19564_v34, %v19518_v22  ;;  %7962 = vmatmul.bf16.gmra.mxu3 %v7623_v16  ;;  %v4888_v63 = vpop.f32.mrf.mxu2  ;;  %v21801_v1 = vld [vmem:[#allocation21_spill] sm:$0xff] }
 0x730   : > { %v7641_v60 = vpack.c.bf16 %v19566_v20, %v19520_v26  ;;  %v10492_v46 = vpop.eup %10491  ;;  %v3238_v58 = vmul.f32 %v21799_v49, %v3237_v36  ;;  %v19580_v43 = vmul.f32 %v7447_v12, %v4621_v42  ;;  %10495 = vpow2.f32 %v8857_v27 }
 0x731   : > { %8229 = vmatmul.bf16.gmra.mxu2 %v7626_v31  ;;  %v19582_v23 = vmul.f32 %v7450_v28, %v4888_v63  ;;  %v2432_v29 = vadd.f32 %v21801_v1, %v21800_v45  ;;  %v7625_v3 = vpack.c.bf16 %v7545_v25, %v21802_v54  ;;  %v19589_v13 = vadd.f32 1.0, %v10492_v46 }
 0x732   : > { %v7639_v53 = vpack.c.bf16 %v19580_v43, %v19545_v24  ;;  %v3252_v14 = vsub.f32 1.0, %v3251_v21  ;;  %v3239_v30 = vadd.f32 %v21799_v49, %v3238_v58  ;;  %vm3241_vm10 = vweird.f32 %v21799_v49  ;;  %v8086_v40 = vpop.f32.mrf.mxu1  ;;  %v8290_v58 = vpop.permute.xlu0 %8289 }
 0x733   : > { %v7642_v36 = vpack.c.bf16 %v19582_v23, %v19552_v17  ;;  %v7997_v19 = vpop.f32.mrf.mxu0  ;;  %v21803_v15 = vpack.c.bf16 %v18982_v51, %v18908_v61  ;;  %v3246_v27 = vand.u32 2147483648, %v21804_v4  ;;  %v8858_v2 = vmul.f32 -1.442695, %v2432_v29  ;;  %v21807_v51 = vld [vmem:[#allocation22_spill] sm:$0xff] }
 0x734   : > { %v19593_v62 = vpop.eup %10493  ;;  %8140 = vmatmul.bf16.gmra.mxu1 %v7625_v3  ;;  %vm3240_vm12 = vweird.f32 %v21804_v4  ;;  %v3244_v16 = vand.u32 2147483647, %v21804_v4  ;;  %10497 = vrcp.f32 %v19589_v13  ;;  %v3253_v25 = vmul.f32 %v21798_v56, %v3252_v14 }
 0x735   : > { %vm19604_vm9 = vmor %vm3240_vm12, %vm3241_vm10  ;;  %v2435_v48 = vadd.f32 %v21807_v51, %v21800_v45  ;;  %v3266_v31 = vmul.f32 %v19593_v62, %v21794_v44  ;;  %v3247_v46 = vor.u32 1.1754944e-38, %v3246_v27  ;;  %10499 = vpow2.f32 %v8858_v2 }
 0x736   : > { %v10496_v12 = vpop.eup %10495  ;;  %v7908_v61 = vpop.f32.mrf.mxu3  ;;  %v3243_v21 = vsel %vm19604_vm9, %v21799_v49, %v3239_v30  ;;  %vm3245_vm11 = vcmp.eq.f32.partialorder %v3244_v16, 8.507059e+37  ;;  %v3254_v54 = vadd.f32 %v21798_v56, %v3253_v25  ;;  %vm3256_vm1 = vweird.f32 %v21798_v56 }
 0x737   : > { %8051 = vmatmul.bf16.gmra.mxu0 %v21803_v15  ;;  %v7998_v28 = vadd.f32 %v7997_v19, %v7908_v61  ;;  %v8175_v42 = vpop.f32.mrf.mxu2  ;;  %v19617_v63 = vadd.f32 1.0, %v10496_v12  ;;  %v3248_v29 = vsel %vm3245_vm11, %v3247_v46, %v3243_v21  ;;  %v8859_v3 = vmul.f32 -1.442695, %v2435_v48 }
 0x738   : > { %v3267_v14 = vsub.f32 1.0, %v3266_v31  ;;  %v8447_v15 = vmul.f32 %v8290_v58, %v3248_v29  ;;  %vm3255_vm13 = vweird.f32 %v21797_v9  ;;  %v3261_v27 = vand.u32 2147483648, %v21797_v9 }
 0x739   : > { %v8087_v1 = vadd.f32 %v8086_v40, %v7998_v28  ;;  %10501 = vrcp.f32 %v19617_v63  ;;  %vm19628_vm14 = vmor %vm3255_vm13, %vm3256_vm1  ;;  %v3259_v2 = vand.u32 2147483647, %v21797_v9  ;;  %v21810_v25 = vpack.c.bf16 %v19157_v37, %v19102_v7  ;;  %v8295_v7 = vpop.permute.xlu1 %8294  ;;  %v21812_v37 = vld [vmem:[#allocation25_spill] sm:$0xff] }
 0x73a   : > { %v8088_v19 = vpop.f32.mrf.mxu1  ;;  %v19623_v4 = vpop.eup %10497  ;;  %v3258_v12 = vsel %vm19628_vm14, %v21798_v56, %v3254_v54  ;;  %10503 = vpow2.f32 %v8859_v3  ;;  %v3268_v51 = vmul.f32 %v19593_v62, %v3267_v14  ;;  %v21811_v56 = vpack.c.bf16 %v19167_v0, %v19111_v6 }
 0x73b   : > { %v8176_v49 = vadd.f32 %v8175_v42, %v8087_v1  ;;  %v7999_v30 = vpop.f32.mrf.mxu0  ;;  %v10500_v61 = vpop.eup %10499  ;;  %v3281_v48 = vmul.f32 %v19623_v4, %v19589_v13  ;;  %v3262_v21 = vor.u32 1.1754944e-38, %v3261_v27  ;;  %v2437_v28 = vadd.f32 %v21812_v37, %v21800_v45  ;;  %v21817_v27 = vld [vmem:[#allocation93_spill] sm:$0xff] }
 0x73c   : > { %vm3260_vm15 = vcmp.eq.f32.partialorder %v3259_v2, 8.507059e+37  ;;  %v19650_v46 = vadd.f32 1.0, %v10500_v61  ;;  %vm3271_vm2 = vweird.f32 %v19593_v62  ;;  %v3269_v29 = vadd.f32 %v19593_v62, %v3268_v51  ;;  %v8300_v37 = vpop.permute.xlu2 %8299 }
 0x73d   : > { %v8511_v16 = vmul.f32 %v8447_v15, %v8176_v49  ;;  %v3263_v58 = vsel %vm3260_vm15, %v3262_v21, %v3258_v12  ;;  %v3282_v3 = vsub.f32 1.0, %v3281_v48  ;;  %v21813_v15 = vld [vmem:[#allocation97_spill] sm:$0xff]  ;;  %v21814_v49 = vld [vmem:[#allocation159_spill] sm:$0xff]  ;;  %v3276_v2 = vand.u32 2147483648, %v21794_v44 }
 0x73e   : > { %v7910_v59 = vpop.f32.mrf.mxu3  ;;  %v8448_v54 = vmul.f32 %v8295_v7, %v3263_v58  ;;  %v8860_v12 = vmul.f32 -1.442695, %v2437_v28  ;;  %vm3270_vm3 = vweird.f32 %v21794_v44  ;;  %10505 = vrcp.f32 %v19650_v46  ;;  %v21821_v28 = vld [vmem:[#allocation26_spill] sm:$0xff] }
 0x73f   : > { %7967 = vmatmul.bf16.gmra.mxu3 %v21810_v25  ;;  %8543 = vst [vmem:[%s19642_s4] sm:$0xff] %v8511_v16  ;;  %v8000_v9 = vadd.f32 %v7999_v30, %v7910_v59  ;;  %v8177_v31 = vpop.f32.mrf.mxu2  ;;  %v19653_v1 = vpop.eup %10501  ;;  %v21815_v30 = vpack.c.bf16 %v21813_v15, %v21814_v49  ;;  %v3274_v59 = vand.u32 2147483647, %v21794_v44  ;;  %vm19668_vm7 = vmor %vm3270_vm3, %vm3271_vm2  ;;  %v3277_v7 = vor.u32 1.1754944e-38, %v3276_v2 }
 0x740   : > { %v10504_v16 = vpop.eup %10503  ;;  %v3296_v51 = vmul.f32 %v19653_v1, %v19617_v63  ;;  %10507 = vpow2.f32 %v8860_v12  ;;  %vm3286_vm5 = vweird.f32 %v19623_v4  ;;  %vm3285_vm6 = vweird.f32 %v19589_v13 }
 0x741   : > { %8234 = vmatmul.bf16.gmra.mxu2 %v21811_v56  ;;  %v8089_v42 = vadd.f32 %v8088_v19, %v8000_v9  ;;  %v21816_v19 = vld [vmem:[#allocation146_spill] sm:$0xff]  ;;  %v3273_v9 = vsel %vm19668_vm7, %v19593_v62, %v3269_v29  ;;  %v19679_v21 = vadd.f32 1.0, %v10504_v16  ;;  %vm3275_vm4 = vcmp.eq.f32.partialorder %v3274_v59, 8.507059e+37  ;;  %vm19694_vm0 = vmor %vm3285_vm6, %vm3286_vm5 }
 0x742   : > { %v8091_v14 = vpop.f32.mrf.mxu1  ;;  %v21818_v40 = vpack.c.bf16 %v21816_v19, %v21817_v27  ;;  %vm3301_vm10 = vweird.f32 %v19653_v1  ;;  %vm3300_vm12 = vweird.f32 %v19617_v63  ;;  %vm3315_vm13 = vweird.f32 %v19650_v46 }
 0x743   : > { %v8178_v6 = vadd.f32 %v8177_v31, %v8089_v42  ;;  %v8002_v0 = vpop.f32.mrf.mxu0  ;;  %v3283_v31 = vmul.f32 %v19623_v4, %v3282_v3  ;;  %v2440_v42 = vadd.f32 %v21821_v28, %v21800_v45  ;;  %10509 = vrcp.f32 %v19679_v21  ;;  %vm19728_vm9 = vmor %vm3300_vm12, %vm3301_vm10 }
 0x744   : > { %8145 = vmatmul.bf16.gmra.mxu1 %v21818_v40  ;;  %v19685_v49 = vpop.eup %10505  ;;  %v21822_v40 = vld [vmem:[#allocation29_spill] sm:$0xff]  ;;  %vm3330_vm3 = vweird.f32 %v19679_v21  ;;  %v2450_v18 = vadd.f32 %v21840_v41, %v21800_v45 }
 0x745   : > { %v8512_v25 = vmul.f32 %v8448_v54, %v8178_v6  ;;  %v3278_v54 = vsel %vm3275_vm4, %v3277_v7, %v3273_v9  ;;  %v3297_v6 = vsub.f32 1.0, %v3296_v51  ;;  %v3284_v62 = vadd.f32 %v19623_v4, %v3283_v31  ;;  %v21826_v31 = vld [vmem:[#allocation163_spill] sm:$0xff]  ;;  %v8305_v7 = vpop.permute.xlu1 %8304 }
 0x746   : > { %v7913_v48 = vpop.f32.mrf.mxu3  ;;  %v8449_v15 = vmul.f32 %v8300_v37, %v3278_v54  ;;  %v8861_v19 = vmul.f32 -1.442695, %v2440_v42  ;;  %v2442_v2 = vadd.f32 %v21822_v40, %v21800_v45  ;;  %v10508_v61 = vpop.eup %10507  ;;  %v3311_v51 = vmul.f32 %v19685_v49, %v19650_v46 }
 0x747   : > { %8056 = vmatmul.bf16.gmra.mxu0 %v21815_v30  ;;  %8544 = vst [vmem:[%s19642_s4 + $0x8] sm:$0xff] %v8512_v25  ;;  %v8003_v44 = vadd.f32 %v8002_v0, %v7913_v48  ;;  %v8180_v56 = vpop.f32.mrf.mxu2  ;;  %v3291_v30 = vand.u32 2147483648, %v19589_v13  ;;  %v3298_v16 = vmul.f32 %v19653_v1, %v3297_v6  ;;  %v21825_v25 = vpack.c.bf16 %v19319_v38, %v19232_v32 }
 0x748   : > { %10511 = vpow2.f32 %v8861_v19  ;;  %v19712_v37 = vadd.f32 1.0, %v10508_v61  ;;  %v3312_v54 = vsub.f32 1.0, %v3311_v51  ;;  %v21836_v51 = vld [vmem:[#allocation31_spill] sm:$0xff]  ;;  %vm3316_vm1 = vweird.f32 %v19685_v49 }
 0x749   : > { %v8092_v58 = vadd.f32 %v8091_v14, %v8003_v44  ;;  %v3289_v14 = vand.u32 2147483647, %v19589_v13  ;;  %v3288_v13 = vsel %vm19694_vm0, %v19623_v4, %v3284_v62  ;;  %v21827_v44 = vpack.c.bf16 %v19329_v11, %v21826_v31  ;;  %v19710_v38 = vpop.eup %10509  ;;  %v21828_v62 = vld [vmem:[#allocation150_spill] sm:$0xff]  ;;  %v8310_v31 = vpop.permute.xlu2 %8309  ;;  %vm19752_vm14 = vmor %vm3315_vm13, %vm3316_vm1 }
 0x74a   : > { %v8093_v0 = vpop.f32.mrf.mxu1  ;;  %v8862_v4 = vmul.f32 -1.442695, %v2442_v2  ;;  %v3299_v42 = vadd.f32 %v19653_v1, %v3298_v16  ;;  %10513 = vrcp.f32 %v19712_v37  ;;  %v3326_v16 = vmul.f32 %v19710_v38, %v19679_v21 }
 0x74b   : > { %v8181_v29 = vadd.f32 %v8180_v56, %v8092_v58  ;;  %v8004_v3 = vpop.f32.mrf.mxu0  ;;  %v3292_v56 = vor.u32 1.1754944e-38, %v3291_v30  ;;  %vm3290_vm8 = vcmp.eq.f32.partialorder %v3289_v14, 8.507059e+37  ;;  %v21832_v30 = vld [vmem:[#allocation162_spill] sm:$0xff]  ;;  %v3306_v14 = vand.u32 2147483648, %v19617_v63 }
 0x74c   : > { %10515 = vpow2.f32 %v8862_v4  ;;  %vm3331_vm2 = vweird.f32 %v19710_v38  ;;  %vm3345_vm6 = vweird.f32 %v19712_v37 }
 0x74d   : > { %v8513_v27 = vmul.f32 %v8449_v15, %v8181_v29  ;;  %v3293_v28 = vsel %vm3290_vm8, %v3292_v56, %v3288_v13  ;;  %v21829_v29 = vld [vmem:[#allocation128_spill] sm:$0xff]  ;;  %v8315_v33 = vpop.permute.xlu1 %8314  ;;  %vm19790_vm7 = vmor %vm3330_vm3, %vm3331_vm2 }
 0x74e   : > { %v7915_v59 = vpop.f32.mrf.mxu3  ;;  %v8450_v58 = vmul.f32 %v8305_v7, %v3293_v28 }
 0x74f   : > { %7972 = vmatmul.bf16.gmra.mxu3 %v21825_v25  ;;  %8545 = vst [vmem:[%s19642_s4 + $0x10] sm:$0xff] %v8513_v27  ;;  %v8005_v48 = vadd.f32 %v8004_v3, %v7915_v59  ;;  %v8182_v9 = vpop.f32.mrf.mxu2  ;;  %v21830_v3 = vpack.c.bf16 %v21828_v62, %v21829_v29  ;;  %v3304_v27 = vand.u32 2147483647, %v19617_v63  ;;  %v10512_v59 = vpop.eup %10511  ;;  %v3303_v25 = vsel %vm19728_vm9, %v19653_v1, %v3299_v42 }
 0x750   : > { %v3313_v63 = vmul.f32 %v19685_v49, %v3312_v54  ;;  %v19741_v56 = vadd.f32 1.0, %v10512_v59  ;;  %v19745_v54 = vpop.eup %10513 }
 0x751   : > { %8239 = vmatmul.bf16.gmra.mxu2 %v21827_v44  ;;  %v8094_v32 = vadd.f32 %v8093_v0, %v8005_v48  ;;  %v21831_v0 = vld [vmem:[#allocation82_spill] sm:$0xff]  ;;  %v2445_v48 = vadd.f32 %v21836_v51, %v21800_v45  ;;  %vm3305_vm11 = vcmp.eq.f32.partialorder %v3304_v27, 8.507059e+37  ;;  %v3334_v51 = vand.u32 2147483647, %v19679_v21 }
 0x752   : > { %v8096_v15 = vpop.f32.mrf.mxu1  ;;  %v21833_v19 = vpack.c.bf16 %v21831_v0, %v21832_v30  ;;  %v3314_v28 = vadd.f32 %v19685_v49, %v3313_v63  ;;  %v10516_v62 = vpop.eup %10515  ;;  %10517 = vrcp.f32 %v19741_v56  ;;  %vm3346_vm5 = vweird.f32 %v19745_v54 }
 0x753   : > { %v8183_v6 = vadd.f32 %v8182_v9, %v8094_v32  ;;  %v8007_v11 = vpop.f32.mrf.mxu0  ;;  %v3307_v9 = vor.u32 1.1754944e-38, %v3306_v14  ;;  %v3327_v32 = vsub.f32 1.0, %v3326_v16  ;;  %vm3335_vm4 = vcmp.eq.f32.partialorder %v3334_v51, 8.507059e+37  ;;  %vm19813_vm0 = vmor %vm3345_vm6, %vm3346_vm5 }
 0x754   : > { %8150 = vmatmul.bf16.gmra.mxu1 %v21833_v19  ;;  %v3341_v19 = vmul.f32 %v19745_v54, %v19712_v37  ;;  %v3349_v0 = vand.u32 2147483647, %v19712_v37  ;;  %v3366_v23 = vand.u32 2147483648, %v19741_v56  ;;  %vm3360_vm12 = vweird.f32 %v19741_v56 }
 0x755   : > { %v8514_v40 = vmul.f32 %v8450_v58, %v8183_v6  ;;  %v3308_v7 = vsel %vm3305_vm11, %v3307_v9, %v3303_v25  ;;  %v8863_v6 = vmul.f32 -1.442695, %v2445_v48  ;;  %v8330_v41 = vpop.permute.xlu1 %8329 }
 0x756   : > { %v7918_v12 = vpop.f32.mrf.mxu3  ;;  %v8451_v4 = vmul.f32 %v8310_v31, %v3308_v7  ;;  %v3342_v59 = vsub.f32 1.0, %v3341_v19  ;;  %v21843_v19 = vld [vmem:[#allocation38_spill] sm:$0xff]  ;;  %vm3350_vm8 = vcmp.eq.f32.partialorder %v3349_v0, 8.507059e+37 }
 0x757   : > { %8061 = vmatmul.bf16.gmra.mxu0 %v21830_v3  ;;  %8546 = vst [vmem:[%s19642_s4 + $0x18] sm:$0xff] %v8514_v40  ;;  %v8008_v61 = vadd.f32 %v8007_v11, %v7918_v12  ;;  %v8185_v13 = vpop.f32.mrf.mxu2  ;;  %v3321_v11 = vand.u32 2147483648, %v19650_v46  ;;  %v3328_v3 = vmul.f32 %v19710_v38, %v3327_v32  ;;  %v19768_v40 = vadd.f32 1.0, %v10516_v62  ;;  %v8320_v32 = vpop.permute.xlu2 %8319 }
 0x758   : > { %10519 = vpow2.f32 %v8863_v6 }
 0x759   : > { %v8097_v44 = vadd.f32 %v8096_v15, %v8008_v61  ;;  %v3319_v15 = vand.u32 2147483647, %v19650_v46  ;;  %v3318_v46 = vsel %vm19752_vm14, %v19685_v49, %v3314_v28  ;;  %v3322_v2 = vor.u32 1.1754944e-38, %v3321_v11 }
 0x75a   : > { %v8098_v58 = vpop.f32.mrf.mxu1  ;;  %v3329_v12 = vadd.f32 %v19710_v38, %v3328_v3  ;;  %10521 = vrcp.f32 %v19768_v40  ;;  %v3336_v61 = vand.u32 2147483648, %v19679_v21  ;;  %v3351_v3 = vand.u32 2147483648, %v19712_v37 }
 0x75b   : > { %v8186_v1 = vadd.f32 %v8185_v13, %v8097_v44  ;;  %v8009_v42 = vpop.f32.mrf.mxu0  ;;  %vm3320_vm15 = vcmp.eq.f32.partialorder %v3319_v15, 8.507059e+37  ;;  %vm3375_vm13 = vweird.f32 %v19768_v40 }
 0x75c   : > { %v3323_v49 = vsel %vm3320_vm15, %v3322_v2, %v3318_v46  ;;  %v3337_v7 = vor.u32 1.1754944e-38, %v3336_v61  ;;  %v2452_v46 = vadd.f32 %v21843_v19, %v21800_v45 }
 0x75d   : > { %v8515_v29 = vmul.f32 %v8451_v4, %v8186_v1  ;;  %v8452_v25 = vmul.f32 %v8315_v33, %v3323_v49  ;;  %v3352_v49 = vor.u32 1.1754944e-38, %v3351_v3 }
 0x75e   : > { %v7920_v30 = vpop.f32.mrf.mxu3 }
 0x75f   : > { %7977 = vmatmul.bf16.gmra.mxu3 %v7635_v57  ;;  %8547 = vst [vmem:[%s19642_s4 + $0x20] sm:$0xff] %v8515_v29  ;;  %v8010_v14 = vadd.f32 %v8009_v42, %v7920_v30  ;;  %v8187_v27 = vpop.f32.mrf.mxu2  ;;  %v2447_v57 = vadd.f32 %v21839_v50, %v21800_v45  ;;  %v8865_v42 = vmul.f32 -1.442695, %v2450_v18  ;;  %v21848_v18 = vld [vmem:[#allocation39_spill] sm:$0xff] }
 0x760   : > { %v2455_v52 = vadd.f32 %v21848_v18, %v21800_v45 }
 0x761   : > { %8244 = vmatmul.bf16.gmra.mxu2 %v7638_v10  ;;  %v8099_v16 = vadd.f32 %v8098_v58, %v8010_v14  ;;  %v19780_v10 = vpop.eup %10517  ;;  %v8864_v13 = vmul.f32 -1.442695, %v2447_v57  ;;  %v21851_v14 = vld [vmem:[#allocation41_spill] sm:$0xff] }
 0x762   : > { %v8101_v47 = vpop.f32.mrf.mxu1  ;;  %v10520_v9 = vpop.eup %10519  ;;  %v3356_v21 = vmul.f32 %v19780_v10, %v19741_v56  ;;  %vm3361_vm10 = vweird.f32 %v19780_v10 }
 0x763   : > { %v8188_v63 = vadd.f32 %v8187_v27, %v8099_v16  ;;  %v8012_v39 = vpop.f32.mrf.mxu0  ;;  %v19801_v4 = vadd.f32 1.0, %v10520_v9  ;;  %10523 = vpow2.f32 %v8864_v13  ;;  %v19803_v1 = vpop.eup %10521  ;;  %v3364_v13 = vand.u32 2147483647, %v19741_v56  ;;  %vm19848_vm9 = vmor %vm3360_vm12, %vm3361_vm10 }
 0x764   : > { %8155 = vmatmul.bf16.gmra.mxu1 %v7637_v35  ;;  %v3343_v35 = vmul.f32 %v19745_v54, %v3342_v59  ;;  %v3357_v11 = vsub.f32 1.0, %v3356_v21  ;;  %v3371_v27 = vmul.f32 %v19803_v1, %v19768_v40  ;;  %v3367_v9 = vor.u32 1.1754944e-38, %v3366_v23 }
 0x765   : > { %v8516_v48 = vmul.f32 %v8452_v25, %v8188_v63  ;;  %10525 = vrcp.f32 %v19801_v4  ;;  %vm3365_vm11 = vcmp.eq.f32.partialorder %v3364_v13, 8.507059e+37  ;;  %vm3376_vm1 = vweird.f32 %v19803_v1 }
 0x766   : > { %v7923_v55 = vpop.f32.mrf.mxu3  ;;  %v3344_v6 = vadd.f32 %v19745_v54, %v3343_v35  ;;  %10527 = vpow2.f32 %v8865_v42  ;;  %v3358_v50 = vmul.f32 %v19780_v10, %v3357_v11  ;;  %v3372_v25 = vsub.f32 1.0, %v3371_v27  ;;  %vm19869_vm14 = vmor %vm3375_vm13, %vm3376_vm1  ;;  %v21857_v11 = vld [vmem:[#allocation46_spill] sm:$0xff] }
 0x767   : > { %8066 = vmatmul.bf16.gmra.mxu0 %v7636_v8  ;;  %v3333_v8 = vsel %vm19790_vm7, %v19710_v38, %v3329_v12  ;;  %8548 = vst [vmem:[%s19642_s4 + $0x28] sm:$0xff] %v8516_v48  ;;  %v8013_v31 = vadd.f32 %v8012_v39, %v7923_v55  ;;  %v8190_v44 = vpop.f32.mrf.mxu2  ;;  %v8325_v12 = vpop.permute.xlu0 %8324  ;;  %v2457_v27 = vadd.f32 %v21851_v14, %v21800_v45  ;;  %vm3390_vm3 = vweird.f32 %v19801_v4 }
 0x768   : > { %v3338_v58 = vsel %vm3335_vm4, %v3337_v7, %v3333_v8  ;;  %v3348_v37 = vsel %vm19813_vm0, %v19745_v54, %v3344_v6  ;;  %v3359_v39 = vadd.f32 %v19780_v10, %v3358_v50  ;;  %v3373_v26 = vmul.f32 %v19803_v1, %v3372_v25 }
 0x769   : > { %v8102_v28 = vadd.f32 %v8101_v47, %v8013_v31  ;;  %v8453_v38 = vmul.f32 %v8320_v32, %v3338_v58  ;;  %v10524_v33 = vpop.eup %10523  ;;  %v3353_v59 = vsel %vm3350_vm8, %v3352_v49, %v3348_v37  ;;  %v8867_v58 = vmul.f32 -1.442695, %v2455_v52 }
 0x76a   : > { %v8103_v29 = vpop.f32.mrf.mxu1  ;;  %v19830_v43 = vadd.f32 1.0, %v10524_v33  ;;  %v8454_v54 = vmul.f32 %v8325_v12, %v3353_v59  ;;  %v3363_v20 = vsel %vm19848_vm9, %v19780_v10, %v3359_v39  ;;  %v3374_v21 = vadd.f32 %v19803_v1, %v3373_v26 }
 0x76b   : > { %v8191_v62 = vadd.f32 %v8190_v44, %v8102_v28  ;;  %v8014_v15 = vpop.f32.mrf.mxu0  ;;  %v19832_v63 = vpop.eup %10525  ;;  %v3368_v35 = vsel %vm3365_vm11, %v3367_v9, %v3363_v20  ;;  %v3381_v28 = vand.u32 2147483648, %v19768_v40  ;;  %v3394_v59 = vand.u32 2147483647, %v19801_v4 }
 0x76c   : > { %10529 = vrcp.f32 %v19830_v43  ;;  %v3386_v48 = vmul.f32 %v19832_v63, %v19801_v4  ;;  %v8455_v31 = vmul.f32 %v8330_v41, %v3368_v35  ;;  %vm3391_vm2 = vweird.f32 %v19832_v63 }
 0x76d   : > { %v8517_v30 = vmul.f32 %v8453_v38, %v8191_v62  ;;  %v3379_v38 = vand.u32 2147483647, %v19768_v40  ;;  %v3382_v40 = vor.u32 1.1754944e-38, %v3381_v28  ;;  %vm19892_vm7 = vmor %vm3390_vm3, %vm3391_vm2  ;;  %vm3395_vm4 = vcmp.eq.f32.partialorder %v3394_v59, 8.507059e+37 }
 0x76e   : > { %v7925_v2 = vpop.f32.mrf.mxu3  ;;  %v3387_v8 = vsub.f32 1.0, %v3386_v48  ;;  %vm3405_vm6 = vweird.f32 %v19830_v43  ;;  %v3409_v35 = vand.u32 2147483647, %v19830_v43 }
 0x76f   : > { %7982 = vmatmul.bf16.gmra.mxu3 %v7639_v53  ;;  %8549 = vst [vmem:[%s19642_s4 + $0x30] sm:$0xff] %v8517_v30  ;;  %v8015_v57 = vadd.f32 %v8014_v15, %v7925_v2  ;;  %v8192_v16 = vpop.f32.mrf.mxu2  ;;  %v8866_v53 = vmul.f32 -1.442695, %v2452_v46  ;;  %v8335_v46 = vpop.permute.xlu2 %8334  ;;  %vm3380_vm15 = vcmp.eq.f32.partialorder %v3379_v38, 8.507059e+37 }
 0x770   : > { %v3388_v62 = vmul.f32 %v19832_v63, %v3387_v8  ;;  %v8340_v22 = vpop.permute.xlu0 %8339  ;;  %v3411_v8 = vand.u32 2147483648, %v19830_v43  ;;  %vm3410_vm8 = vcmp.eq.f32.partialorder %v3409_v35, 8.507059e+37 }
 0x771   : > { %8249 = vmatmul.bf16.gmra.mxu2 %v7642_v36  ;;  %v8104_v24 = vadd.f32 %v8103_v29, %v8015_v57  ;;  %v10528_v36 = vpop.eup %10527  ;;  %10531 = vpow2.f32 %v8866_v53  ;;  %v3378_v29 = vsel %vm19869_vm14, %v19803_v1, %v3374_v21  ;;  %v8868_v53 = vmul.f32 -1.442695, %v2457_v27 }
 0x772   : > { %v8106_v17 = vpop.f32.mrf.mxu1  ;;  %v19857_v56 = vadd.f32 1.0, %v10528_v36  ;;  %v19863_v32 = vpop.eup %10529  ;;  %v3383_v37 = vsel %vm3380_vm15, %v3382_v40, %v3378_v29  ;;  %v3389_v1 = vadd.f32 %v19832_v63, %v3388_v62  ;;  %v3412_v38 = vor.u32 1.1754944e-38, %v3411_v8 }
 0x773   : > { %v8193_v47 = vadd.f32 %v8192_v16, %v8104_v24  ;;  %v8017_v61 = vpop.f32.mrf.mxu0  ;;  %v3401_v3 = vmul.f32 %v19863_v32, %v19830_v43  ;;  %v8456_v50 = vmul.f32 %v8335_v46, %v3383_v37  ;;  %v3396_v24 = vand.u32 2147483648, %v19801_v4  ;;  %v21854_v4 = vld [vmem:[#allocation43_spill] sm:$0xff] }
 0x774   : > { %8160 = vmatmul.bf16.gmra.mxu1 %v7641_v60  ;;  %10533 = vrcp.f32 %v19857_v56  ;;  %vm3406_vm5 = vweird.f32 %v19863_v32  ;;  %v2462_v62 = vadd.f32 %v21857_v11, %v21800_v45  ;;  %vm3420_vm12 = vweird.f32 %v19857_v56 }
 0x775   : > { %v8518_v51 = vmul.f32 %v8454_v54, %v8193_v47  ;;  %10535 = vpow2.f32 %v8867_v58  ;;  %v3402_v57 = vsub.f32 1.0, %v3401_v3  ;;  %v3397_v48 = vor.u32 1.1754944e-38, %v3396_v24  ;;  %vm19917_vm0 = vmor %vm3405_vm6, %vm3406_vm5 }
 0x776   : > { %v7928_v34 = vpop.f32.mrf.mxu3  ;;  %v8870_v37 = vmul.f32 -1.442695, %v2462_v62 }
 0x777   : > { %8071 = vmatmul.bf16.gmra.mxu0 %v7640_v5  ;;  %8550 = vst [vmem:[%s19642_s4 + $0x38] sm:$0xff] %v8518_v51  ;;  %v8018_v5 = vadd.f32 %v8017_v61, %v7928_v34  ;;  %v8195_v60 = vpop.f32.mrf.mxu2  ;;  %v10532_v42 = vpop.eup %10531  ;;  %v3403_v23 = vmul.f32 %v19863_v32, %v3402_v57  ;;  %v2460_v51 = vadd.f32 %v21854_v4, %v21800_v45 }
 0x778   : > { %v19880_v19 = vadd.f32 1.0, %v10532_v42  ;;  %v8355_v8 = vpop.permute.xlu0 %8354 }
 0x779   : > { %v8107_v55 = vadd.f32 %v8106_v17, %v8018_v5  ;;  %v3393_v17 = vsel %vm19892_vm7, %v19832_v63, %v3389_v1  ;;  %v3404_v9 = vadd.f32 %v19863_v32, %v3403_v23  ;;  %v3424_v1 = vand.u32 2147483647, %v19857_v56 }
 0x77a   : > { %v8108_v7 = vpop.f32.mrf.mxu1  ;;  %v19884_v33 = vpop.eup %10533  ;;  %10537 = vrcp.f32 %v19880_v19  ;;  %v3398_v5 = vsel %vm3395_vm4, %v3397_v48, %v3393_v17  ;;  %v3441_v4 = vand.u32 2147483648, %v19880_v19  ;;  %vm3435_vm13 = vweird.f32 %v19880_v19 }
 0x77b   : > { %v8196_v10 = vadd.f32 %v8195_v60, %v8107_v55  ;;  %v8019_v44 = vpop.f32.mrf.mxu0  ;;  %v3416_v39 = vmul.f32 %v19884_v33, %v19857_v56  ;;  %v10536_v61 = vpop.eup %10535  ;;  %10539 = vpow2.f32 %v8868_v53  ;;  %v8457_v63 = vmul.f32 %v8340_v22, %v3398_v5 }
 0x77c   : > { %v19907_v20 = vadd.f32 1.0, %v10536_v61  ;;  %v8869_v55 = vmul.f32 -1.442695, %v2460_v51  ;;  %v3408_v42 = vsel %vm19917_vm0, %v19863_v32, %v3404_v9  ;;  %vm3421_vm10 = vweird.f32 %v19884_v33 }
 0x77d   : > { %v8519_v6 = vmul.f32 %v8455_v31, %v8196_v10  ;;  %v3417_v60 = vsub.f32 1.0, %v3416_v39  ;;  %vm19940_vm9 = vmor %vm3420_vm12, %vm3421_vm10  ;;  %vm3425_vm11 = vcmp.eq.f32.partialorder %v3424_v1, 8.507059e+37  ;;  %v21863_v10 = vld [vmem:[#allocation50_spill] sm:$0xff] }
 0x77e   : > { %v7930_v15 = vpop.f32.mrf.mxu3  ;;  %10541 = vrcp.f32 %v19907_v20  ;;  %vm3450_vm3 = vweird.f32 %v19907_v20 }
 0x77f   : > { %8551 = vst [vmem:[%s19642_s4 + $0x40] sm:$0xff] %v8519_v6  ;;  %v8020_v0 = vadd.f32 %v8019_v44, %v7930_v15  ;;  %v8197_v30 = vpop.f32.mrf.mxu2  ;;  %v3418_v28 = vmul.f32 %v19884_v33, %v3417_v60  ;;  %10543 = vpow2.f32 %v8869_v55  ;;  %v8345_v6 = vpop.permute.xlu1 %8344  ;;  %v3439_v60 = vand.u32 2147483647, %v19880_v19 }
 0x780   : > { %v19905_v26 = vpop.eup %10537  ;;  %v3442_v55 = vor.u32 1.1754944e-38, %v3441_v4 }
 0x781   : > { %v8109_v2 = vadd.f32 %v8108_v7, %v8020_v0  ;;  %v3431_v31 = vmul.f32 %v19905_v26, %v19880_v19  ;;  %v10540_v7 = vpop.eup %10539  ;;  %v3413_v0 = vsel %vm3410_vm8, %v3412_v38, %v3408_v42  ;;  %vm3436_vm1 = vweird.f32 %v19905_v26 }
 0x782   : > { %v8111_v12 = vpop.f32.mrf.mxu1  ;;  %v19928_v29 = vadd.f32 1.0, %v10540_v7  ;;  %v8458_v32 = vmul.f32 %v8345_v6, %v3413_v0  ;;  %vm19961_vm14 = vmor %vm3435_vm13, %vm3436_vm1  ;;  %vm3440_vm15 = vcmp.eq.f32.partialorder %v3439_v60, 8.507059e+37 }
 0x783   : > { %v8198_v16 = vadd.f32 %v8197_v30, %v8109_v2  ;;  %v8022_v49 = vpop.f32.mrf.mxu0  ;;  %v3432_v3 = vsub.f32 1.0, %v3431_v31  ;;  %v3419_v30 = vadd.f32 %v19884_v33, %v3418_v28  ;;  %v3426_v2 = vand.u32 2147483648, %v19857_v56 }
 0x784   : > { %v19932_v27 = vpop.eup %10541  ;;  %10545 = vrcp.f32 %v19928_v29  ;;  %vm3465_vm6 = vweird.f32 %v19928_v29 }
 0x785   : > { %v8520_v25 = vmul.f32 %v8456_v50, %v8198_v16  ;;  %v10544_v57 = vpop.eup %10543  ;;  %v21858_v16 = vld [vmem:[#allocation48_spill] sm:$0xff]  ;;  %v3433_v24 = vmul.f32 %v19905_v26, %v3432_v3  ;;  %v3423_v59 = vsel %vm19940_vm9, %v19884_v33, %v3419_v30  ;;  %v3446_v56 = vmul.f32 %v19932_v27, %v19907_v20 }
 0x786   : > { %v7933_v47 = vpop.f32.mrf.mxu3  ;;  %v3427_v39 = vor.u32 1.1754944e-38, %v3426_v2  ;;  %v19951_v61 = vadd.f32 1.0, %v10544_v57  ;;  %10547 = vpow2.f32 %v8870_v37  ;;  %vm3451_vm2 = vweird.f32 %v19932_v27 }
 0x787   : > { %8552 = vst [vmem:[%s19642_s4 + $0x48] sm:$0xff] %v8520_v25  ;;  %v8023_v36 = vadd.f32 %v8022_v49, %v7933_v47  ;;  %v8200_v13 = vpop.f32.mrf.mxu2  ;;  %v2465_v49 = vadd.f32 %v21858_v16, %v21800_v45  ;;  %v8350_v47 = vpop.permute.xlu2 %8349  ;;  %v3447_v51 = vsub.f32 1.0, %v3446_v56  ;;  %v3456_v3 = vand.u32 2147483648, %v19907_v20  ;;  %vm19984_vm7 = vmor %vm3450_vm3, %vm3451_vm2 }
 0x788   : > { %10549 = vrcp.f32 %v19951_v61  ;;  %v3454_v30 = vand.u32 2147483647, %v19907_v20  ;;  %v8360_v16 = vpop.permute.xlu1 %8359  ;;  %vm3480_vm12 = vweird.f32 %v19951_v61 }
 0x789   : > { %v8112_v34 = vadd.f32 %v8111_v12, %v8023_v36  ;;  %v8871_v23 = vmul.f32 -1.442695, %v2465_v49  ;;  %v3428_v36 = vsel %vm3425_vm11, %v3427_v39, %v3423_v59  ;;  %v3448_v19 = vmul.f32 %v19932_v27, %v3447_v51  ;;  %v21866_v49 = vld [vmem:[#allocation53_spill] sm:$0xff] }
 0x78a   : > { %v8113_v52 = vpop.f32.mrf.mxu1  ;;  %v8459_v33 = vmul.f32 %v8350_v47, %v3428_v36  ;;  %v19956_v5 = vpop.eup %10545  ;;  %v3457_v57 = vor.u32 1.1754944e-38, %v3456_v3  ;;  %v2470_v12 = vadd.f32 %v21866_v49, %v21800_v45  ;;  %vm3455_vm4 = vcmp.eq.f32.partialorder %v3454_v30, 8.507059e+37  ;;  %v21875_v51 = vld [vmem:[#allocation61_spill] sm:$0xff] }
 0x78b   : > { %v8201_v41 = vadd.f32 %v8200_v13, %v8112_v34  ;;  %v8024_v18 = vpop.f32.mrf.mxu0  ;;  %v3434_v13 = vadd.f32 %v19905_v26, %v3433_v24  ;;  %10551 = vpow2.f32 %v8871_v23  ;;  %v3461_v35 = vmul.f32 %v19956_v5, %v19928_v29  ;;  %v8370_v30 = vpop.permute.xlu0 %8369 }
 0x78c   : > { %v3449_v38 = vadd.f32 %v19932_v27, %v3448_v19  ;;  %vm3466_vm5 = vweird.f32 %v19956_v5  ;;  %v8873_v23 = vmul.f32 -1.442695, %v2470_v12  ;;  %v3469_v36 = vand.u32 2147483647, %v19928_v29 }
 0x78d   : > { %v8521_v21 = vmul.f32 %v8457_v63, %v8201_v41  ;;  %v3438_v41 = vsel %vm19961_vm14, %v19905_v26, %v3434_v13  ;;  %vm20011_vm0 = vmor %vm3465_vm6, %vm3466_vm5 }
 0x78e   : > { %v7935_v44 = vpop.f32.mrf.mxu3  ;;  %v3443_v7 = vsel %vm3440_vm15, %v3442_v55, %v3438_v41  ;;  %v3453_v37 = vsel %vm19984_vm7, %v19932_v27, %v3449_v38  ;;  %vm3470_vm8 = vcmp.eq.f32.partialorder %v3469_v36, 8.507059e+37 }
 0x78f   : > { %8553 = vst [vmem:[%s19642_s4 + $0x50] sm:$0xff] %v8521_v21  ;;  %v8025_v43 = vadd.f32 %v8024_v18, %v7935_v44  ;;  %v8202_v58 = vpop.f32.mrf.mxu2  ;;  %v2467_v44 = vadd.f32 %v21863_v10, %v21800_v45  ;;  %v8460_v26 = vmul.f32 %v8355_v8, %v3443_v7 }
 0x791   : > { %v8114_v15 = vadd.f32 %v8113_v52, %v8025_v43  ;;  %v10548_v52 = vpop.eup %10547  ;;  %v8872_v0 = vmul.f32 -1.442695, %v2467_v44 }
 0x792   : > { %v8116_v14 = vpop.f32.mrf.mxu1  ;;  %v19974_v42 = vadd.f32 1.0, %v10548_v52  ;;  %v19976_v43 = vpop.eup %10549 }
 0x793   : > { %v8203_v40 = vadd.f32 %v8202_v58, %v8114_v15  ;;  %v8027_v46 = vpop.f32.mrf.mxu0  ;;  %v3462_v58 = vsub.f32 1.0, %v3461_v35  ;;  %v10552_v15 = vpop.eup %10551  ;;  %v3476_v2 = vmul.f32 %v19976_v43, %v19951_v61  ;;  %vm3481_vm10 = vweird.f32 %v19976_v43 }
 0x794   : > { %10553 = vrcp.f32 %v19974_v42  ;;  %vm20032_vm9 = vmor %vm3480_vm12, %vm3481_vm10  ;;  %vm3495_vm13 = vweird.f32 %v19974_v42 }
 0x795   : > { %v8522_v50 = vmul.f32 %v8458_v32, %v8203_v40  ;;  %10555 = vpow2.f32 %v8872_v0  ;;  %v3477_v56 = vsub.f32 1.0, %v3476_v2  ;;  %v21872_v40 = vld [vmem:[#allocation58_spill] sm:$0xff] }
 0x796   : > { %v7938_v53 = vpop.f32.mrf.mxu3 }
 0x797   : > { %8554 = vst [vmem:[%s19642_s4 + $0x58] sm:$0xff] %v8522_v50  ;;  %v8028_v25 = vadd.f32 %v8027_v46, %v7938_v53  ;;  %v8205_v54 = vpop.f32.mrf.mxu2  ;;  %v19995_v50 = vadd.f32 1.0, %v10552_v15  ;;  %v3458_v53 = vsel %vm3455_vm4, %v3457_v57, %v3453_v37  ;;  %v3478_v60 = vmul.f32 %v19976_v43, %v3477_v56 }
 0x798   : > { %v8461_v27 = vmul.f32 %v8360_v16, %v3458_v53  ;;  %v3499_v56 = vand.u32 2147483647, %v19974_v42 }
 0x799   : > { %v8117_v17 = vadd.f32 %v8116_v14, %v8028_v25  ;;  %v3463_v14 = vmul.f32 %v19956_v5, %v3462_v58  ;;  %10557 = vrcp.f32 %v19995_v50  ;;  %vm3510_vm3 = vweird.f32 %v19995_v50 }
 0x79a   : > { %v8118_v34 = vpop.f32.mrf.mxu1  ;;  %v20001_v47 = vpop.eup %10553  ;;  %10559 = vpow2.f32 %v8873_v23  ;;  %vm3500_vm15 = vcmp.eq.f32.partialorder %v3499_v56, 8.507059e+37 }
 0x79b   : > { %v8206_v48 = vadd.f32 %v8205_v54, %v8117_v17  ;;  %v8029_v22 = vpop.f32.mrf.mxu0  ;;  %v3464_v59 = vadd.f32 %v19956_v5, %v3463_v14  ;;  %v3471_v17 = vand.u32 2147483648, %v19928_v29  ;;  %v3491_v29 = vmul.f32 %v20001_v47, %v19974_v42  ;;  %v8385_v56 = vpop.permute.xlu0 %8384 }
 0x79c   : > { %vm3496_vm1 = vweird.f32 %v20001_v47 }
 0x79d   : > { %v8523_v9 = vmul.f32 %v8459_v33, %v8206_v48  ;;  %v21867_v33 = vld [vmem:[#allocation56_spill] sm:$0xff]  ;;  %v3472_v41 = vor.u32 1.1754944e-38, %v3471_v17  ;;  %vm20056_vm14 = vmor %vm3495_vm13, %vm3496_vm1 }
 0x79e   : > { %v7940_v18 = vpop.f32.mrf.mxu3  ;;  %v2472_v4 = vadd.f32 %v21867_v33, %v21800_v45  ;;  %v8375_v33 = vpop.permute.xlu1 %8374 }
 0x79f   : > { %8555 = vst [vmem:[%s19642_s4 + $0x60] sm:$0xff] %v8523_v9  ;;  %v8030_v21 = vadd.f32 %v8029_v22, %v7940_v18  ;;  %v8207_v31 = vpop.f32.mrf.mxu2  ;;  %v10556_v22 = vpop.eup %10555 }
 0x7a0   : > { %v8365_v18 = vpop.permute.xlu2 %8364  ;;  %v20022_v55 = vpop.eup %10557  ;;  %v20024_v8 = vadd.f32 1.0, %v10556_v22  ;;  %v8874_v35 = vmul.f32 -1.442695, %v2472_v4 }
 0x7a1   : > { %v8119_v28 = vadd.f32 %v8118_v34, %v8030_v21  ;;  %v3468_v34 = vsel %vm20011_vm0, %v19956_v5, %v3464_v59  ;;  %v3479_v21 = vadd.f32 %v19976_v43, %v3478_v60  ;;  %vm3511_vm2 = vweird.f32 %v20022_v55 }
 0x7a2   : > { %v8121_v62 = vpop.f32.mrf.mxu1  ;;  %v3473_v19 = vsel %vm3470_vm8, %v3472_v41, %v3468_v34  ;;  %10561 = vrcp.f32 %v20024_v8  ;;  %vm20080_vm7 = vmor %vm3510_vm3, %vm3511_vm2  ;;  %vm3525_vm6 = vweird.f32 %v20024_v8 }
 0x7a3   : > { %v8208_v6 = vadd.f32 %v8207_v31, %v8119_v28  ;;  %v8032_v11 = vpop.f32.mrf.mxu0  ;;  %v8462_v5 = vmul.f32 %v8365_v18, %v3473_v19  ;;  %v3492_v31 = vsub.f32 1.0, %v3491_v29  ;;  %v3486_v28 = vand.u32 2147483648, %v19951_v61 }
 0x7a4   : > { %10563 = vpow2.f32 %v8874_v35  ;;  %v3483_v15 = vsel %vm20032_vm9, %v19976_v43, %v3479_v21  ;;  %v3514_v19 = vand.u32 2147483647, %v19995_v50  ;;  %v21876_v21 = vld [vmem:[#allocation42_spill] sm:$0xff] }
 0x7a5   : > { %v8524_v32 = vmul.f32 %v8460_v26, %v8208_v6  ;;  %v3484_v26 = vand.u32 2147483647, %v19951_v61  ;;  %v3506_v6 = vmul.f32 %v20022_v55, %v19995_v50  ;;  %v3493_v3 = vmul.f32 %v20001_v47, %v3492_v31 }
 0x7a6   : > { %v7943_v46 = vpop.f32.mrf.mxu3  ;;  %v2480_v31 = vadd.f32 %v21876_v21, %v21800_v45  ;;  %vm3515_vm4 = vcmp.eq.f32.partialorder %v3514_v19, 8.507059e+37  ;;  %v8390_v21 = vpop.permute.xlu1 %8389 }
 0x7a7   : > { %8556 = vst [vmem:[%s19642_s4 + $0x68] sm:$0xff] %v8524_v32  ;;  %v8033_v1 = vadd.f32 %v8032_v11, %v7943_v46  ;;  %v8210_v20 = vpop.f32.mrf.mxu2  ;;  %v3487_v32 = vor.u32 1.1754944e-38, %v3486_v28  ;;  %v2475_v46 = vadd.f32 %v21872_v40, %v21800_v45  ;;  %vm3485_vm11 = vcmp.eq.f32.partialorder %v3484_v26, 8.507059e+37 }
 0x7a8   : > { %v3494_v57 = vadd.f32 %v20001_v47, %v3493_v3  ;;  %v8877_v3 = vmul.f32 -1.442695, %v2480_v31 }
 0x7a9   : > { %v8122_v24 = vadd.f32 %v8121_v62, %v8033_v1  ;;  %v10560_v62 = vpop.eup %10559  ;;  %v3488_v37 = vsel %vm3485_vm11, %v3487_v32, %v3483_v15  ;;  %v3507_v1 = vsub.f32 1.0, %v3506_v6  ;;  %v8875_v59 = vmul.f32 -1.442695, %v2475_v46  ;;  %v8380_v6 = vpop.permute.xlu2 %8379 }
 0x7aa   : > { %v8123_v39 = vpop.f32.mrf.mxu1  ;;  %v20045_v2 = vadd.f32 1.0, %v10560_v62  ;;  %v20049_v12 = vpop.eup %10561  ;;  %v3498_v23 = vsel %vm20056_vm14, %v20001_v47, %v3494_v57 }
 0x7ab   : > { %v8211_v25 = vadd.f32 %v8210_v20, %v8122_v24  ;;  %v8034_v54 = vpop.f32.mrf.mxu0  ;;  %v8463_v20 = vmul.f32 %v8370_v30, %v3488_v37  ;;  %v3501_v24 = vand.u32 2147483648, %v19974_v42  ;;  %v10564_v53 = vpop.eup %10563  ;;  %v3521_v17 = vmul.f32 %v20049_v12, %v20024_v8 }
 0x7ac   : > { %10565 = vrcp.f32 %v20045_v2  ;;  %vm3526_vm5 = vweird.f32 %v20049_v12  ;;  %v3531_v37 = vand.u32 2147483648, %v20024_v8  ;;  %vm3540_vm12 = vweird.f32 %v20045_v2 }
 0x7ad   : > { %v8525_v13 = vmul.f32 %v8461_v27, %v8211_v25  ;;  %v3508_v25 = vmul.f32 %v20022_v55, %v3507_v1  ;;  %v3502_v4 = vor.u32 1.1754944e-38, %v3501_v24  ;;  %10567 = vpow2.f32 %v8875_v59  ;;  %vm20101_vm0 = vmor %vm3525_vm6, %vm3526_vm5 }
 0x7ae   : > { %v7945_v48 = vpop.f32.mrf.mxu3  ;;  %v3522_v29 = vsub.f32 1.0, %v3521_v17  ;;  %v3529_v1 = vand.u32 2147483647, %v20024_v8 }
 0x7af   : > { %8557 = vst [vmem:[%s19642_s4 + $0x70] sm:$0xff] %v8525_v13  ;;  %v8035_v63 = vadd.f32 %v8034_v54, %v7945_v48  ;;  %v8212_v9 = vpop.f32.mrf.mxu2  ;;  %v20066_v13 = vadd.f32 1.0, %v10564_v53  ;;  %v2477_v48 = vadd.f32 %v21875_v51, %v21800_v45  ;;  %v3509_v34 = vadd.f32 %v20022_v55, %v3508_v25  ;;  %v21881_v25 = vld [vmem:[#allocation45_spill] sm:$0xff] }
 0x7b0   : > { %v3503_v60 = vsel %vm3500_vm15, %v3502_v4, %v3498_v23  ;;  %v3523_v26 = vmul.f32 %v20049_v12, %v3522_v29  ;;  %v2482_v54 = vadd.f32 %v21881_v25, %v21800_v45  ;;  %vm3530_vm8 = vcmp.eq.f32.partialorder %v3529_v1, 8.507059e+37 }
 0x7b1   : > { %v8124_v52 = vadd.f32 %v8123_v39, %v8035_v63  ;;  %v8464_v47 = vmul.f32 %v8375_v33, %v3503_v60  ;;  %10569 = vrcp.f32 %v20066_v13  ;;  %v8876_v35 = vmul.f32 -1.442695, %v2477_v48 }
 0x7b2   : > { %v8126_v7 = vpop.f32.mrf.mxu1  ;;  %v20072_v18 = vpop.eup %10565  ;;  %v3513_v28 = vsel %vm20080_vm7, %v20022_v55, %v3509_v34  ;;  %v3524_v30 = vadd.f32 %v20049_v12, %v3523_v26  ;;  %v8878_v60 = vmul.f32 -1.442695, %v2482_v54  ;;  %v3544_v29 = vand.u32 2147483647, %v20045_v2 }
 0x7b3   : > { %v8213_v10 = vadd.f32 %v8212_v9, %v8124_v52  ;;  %v8037_v44 = vpop.f32.mrf.mxu0  ;;  %v3516_v52 = vand.u32 2147483648, %v19995_v50  ;;  %10571 = vpow2.f32 %v8876_v35  ;;  %vm3541_vm10 = vweird.f32 %v20072_v18 }
 0x7b4   : > { %v3528_v24 = vsel %vm20101_vm0, %v20049_v12, %v3524_v30  ;;  %vm20124_vm9 = vmor %vm3540_vm12, %vm3541_vm10  ;;  %vm3545_vm11 = vcmp.eq.f32.partialorder %v3544_v29, 8.507059e+37  ;;  %vm3555_vm13 = vweird.f32 %v20066_v13  ;;  %v21885_v30 = vld [vmem:[#allocation49_spill] sm:$0xff]  ;;  %v8400_v29 = vpop.permute.xlu0 %8399 }
 0x7b5   : > { %v8526_v58 = vmul.f32 %v8462_v5, %v8213_v10  ;;  %v21884_v10 = vld [vmem:[#allocation47_spill] sm:$0xff] }
 0x7b6   : > { %v7948_v11 = vpop.f32.mrf.mxu3 }
 0x7b7   : > { %8558 = vst [vmem:[%s19642_s4 + $0x78] sm:$0xff] %v8526_v58  ;;  %v8038_v61 = vadd.f32 %v8037_v44, %v7948_v11  ;;  %v8215_v0 = vpop.f32.mrf.mxu2  ;;  %v3536_v58 = vmul.f32 %v20072_v18, %v20045_v2  ;;  %v3517_v11 = vor.u32 1.1754944e-38, %v3516_v52 }
 0x7b9   : > { %v8127_v14 = vadd.f32 %v8126_v7, %v8038_v61  ;;  %v10568_v7 = vpop.eup %10567  ;;  %v3537_v32 = vsub.f32 1.0, %v3536_v58 }
 0x7ba   : > { %v8128_v49 = vpop.f32.mrf.mxu1  ;;  %v20091_v15 = vpop.eup %10569  ;;  %v20093_v61 = vadd.f32 1.0, %v10568_v7 }
 0x7bb   : > { %v8216_v43 = vadd.f32 %v8215_v0, %v8127_v14  ;;  %v8039_v16 = vpop.f32.mrf.mxu0  ;;  %v3518_v0 = vsel %vm3515_vm4, %v3517_v11, %v3513_v28  ;;  %v3538_v53 = vmul.f32 %v20072_v18, %v3537_v32  ;;  %vm3556_vm1 = vweird.f32 %v20091_v15 }
 0x7bc   : > { %v8465_v55 = vmul.f32 %v8380_v6, %v3518_v0  ;;  %10573 = vrcp.f32 %v20093_v61  ;;  %v3559_v0 = vand.u32 2147483647, %v20066_v13  ;;  %v2487_v32 = vadd.f32 %v21885_v30, %v21800_v45  ;;  %vm20151_vm14 = vmor %vm3555_vm13, %vm3556_vm1  ;;  %v8405_v30 = vpop.permute.xlu1 %8404 }
 0x7bd   : > { %v8527_v27 = vmul.f32 %v8463_v20, %v8216_v43  ;;  %v3551_v43 = vmul.f32 %v20091_v15, %v20066_v13  ;;  %10575 = vpow2.f32 %v8877_v3  ;;  %v3539_v33 = vadd.f32 %v20072_v18, %v3538_v53 }
 0x7be   : > { %v7950_v39 = vpop.f32.mrf.mxu3  ;;  %vm3560_vm15 = vcmp.eq.f32.partialorder %v3559_v0, 8.507059e+37  ;;  %vm3570_vm3 = vweird.f32 %v20093_v61 }
 0x7bf   : > { %8559 = vst [vmem:[%s19642_s4 + $0x80] sm:$0xff] %v8527_v27  ;;  %v8040_v36 = vadd.f32 %v8039_v16, %v7950_v39  ;;  %v8217_v42 = vpop.f32.mrf.mxu2  ;;  %v3532_v27 = vor.u32 1.1754944e-38, %v3531_v37  ;;  %v3543_v35 = vsel %vm20124_vm9, %v20072_v18, %v3539_v33 }
 0x7c1   : > { %v8129_v22 = vadd.f32 %v8128_v49, %v8040_v36  ;;  %v10572_v49 = vpop.eup %10571  ;;  %v3533_v23 = vsel %vm3530_vm8, %v3532_v27, %v3528_v24  ;;  %v3552_v36 = vsub.f32 1.0, %v3551_v43  ;;  %v8395_v43 = vpop.permute.xlu2 %8394 }
 0x7c2   : > { %v8131_v41 = vpop.f32.mrf.mxu1  ;;  %v20114_v17 = vadd.f32 1.0, %v10572_v49  ;;  %v20118_v48 = vpop.eup %10573 }
 0x7c3   : > { %v8218_v63 = vadd.f32 %v8217_v42, %v8129_v22  ;;  %v8042_v9 = vpop.f32.mrf.mxu0  ;;  %v8466_v42 = vmul.f32 %v8385_v56, %v3533_v23  ;;  %v3546_v22 = vand.u32 2147483648, %v20045_v2  ;;  %v10576_v34 = vpop.eup %10575  ;;  %v3566_v52 = vmul.f32 %v20118_v48, %v20093_v61 }
 0x7c4   : > { %10577 = vrcp.f32 %v20114_v17  ;;  %vm3571_vm2 = vweird.f32 %v20118_v48  ;;  %v3576_v23 = vand.u32 2147483648, %v20093_v61  ;;  %vm3585_vm6 = vweird.f32 %v20114_v17 }
 0x7c5   : > { %v8528_v5 = vmul.f32 %v8464_v47, %v8218_v63  ;;  %v3547_v31 = vor.u32 1.1754944e-38, %v3546_v22  ;;  %10579 = vpow2.f32 %v8878_v60  ;;  %v3567_v58 = vsub.f32 1.0, %v3566_v52  ;;  %vm20172_vm7 = vmor %vm3570_vm3, %vm3571_vm2  ;;  %v21890_v63 = vld [vmem:[#allocation52_spill] sm:$0xff] }
 0x7c6   : > { %v7953_v44 = vpop.f32.mrf.mxu3 }
 0x7c7   : > { %8560 = vst [vmem:[%s19642_s4 + $0x88] sm:$0xff] %v8528_v5  ;;  %v8043_v50 = vadd.f32 %v8042_v9, %v7953_v44  ;;  %v8220_v38 = vpop.f32.mrf.mxu2  ;;  %v20135_v5 = vadd.f32 1.0, %v10576_v34  ;;  %v2485_v44 = vadd.f32 %v21884_v10, %v21800_v45  ;;  %v3548_v28 = vsel %vm3545_vm11, %v3547_v31, %v3543_v35 }
 0x7c8   : > { %v8467_v18 = vmul.f32 %v8390_v21, %v3548_v28  ;;  %v3568_v1 = vmul.f32 %v20118_v48, %v3567_v58  ;;  %v3589_v58 = vand.u32 2147483647, %v20114_v17 }
 0x7c9   : > { %v8132_v62 = vadd.f32 %v8131_v41, %v8043_v50  ;;  %v3553_v41 = vmul.f32 %v20091_v15, %v3552_v36  ;;  %10581 = vrcp.f32 %v20135_v5  ;;  %v8879_v3 = vmul.f32 -1.442695, %v2485_v44 }
 0x7ca   : > { %v8133_v14 = vpop.f32.mrf.mxu1  ;;  %v20141_v11 = vpop.eup %10577  ;;  %v3569_v56 = vadd.f32 %v20118_v48, %v3568_v1  ;;  %v3574_v36 = vand.u32 2147483647, %v20093_v61  ;;  %vm3590_vm8 = vcmp.eq.f32.partialorder %v3589_v58, 8.507059e+37  ;;  %vm3600_vm12 = vweird.f32 %v20135_v5 }
 0x7cb   : > { %v8221_v40 = vadd.f32 %v8220_v38, %v8132_v62  ;;  %v8044_v46 = vpop.f32.mrf.mxu0  ;;  %v3554_v26 = vadd.f32 %v20091_v15, %v3553_v41  ;;  %v3561_v62 = vand.u32 2147483648, %v20066_v13  ;;  %v3581_v13 = vmul.f32 %v20141_v11, %v20114_v17 }
 0x7cc   : > { %10583 = vpow2.f32 %v8879_v3  ;;  %v3573_v22 = vsel %vm20172_vm7, %v20118_v48, %v3569_v56  ;;  %vm3575_vm4 = vcmp.eq.f32.partialorder %v3574_v36, 8.507059e+37  ;;  %vm3586_vm5 = vweird.f32 %v20141_v11 }
 0x7cd   : > { %v8529_v20 = vmul.f32 %v8465_v55, %v8221_v40  ;;  %v3558_v37 = vsel %vm20151_vm14, %v20091_v15, %v3554_v26  ;;  %v3582_v27 = vsub.f32 1.0, %v3581_v13  ;;  %vm20195_vm0 = vmor %vm3585_vm6, %vm3586_vm5  ;;  %v21893_v40 = vld [vmem:[#allocation54_spill] sm:$0xff] }
 0x7ce   : > { %v7955_v16 = vpop.f32.mrf.mxu3 }
 0x7cf   : > { %8561 = vst [vmem:[%s19642_s4 + $0x90] sm:$0xff] %v8529_v20  ;;  %v8045_v8 = vadd.f32 %v8044_v46, %v7955_v16  ;;  %v8222_v59 = vpop.f32.mrf.mxu2  ;;  %v3562_v16 = vor.u32 1.1754944e-38, %v3561_v62  ;;  %v3583_v34 = vmul.f32 %v20141_v11, %v3582_v27 }
 0x7d1   : > { %v8134_v39 = vadd.f32 %v8133_v14, %v8045_v8  ;;  %v10580_v14 = vpop.eup %10579  ;;  %v8880_v8 = vmul.f32 -1.442695, %v2487_v32  ;;  %v3584_v21 = vadd.f32 %v20141_v11, %v3583_v34 }
 0x7d2   : > { %v8136_v51 = vpop.f32.mrf.mxu1  ;;  %v20162_v24 = vpop.eup %10581  ;;  %v20164_v53 = vadd.f32 1.0, %v10580_v14 }
 0x7d3   : > { %v8223_v12 = vadd.f32 %v8222_v59, %v8134_v39  ;;  %v8047_v4 = vpop.f32.mrf.mxu0  ;;  %v3563_v59 = vsel %vm3560_vm15, %v3562_v16, %v3558_v37  ;;  %v3588_v3 = vsel %vm20195_vm0, %v20141_v11, %v3584_v21  ;;  %vm3601_vm10 = vweird.f32 %v20162_v24 }
 0x7d4   : > { %v8468_v15 = vmul.f32 %v8395_v43, %v3563_v59  ;;  %10585 = vrcp.f32 %v20164_v53  ;;  %v3604_v59 = vand.u32 2147483647, %v20135_v5  ;;  %vm20220_vm9 = vmor %vm3600_vm12, %vm3601_vm10  ;;  %vm3615_vm13 = vweird.f32 %v20164_v53 }
 0x7d5   : > { %v8530_v47 = vmul.f32 %v8466_v42, %v8223_v12  ;;  %v3596_v12 = vmul.f32 %v20162_v24, %v20135_v5  ;;  %10587 = vpow2.f32 %v8880_v8 }
 0x7d6   : > { %v7958_v9 = vpop.f32.mrf.mxu3  ;;  %vm3605_vm11 = vcmp.eq.f32.partialorder %v3604_v59, 8.507059e+37 }
 0x7d7   : > { %8562 = vst [vmem:[%s19642_s4 + $0x98] sm:$0xff] %v8530_v47  ;;  %v8048_v19 = vadd.f32 %v8047_v4, %v7958_v9  ;;  %v8225_v2 = vpop.f32.mrf.mxu2  ;;  %v3577_v47 = vor.u32 1.1754944e-38, %v3576_v23  ;;  %v2490_v9 = vadd.f32 %v21890_v63, %v21800_v45 }
 0x7d9   : > { %v8137_v7 = vadd.f32 %v8136_v51, %v8048_v19  ;;  %v10584_v51 = vpop.eup %10583  ;;  %v3578_v35 = vsel %vm3575_vm4, %v3577_v47, %v3573_v22  ;;  %v3597_v19 = vsub.f32 1.0, %v3596_v12  ;;  %v8881_v26 = vmul.f32 -1.442695, %v2490_v9 }
 0x7da   : > { %v8138_v6 = vpop.f32.mrf.mxu1  ;;  %v20185_v52 = vadd.f32 1.0, %v10584_v51  ;;  %v20189_v44 = vpop.eup %10585 }
 0x7db   : > { %v8226_v50 = vadd.f32 %v8225_v2, %v8137_v7  ;;  %v8049_v38 = vpop.f32.mrf.mxu0  ;;  %v8469_v2 = vmul.f32 %v8400_v29, %v3578_v35  ;;  %v3591_v7 = vand.u32 2147483648, %v20114_v17  ;;  %v10588_v28 = vpop.eup %10587  ;;  %v3611_v62 = vmul.f32 %v20189_v44, %v20164_v53 }
 0x7dc   : > { %10589 = vrcp.f32 %v20185_v52  ;;  %vm3616_vm1 = vweird.f32 %v20189_v44  ;;  %v3621_v35 = vand.u32 2147483648, %v20164_v53  ;;  %vm3630_vm3 = vweird.f32 %v20185_v52 }
 0x7dd   : > { %v8531_v55 = vmul.f32 %v8467_v18, %v8226_v50  ;;  %v3592_v32 = vor.u32 1.1754944e-38, %v3591_v7  ;;  %10591 = vpow2.f32 %v8881_v26  ;;  %v3612_v13 = vsub.f32 1.0, %v3611_v62  ;;  %vm20243_vm14 = vmor %vm3615_vm13, %vm3616_vm1  ;;  %v21899_v50 = vld [vmem:[#allocation60_spill] sm:$0xff] }
 0x7de   : > { %v7960_v46 = vpop.f32.mrf.mxu3  ;;  %v3622_v58 = vor.u32 1.1754944e-38, %v3621_v35 }
 0x7df   : > { %8563 = vst [vmem:[%s19642_s4 + $0xa0] sm:$0xff] %v8531_v55  ;;  %v8050_v20 = vadd.f32 %v8049_v38, %v7960_v46  ;;  %v8227_v57 = vpop.f32.mrf.mxu2  ;;  %v20206_v55 = vadd.f32 1.0, %v10588_v28  ;;  %v2492_v46 = vadd.f32 %v21893_v40, %v21800_v45  ;;  %v3593_v37 = vsel %vm3590_vm8, %v3592_v32, %v3588_v3 }
 0x7e0   : > { %v8470_v11 = vmul.f32 %v8405_v30, %v3593_v37  ;;  %v3634_v37 = vand.u32 2147483647, %v20185_v52 }
 0x7e1   : > { %v8139_v49 = vadd.f32 %v8138_v6, %v8050_v20  ;;  %v3598_v6 = vmul.f32 %v20162_v24, %v3597_v19  ;;  %10593 = vrcp.f32 %v20206_v55  ;;  %v8882_v8 = vmul.f32 -1.442695, %v2492_v46 }
 0x7e2   : > { %v8141_v39 = vpop.f32.mrf.mxu1  ;;  %v20212_v16 = vpop.eup %10589  ;;  %v3619_v19 = vand.u32 2147483647, %v20164_v53  ;;  %vm3635_vm4 = vcmp.eq.f32.partialorder %v3634_v37, 8.507059e+37  ;;  %vm3645_vm6 = vweird.f32 %v20206_v55 }
 0x7e3   : > { %v8228_v25 = vadd.f32 %v8227_v57, %v8139_v49  ;;  %v8052_v54 = vpop.f32.mrf.mxu0  ;;  %v3599_v1 = vadd.f32 %v20162_v24, %v3598_v6  ;;  %v3606_v49 = vand.u32 2147483648, %v20135_v5  ;;  %v3626_v23 = vmul.f32 %v20212_v16, %v20185_v52 }
 0x7e4   : > { %10595 = vpow2.f32 %v8882_v8  ;;  %vm3620_vm15 = vcmp.eq.f32.partialorder %v3619_v19, 8.507059e+37  ;;  %vm3631_vm2 = vweird.f32 %v20212_v16 }
 0x7e5   : > { %v8532_v42 = vmul.f32 %v8468_v15, %v8228_v25  ;;  %v10592_v25 = vpop.eup %10591  ;;  %v3607_v12 = vor.u32 1.1754944e-38, %v3606_v49  ;;  %v3627_v29 = vsub.f32 1.0, %v3626_v23  ;;  %vm20266_vm7 = vmor %vm3630_vm3, %vm3631_vm2 }
 0x7e6   : > { %v7963_v4 = vpop.f32.mrf.mxu3  ;;  %v20235_v34 = vadd.f32 1.0, %v10592_v25 }
 0x7e7   : > { %8564 = vst [vmem:[%s19642_s4 + $0xa8] sm:$0xff] %v8532_v42  ;;  %v8053_v61 = vadd.f32 %v8052_v54, %v7963_v4  ;;  %v8230_v60 = vpop.f32.mrf.mxu2  ;;  %v3603_v54 = vsel %vm20220_vm9, %v20162_v24, %v3599_v1  ;;  %v21896_v42 = vld [vmem:[#allocation57_spill] sm:$0xff]  ;;  %v8410_v4 = vpop.permute.xlu2 %8409  ;;  %v3628_v28 = vmul.f32 %v20212_v16, %v3627_v29 }
 0x7e8   : > { %v2495_v33 = vadd.f32 %v21896_v42, %v21800_v45  ;;  %v20233_v22 = vpop.eup %10593  ;;  %v3608_v24 = vsel %vm3605_vm11, %v3607_v12, %v3603_v54  ;;  %10597 = vrcp.f32 %v20235_v34  ;;  %v3649_v12 = vand.u32 2147483647, %v20206_v55 }
 0x7e9   : > { %v8142_v41 = vadd.f32 %v8141_v39, %v8053_v61  ;;  %v3613_v39 = vmul.f32 %v20189_v44, %v3612_v13  ;;  %v8471_v61 = vmul.f32 %v8410_v4, %v3608_v24  ;;  %vm3646_vm5 = vweird.f32 %v20233_v22 }
 0x7ea   : > { %v8143_v10 = vpop.f32.mrf.mxu1  ;;  %vm3647_vm0 = vmor %vm3645_vm6, %vm3646_vm5  ;;  %vm3650_vm8 = vcmp.eq.f32.partialorder %v3649_v12, 8.507059e+37  ;;  %vm3660_vm12 = vweird.f32 %v20235_v34 }
 0x7eb   : > { %v8231_v48 = vadd.f32 %v8230_v60, %v8142_v41  ;;  %v8054_v31 = vpop.f32.mrf.mxu0  ;;  %v3614_v60 = vadd.f32 %v20189_v44, %v3613_v39  ;;  %v8883_v41 = vmul.f32 -1.442695, %v2495_v33  ;;  %v3651_v33 = vand.u32 2147483648, %v20206_v55 }
 0x7ed   : > { %v8533_v18 = vmul.f32 %v8469_v2, %v8231_v48  ;;  %v3641_v48 = vmul.f32 %v20233_v22, %v20206_v55  ;;  %v3618_v7 = vsel %vm20243_vm14, %v20189_v44, %v3614_v60  ;;  %10599 = vpow2.f32 %v8883_v41 }
 0x7ee   : > { %v7965_v38 = vpop.f32.mrf.mxu3  ;;  %v3623_v3 = vsel %vm3620_vm15, %v3622_v58, %v3618_v7  ;;  %v3629_v44 = vadd.f32 %v20212_v16, %v3628_v28  ;;  %v3666_v28 = vand.u32 2147483648, %v20235_v34 }
 0x7ef   : > { %8565 = vst [vmem:[%s19642_s4 + $0xb0] sm:$0xff] %v8533_v18  ;;  %v8055_v0 = vadd.f32 %v8054_v31, %v7965_v38  ;;  %v8232_v17 = vpop.f32.mrf.mxu2  ;;  %v8415_v18 = vpop.permute.xlu0 %8414  ;;  %v2497_v38 = vadd.f32 %v21899_v50, %v21800_v45 }
 0x7f0   : > { %v3633_v49 = vsel %vm20266_vm7, %v20212_v16, %v3629_v44  ;;  %v8425_v41 = vpop.permute.xlu2 %8424 }
 0x7f1   : > { %v8144_v14 = vadd.f32 %v8143_v10, %v8055_v0  ;;  %v10596_v10 = vpop.eup %10595  ;;  %v3642_v0 = vsub.f32 1.0, %v3641_v48  ;;  %v8884_v45 = vmul.f32 -1.442695, %v2497_v38 }
 0x7f2   : > { %v8146_v43 = vpop.f32.mrf.mxu1  ;;  %v20256_v62 = vadd.f32 1.0, %v10596_v10  ;;  %v20260_v46 = vpop.eup %10597 }
 0x7f3   : > { %v8233_v20 = vadd.f32 %v8232_v17, %v8144_v14  ;;  %v8057_v57 = vpop.f32.mrf.mxu0  ;;  %v8472_v17 = vmul.f32 %v8415_v18, %v3623_v3  ;;  %v3636_v14 = vand.u32 2147483648, %v20185_v52  ;;  %v10600_v13 = vpop.eup %10599  ;;  %vm3661_vm10 = vweird.f32 %v20260_v46 }
 0x7f4   : > { %10601 = vrcp.f32 %v20256_v62  ;;  %v20277_v56 = vadd.f32 1.0, %v10600_v13  ;;  %vm3662_vm9 = vmor %vm3660_vm12, %vm3661_vm10  ;;  %v3681_v37 = vand.u32 2147483648, %v20256_v62  ;;  %vm3675_vm13 = vweird.f32 %v20256_v62 }
 0x7f5   : > { %v8534_v15 = vmul.f32 %v8470_v11, %v8233_v20  ;;  %v3637_v59 = vor.u32 1.1754944e-38, %v3636_v14  ;;  %10603 = vpow2.f32 %v8884_v45  ;;  %v3679_v13 = vand.u32 2147483647, %v20256_v62 }
 0x7f6   : > { %v7968_v27 = vpop.f32.mrf.mxu3  ;;  %10605 = vrcp.f32 %v20277_v56  ;;  %vm3690_vm3 = vweird.f32 %v20277_v56 }
 0x7f7   : > { %8566 = vst [vmem:[%s19642_s4 + $0xb8] sm:$0xff] %v8534_v15  ;;  %v8058_v5 = vadd.f32 %v8057_v57, %v7968_v27  ;;  %v8235_v36 = vpop.f32.mrf.mxu2  ;;  %v3643_v57 = vmul.f32 %v20233_v22, %v3642_v0  ;;  %v8420_v15 = vpop.permute.xlu1 %8419  ;;  %v3638_v25 = vsel %vm3635_vm4, %v3637_v59, %v3633_v49  ;;  %v3667_v0 = vor.u32 1.1754944e-38, %v3666_v28 }
 0x7f8   : > { %v8473_v23 = vmul.f32 %v8420_v15, %v3638_v25  ;;  %v3682_v59 = vor.u32 1.1754944e-38, %v3681_v37  ;;  %vm3680_vm15 = vcmp.eq.f32.partialorder %v3679_v13, 8.507059e+37 }
 0x7f9   : > { %v8147_v51 = vadd.f32 %v8146_v43, %v8058_v5  ;;  %v3656_v43 = vmul.f32 %v20260_v46, %v20235_v34  ;;  %v3644_v54 = vadd.f32 %v20233_v22, %v3643_v57 }
 0x7fa   : > { %v8148_v9 = vpop.f32.mrf.mxu1  ;;  %v20281_v42 = vpop.eup %10601 }
 0x7fb   : > { %v8236_v47 = vadd.f32 %v8235_v36, %v8147_v51  ;;  %v8059_v63 = vpop.f32.mrf.mxu0  ;;  %v3657_v39 = vsub.f32 1.0, %v3656_v43  ;;  %v10604_v24 = vpop.eup %10603  ;;  %v3671_v29 = vmul.f32 %v20281_v42, %v20256_v62  ;;  %vm3676_vm1 = vweird.f32 %v20281_v42 }
 0x7fc   : > { %v20292_v19 = vadd.f32 1.0, %v10604_v24  ;;  %vm3677_vm14 = vmor %vm3675_vm13, %vm3676_vm1 }
 0x7fd   : > { %v8535_v2 = vmul.f32 %v8471_v61, %v8236_v47  ;;  %v3648_v61 = vsel %vm3647_vm0, %v20233_v22, %v3644_v54  ;;  %v3658_v60 = vmul.f32 %v20260_v46, %v3657_v39  ;;  %v3672_v48 = vsub.f32 1.0, %v3671_v29 }
 0x7fe   : > { %v7970_v31 = vpop.f32.mrf.mxu3  ;;  %10607 = vrcp.f32 %v20292_v19  ;;  %vm3705_vm6 = vweird.f32 %v20292_v19 }
 0x7ff   : > { %8567 = vst [vmem:[%s19642_s4 + $0xc0] sm:$0xff] %v8535_v2  ;;  %v8060_v53 = vadd.f32 %v8059_v63, %v7970_v31  ;;  %v8237_v26 = vpop.f32.mrf.mxu2  ;;  %v20295_v2 = vpop.eup %10605  ;;  %v3659_v21 = vadd.f32 %v20260_v46, %v3658_v60  ;;  %v3673_v38 = vmul.f32 %v20281_v42, %v3672_v48 }
 0x800   : > { %v3686_v58 = vmul.f32 %v20295_v2, %v20277_v56  ;;  %v8435_v15 = vpop.permute.xlu1 %8434  ;;  %vm3691_vm2 = vweird.f32 %v20295_v2  ;;  %v8440_v60 = vpop.permute.xlu2 %8439 }
 0x801   : > { %v8149_v6 = vadd.f32 %v8148_v9, %v8060_v53  ;;  %v3652_v9 = vor.u32 1.1754944e-38, %v3651_v33  ;;  %v3664_v53 = vand.u32 2147483647, %v20235_v34  ;;  %v3663_v50 = vsel %vm3662_vm9, %v20260_v46, %v3659_v21  ;;  %vm3692_vm7 = vmor %vm3690_vm3, %vm3691_vm2 }
 0x802   : > { %v8151_v40 = vpop.f32.mrf.mxu1 }
 0x803   : > { %v8238_v30 = vadd.f32 %v8237_v26, %v8149_v6  ;;  %v8062_v32 = vpop.f32.mrf.mxu0  ;;  %v3653_v55 = vsel %vm3650_vm8, %v3652_v9, %v3648_v61  ;;  %vm3665_vm11 = vcmp.eq.f32.partialorder %v3664_v53, 8.507059e+37 }
 0x804   : > { %v8474_v22 = vmul.f32 %v8425_v41, %v3653_v55  ;;  %v3668_v34 = vsel %vm3665_vm11, %v3667_v0, %v3663_v50  ;;  %v20309_v46 = vpop.eup %10607  ;;  %v3709_v55 = vand.u32 2147483647, %v20292_v19 }
 0x805   : > { %v8536_v1 = vmul.f32 %v8472_v17, %v8238_v30  ;;  %v8430_v17 = vpop.permute.xlu0 %8429  ;;  %v3687_v30 = vsub.f32 1.0, %v3686_v58  ;;  %v3701_v43 = vmul.f32 %v20309_v46, %v20292_v19  ;;  %vm3706_vm5 = vweird.f32 %v20309_v46 }
 0x806   : > { %v7973_v20 = vpop.f32.mrf.mxu3  ;;  %vm3707_vm0 = vmor %vm3705_vm6, %vm3706_vm5  ;;  %vm3710_vm8 = vcmp.eq.f32.partialorder %v3709_v55, 8.507059e+37 }
 0x807   : > { %8568 = vst [vmem:[%s19642_s4 + $0xc8] sm:$0xff] %v8536_v1  ;;  %v8063_v52 = vadd.f32 %v8062_v32, %v7973_v20  ;;  %v8240_v8 = vpop.f32.mrf.mxu2  ;;  %v8475_v32 = vmul.f32 %v8430_v17, %v3668_v34  ;;  %v3688_v57 = vmul.f32 %v20295_v2, %v3687_v30  ;;  %v3702_v54 = vsub.f32 1.0, %v3701_v43 }
 0x809   : > { %v8152_v27 = vadd.f32 %v8151_v40, %v8063_v52  ;;  %v3674_v40 = vadd.f32 %v20281_v42, %v3673_v38  ;;  %v3689_v25 = vadd.f32 %v20295_v2, %v3688_v57 }
 0x80a   : > { %v8153_v36 = vpop.f32.mrf.mxu1 }
 0x80b   : > { %v8241_v5 = vadd.f32 %v8240_v8, %v8152_v27  ;;  %v8064_v16 = vpop.f32.mrf.mxu0  ;;  %v3678_v49 = vsel %vm3677_vm14, %v20281_v42, %v3674_v40 }
 0x80c   : > { %v3683_v62 = vsel %vm3680_vm15, %v3682_v59, %v3678_v49 }
 0x80d   : > { %v8537_v4 = vmul.f32 %v8473_v23, %v8241_v5  ;;  %v8476_v39 = vmul.f32 %v8435_v15, %v3683_v62  ;;  %v3696_v5 = vand.u32 2147483648, %v20277_v56 }
 0x80e   : > { %v7975_v51 = vpop.f32.mrf.mxu3 }
 0x80f   : > { %8569 = vst [vmem:[%s19642_s4 + $0xd0] sm:$0xff] %v8537_v4  ;;  %v8065_v47 = vadd.f32 %v8064_v16, %v7975_v51  ;;  %v8242_v63 = vpop.f32.mrf.mxu2  ;;  %v3693_v4 = vsel %vm3692_vm7, %v20295_v2, %v3689_v25  ;;  %v3703_v51 = vmul.f32 %v20309_v46, %v3702_v54  ;;  %v3697_v61 = vor.u32 1.1754944e-38, %v3696_v5 }
 0x811   : > { %v8154_v35 = vadd.f32 %v8153_v36, %v8065_v47  ;;  %v3694_v36 = vand.u32 2147483647, %v20277_v56  ;;  %v3704_v56 = vadd.f32 %v20309_v46, %v3703_v51 }
 0x812   : > { %v8156_v7 = vpop.f32.mrf.mxu1 }
 0x813   : > { %v8243_v31 = vadd.f32 %v8242_v63, %v8154_v35  ;;  %v8067_v10 = vpop.f32.mrf.mxu0  ;;  %vm3695_vm4 = vcmp.eq.f32.partialorder %v3694_v36, 8.507059e+37  ;;  %v3711_v35 = vand.u32 2147483648, %v20292_v19  ;;  %v3708_v48 = vsel %vm3707_vm0, %v20309_v46, %v3704_v56 }
 0x814   : > { %v3698_v63 = vsel %vm3695_vm4, %v3697_v61, %v3693_v4 }
 0x815   : > { %v8538_v26 = vmul.f32 %v8474_v22, %v8243_v31  ;;  %v8477_v9 = vmul.f32 %v8440_v60, %v3698_v63 }
 0x816   : > { %v7978_v18 = vpop.f32.mrf.mxu3 }
 0x817   : > { %8570 = vst [vmem:[%s19642_s4 + $0xd8] sm:$0xff] %v8538_v26  ;;  %v8068_v6 = vadd.f32 %v8067_v10, %v7978_v18  ;;  %v8245_v3 = vpop.f32.mrf.mxu2  ;;  %v3712_v10 = vor.u32 1.1754944e-38, %v3711_v35 }
 0x819   : > { %v8157_v44 = vadd.f32 %v8156_v7, %v8068_v6  ;;  %v8445_v7 = vpop.permute.xlu0 %8444  ;;  %v3713_v19 = vsel %vm3710_vm8, %v3712_v10, %v3708_v48 }
 0x81a   : > { %v8158_v1 = vpop.f32.mrf.mxu1  ;;  %v8478_v58 = vmul.f32 %v8445_v7, %v3713_v19 }
 0x81b   : > { %v8246_v14 = vadd.f32 %v8245_v3, %v8157_v44  ;;  %v8069_v45 = vpop.f32.mrf.mxu0 }
 0x81d   : > { %v8539_v11 = vmul.f32 %v8475_v32, %v8246_v14 }
 0x81e   : > { %v7980_v20 = vpop.f32.mrf.mxu3 }
 0x81f   : > { %8571 = vst [vmem:[%s19642_s4 + $0xe0] sm:$0xff] %v8539_v11  ;;  %v8070_v52 = vadd.f32 %v8069_v45, %v7980_v20  ;;  %v8247_v8 = vpop.f32.mrf.mxu2 }
 0x821   : > { %v8159_v27 = vadd.f32 %v8158_v1, %v8070_v52 }
 0x822   : > { %v8161_v33 = vpop.f32.mrf.mxu1 }
 0x823   : > { %v8248_v23 = vadd.f32 %v8247_v8, %v8159_v27  ;;  %v8072_v16 = vpop.f32.mrf.mxu0 }
 0x825   : > { %v8540_v42 = vmul.f32 %v8476_v39, %v8248_v23 }
 0x826   : > { %v7983_v12 = vpop.f32.mrf.mxu3 }
 0x827   : > { %8572 = vst [vmem:[%s19642_s4 + $0xe8] sm:$0xff] %v8540_v42  ;;  %v8073_v24 = vadd.f32 %v8072_v16, %v7983_v12  ;;  %v8250_v29 = vpop.f32.mrf.mxu2 }
 0x829   : > { %v8162_v47 = vadd.f32 %v8161_v33, %v8073_v24 }
 0x82a   : > { %v8163_v28 = vpop.f32.mrf.mxu1 }
 0x82b   : > { %v8251_v41 = vadd.f32 %v8250_v29, %v8162_v47  ;;  %v8074_v22 = vpop.f32.mrf.mxu0 }
 0x82d   : > { %v8541_v2 = vmul.f32 %v8477_v9, %v8251_v41 }
 0x82e   : > { %v7985_v21 = vpop.f32.mrf.mxu3 }
 0x82f   : > { %8573 = vst [vmem:[%s19642_s4 + $0xf0] sm:$0xff] %v8541_v2  ;;  %v8075_v31 = vadd.f32 %v8074_v22, %v7985_v21  ;;  %v8252_v26 = vpop.f32.mrf.mxu2 }
 0x831   : > { %v8164_v53 = vadd.f32 %v8163_v28, %v8075_v31 }
 0x833   : > { %v8253_v18 = vadd.f32 %v8252_v26, %v8164_v53 }
 0x835   : > { %v8542_v50 = vmul.f32 %v8478_v58, %v8253_v18 }
 0x837   : > { %8574 = vst [vmem:[%s19642_s4 + $0xf8] sm:$0xff] %v8542_v50 }
 0x838   : > { %10733 = shalt.err (!%p10730_p8)
}
 0x839   : > { %s10787_s21 = smov 128   ;;  %s10788_s4 = smov 8  }
 0x83a   : > { %9559 = dma.vmem_to_hbm [thread:$0]  (%p10872_p5), %s8589_s9, 4096, %s8591_s22, %s8576_s13, %s10787_s21, %s10787_s21, %s10788_s4  }
 0x83b PF: > { %p9581_p9 = scmp.ge.s32.totalorder %s10776_s30, 2  ;;  %s8605_s26 = sand.u32 1, %s10764_s27  }
 0x83c   : > { %s8606_s20 = scalar_lea.sflag [#allocation5], %s8605_s26 }
 0x83d   : > { %p9572_p10 = pnand %p9581_p9, %p10876_p6 }
 0x83f   : > { %p9573_p11 = pneg %p9572_p10 }
 0x841   : > { %10759 = dma.done.wait (%p9573_p11), %s8606_s20, 4096  }
 0x842   : > { %10761 = vsyncadd (%p9573_p11), %s8606_s20, 4294963200  ;;  %p20_p12 = scmp.ge.s32.totalorder %s10859_s11, 4   ;;  %s21902_s27 = smov %s10768_s28 }
 0x843   : > { %s21903_s28 = smov %s10772_s29  ;;  %s21904_s29 = smov %s10870_s14 }
 0x844   : > { %s21905_s30 = smov %s10859_s11  ;;  %22 = sbr.rel (!%p20_p12) target bundleno = 7 (0x7), region = 106 }
 0x849   :  { %8612 = vsyncpa [#allocation4], 1 }
 0x84a   :  { %8614 = vsyncpa [#allocation4 + $0x1], 1 }
 0x84b   :  { %8615 = vsyncpa [#allocation7], 1 }
 0x84c   :  { %8616 = vsyncpa [#allocation5], 1 }
 0x84d   :  { %8618 = vsyncpa [#allocation5 + $0x1], 1 }

</bundles_post_ra>
